<compile_context>
chip_gen: v5e
topology: v5e:2x2
jax: 0.10.0
libtpu: 0.0.40
codegen_flags: <defaults>
</compile_context>

<pallas_src>
import functools

import jax
import jax.numpy as jnp
import numpy as np
from jax.experimental import pallas as pl
from jax.experimental.pallas import tpu as pltpu


# Padded dims (TPU (8,128)-tiling friendly).
M_PAD = 8          # padded batch rows
K1_PAD = 25088     # 24800 -> 196 * 128
H_PAD = 1024       # 1000  -> 1024
C_PAD = 128        # 2     -> 128


# ----------------------------------------------------------------------------
# Pallas kernel: fused  (x @ W + b)  -> optional ReLU / masked log_softmax.
# Grid = (M/tm, N/tn, K/tk); K is the reduction axis (last, "arbitrary").
# The output block is resident across K, so we accumulate directly into o_ref.
# ----------------------------------------------------------------------------
def _linear_kernel(x_ref, w_ref, b_ref, o_ref, *, activation, n_valid):
    k = pl.program_id(2)

    @pl.when(k == 0)
    def _():
        o_ref[...] = jnp.zeros_like(o_ref)

    o_ref[...] += jnp.dot(
        x_ref[...], w_ref[...], preferred_element_type=jnp.float32
    )

    @pl.when(k == pl.num_programs(2) - 1)
    def _():
        out = o_ref[...] + b_ref[...]
        if activation == "relu":
            out = jnp.maximum(out, 0.0)
        elif activation == "log_softmax":
            # Mask padded logit columns, then numerically-stable log_softmax.
            col = jax.lax.broadcasted_iota(jnp.int32, out.shape, 1)
            out = jnp.where(col < n_valid, out, -jnp.inf)
            m = jnp.max(out, axis=-1, keepdims=True)
            lse = jnp.log(jnp.sum(jnp.exp(out - m), axis=-1, keepdims=True)) + m
            out = out - lse
        o_ref[...] = out.astype(o_ref.dtype)


def pallas_linear(x, w, b, *, activation="none", n_valid=0,
                  tm=M_PAD, tn=None, tk=None):
    """x: (M, K) bf16, w: (K, N) bf16, b: (N,) f32. All dims already padded."""
    M, K = x.shape
    Kw, N = w.shape
    assert K == Kw and b.shape == (N,)
    tn = N if tn is None else min(tn, N)
    tk = K if tk is None else min(tk, K)
    assert M % tm == 0 and N % tn == 0 and K % tk == 0

    b2 = b.reshape(1, N).astype(jnp.float32)
    kernel = functools.partial(_linear_kernel, activation=activation,
                               n_valid=n_valid)

    cost = pl.CostEstimate(
        flops=2 * M * K * N,
        transcendentals=0,
        bytes_accessed=(M * K * x.dtype.itemsize
                        + K * N * w.dtype.itemsize
                        + N * 4
                        + M * N * 4),
    )

    return pl.pallas_call(
        kernel,
        out_shape=jax.ShapeDtypeStruct((M, N), jnp.float32),
        grid_spec=pltpu.PrefetchScalarGridSpec(
            num_scalar_prefetch=0,
            grid=(M // tm, N // tn, K // tk),
            in_specs=[
                pl.BlockSpec((tm, tk), lambda i, j, k: (i, k)),
                pl.BlockSpec((tk, tn), lambda i, j, k: (k, j)),
                pl.BlockSpec((1, tn), lambda i, j, k: (0, j)),
            ],
            out_specs=pl.BlockSpec((tm, tn), lambda i, j, k: (i, j)),
        ),
        compiler_params=pltpu.CompilerParams(
            dimension_semantics=("parallel", "parallel", "arbitrary"),
        ),
        cost_estimate=cost,
    )(x, w, b2)


# ----------------------------------------------------------------------------
# Parameter init (deterministic, matches SimpleNN.__init__ shapes) + one-time
# weight prep (transpose, pad, bf16 cast) hoisted OUT of the forward pass.
# ----------------------------------------------------------------------------
def _xavier_uniform(key, out_features, in_features):
    bound = np.sqrt(6.0 / (in_features + out_features))
    # torch Linear stores weight as (out, in).
    return jax.random.uniform(
        key, (out_features, in_features), jnp.float32, -bound, bound)


def _bias_init(key, out_features, in_features):
    bound = 1.0 / np.sqrt(in_features)
    return jax.random.uniform(key, (out_features,), jnp.float32, -bound, bound)


def init_params(key):
    ks = jax.random.split(key, 6)
    return {
        "w1": _xavier_uniform(ks[0], 1000, 24800),
        "b1": _bias_init(ks[1], 1000, 24800),
        "w2": _xavier_uniform(ks[2], 1000, 1000),
        "b2": _bias_init(ks[3], 1000, 1000),
        "w3": _xavier_uniform(ks[4], 2, 1000),
        "b3": _bias_init(ks[5], 2, 1000),
    }


def _pad_to(x, shape):
    pads = [(0, s - d) for d, s in zip(x.shape, shape)]
    return jnp.pad(x, pads)


def prepare_params(params):
    """One-time: transpose to (K, N), zero-pad, cast weights to bf16."""
    def prep_w(w, kp, npad):
        return _pad_to(w.T, (kp, npad)).astype(jnp.bfloat16)

    def prep_b(b, npad):
        return _pad_to(b.astype(jnp.float32), (npad,))

    return {
        "w1": prep_w(params["w1"], K1_PAD, H_PAD),
        "b1": prep_b(params["b1"], H_PAD),
        "w2": prep_w(params["w2"], H_PAD, H_PAD),
        "b2": prep_b(params["b2"], H_PAD),
        "w3": prep_w(params["w3"], H_PAD, C_PAD),
        "b3": prep_b(params["b3"], C_PAD),
    }


# ----------------------------------------------------------------------------
# Forward pass: flatten + 3 fused linear kernels.
# ----------------------------------------------------------------------------
@jax.jit
def simple_nn_forward(x_nchw, prepped):
    B = x_nchw.shape[0]
    x = x_nchw.reshape(B, -1).astype(jnp.float32)   # (B, 24800)
    assert x.shape[1] == 24800
    x_p = _pad_to(x, (M_PAD, K1_PAD)).astype(jnp.bfloat16)

    # Layer 1: HBM-bound weight streaming of w1 (bf16). grid (1, 2, 7);
    # the 2-wide parallel N axis shards across v7x's 2 TensorCores.
    h1 = pallas_linear(x_p, prepped["w1"], prepped["b1"],
                       activation="relu", tn=512, tk=3584)
    # Layers 2-3: whole weight fits in VMEM -> single grid step each.
    h2 = pallas_linear(h1.astype(jnp.bfloat16), prepped["w2"], prepped["b2"],
                       activation="relu")
    out = pallas_linear(h2.astype(jnp.bfloat16), prepped["w3"], prepped["b3"],
                        activation="log_softmax", n_valid=2)
    return out[:B, :2]   # (B, 2) log-probabilities


# ----------------------------------------------------------------------------
# References for correctness checks.
# ----------------------------------------------------------------------------
def reference_forward_f32(x_nchw, params):
    B = x_nchw.shape[0]
    x = x_nchw.reshape(B, -1).astype(jnp.float32)
    h1 = jnp.maximum(x @ params["w1"].T + params["b1"], 0.0)
    h2 = jnp.maximum(h1 @ params["w2"].T + params["b2"], 0.0)
    logits = h2 @ params["w3"].T + params["b3"]
    return jax.nn.log_softmax(logits, axis=1)


def reference_forward_bf16(x_nchw, params):
    """Mirrors the kernel's mixed precision: bf16 operands, f32 accumulation."""
    B = x_nchw.shape[0]

    def mm(h, w):
        return jax.lax.dot_general(
            h.astype(jnp.bfloat16), w.T.astype(jnp.bfloat16),
            (((1,), (0,)), ((), ())), preferred_element_type=jnp.float32)

    x = x_nchw.reshape(B, -1).astype(jnp.float32)
    h1 = jnp.maximum(mm(x, params["w1"]) + params["b1"], 0.0)
    h2 = jnp.maximum(mm(h1, params["w2"]) + params["b2"], 0.0)
    logits = mm(h2, params["w3"]) + params["b3"]
    return jax.nn.log_softmax(logits, axis=1)


if __name__ == "__main__":
    key = jax.random.PRNGKey(0)
    k_x, k_p = jax.random.split(key)

    # NCHW input consistent with 24800 = 1 * 62 * 400 flattened features.
    x = jax.random.normal(k_x, (2, 1, 62, 400), jnp.float32)
    params = init_params(k_p)
    prepped = prepare_params(params)          # one-time weight prep

    out = jax.block_until_ready(simple_nn_forward(x, prepped))

    # Tight check against a reference with identical mixed precision.
    ref_bf16 = jax.block_until_ready(reference_forward_bf16(x, params))
    np.testing.assert_allclose(np.asarray(out), np.asarray(ref_bf16),
                               rtol=2e-3, atol=2e-3)

    # Loose sanity check against the pure-f32 reference (bf16 weight streaming).
    ref_f32 = jax.block_until_ready(reference_forward_f32(x, params))
    np.testing.assert_allclose(np.asarray(out), np.asarray(ref_f32),
                               rtol=0.0, atol=1.5e-1)

    print("KERNEL_OK")
</pallas_src>

<mosaic_0001>
module attributes {stable_mosaic.version = 11 : i64} {
  func.func @_linear_kernel(%arg0: i32, %arg1: i32, %arg2: i32, %arg3: memref<8x3584xbf16, #tpu.memory_space<vmem>>, %arg4: memref<3584x512xbf16, #tpu.memory_space<vmem>>, %arg5: memref<1x512xf32, #tpu.memory_space<vmem>>, %arg6: memref<8x512xf32, #tpu.memory_space<vmem>>) attributes {dimension_semantics = [#tpu.dimension_semantics<parallel>, #tpu.dimension_semantics<parallel>, #tpu.dimension_semantics<arbitrary>], iteration_bounds = array<i64: 1, 2, 7>, scalar_prefetch = 0 : i64, scratch_operands = 0 : i64, tpu.core_type = #tpu.core_type<tc>, window_params = [{transform_indices = @transform_0, window_bounds = array<i64: 8, 3584>}, {transform_indices = @transform_1, window_bounds = array<i64: 3584, 512>}, {transform_indices = @transform_2, window_bounds = array<i64: 1, 512>}, {transform_indices = @transform_3, window_bounds = array<i64: 8, 512>}]} {
    %c0_i32 = arith.constant 0 : i32
    %0 = arith.cmpi eq, %arg2, %c0_i32 : i32
    %1 = arith.extui %0 : i1 to i32
    %c0_i32_0 = arith.constant 0 : i32
    %2 = arith.cmpi ne, %1, %c0_i32_0 : i32
    scf.if %2 {
      %cst_9 = arith.constant 0.000000e+00 : f32
      %12 = vector.broadcast %cst_9 : f32 to vector<8x512xf32>
      %c0_10 = arith.constant 0 : index
      %c0_11 = arith.constant 0 : index
      %13 = vector.load %arg6[%c0_10, %c0_11] : memref<8x512xf32, #tpu.memory_space<vmem>>, vector<8x512xf32>
      tpu.vector_store %arg6[%c0_10, %c0_11], %12 {strides = array<i32>} : memref<8x512xf32, #tpu.memory_space<vmem>>, vector<8x512xf32>,
    } else {
    }
    %c0 = arith.constant 0 : index
    %c0_1 = arith.constant 0 : index
    %3 = vector.load %arg6[%c0, %c0_1] : memref<8x512xf32, #tpu.memory_space<vmem>>, vector<8x512xf32>
    %c0_2 = arith.constant 0 : index
    %c0_3 = arith.constant 0 : index
    %4 = vector.load %arg3[%c0_2, %c0_3] : memref<8x3584xbf16, #tpu.memory_space<vmem>>, vector<8x3584xbf16>
    %c0_4 = arith.constant 0 : index
    %c0_5 = arith.constant 0 : index
    %5 = vector.load %arg4[%c0_4, %c0_5] : memref<3584x512xbf16, #tpu.memory_space<vmem>>, vector<3584x512xbf16>
    %cst = arith.constant dense<0.000000e+00> : vector<8x512xf32>
    %6 = tpu.matmul %4, %5, %cst {dimension_numbers = #tpu.dot_dimension_numbers<[1], [0], [0], [1], [0, 0, 1, 1], [], []>} : vector<8x3584xbf16>, vector<3584x512xbf16>, vector<8x512xf32> -> vector<8x512xf32>
    %7 = arith.addf %3, %6 : vector<8x512xf32>
    %c0_6 = arith.constant 0 : index
    %c0_7 = arith.constant 0 : index
    %8 = vector.load %arg6[%c0_6, %c0_7] : memref<8x512xf32, #tpu.memory_space<vmem>>, vector<8x512xf32>
    tpu.vector_store %arg6[%c0_6, %c0_7], %7 {strides = array<i32>} : memref<8x512xf32, #tpu.memory_space<vmem>>, vector<8x512xf32>,
    %c6_i32 = arith.constant 6 : i32
    %9 = arith.cmpi eq, %arg2, %c6_i32 : i32
    %10 = arith.extui %9 : i1 to i32
    %c0_i32_8 = arith.constant 0 : i32
    %11 = arith.cmpi ne, %10, %c0_i32_8 : i32
    scf.if %11 {
      %c0_9 = arith.constant 0 : index
      %c0_10 = arith.constant 0 : index
      %12 = vector.load %arg6[%c0_9, %c0_10] : memref<8x512xf32, #tpu.memory_space<vmem>>, vector<8x512xf32>
      %c0_11 = arith.constant 0 : index
      %c0_12 = arith.constant 0 : index
      %13 = vector.load %arg5[%c0_11, %c0_12] : memref<1x512xf32, #tpu.memory_space<vmem>>, vector<1x512xf32>
      %14 = vector.broadcast %13 : vector<1x512xf32> to vector<8x512xf32>
      %15 = arith.addf %12, %14 : vector<8x512xf32>
      %cst_13 = arith.constant 0.000000e+00 : f32
      %16 = vector.broadcast %cst_13 : f32 to vector<8x512xf32>
      %17 = arith.maximumf %15, %16 : vector<8x512xf32>
      %c0_14 = arith.constant 0 : index
      %c0_15 = arith.constant 0 : index
      %18 = vector.load %arg6[%c0_14, %c0_15] : memref<8x512xf32, #tpu.memory_space<vmem>>, vector<8x512xf32>
      tpu.vector_store %arg6[%c0_14, %c0_15], %17 {strides = array<i32>} : memref<8x512xf32, #tpu.memory_space<vmem>>, vector<8x512xf32>,
    } else {
    }
    return
  }
  func.func @transform_0(%arg0: i32, %arg1: i32, %arg2: i32) -> (i32, i32) {
    %c0_i32 = arith.constant 0 : i32
    return %arg0, %arg2 : i32, i32
  }
  func.func @transform_1(%arg0: i32, %arg1: i32, %arg2: i32) -> (i32, i32) {
    %c0_i32 = arith.constant 0 : i32
    return %arg2, %arg1 : i32, i32
  }
  func.func @transform_2(%arg0: i32, %arg1: i32, %arg2: i32) -> (i32, i32) {
    %c0_i32 = arith.constant 0 : i32
    %c0_i32_0 = arith.constant 0 : i32
    return %c0_i32, %arg1 : i32, i32
  }
  func.func @transform_3(%arg0: i32, %arg1: i32, %arg2: i32) -> (i32, i32) {
    %c0_i32 = arith.constant 0 : i32
    return %arg0, %arg1 : i32, i32
  }
}

module attributes {stable_mosaic.version = 11 : i64} {
  func.func @_linear_kernel(%arg0: i32, %arg1: i32, %arg2: i32, %arg3: memref<8x1024xbf16, #tpu.memory_space<vmem>>, %arg4: memref<1024x1024xbf16, #tpu.memory_space<vmem>>, %arg5: memref<1x1024xf32, #tpu.memory_space<vmem>>, %arg6: memref<8x1024xf32, #tpu.memory_space<vmem>>) attributes {dimension_semantics = [#tpu.dimension_semantics<parallel>, #tpu.dimension_semantics<parallel>, #tpu.dimension_semantics<arbitrary>], iteration_bounds = array<i64: 1, 1, 1>, scalar_prefetch = 0 : i64, scratch_operands = 0 : i64, tpu.core_type = #tpu.core_type<tc>, window_params = [{transform_indices = @transform_0, window_bounds = array<i64: 8, 1024>}, {transform_indices = @transform_1, window_bounds = array<i64: 1024, 1024>}, {transform_indices = @transform_2, window_bounds = array<i64: 1, 1024>}, {transform_indices = @transform_3, window_bounds = array<i64: 8, 1024>}]} {
    %c0_i32 = arith.constant 0 : i32
    %0 = arith.cmpi eq, %arg2, %c0_i32 : i32
    %1 = arith.extui %0 : i1 to i32
    %c0_i32_0 = arith.constant 0 : i32
    %2 = arith.cmpi ne, %1, %c0_i32_0 : i32
    scf.if %2 {
      %cst_10 = arith.constant 0.000000e+00 : f32
      %12 = vector.broadcast %cst_10 : f32 to vector<8x1024xf32>
      %c0_11 = arith.constant 0 : index
      %c0_12 = arith.constant 0 : index
      %13 = vector.load %arg6[%c0_11, %c0_12] : memref<8x1024xf32, #tpu.memory_space<vmem>>, vector<8x1024xf32>
      tpu.vector_store %arg6[%c0_11, %c0_12], %12 {strides = array<i32>} : memref<8x1024xf32, #tpu.memory_space<vmem>>, vector<8x1024xf32>,
    } else {
    }
    %c0 = arith.constant 0 : index
    %c0_1 = arith.constant 0 : index
    %3 = vector.load %arg6[%c0, %c0_1] : memref<8x1024xf32, #tpu.memory_space<vmem>>, vector<8x1024xf32>
    %c0_2 = arith.constant 0 : index
    %c0_3 = arith.constant 0 : index
    %4 = vector.load %arg3[%c0_2, %c0_3] : memref<8x1024xbf16, #tpu.memory_space<vmem>>, vector<8x1024xbf16>
    %c0_4 = arith.constant 0 : index
    %c0_5 = arith.constant 0 : index
    %5 = vector.load %arg4[%c0_4, %c0_5] : memref<1024x1024xbf16, #tpu.memory_space<vmem>>, vector<1024x1024xbf16>
    %cst = arith.constant dense<0.000000e+00> : vector<8x1024xf32>
    %6 = tpu.matmul %4, %5, %cst {dimension_numbers = #tpu.dot_dimension_numbers<[1], [0], [0], [1], [0, 0, 1, 1], [], []>} : vector<8x1024xbf16>, vector<1024x1024xbf16>, vector<8x1024xf32> -> vector<8x1024xf32>
    %7 = arith.addf %3, %6 : vector<8x1024xf32>
    %c0_6 = arith.constant 0 : index
    %c0_7 = arith.constant 0 : index
    %8 = vector.load %arg6[%c0_6, %c0_7] : memref<8x1024xf32, #tpu.memory_space<vmem>>, vector<8x1024xf32>
    tpu.vector_store %arg6[%c0_6, %c0_7], %7 {strides = array<i32>} : memref<8x1024xf32, #tpu.memory_space<vmem>>, vector<8x1024xf32>,
    %c0_i32_8 = arith.constant 0 : i32
    %9 = arith.cmpi eq, %arg2, %c0_i32_8 : i32
    %10 = arith.extui %9 : i1 to i32
    %c0_i32_9 = arith.constant 0 : i32
    %11 = arith.cmpi ne, %10, %c0_i32_9 : i32
    scf.if %11 {
      %c0_10 = arith.constant 0 : index
      %c0_11 = arith.constant 0 : index
      %12 = vector.load %arg6[%c0_10, %c0_11] : memref<8x1024xf32, #tpu.memory_space<vmem>>, vector<8x1024xf32>
      %c0_12 = arith.constant 0 : index
      %c0_13 = arith.constant 0 : index
      %13 = vector.load %arg5[%c0_12, %c0_13] : memref<1x1024xf32, #tpu.memory_space<vmem>>, vector<1x1024xf32>
      %14 = vector.broadcast %13 : vector<1x1024xf32> to vector<8x1024xf32>
      %15 = arith.addf %12, %14 : vector<8x1024xf32>
      %cst_14 = arith.constant 0.000000e+00 : f32
      %16 = vector.broadcast %cst_14 : f32 to vector<8x1024xf32>
      %17 = arith.maximumf %15, %16 : vector<8x1024xf32>
      %c0_15 = arith.constant 0 : index
      %c0_16 = arith.constant 0 : index
      %18 = vector.load %arg6[%c0_15, %c0_16] : memref<8x1024xf32, #tpu.memory_space<vmem>>, vector<8x1024xf32>
      tpu.vector_store %arg6[%c0_15, %c0_16], %17 {strides = array<i32>} : memref<8x1024xf32, #tpu.memory_space<vmem>>, vector<8x1024xf32>,
    } else {
    }
    return
  }
  func.func @transform_0(%arg0: i32, %arg1: i32, %arg2: i32) -> (i32, i32) {
    %c0_i32 = arith.constant 0 : i32
    return %arg0, %arg2 : i32, i32
  }
  func.func @transform_1(%arg0: i32, %arg1: i32, %arg2: i32) -> (i32, i32) {
    %c0_i32 = arith.constant 0 : i32
    return %arg2, %arg1 : i32, i32
  }
  func.func @transform_2(%arg0: i32, %arg1: i32, %arg2: i32) -> (i32, i32) {
    %c0_i32 = arith.constant 0 : i32
    %c0_i32_0 = arith.constant 0 : i32
    return %c0_i32, %arg1 : i32, i32
  }
  func.func @transform_3(%arg0: i32, %arg1: i32, %arg2: i32) -> (i32, i32) {
    %c0_i32 = arith.constant 0 : i32
    return %arg0, %arg1 : i32, i32
  }
}

module attributes {stable_mosaic.version = 11 : i64} {
  func.func @_linear_kernel(%arg0: i32, %arg1: i32, %arg2: i32, %arg3: memref<8x1024xbf16, #tpu.memory_space<vmem>>, %arg4: memref<1024x128xbf16, #tpu.memory_space<vmem>>, %arg5: memref<1x128xf32, #tpu.memory_space<vmem>>, %arg6: memref<8x128xf32, #tpu.memory_space<vmem>>) attributes {dimension_semantics = [#tpu.dimension_semantics<parallel>, #tpu.dimension_semantics<parallel>, #tpu.dimension_semantics<arbitrary>], iteration_bounds = array<i64: 1, 1, 1>, scalar_prefetch = 0 : i64, scratch_operands = 0 : i64, tpu.core_type = #tpu.core_type<tc>, window_params = [{transform_indices = @transform_0, window_bounds = array<i64: 8, 1024>}, {transform_indices = @transform_1, window_bounds = array<i64: 1024, 128>}, {transform_indices = @transform_2, window_bounds = array<i64: 1, 128>}, {transform_indices = @transform_3, window_bounds = array<i64: 8, 128>}]} {
    %c0_i32 = arith.constant 0 : i32
    %0 = arith.cmpi eq, %arg2, %c0_i32 : i32
    %1 = arith.extui %0 : i1 to i32
    %c0_i32_0 = arith.constant 0 : i32
    %2 = arith.cmpi ne, %1, %c0_i32_0 : i32
    scf.if %2 {
      %cst_10 = arith.constant 0.000000e+00 : f32
      %12 = vector.broadcast %cst_10 : f32 to vector<8x128xf32>
      %c0_11 = arith.constant 0 : index
      %c0_12 = arith.constant 0 : index
      %13 = vector.load %arg6[%c0_11, %c0_12] : memref<8x128xf32, #tpu.memory_space<vmem>>, vector<8x128xf32>
      tpu.vector_store %arg6[%c0_11, %c0_12], %12 {strides = array<i32>} : memref<8x128xf32, #tpu.memory_space<vmem>>, vector<8x128xf32>,
    } else {
    }
    %c0 = arith.constant 0 : index
    %c0_1 = arith.constant 0 : index
    %3 = vector.load %arg6[%c0, %c0_1] : memref<8x128xf32, #tpu.memory_space<vmem>>, vector<8x128xf32>
    %c0_2 = arith.constant 0 : index
    %c0_3 = arith.constant 0 : index
    %4 = vector.load %arg3[%c0_2, %c0_3] : memref<8x1024xbf16, #tpu.memory_space<vmem>>, vector<8x1024xbf16>
    %c0_4 = arith.constant 0 : index
    %c0_5 = arith.constant 0 : index
    %5 = vector.load %arg4[%c0_4, %c0_5] : memref<1024x128xbf16, #tpu.memory_space<vmem>>, vector<1024x128xbf16>
    %cst = arith.constant dense<0.000000e+00> : vector<8x128xf32>
    %6 = tpu.matmul %4, %5, %cst {dimension_numbers = #tpu.dot_dimension_numbers<[1], [0], [0], [1], [0, 0, 1, 1], [], []>} : vector<8x1024xbf16>, vector<1024x128xbf16>, vector<8x128xf32> -> vector<8x128xf32>
    %7 = arith.addf %3, %6 : vector<8x128xf32>
    %c0_6 = arith.constant 0 : index
    %c0_7 = arith.constant 0 : index
    %8 = vector.load %arg6[%c0_6, %c0_7] : memref<8x128xf32, #tpu.memory_space<vmem>>, vector<8x128xf32>
    tpu.vector_store %arg6[%c0_6, %c0_7], %7 {strides = array<i32>} : memref<8x128xf32, #tpu.memory_space<vmem>>, vector<8x128xf32>,
    %c0_i32_8 = arith.constant 0 : i32
    %9 = arith.cmpi eq, %arg2, %c0_i32_8 : i32
    %10 = arith.extui %9 : i1 to i32
    %c0_i32_9 = arith.constant 0 : i32
    %11 = arith.cmpi ne, %10, %c0_i32_9 : i32
    scf.if %11 {
      %c0_10 = arith.constant 0 : index
      %c0_11 = arith.constant 0 : index
      %12 = vector.load %arg6[%c0_10, %c0_11] : memref<8x128xf32, #tpu.memory_space<vmem>>, vector<8x128xf32>
      %c0_12 = arith.constant 0 : index
      %c0_13 = arith.constant 0 : index
      %13 = vector.load %arg5[%c0_12, %c0_13] : memref<1x128xf32, #tpu.memory_space<vmem>>, vector<1x128xf32>
      %14 = vector.broadcast %13 : vector<1x128xf32> to vector<8x128xf32>
      %15 = arith.addf %12, %14 : vector<8x128xf32>
      %16 = tpu.iota {dimensions = array<i32: 1>} : vector<8x128xi32>
      %c2_i32 = arith.constant 2 : i32
      %17 = vector.broadcast %c2_i32 : i32 to vector<8x128xi32>
      %18 = arith.cmpi slt, %16, %17 : vector<8x128xi32>
      %cst_14 = arith.constant 0xFF800000 : f32
      %19 = vector.broadcast %cst_14 : f32 to vector<8x128xf32>
      %20 = arith.select %18, %15, %19 : vector<8x128xi1>, vector<8x128xf32>
      %cst_15 = arith.constant dense<0xFF800000> : vector<8xf32>
      %21 = vector.multi_reduction <maximumf>, %20, %cst_15 [1] : vector<8x128xf32> to vector<8xf32>
      %22 = vector.shape_cast %21 : vector<8xf32> to vector<8x1xf32>
      %23 = vector.broadcast %22 : vector<8x1xf32> to vector<8x128xf32>
      %24 = arith.subf %20, %23 : vector<8x128xf32>
      %25 = math.exp %24 : vector<8x128xf32>
      %cst_16 = arith.constant dense<0.000000e+00> : vector<8xf32>
      %26 = vector.multi_reduction <add>, %25, %cst_16 [1] : vector<8x128xf32> to vector<8xf32>
      %27 = vector.shape_cast %26 : vector<8xf32> to vector<8x1xf32>
      %28 = math.log %27 : vector<8x1xf32>
      %29 = arith.addf %28, %22 : vector<8x1xf32>
      %30 = vector.broadcast %29 : vector<8x1xf32> to vector<8x128xf32>
      %31 = arith.subf %20, %30 : vector<8x128xf32>
      %c0_17 = arith.constant 0 : index
      %c0_18 = arith.constant 0 : index
      %32 = vector.load %arg6[%c0_17, %c0_18] : memref<8x128xf32, #tpu.memory_space<vmem>>, vector<8x128xf32>
      tpu.vector_store %arg6[%c0_17, %c0_18], %31 {strides = array<i32>} : memref<8x128xf32, #tpu.memory_space<vmem>>, vector<8x128xf32>,
    } else {
    }
    return
  }
  func.func @transform_0(%arg0: i32, %arg1: i32, %arg2: i32) -> (i32, i32) {
    %c0_i32 = arith.constant 0 : i32
    return %arg0, %arg2 : i32, i32
  }
  func.func @transform_1(%arg0: i32, %arg1: i32, %arg2: i32) -> (i32, i32) {
    %c0_i32 = arith.constant 0 : i32
    return %arg2, %arg1 : i32, i32
  }
  func.func @transform_2(%arg0: i32, %arg1: i32, %arg2: i32) -> (i32, i32) {
    %c0_i32 = arith.constant 0 : i32
    %c0_i32_0 = arith.constant 0 : i32
    return %c0_i32, %arg1 : i32, i32
  }
  func.func @transform_3(%arg0: i32, %arg1: i32, %arg2: i32) -> (i32, i32) {
    %c0_i32 = arith.constant 0 : i32
    return %arg0, %arg1 : i32, i32
  }
}

</mosaic_0001>

<bundles_post_ra>
// kernel: simple_nn_forward.5
= control target key start
LH: loop header
LB: loop body
LE: loop exit
PB: predicated region body
PF: predicated region fallthrough
CT: control target
= control target key end

     0   :  { %s1255_s1 = inlined_call_operand.vmem [shape: bf16[1024,128], index: 1, kind: input, shape index: {}]   ;;  %s1256_s0 = inlined_call_operand.vmem [shape: bf16[8,1024], index: 0, kind: input, shape index: {}]   ;;  %s1257_s2 = inlined_call_operand.vmem [shape: f32[1,128], index: 2, kind: input, shape index: {}]   ;;  %s1258_s3 = inlined_call_operand.vmem [shape: f32[8,128], index: 3, kind: output, shape index: {}]  }
   0x1   :  { %v962_v0 = vld [vmem:[%s1255_s1 + $0x38] sm:$0xff]  ;;  %v961_v4 = vld [vmem:[%s1255_s1 + $0x30] sm:$0xff]  ;;  %v960_v8 = vld [vmem:[%s1255_s1 + $0x28] sm:$0xff] }
   0x2   :  { %v970_v1 = vld [vmem:[%s1255_s1 + $0x78] sm:$0xff]  ;;  %564 = vmatpush.bf16.msra.mxu0 %v962_v0  ;;  %v969_v5 = vld [vmem:[%s1255_s1 + $0x70] sm:$0xff]  ;;  %v968_v9 = vld [vmem:[%s1255_s1 + $0x68] sm:$0xff] }
   0x3   :  { %v978_v2 = vld [vmem:[%s1255_s1 + $0xb8] sm:$0xff]  ;;  %577 = vmatpush.bf16.msra.mxu1 %v970_v1  ;;  %v977_v6 = vld [vmem:[%s1255_s1 + $0xb0] sm:$0xff]  ;;  %v976_v10 = vld [vmem:[%s1255_s1 + $0xa8] sm:$0xff] }
   0x4   :  { %v986_v3 = vld [vmem:[%s1255_s1 + $0xf8] sm:$0xff]  ;;  %590 = vmatpush.bf16.msra.mxu2 %v978_v2  ;;  %v985_v7 = vld [vmem:[%s1255_s1 + $0xf0] sm:$0xff]  ;;  %v984_v11 = vld [vmem:[%s1255_s1 + $0xe8] sm:$0xff] }
   0x5   :  { %603 = vmatpush.bf16.msra.mxu3 %v986_v3  ;;  %v959_v12 = vld [vmem:[%s1255_s1 + $0x20] sm:$0xff]  ;;  %v958_v16 = vld [vmem:[%s1255_s1 + $0x18] sm:$0xff]  ;;  %v957_v20 = vld [vmem:[%s1255_s1 + $0x10] sm:$0xff] }
   0x6   :  { %565 = vmatpush.bf16.msra.mxu0 %v961_v4  ;;  %v967_v13 = vld [vmem:[%s1255_s1 + $0x60] sm:$0xff]  ;;  %v966_v17 = vld [vmem:[%s1255_s1 + $0x58] sm:$0xff]  ;;  %v965_v21 = vld [vmem:[%s1255_s1 + $0x50] sm:$0xff] }
   0x7   :  { %578 = vmatpush.bf16.msra.mxu1 %v969_v5  ;;  %v975_v14 = vld [vmem:[%s1255_s1 + $0xa0] sm:$0xff]  ;;  %v974_v18 = vld [vmem:[%s1255_s1 + $0x98] sm:$0xff]  ;;  %v973_v22 = vld [vmem:[%s1255_s1 + $0x90] sm:$0xff] }
   0x8   :  { %591 = vmatpush.bf16.msra.mxu2 %v977_v6  ;;  %v983_v15 = vld [vmem:[%s1255_s1 + $0xe0] sm:$0xff]  ;;  %v982_v19 = vld [vmem:[%s1255_s1 + $0xd8] sm:$0xff]  ;;  %v981_v23 = vld [vmem:[%s1255_s1 + $0xd0] sm:$0xff] }
   0x9   :  { %604 = vmatpush.bf16.msra.mxu3 %v985_v7  ;;  %v956_v24 = vld [vmem:[%s1255_s1 + $0x8] sm:$0xff]  ;;  %v20_v29 = vld [vmem:[%s1256_s0] sm:$0xff]  ;;  %v994_v38 = vld [vmem:[%s1255_s1 + $0x138] sm:$0xff] }
   0xa   :  { %566 = vmatpush.bf16.msra.mxu0 %v960_v8  ;;  %v964_v25 = vld [vmem:[%s1255_s1 + $0x48] sm:$0xff]  ;;  %v955_v30 = vld [vmem:[%s1255_s1] sm:$0xff]  ;;  %v156_v33 = vunpack.c.l.b16 %v20_v29  ;;  %v157_v37 = vunpack.c.h.b16 %v20_v29  ;;  %v1002_v39 = vld [vmem:[%s1255_s1 + $0x178] sm:$0xff] }
   0xb   :  { %579 = vmatpush.bf16.msra.mxu1 %v968_v9  ;;  %v972_v26 = vld [vmem:[%s1255_s1 + $0x88] sm:$0xff]  ;;  %v963_v31 = vld [vmem:[%s1255_s1 + $0x40] sm:$0xff]  ;;  %v1010_v40 = vld [vmem:[%s1255_s1 + $0x1b8] sm:$0xff] }
   0xc   :  { %592 = vmatpush.bf16.msra.mxu2 %v976_v10  ;;  %v980_v27 = vld [vmem:[%s1255_s1 + $0xc8] sm:$0xff]  ;;  %v971_v34 = vld [vmem:[%s1255_s1 + $0x80] sm:$0xff]  ;;  %v1018_v41 = vld [vmem:[%s1255_s1 + $0x1f8] sm:$0xff]  ;;  %v164_v43 = vpack.c.b16 %v156_v33, %v156_v33  ;;  %v165_v45 = vpack.c.b16 %v157_v37, %v157_v37 }
   0xd   :  { %605 = vmatpush.bf16.msra.mxu3 %v984_v11  ;;  %v21_v28 = vld [vmem:[%s1256_s0 + $0x8] sm:$0xff]  ;;  %v979_v35 = vld [vmem:[%s1255_s1 + $0xc0] sm:$0xff]  ;;  %v993_v46 = vld [vmem:[%s1255_s1 + $0x130] sm:$0xff] }
   0xe   :  { %567 = vmatpush.bf16.msra.mxu0 %v959_v12  ;;  %v158_v32 = vunpack.c.l.b16 %v21_v28  ;;  %v159_v36 = vunpack.c.h.b16 %v21_v28  ;;  %v1001_v47 = vld [vmem:[%s1255_s1 + $0x170] sm:$0xff]  ;;  %v992_v50 = vld [vmem:[%s1255_s1 + $0x128] sm:$0xff]  ;;  %v991_v54 = vld [vmem:[%s1255_s1 + $0x120] sm:$0xff] }
   0xf   :  { %580 = vmatpush.bf16.msra.mxu1 %v967_v13  ;;  %v1009_v48 = vld [vmem:[%s1255_s1 + $0x1b0] sm:$0xff]  ;;  %v1000_v51 = vld [vmem:[%s1255_s1 + $0x168] sm:$0xff]  ;;  %v999_v55 = vld [vmem:[%s1255_s1 + $0x160] sm:$0xff] }
  0x10   :  { %593 = vmatpush.bf16.msra.mxu2 %v975_v14  ;;  %v166_v42 = vpack.c.b16 %v158_v32, %v158_v32  ;;  %v167_v44 = vpack.c.b16 %v159_v36, %v159_v36  ;;  %v1017_v49 = vld [vmem:[%s1255_s1 + $0x1f0] sm:$0xff]  ;;  %v1008_v52 = vld [vmem:[%s1255_s1 + $0x1a8] sm:$0xff]  ;;  %v1007_v56 = vld [vmem:[%s1255_s1 + $0x1a0] sm:$0xff] }
  0x11   :  { %606 = vmatpush.bf16.msra.mxu3 %v983_v15  ;;  %v1016_v53 = vld [vmem:[%s1255_s1 + $0x1e8] sm:$0xff]  ;;  %v1015_v57 = vld [vmem:[%s1255_s1 + $0x1e0] sm:$0xff]  ;;  %v990_v58 = vld [vmem:[%s1255_s1 + $0x118] sm:$0xff] }
  0x12   :  { %568 = vmatpush.bf16.msra.mxu0 %v958_v16  ;;  %v998_v59 = vld [vmem:[%s1255_s1 + $0x158] sm:$0xff]  ;;  %v989_v62 = vld [vmem:[%s1255_s1 + $0x110] sm:$0xff]  ;;  %v988_v2 = vld [vmem:[%s1255_s1 + $0x108] sm:$0xff] }
  0x13   :  { %581 = vmatpush.bf16.msra.mxu1 %v966_v17  ;;  %v1006_v60 = vld [vmem:[%s1255_s1 + $0x198] sm:$0xff]  ;;  %v997_v63 = vld [vmem:[%s1255_s1 + $0x150] sm:$0xff]  ;;  %v996_v3 = vld [vmem:[%s1255_s1 + $0x148] sm:$0xff] }
  0x14   :  { %594 = vmatpush.bf16.msra.mxu2 %v974_v18  ;;  %v1014_v61 = vld [vmem:[%s1255_s1 + $0x1d8] sm:$0xff]  ;;  %v1005_v0 = vld [vmem:[%s1255_s1 + $0x190] sm:$0xff]  ;;  %v1004_v5 = vld [vmem:[%s1255_s1 + $0x188] sm:$0xff] }
  0x15   :  { %607 = vmatpush.bf16.msra.mxu3 %v982_v19  ;;  %v1013_v1 = vld [vmem:[%s1255_s1 + $0x1d0] sm:$0xff]  ;;  %v1012_v6 = vld [vmem:[%s1255_s1 + $0x1c8] sm:$0xff]  ;;  %v23_v7 = vld [vmem:[%s1256_s0 + $0x18] sm:$0xff] }
  0x16   :  { %569 = vmatpush.bf16.msra.mxu0 %v957_v20  ;;  %v22_v4 = vld [vmem:[%s1256_s0 + $0x10] sm:$0xff]  ;;  %v987_v10 = vld [vmem:[%s1255_s1 + $0x100] sm:$0xff]  ;;  %v162_v12 = vunpack.c.l.b16 %v23_v7  ;;  %v163_v13 = vunpack.c.h.b16 %v23_v7 }
  0x17   :  { %582 = vmatpush.bf16.msra.mxu1 %v965_v21  ;;  %v160_v8 = vunpack.c.l.b16 %v22_v4  ;;  %v161_v9 = vunpack.c.h.b16 %v22_v4  ;;  %v995_v11 = vld [vmem:[%s1255_s1 + $0x140] sm:$0xff] }
  0x18   :  { %595 = vmatpush.bf16.msra.mxu2 %v973_v22  ;;  %v1003_v14 = vld [vmem:[%s1255_s1 + $0x180] sm:$0xff]  ;;  %v170_v18 = vpack.c.b16 %v162_v12, %v162_v12  ;;  %v171_v19 = vpack.c.b16 %v163_v13, %v163_v13 }
  0x19   :  { %608 = vmatpush.bf16.msra.mxu3 %v981_v23  ;;  %v1011_v15 = vld [vmem:[%s1255_s1 + $0x1c0] sm:$0xff]  ;;  %v168_v16 = vpack.c.b16 %v160_v8, %v160_v8  ;;  %v169_v17 = vpack.c.b16 %v161_v9, %v161_v9 }
  0x1a   :  { %570 = vmatpush.bf16.msra.mxu0 %v956_v24 }
  0x1b   :  { %583 = vmatpush.bf16.msra.mxu1 %v964_v25 }
  0x1c   :  { %596 = vmatpush.bf16.msra.mxu2 %v972_v26 }
  0x1d   :  { %609 = vmatpush.bf16.msra.mxu3 %v980_v27 }
  0x1e   :  { %571 = vmatpush.bf16.msra.mxu0 %v955_v30 }
  0x1f   :  { %584 = vmatpush.bf16.msra.mxu1 %v963_v31 }
  0x20   :  { %597 = vmatpush.bf16.msra.mxu2 %v971_v34  ;;  %v679_v34 = vlaneseq }
  0x21   :  { %610 = vmatpush.bf16.msra.mxu3 %v979_v35  ;;  %572 = vmatmul.bf16.vlgmr.msra.gmra.mxu0 %v164_v43  ;;  %v1020_v43 = vld [vmem:[%s1257_s2] ss:$0 sm:$0xff] }
  0x22   :  { %616 = vmatpush.bf16.msrb.mxu0 %v994_v38  ;;  %585 = vmatmul.bf16.vlgmr.msra.gmra.mxu1 %v165_v45 }
  0x23   :  { %629 = vmatpush.bf16.msrb.mxu1 %v1002_v39  ;;  %598 = vmatmul.bf16.vlgmr.msra.gmra.mxu2 %v166_v42 }
  0x24   :  { %642 = vmatpush.bf16.msrb.mxu2 %v1010_v40  ;;  %611 = vmatmul.bf16.vlgmr.msra.gmra.mxu3 %v167_v44 }
  0x25   :  { %655 = vmatpush.bf16.msrb.mxu3 %v1018_v41  ;;  %v680_v41 = vand.u32 127, %v679_v34 }
  0x26   :  { %617 = vmatpush.bf16.msrb.mxu0 %v993_v46 }
  0x27   :  { %630 = vmatpush.bf16.msrb.mxu1 %v1001_v47  ;;  %vm681_vm0 = vcmp.lt.s32.totalorder %v680_v41, 2 }
  0x28   :  { %643 = vmatpush.bf16.msrb.mxu2 %v1009_v48 }
  0x29   :  { %656 = vmatpush.bf16.msrb.mxu3 %v1017_v49 }
  0x2a   :  { %618 = vmatpush.bf16.msrb.mxu0 %v992_v50 }
  0x2b   :  { %631 = vmatpush.bf16.msrb.mxu1 %v1000_v51 }
  0x2c   :  { %644 = vmatpush.bf16.msrb.mxu2 %v1008_v52 }
  0x2d   :  { %657 = vmatpush.bf16.msrb.mxu3 %v1016_v53 }
  0x2e   :  { %619 = vmatpush.bf16.msrb.mxu0 %v991_v54 }
  0x2f   :  { %632 = vmatpush.bf16.msrb.mxu1 %v999_v55 }
  0x30   :  { %645 = vmatpush.bf16.msrb.mxu2 %v1007_v56 }
  0x31   :  { %658 = vmatpush.bf16.msrb.mxu3 %v1015_v57 }
  0x32   :  { %620 = vmatpush.bf16.msrb.mxu0 %v990_v58 }
  0x33   :  { %633 = vmatpush.bf16.msrb.mxu1 %v998_v59 }
  0x34   :  { %646 = vmatpush.bf16.msrb.mxu2 %v1006_v60 }
  0x35   :  { %659 = vmatpush.bf16.msrb.mxu3 %v1014_v61 }
  0x36   :  { %621 = vmatpush.bf16.msrb.mxu0 %v989_v62 }
  0x37   :  { %634 = vmatpush.bf16.msrb.mxu1 %v997_v63 }
  0x38   :  { %647 = vmatpush.bf16.msrb.mxu2 %v1005_v0 }
  0x39   :  { %660 = vmatpush.bf16.msrb.mxu3 %v1013_v1 }
  0x3a   :  { %622 = vmatpush.bf16.msrb.mxu0 %v988_v2 }
  0x3b   :  { %635 = vmatpush.bf16.msrb.mxu1 %v996_v3 }
  0x3c   :  { %648 = vmatpush.bf16.msrb.mxu2 %v1004_v5 }
  0x3d   :  { %661 = vmatpush.bf16.msrb.mxu3 %v1012_v6 }
  0x3e   :  { %623 = vmatpush.bf16.msrb.mxu0 %v987_v10 }
  0x3f   :  { %636 = vmatpush.bf16.msrb.mxu1 %v995_v11 }
  0x40   :  { %649 = vmatpush.bf16.msrb.mxu2 %v1003_v14 }
  0x41   :  { %662 = vmatpush.bf16.msrb.mxu3 %v1011_v15  ;;  %624 = vmatmul.bf16.vlgmr.msrb.gmra.mxu0 %v168_v16 }
  0x42   :  { %637 = vmatmul.bf16.vlgmr.msrb.gmra.mxu1 %v169_v17 }
  0x43   :  { %650 = vmatmul.bf16.vlgmr.msrb.gmra.mxu2 %v170_v18 }
  0x44   :  { %663 = vmatmul.bf16.vlgmr.msrb.gmra.mxu3 %v171_v19 }
  0x9e   :  { %v573_v20 = vpop.f32.mrf.mxu0 }
  0x9f   :  { %v586_v21 = vpop.f32.mrf.mxu1 }
  0xa0   :  { %v587_v28 = vadd.f32 %v586_v21, %v573_v20 }
  0xa6   :  { %v599_v22 = vpop.f32.mrf.mxu2  ;;  %v575_v24 = vpop.f32.mrf.mxu0 }
  0xa7   :  { %v612_v23 = vpop.f32.mrf.mxu3  ;;  %v588_v25 = vpop.f32.mrf.mxu1  ;;  %v600_v29 = vadd.f32 %v599_v22, %v587_v28 }
  0xa9   :  { %v613_v30 = vadd.f32 %v612_v23, %v600_v29 }
  0xae   :  { %v601_v26 = vpop.f32.mrf.mxu2 }
  0xaf   :  { %v614_v27 = vpop.f32.mrf.mxu3 }
  0xbe   :  { %v625_v31 = vpop.f32.mrf.mxu0 }
  0xbf   :  { %v638_v32 = vpop.f32.mrf.mxu1  ;;  %v626_v33 = vadd.f32 %v625_v31, %v613_v30 }
  0xc1   :  { %v639_v35 = vadd.f32 %v638_v32, %v626_v33 }
  0xc6   :  { %v651_v36 = vpop.f32.mrf.mxu2  ;;  %v627_v39 = vpop.f32.mrf.mxu0 }
  0xc7   :  { %v664_v37 = vpop.f32.mrf.mxu3  ;;  %v652_v38 = vadd.f32 %v651_v36, %v639_v35  ;;  %v640_v40 = vpop.f32.mrf.mxu1 }
  0xc9   :  { %v665_v42 = vadd.f32 %v664_v37, %v652_v38 }
  0xcb   :  { %v678_v44 = vadd.f32 %v1020_v43, %v665_v42 }
  0xcd   :  { %v682_v47 = vsel %vm681_vm0, %v678_v44, -inf }
  0xce   :  { %v653_v45 = vpop.f32.mrf.mxu2  ;;  %683 = vmax.xlane.f32.xlu0 %v682_v47 }
  0xcf   :  { %v666_v46 = vpop.f32.mrf.mxu3 }
 0x141   :  { %v684_v48 = vpop.xlane.xlu0 %683 }
 0x142   :  { %v685_v49 = vsub.f32 %v682_v47, %v684_v48 }
 0x144   :  { %v686_v50 = vmul.f32 1.442695, %v685_v49 }
 0x146   :  { %1021 = vpow2.f32 %v686_v50 }
 0x14c   :  { %v1022_v51 = vpop.eup %1021 }
 0x14d   :  { %688 = vadd.xlane.f32.xlu0 %v1022_v51 }
 0x1c0   :  { %v689_v52 = vpop.xlane.xlu0 %688 }
 0x1c1   :  { %1023 = vlog2.f32 %v689_v52 }
 0x1c7   :  { %v1024_v53 = vpop.eup %1023 }
 0x1c8   :  { %v691_v54 = vmul.f32 0.6931472, %v1024_v53 }
 0x1ca   :  { %v692_v55 = vadd.f32 %v691_v54, %v684_v48 }
 0x1cc   :  { %v693_v56 = vsub.f32 %v682_v47, %v692_v55 }
 0x1ce   :  { %694 = vst [vmem:[%s1258_s3] sm:$0xff] %v693_v56 }

// kernel: simple_nn_forward.4
= control target key start
LH: loop header
LB: loop body
LE: loop exit
PB: predicated region body
PF: predicated region fallthrough
CT: control target
= control target key end

     0   :  { %s9897_s1 = inlined_call_operand.vmem [shape: bf16[1024,1024], index: 1, kind: input, shape index: {}]   ;;  %s9898_s0 = inlined_call_operand.vmem [shape: bf16[8,1024], index: 0, kind: input, shape index: {}]   ;;  %s9899_s2 = inlined_call_operand.vmem [shape: f32[1,1024], index: 2, kind: input, shape index: {}]   ;;  %s9900_s3 = inlined_call_operand.vmem [shape: f32[8,1024], index: 3, kind: output, shape index: {}]  }
   0x1   :  { %v4269_v0 = vld [vmem:[%s9897_s1 + $0x1c0] sm:$0xf] }
   0x2   :  { %v6151_v1 = vld [vmem:[%s9897_s1 + $0x1dc] sm:$0xf0] }
   0x3   :  { %v4525_v2 = vld [vmem:[%s9897_s1 + $0x3c0] sm:$0xf]  ;;  %v4270_v3 = vor.u32 %v6151_v1, %v4269_v0 }
   0x4   :  { %v6215_v4 = vld [vmem:[%s9897_s1 + $0x3dc] sm:$0xf0] }
   0x5   :  { %v4781_v5 = vld [vmem:[%s9897_s1 + $0x5c0] sm:$0xf]  ;;  %v4526_v7 = vor.u32 %v6215_v4, %v4525_v2  ;;  %3138 = vmatpush.bf16.msra.mxu0 %v4270_v3 }
   0x6   :  { %v6279_v6 = vld [vmem:[%s9897_s1 + $0x5dc] sm:$0xf0] }
   0x7   :  { %v4782_v8 = vor.u32 %v6279_v6, %v4781_v5  ;;  %v5037_v9 = vld [vmem:[%s9897_s1 + $0x7c0] sm:$0xf]  ;;  %3151 = vmatpush.bf16.msra.mxu1 %v4526_v7 }
   0x8   :  { %v6343_v10 = vld [vmem:[%s9897_s1 + $0x7dc] sm:$0xf0] }
   0x9   :  { %v4237_v11 = vld [vmem:[%s9897_s1 + $0x180] sm:$0xf]  ;;  %v5038_v12 = vor.u32 %v6343_v10, %v5037_v9  ;;  %3164 = vmatpush.bf16.msra.mxu2 %v4782_v8 }
   0xa   :  { %v6143_v13 = vld [vmem:[%s9897_s1 + $0x19c] sm:$0xf0] }
   0xb   :  { %v4493_v14 = vld [vmem:[%s9897_s1 + $0x380] sm:$0xf]  ;;  %v4238_v16 = vor.u32 %v6143_v13, %v4237_v11  ;;  %3177 = vmatpush.bf16.msra.mxu3 %v5038_v12 }
   0xc   :  { %v6207_v15 = vld [vmem:[%s9897_s1 + $0x39c] sm:$0xf0] }
   0xd   :  { %v4494_v17 = vor.u32 %v6207_v15, %v4493_v14  ;;  %v4749_v18 = vld [vmem:[%s9897_s1 + $0x580] sm:$0xf]  ;;  %3139 = vmatpush.bf16.msra.mxu0 %v4238_v16 }
   0xe   :  { %v6271_v19 = vld [vmem:[%s9897_s1 + $0x59c] sm:$0xf0] }
   0xf   :  { %v5005_v20 = vld [vmem:[%s9897_s1 + $0x780] sm:$0xf]  ;;  %v4750_v21 = vor.u32 %v6271_v19, %v4749_v18  ;;  %3152 = vmatpush.bf16.msra.mxu1 %v4494_v17 }
  0x10   :  { %v6335_v22 = vld [vmem:[%s9897_s1 + $0x79c] sm:$0xf0] }
  0x11   :  { %v4205_v23 = vld [vmem:[%s9897_s1 + $0x140] sm:$0xf]  ;;  %v5006_v25 = vor.u32 %v6335_v22, %v5005_v20  ;;  %3165 = vmatpush.bf16.msra.mxu2 %v4750_v21 }
  0x12   :  { %v6135_v24 = vld [vmem:[%s9897_s1 + $0x15c] sm:$0xf0] }
  0x13   :  { %v4461_v26 = vld [vmem:[%s9897_s1 + $0x340] sm:$0xf]  ;;  %v4206_v29 = vor.u32 %v6135_v24, %v4205_v23  ;;  %3178 = vmatpush.bf16.msra.mxu3 %v5006_v25 }
  0x14   :  { %v6199_v27 = vld [vmem:[%s9897_s1 + $0x35c] sm:$0xf0] }
  0x15   :  { %v4717_v28 = vld [vmem:[%s9897_s1 + $0x540] sm:$0xf]  ;;  %v4462_v33 = vor.u32 %v6199_v27, %v4461_v26  ;;  %3140 = vmatpush.bf16.msra.mxu0 %v4206_v29 }
  0x16   :  { %v6263_v30 = vld [vmem:[%s9897_s1 + $0x55c] sm:$0xf0] }
  0x17   :  { %v4973_v31 = vld [vmem:[%s9897_s1 + $0x740] sm:$0xf]  ;;  %v4718_v34 = vor.u32 %v6263_v30, %v4717_v28  ;;  %3153 = vmatpush.bf16.msra.mxu1 %v4462_v33 }
  0x18   :  { %v6327_v32 = vld [vmem:[%s9897_s1 + $0x75c] sm:$0xf0] }
  0x19   :  { %v4173_v35 = vld [vmem:[%s9897_s1 + $0x100] sm:$0xf]  ;;  %v4974_v38 = vor.u32 %v6327_v32, %v4973_v31  ;;  %3166 = vmatpush.bf16.msra.mxu2 %v4718_v34 }
  0x1a   :  { %v6127_v36 = vld [vmem:[%s9897_s1 + $0x11c] sm:$0xf0] }
  0x1b   :  { %v4429_v37 = vld [vmem:[%s9897_s1 + $0x300] sm:$0xf]  ;;  %v4174_v44 = vor.u32 %v6127_v36, %v4173_v35  ;;  %3179 = vmatpush.bf16.msra.mxu3 %v4974_v38 }
  0x1c   :  { %v6191_v39 = vld [vmem:[%s9897_s1 + $0x31c] sm:$0xf0] }
  0x1d   :  { %v4685_v40 = vld [vmem:[%s9897_s1 + $0x500] sm:$0xf]  ;;  %v4430_v45 = vor.u32 %v6191_v39, %v4429_v37  ;;  %3141 = vmatpush.bf16.msra.mxu0 %v4174_v44 }
  0x1e   :  { %v6255_v41 = vld [vmem:[%s9897_s1 + $0x51c] sm:$0xf0] }
  0x1f   :  { %v4941_v42 = vld [vmem:[%s9897_s1 + $0x700] sm:$0xf]  ;;  %v4686_v46 = vor.u32 %v6255_v41, %v4685_v40  ;;  %3154 = vmatpush.bf16.msra.mxu1 %v4430_v45 }
  0x20   :  { %v6319_v43 = vld [vmem:[%s9897_s1 + $0x71c] sm:$0xf0] }
  0x21   :  { %v4141_v47 = vld [vmem:[%s9897_s1 + $0xc0] sm:$0xf]  ;;  %v4942_v50 = vor.u32 %v6319_v43, %v4941_v42  ;;  %3167 = vmatpush.bf16.msra.mxu2 %v4686_v46 }
  0x22   :  { %v6119_v48 = vld [vmem:[%s9897_s1 + $0xdc] sm:$0xf0] }
  0x23   :  { %v4397_v49 = vld [vmem:[%s9897_s1 + $0x2c0] sm:$0xf]  ;;  %v4142_v56 = vor.u32 %v6119_v48, %v4141_v47  ;;  %3180 = vmatpush.bf16.msra.mxu3 %v4942_v50 }
  0x24   :  { %v6183_v51 = vld [vmem:[%s9897_s1 + $0x2dc] sm:$0xf0] }
  0x25   :  { %v4653_v52 = vld [vmem:[%s9897_s1 + $0x4c0] sm:$0xf]  ;;  %v4398_v57 = vor.u32 %v6183_v51, %v4397_v49  ;;  %3142 = vmatpush.bf16.msra.mxu0 %v4142_v56 }
  0x26   :  { %v6247_v53 = vld [vmem:[%s9897_s1 + $0x4dc] sm:$0xf0] }
  0x27   :  { %v4909_v54 = vld [vmem:[%s9897_s1 + $0x6c0] sm:$0xf]  ;;  %v4654_v58 = vor.u32 %v6247_v53, %v4653_v52  ;;  %3155 = vmatpush.bf16.msra.mxu1 %v4398_v57 }
  0x28   :  { %v6311_v55 = vld [vmem:[%s9897_s1 + $0x6dc] sm:$0xf0] }
  0x29   :  { %v4109_v59 = vld [vmem:[%s9897_s1 + $0x80] sm:$0xf]  ;;  %v4910_v62 = vor.u32 %v6311_v55, %v4909_v54  ;;  %3168 = vmatpush.bf16.msra.mxu2 %v4654_v58  ;;  %v35_v58 = vld [vmem:[%s9898_s0 + $0x8] sm:$0xff] }
  0x2a   :  { %v6111_v60 = vld [vmem:[%s9897_s1 + $0x9c] sm:$0xf0] }
  0x2b   :  { %v4365_v61 = vld [vmem:[%s9897_s1 + $0x280] sm:$0xf]  ;;  %v4110_v4 = vor.u32 %v6111_v60, %v4109_v59  ;;  %3181 = vmatpush.bf16.msra.mxu3 %v4910_v62 }
  0x2c   :  { %v6175_v63 = vld [vmem:[%s9897_s1 + $0x29c] sm:$0xf0] }
  0x2d   :  { %v4621_v0 = vld [vmem:[%s9897_s1 + $0x480] sm:$0xf]  ;;  %v4366_v5 = vor.u32 %v6175_v63, %v4365_v61  ;;  %3143 = vmatpush.bf16.msra.mxu0 %v4110_v4  ;;  %v556_v63 = vunpack.c.l.b16 %v35_v58 }
  0x2e   :  { %v6239_v1 = vld [vmem:[%s9897_s1 + $0x49c] sm:$0xf0] }
  0x2f   :  { %v4877_v2 = vld [vmem:[%s9897_s1 + $0x680] sm:$0xf]  ;;  %v4622_v6 = vor.u32 %v6239_v1, %v4621_v0  ;;  %3156 = vmatpush.bf16.msra.mxu1 %v4366_v5  ;;  %v557_v0 = vunpack.c.h.b16 %v35_v58  ;;  %v6893_v4 = vpack.c.b16 %v556_v63, %v556_v63 }
  0x30   :  { %v6303_v3 = vld [vmem:[%s9897_s1 + $0x69c] sm:$0xf0] }
  0x31   :  { %v4077_v7 = vld [vmem:[%s9897_s1 + $0x40] sm:$0xf]  ;;  %v4878_v10 = vor.u32 %v6303_v3, %v4877_v2  ;;  %3169 = vmatpush.bf16.msra.mxu2 %v4622_v6  ;;  %v6898_v6 = vpack.c.b16 %v557_v0, %v557_v0 }
  0x32   :  { %v6103_v8 = vld [vmem:[%s9897_s1 + $0x5c] sm:$0xf0] }
  0x33   :  { %v4333_v9 = vld [vmem:[%s9897_s1 + $0x240] sm:$0xf]  ;;  %v4078_v16 = vor.u32 %v6103_v8, %v4077_v7  ;;  %3182 = vmatpush.bf16.msra.mxu3 %v4878_v10 }
  0x34   :  { %v6167_v11 = vld [vmem:[%s9897_s1 + $0x25c] sm:$0xf0] }
  0x35   :  { %v4589_v12 = vld [vmem:[%s9897_s1 + $0x440] sm:$0xf]  ;;  %v4334_v19 = vor.u32 %v6167_v11, %v4333_v9  ;;  %3144 = vmatpush.bf16.msra.mxu0 %v4078_v16 }
  0x36   :  { %v6231_v13 = vld [vmem:[%s9897_s1 + $0x45c] sm:$0xf0] }
  0x37   :  { %v4845_v14 = vld [vmem:[%s9897_s1 + $0x640] sm:$0xf]  ;;  %v4590_v20 = vor.u32 %v6231_v13, %v4589_v12  ;;  %3157 = vmatpush.bf16.msra.mxu1 %v4334_v19 }
  0x38   :  { %v6295_v15 = vld [vmem:[%s9897_s1 + $0x65c] sm:$0xf0] }
  0x39   :  { %v4045_v17 = vld [vmem:[%s9897_s1] sm:$0xf]  ;;  %v4846_v24 = vor.u32 %v6295_v15, %v4845_v14  ;;  %3170 = vmatpush.bf16.msra.mxu2 %v4590_v20 }
  0x3a   :  { %v6095_v18 = vld [vmem:[%s9897_s1 + $0x1c] sm:$0xf0] }
  0x3b   :  { %v4301_v21 = vld [vmem:[%s9897_s1 + $0x200] sm:$0xf]  ;;  %v4046_v31 = vor.u32 %v6095_v18, %v4045_v17  ;;  %3183 = vmatpush.bf16.msra.mxu3 %v4846_v24 }
  0x3c   :  { %v6159_v22 = vld [vmem:[%s9897_s1 + $0x21c] sm:$0xf0] }
  0x3d   :  { %v4557_v23 = vld [vmem:[%s9897_s1 + $0x400] sm:$0xf]  ;;  %v4302_v35 = vor.u32 %v6159_v22, %v4301_v21  ;;  %3145 = vmatpush.bf16.msra.mxu0 %v4046_v31 }
  0x3e   :  { %v6223_v25 = vld [vmem:[%s9897_s1 + $0x41c] sm:$0xf0] }
  0x3f   :  { %v4813_v26 = vld [vmem:[%s9897_s1 + $0x600] sm:$0xf]  ;;  %v4558_v36 = vor.u32 %v6223_v25, %v4557_v23  ;;  %3158 = vmatpush.bf16.msra.mxu1 %v4302_v35 }
  0x40   :  { %v6287_v27 = vld [vmem:[%s9897_s1 + $0x61c] sm:$0xf0] }
  0x41   :  { %v5293_v28 = vld [vmem:[%s9897_s1 + $0x9c0] sm:$0xf]  ;;  %v4814_v39 = vor.u32 %v6287_v27, %v4813_v26  ;;  %3171 = vmatpush.bf16.msra.mxu2 %v4558_v36 }
  0x42   :  { %v6407_v29 = vld [vmem:[%s9897_s1 + $0x9dc] sm:$0xf0] }
  0x43   :  { %v5549_v30 = vld [vmem:[%s9897_s1 + $0xbc0] sm:$0xf]  ;;  %v5294_v40 = vor.u32 %v6407_v29, %v5293_v28  ;;  %3184 = vmatpush.bf16.msra.mxu3 %v4814_v39 }
  0x44   :  { %v6471_v32 = vld [vmem:[%s9897_s1 + $0xbdc] sm:$0xf0]  ;;  %3172 = vmatmul.bf16.vlgmr.msra.gmra.mxu2 %v6893_v4 }
  0x45   :  { %v5805_v33 = vld [vmem:[%s9897_s1 + $0xdc0] sm:$0xf]  ;;  %v5550_v41 = vor.u32 %v6471_v32, %v5549_v30  ;;  %3190 = vmatpush.bf16.msrb.mxu0 %v5294_v40 }
  0x46   :  { %v6535_v34 = vld [vmem:[%s9897_s1 + $0xddc] sm:$0xf0]  ;;  %3185 = vmatmul.bf16.vlgmr.msra.gmra.mxu3 %v6898_v6 }
  0x47   :  { %v6061_v37 = vld [vmem:[%s9897_s1 + $0xfc0] sm:$0xf]  ;;  %v5806_v42 = vor.u32 %v6535_v34, %v5805_v33  ;;  %3203 = vmatpush.bf16.msrb.mxu1 %v5550_v41 }
  0x48   :  { %v6599_v38 = vld [vmem:[%s9897_s1 + $0xfdc] sm:$0xf0] }
  0x49   :  { %v5261_v43 = vld [vmem:[%s9897_s1 + $0x980] sm:$0xf]  ;;  %v6062_v46 = vor.u32 %v6599_v38, %v6061_v37  ;;  %3216 = vmatpush.bf16.msrb.mxu2 %v5806_v42 }
  0x4a   :  { %v6399_v44 = vld [vmem:[%s9897_s1 + $0x99c] sm:$0xf0] }
  0x4b   :  { %v5517_v45 = vld [vmem:[%s9897_s1 + $0xb80] sm:$0xf]  ;;  %v5262_v52 = vor.u32 %v6399_v44, %v5261_v43  ;;  %3229 = vmatpush.bf16.msrb.mxu3 %v6062_v46 }
  0x4c   :  { %v6463_v47 = vld [vmem:[%s9897_s1 + $0xb9c] sm:$0xf0] }
  0x4d   :  { %v5773_v48 = vld [vmem:[%s9897_s1 + $0xd80] sm:$0xf]  ;;  %v5518_v54 = vor.u32 %v6463_v47, %v5517_v45  ;;  %3191 = vmatpush.bf16.msrb.mxu0 %v5262_v52 }
  0x4e   :  { %v6527_v49 = vld [vmem:[%s9897_s1 + $0xd9c] sm:$0xf0] }
  0x4f   :  { %v6029_v50 = vld [vmem:[%s9897_s1 + $0xf80] sm:$0xf]  ;;  %v5774_v55 = vor.u32 %v6527_v49, %v5773_v48  ;;  %3204 = vmatpush.bf16.msrb.mxu1 %v5518_v54 }
  0x50   :  { %v6591_v51 = vld [vmem:[%s9897_s1 + $0xf9c] sm:$0xf0] }
  0x51   :  { %v5229_v53 = vld [vmem:[%s9897_s1 + $0x940] sm:$0xf]  ;;  %v6030_v59 = vor.u32 %v6591_v51, %v6029_v50  ;;  %3217 = vmatpush.bf16.msrb.mxu2 %v5774_v55 }
  0x52   :  { %v6391_v56 = vld [vmem:[%s9897_s1 + $0x95c] sm:$0xf0] }
  0x53   :  { %v5485_v57 = vld [vmem:[%s9897_s1 + $0xb40] sm:$0xf]  ;;  %v5230_v3 = vor.u32 %v6391_v56, %v5229_v53  ;;  %3230 = vmatpush.bf16.msrb.mxu3 %v6030_v59 }
  0x54   :  { %v6455_v60 = vld [vmem:[%s9897_s1 + $0xb5c] sm:$0xf0] }
  0x55   :  { %v5741_v61 = vld [vmem:[%s9897_s1 + $0xd40] sm:$0xf]  ;;  %v5486_v7 = vor.u32 %v6455_v60, %v5485_v57  ;;  %3192 = vmatpush.bf16.msrb.mxu0 %v5230_v3  ;;  %v37_v3 = vld [vmem:[%s9898_s0 + $0x18] sm:$0xff] }
  0x56   :  { %v6519_v62 = vld [vmem:[%s9897_s1 + $0xd5c] sm:$0xf0] }
  0x57   :  { %v5997_v1 = vld [vmem:[%s9897_s1 + $0xf40] sm:$0xf]  ;;  %v5742_v8 = vor.u32 %v6519_v62, %v5741_v61  ;;  %3205 = vmatpush.bf16.msrb.mxu1 %v5486_v7 }
  0x58   :  { %v6583_v2 = vld [vmem:[%s9897_s1 + $0xf5c] sm:$0xf0] }
  0x59   :  { %v34_v5 = vld [vmem:[%s9898_s0] sm:$0xff]  ;;  %v5998_v14 = vor.u32 %v6583_v2, %v5997_v1  ;;  %3218 = vmatpush.bf16.msrb.mxu2 %v5742_v8 }
  0x5a   :  { %v5197_v9 = vld [vmem:[%s9897_s1 + $0x900] sm:$0xf]  ;;  %v554_v12 = vunpack.c.l.b16 %v34_v5  ;;  %v555_v13 = vunpack.c.h.b16 %v34_v5 }
  0x5b   :  { %v6383_v10 = vld [vmem:[%s9897_s1 + $0x91c] sm:$0xf0]  ;;  %3231 = vmatpush.bf16.msrb.mxu3 %v5998_v14  ;;  %v4527_v14 = vld [vmem:[%s9897_s1 + $0x3e0] sm:$0xf0] }
  0x5c   :  { %v5453_v11 = vld [vmem:[%s9897_s1 + $0xb00] sm:$0xf]  ;;  %v6925_v20 = vpack.c.b16 %v554_v12, %v554_v12  ;;  %v6928_v21 = vpack.c.b16 %v555_v13, %v555_v13  ;;  %v5198_v22 = vor.u32 %v6383_v10, %v5197_v9  ;;  %v36_v9 = vld [vmem:[%s9898_s0 + $0x10] sm:$0xff]  ;;  %v6147_v10 = vld [vmem:[%s9897_s1 + $0x1c4] sm:$0xf] }
  0x5d   :  { %v6447_v15 = vld [vmem:[%s9897_s1 + $0xb1c] sm:$0xf0]  ;;  %v6211_v12 = vld [vmem:[%s9897_s1 + $0x3c4] sm:$0xf] }
  0x5e   :  { %v5709_v16 = vld [vmem:[%s9897_s1 + $0xd00] sm:$0xf]  ;;  %v5454_v23 = vor.u32 %v6447_v15, %v5453_v11  ;;  %3146 = vmatmul.bf16.vlgmr.msra.gmra.mxu0 %v6925_v20  ;;  %3159 = vmatmul.bf16.vlgmr.msra.gmra.mxu1 %v6928_v21  ;;  %v4271_v11 = vld [vmem:[%s9897_s1 + $0x1e0] sm:$0xf0] }
  0x5f   :  { %v6511_v17 = vld [vmem:[%s9897_s1 + $0xd1c] sm:$0xf0]  ;;  %3193 = vmatpush.bf16.msrb.mxu0 %v5198_v22  ;;  %v6275_v15 = vld [vmem:[%s9897_s1 + $0x5c4] sm:$0xf] }
  0x60   :  { %v5965_v18 = vld [vmem:[%s9897_s1 + $0xf00] sm:$0xf]  ;;  %v5710_v24 = vor.u32 %v6511_v17, %v5709_v16  ;;  %3206 = vmatpush.bf16.msrb.mxu1 %v5454_v23  ;;  %v4783_v16 = vld [vmem:[%s9897_s1 + $0x5e0] sm:$0xf0]  ;;  %v560_v17 = vunpack.c.l.b16 %v37_v3 }
  0x61   :  { %v6575_v19 = vld [vmem:[%s9897_s1 + $0xf1c] sm:$0xf0]  ;;  %v6339_v22 = vld [vmem:[%s9897_s1 + $0x7c4] sm:$0xf] }
  0x62   :  { %v5165_v25 = vld [vmem:[%s9897_s1 + $0x8c0] sm:$0xf]  ;;  %v5966_v28 = vor.u32 %v6575_v19, %v5965_v18  ;;  %3219 = vmatpush.bf16.msrb.mxu2 %v5710_v24  ;;  %v5039_v23 = vld [vmem:[%s9897_s1 + $0x7e0] sm:$0xf0]  ;;  %v558_v24 = vunpack.c.l.b16 %v36_v9 }
  0x63   :  { %v6375_v26 = vld [vmem:[%s9897_s1 + $0x8dc] sm:$0xf0] }
  0x64   :  { %v5421_v27 = vld [vmem:[%s9897_s1 + $0xac0] sm:$0xf]  ;;  %v5166_v34 = vor.u32 %v6375_v26, %v5165_v25  ;;  %3232 = vmatpush.bf16.msrb.mxu3 %v5966_v28  ;;  %v561_v25 = vunpack.c.h.b16 %v37_v3  ;;  %v559_v28 = vunpack.c.h.b16 %v36_v9  ;;  %v4943_v3 = vld [vmem:[%s9897_s1 + $0x720] sm:$0xf0] }
  0x65   :  { %v6439_v29 = vld [vmem:[%s9897_s1 + $0xadc] sm:$0xf0]  ;;  %v6115_v9 = vld [vmem:[%s9897_s1 + $0xc4] sm:$0xf] }
  0x66   :  { %v5677_v30 = vld [vmem:[%s9897_s1 + $0xcc0] sm:$0xf]  ;;  %v5422_v35 = vor.u32 %v6439_v29, %v5421_v27  ;;  %3194 = vmatpush.bf16.msrb.mxu0 %v5166_v34  ;;  %v4274_v27 = vor.u32 %v6147_v10, %v4271_v11  ;;  %v4530_v29 = vor.u32 %v6211_v12, %v4527_v14  ;;  %v5042_v34 = vor.u32 %v6339_v22, %v5039_v23  ;;  %v4143_v10 = vld [vmem:[%s9897_s1 + $0xe0] sm:$0xf0] }
  0x67   :  { %v6503_v31 = vld [vmem:[%s9897_s1 + $0xcdc] sm:$0xf0]  ;;  %v6179_v11 = vld [vmem:[%s9897_s1 + $0x2c4] sm:$0xf] }
  0x68   :  { %v5933_v32 = vld [vmem:[%s9897_s1 + $0xec0] sm:$0xf]  ;;  %v5678_v36 = vor.u32 %v6503_v31, %v5677_v30  ;;  %3207 = vmatpush.bf16.msrb.mxu1 %v5422_v35  ;;  %v4786_v30 = vor.u32 %v6275_v15, %v4783_v16  ;;  %v6139_v31 = vld [vmem:[%s9897_s1 + $0x184] sm:$0xf] }
  0x69   :  { %v6567_v33 = vld [vmem:[%s9897_s1 + $0xedc] sm:$0xf0]  ;;  %v4495_v35 = vld [vmem:[%s9897_s1 + $0x3a0] sm:$0xf0] }
  0x6a   :  { %v5133_v37 = vld [vmem:[%s9897_s1 + $0x880] sm:$0xf]  ;;  %v5934_v40 = vor.u32 %v6567_v33, %v5933_v32  ;;  %3220 = vmatpush.bf16.msrb.mxu2 %v5678_v36  ;;  %v4239_v32 = vld [vmem:[%s9897_s1 + $0x1a0] sm:$0xf0] }
  0x6b   :  { %v6367_v38 = vld [vmem:[%s9897_s1 + $0x89c] sm:$0xf0]  ;;  %v6203_v33 = vld [vmem:[%s9897_s1 + $0x384] sm:$0xf] }
  0x6c   :  { %v5389_v39 = vld [vmem:[%s9897_s1 + $0xa80] sm:$0xf]  ;;  %v5134_v46 = vor.u32 %v6367_v38, %v5133_v37  ;;  %3233 = vmatpush.bf16.msrb.mxu3 %v5934_v40  ;;  %v6267_v36 = vld [vmem:[%s9897_s1 + $0x584] sm:$0xf]  ;;  %v7076_v38 = vpack.c.b16 %v560_v17, %v560_v17 }
  0x6d   :  { %v6431_v41 = vld [vmem:[%s9897_s1 + $0xa9c] sm:$0xf0]  ;;  %v4751_v37 = vld [vmem:[%s9897_s1 + $0x5a0] sm:$0xf0] }
  0x6e   :  { %v5645_v42 = vld [vmem:[%s9897_s1 + $0xc80] sm:$0xf]  ;;  %v5390_v47 = vor.u32 %v6431_v41, %v5389_v39  ;;  %3195 = vmatpush.bf16.msrb.mxu0 %v5134_v46  ;;  %v6331_v39 = vld [vmem:[%s9897_s1 + $0x784] sm:$0xf]  ;;  %v7084_v41 = vpack.c.b16 %v558_v24, %v558_v24  ;;  %v4754_v46 = vor.u32 %v6267_v36, %v4751_v37 }
  0x6f   :  { %v6495_v43 = vld [vmem:[%s9897_s1 + $0xc9c] sm:$0xf0]  ;;  %v5007_v40 = vld [vmem:[%s9897_s1 + $0x7a0] sm:$0xf0] }
  0x70   :  { %v5901_v44 = vld [vmem:[%s9897_s1 + $0xe80] sm:$0xf]  ;;  %v5646_v48 = vor.u32 %v6495_v43, %v5645_v42  ;;  %3208 = vmatpush.bf16.msrb.mxu1 %v5390_v47  ;;  %v7086_v42 = vpack.c.b16 %v561_v25, %v561_v25  ;;  %v4242_v43 = vor.u32 %v6139_v31, %v4239_v32  ;;  %v6131_v47 = vld [vmem:[%s9897_s1 + $0x144] sm:$0xf] }
  0x71   :  { %v6559_v45 = vld [vmem:[%s9897_s1 + $0xe9c] sm:$0xf0]  ;;  %v6243_v14 = vld [vmem:[%s9897_s1 + $0x4c4] sm:$0xf] }
  0x72   :  { %v5101_v49 = vld [vmem:[%s9897_s1 + $0x840] sm:$0xf]  ;;  %v5902_v52 = vor.u32 %v6559_v45, %v5901_v44  ;;  %3221 = vmatpush.bf16.msrb.mxu2 %v5646_v48  ;;  %v7088_v44 = vpack.c.b16 %v559_v28, %v559_v28  ;;  %v4498_v45 = vor.u32 %v6203_v33, %v4495_v35  ;;  %v4207_v48 = vld [vmem:[%s9897_s1 + $0x160] sm:$0xf0] }
  0x73   :  { %v6359_v50 = vld [vmem:[%s9897_s1 + $0x85c] sm:$0xf0]  ;;  %v4655_v15 = vld [vmem:[%s9897_s1 + $0x4e0] sm:$0xf0] }
  0x74   :  { %v5357_v51 = vld [vmem:[%s9897_s1 + $0xa40] sm:$0xf]  ;;  %v5102_v59 = vor.u32 %v6359_v50, %v5101_v49  ;;  %3234 = vmatpush.bf16.msrb.mxu3 %v5902_v52  ;;  %v6195_v49 = vld [vmem:[%s9897_s1 + $0x344] sm:$0xf]  ;;  %v5010_v50 = vor.u32 %v6331_v39, %v5007_v40  ;;  %v4658_v22 = vor.u32 %v6243_v14, %v4655_v15 }
  0x75   :  { %v6423_v53 = vld [vmem:[%s9897_s1 + $0xa5c] sm:$0xf0]  ;;  %v6259_v52 = vld [vmem:[%s9897_s1 + $0x544] sm:$0xf] }
  0x76   :  { %v5613_v54 = vld [vmem:[%s9897_s1 + $0xc40] sm:$0xf]  ;;  %v5358_v63 = vor.u32 %v6423_v53, %v5357_v51  ;;  %3196 = vmatpush.bf16.msrb.mxu0 %v5102_v59  ;;  %v4463_v51 = vld [vmem:[%s9897_s1 + $0x360] sm:$0xf0] }
  0x77   :  { %v6487_v55 = vld [vmem:[%s9897_s1 + $0xc5c] sm:$0xf0]  ;;  %v4719_v53 = vld [vmem:[%s9897_s1 + $0x560] sm:$0xf0] }
  0x78   :  { %v5869_v56 = vld [vmem:[%s9897_s1 + $0xe40] sm:$0xf]  ;;  %v5614_v0 = vor.u32 %v6487_v55, %v5613_v54  ;;  %3209 = vmatpush.bf16.msrb.mxu1 %v5358_v63  ;;  %v6323_v54 = vld [vmem:[%s9897_s1 + $0x744] sm:$0xf] }
  0x79   :  { %v6551_v57 = vld [vmem:[%s9897_s1 + $0xe5c] sm:$0xf0]  ;;  %v4975_v55 = vld [vmem:[%s9897_s1 + $0x760] sm:$0xf0] }
  0x7a   :  { %v5069_v58 = vld [vmem:[%s9897_s1 + $0x800] sm:$0xf]  ;;  %v5870_v5 = vor.u32 %v6551_v57, %v5869_v56  ;;  %3222 = vmatpush.bf16.msrb.mxu2 %v5614_v0  ;;  %v4210_v56 = vor.u32 %v6131_v47, %v4207_v48  ;;  %v4466_v57 = vor.u32 %v6195_v49, %v4463_v51  ;;  %v6123_v59 = vld [vmem:[%s9897_s1 + $0x104] sm:$0xf] }
  0x7b   :  { %v6351_v60 = vld [vmem:[%s9897_s1 + $0x81c] sm:$0xf0]  ;;  %v4431_v63 = vld [vmem:[%s9897_s1 + $0x320] sm:$0xf0] }
  0x7c   :  { %v5325_v61 = vld [vmem:[%s9897_s1 + $0xa00] sm:$0xf]  ;;  %v5070_v13 = vor.u32 %v6351_v60, %v5069_v58  ;;  %3235 = vmatpush.bf16.msrb.mxu3 %v5870_v5  ;;  %v4722_v58 = vor.u32 %v6259_v52, %v4719_v53  ;;  %v4175_v60 = vld [vmem:[%s9897_s1 + $0x120] sm:$0xf0] }
  0x7d   :  { %v6415_v62 = vld [vmem:[%s9897_s1 + $0xa1c] sm:$0xf0]  ;;  %v6251_v0 = vld [vmem:[%s9897_s1 + $0x504] sm:$0xf]  ;;  %v4178_v5 = vor.u32 %v6123_v59, %v4175_v60 }
  0x7e   :  { %v5581_v1 = vld [vmem:[%s9897_s1 + $0xc00] sm:$0xf]  ;;  %v5326_v18 = vor.u32 %v6415_v62, %v5325_v61  ;;  %3197 = vmatpush.bf16.msrb.mxu0 %v5070_v13  ;;  %v6187_v61 = vld [vmem:[%s9897_s1 + $0x304] sm:$0xf]  ;;  %v4978_v62 = vor.u32 %v6323_v54, %v4975_v55 }
  0x7f   :  { %v6479_v2 = vld [vmem:[%s9897_s1 + $0xc1c] sm:$0xf0]  ;;  %v4399_v13 = vld [vmem:[%s9897_s1 + $0x2e0] sm:$0xf0] }
  0x80   :  { %v5837_v7 = vld [vmem:[%s9897_s1 + $0xe00] sm:$0xf]  ;;  %v5582_v19 = vor.u32 %v6479_v2, %v5581_v1  ;;  %3210 = vmatpush.bf16.msrb.mxu1 %v5326_v18  ;;  %v4687_v1 = vld [vmem:[%s9897_s1 + $0x520] sm:$0xf0]  ;;  %v4146_v18 = vor.u32 %v6115_v9, %v4143_v10 }
  0x81   :  { %v6543_v8 = vld [vmem:[%s9897_s1 + $0xe1c] sm:$0xf0]  ;;  %3198 = vmatmul.bf16.vlgmr.msrb.gmra.mxu0 %v7084_v41  ;;  %v6315_v2 = vld [vmem:[%s9897_s1 + $0x704] sm:$0xf] }
  0x82   :  { %v5838_v26 = vor.u32 %v6543_v8, %v5837_v7  ;;  %3223 = vmatpush.bf16.msrb.mxu2 %v5582_v19  ;;  %3242 = vmatpush.bf16.msra.mxu0 %v4274_v27  ;;  %v4434_v7 = vor.u32 %v6187_v61, %v4431_v63  ;;  %v4690_v8 = vor.u32 %v6251_v0, %v4687_v1  ;;  %v6307_v16 = vld [vmem:[%s9897_s1 + $0x6c4] sm:$0xf] }
  0x83   :  { %3211 = vmatmul.bf16.vlgmr.msrb.gmra.mxu1 %v7088_v44  ;;  %v4946_v12 = vor.u32 %v6315_v2, %v4943_v3  ;;  %v4911_v17 = vld [vmem:[%s9897_s1 + $0x6e0] sm:$0xf0]  ;;  %v4402_v19 = vor.u32 %v6179_v11, %v4399_v13 }
  0x84   :  { %3236 = vmatpush.bf16.msrb.mxu3 %v5838_v26  ;;  %3255 = vmatpush.bf16.msra.mxu1 %v4530_v29  ;;  %v6107_v23 = vld [vmem:[%s9897_s1 + $0x84] sm:$0xf]  ;;  %v4914_v26 = vor.u32 %v6307_v16, %v4911_v17 }
  0x85   :  { %3224 = vmatmul.bf16.vlgmr.msrb.gmra.mxu2 %v7076_v38  ;;  %v4111_v24 = vld [vmem:[%s9897_s1 + $0xa0] sm:$0xf0] }
  0x86   :  { %3268 = vmatpush.bf16.msra.mxu2 %v4786_v30  ;;  %3243 = vmatpush.bf16.msra.mxu0 %v4242_v43  ;;  %v6171_v25 = vld [vmem:[%s9897_s1 + $0x284] sm:$0xf]  ;;  %v4114_v32 = vor.u32 %v6107_v23, %v4111_v24 }
  0x87   :  { %3237 = vmatmul.bf16.vlgmr.msrb.gmra.mxu3 %v7086_v42  ;;  %v4367_v27 = vld [vmem:[%s9897_s1 + $0x2a0] sm:$0xf0] }
  0x88   :  { %3281 = vmatpush.bf16.msra.mxu3 %v5042_v34  ;;  %3256 = vmatpush.bf16.msra.mxu1 %v4498_v45  ;;  %v6235_v28 = vld [vmem:[%s9897_s1 + $0x484] sm:$0xf]  ;;  %v4370_v33 = vor.u32 %v6171_v25, %v4367_v27 }
  0x89   :  { %v4623_v29 = vld [vmem:[%s9897_s1 + $0x4a0] sm:$0xf0] }
  0x8a   :  { %3269 = vmatpush.bf16.msra.mxu2 %v4754_v46  ;;  %3244 = vmatpush.bf16.msra.mxu0 %v4210_v56  ;;  %v6299_v30 = vld [vmem:[%s9897_s1 + $0x684] sm:$0xf]  ;;  %v4626_v34 = vor.u32 %v6235_v28, %v4623_v29 }
  0x8b   :  { %v4879_v31 = vld [vmem:[%s9897_s1 + $0x6a0] sm:$0xf0] }
  0x8c   :  { %3282 = vmatpush.bf16.msra.mxu3 %v5010_v50  ;;  %3257 = vmatpush.bf16.msra.mxu1 %v4466_v57  ;;  %v6099_v35 = vld [vmem:[%s9897_s1 + $0x44] sm:$0xf]  ;;  %v4882_v39 = vor.u32 %v6299_v30, %v4879_v31 }
  0x8d   :  { %v4079_v36 = vld [vmem:[%s9897_s1 + $0x60] sm:$0xf0] }
  0x8e   :  { %3270 = vmatpush.bf16.msra.mxu2 %v4722_v58  ;;  %3245 = vmatpush.bf16.msra.mxu0 %v4178_v5  ;;  %v6163_v37 = vld [vmem:[%s9897_s1 + $0x244] sm:$0xf]  ;;  %v4082_v48 = vor.u32 %v6099_v35, %v4079_v36 }
  0x8f   :  { %v4335_v40 = vld [vmem:[%s9897_s1 + $0x260] sm:$0xf0] }
  0x90   :  { %3283 = vmatpush.bf16.msra.mxu3 %v4978_v62  ;;  %3258 = vmatpush.bf16.msra.mxu1 %v4434_v7  ;;  %v6227_v43 = vld [vmem:[%s9897_s1 + $0x444] sm:$0xf]  ;;  %v4338_v51 = vor.u32 %v6163_v37, %v4335_v40 }
  0x91   :  { %v4591_v45 = vld [vmem:[%s9897_s1 + $0x460] sm:$0xf0] }
  0x92   :  { %3271 = vmatpush.bf16.msra.mxu2 %v4690_v8  ;;  %3246 = vmatpush.bf16.msra.mxu0 %v4146_v18  ;;  %v6291_v46 = vld [vmem:[%s9897_s1 + $0x644] sm:$0xf]  ;;  %v4594_v52 = vor.u32 %v6227_v43, %v4591_v45 }
  0x93   :  { %v4847_v47 = vld [vmem:[%s9897_s1 + $0x660] sm:$0xf0] }
  0x94   :  { %3284 = vmatpush.bf16.msra.mxu3 %v4946_v12  ;;  %3259 = vmatpush.bf16.msra.mxu1 %v4402_v19  ;;  %v6091_v49 = vld [vmem:[%s9897_s1 + $0x4] sm:$0xf]  ;;  %v4850_v56 = vor.u32 %v6291_v46, %v4847_v47 }
  0x95   :  { %v4047_v50 = vld [vmem:[%s9897_s1 + $0x20] sm:$0xf0] }
  0x96   :  { %3272 = vmatpush.bf16.msra.mxu2 %v4658_v22  ;;  %3247 = vmatpush.bf16.msra.mxu0 %v4114_v32  ;;  %v6155_v53 = vld [vmem:[%s9897_s1 + $0x204] sm:$0xf]  ;;  %v4050_v63 = vor.u32 %v6091_v49, %v4047_v50 }
  0x97   :  { %v4303_v54 = vld [vmem:[%s9897_s1 + $0x220] sm:$0xf0] }
  0x98   :  { %3285 = vmatpush.bf16.msra.mxu3 %v4914_v26  ;;  %3260 = vmatpush.bf16.msra.mxu1 %v4370_v33  ;;  %v6219_v55 = vld [vmem:[%s9897_s1 + $0x404] sm:$0xf]  ;;  %v4306_v3 = vor.u32 %v6155_v53, %v4303_v54 }
  0x99   :  { %v4559_v57 = vld [vmem:[%s9897_s1 + $0x420] sm:$0xf0] }
  0x9a   :  { %3273 = vmatpush.bf16.msra.mxu2 %v4626_v34  ;;  %v6283_v58 = vld [vmem:[%s9897_s1 + $0x604] sm:$0xf]  ;;  %3248 = vmatpush.bf16.msra.mxu0 %v4082_v48  ;;  %v4562_v5 = vor.u32 %v6219_v55, %v4559_v57 }
  0x9b   :  { %v4815_v59 = vld [vmem:[%s9897_s1 + $0x620] sm:$0xf0] }
  0x9c   :  { %3286 = vmatpush.bf16.msra.mxu3 %v4882_v39  ;;  %v6403_v60 = vld [vmem:[%s9897_s1 + $0x9c4] sm:$0xf]  ;;  %3261 = vmatpush.bf16.msra.mxu1 %v4338_v51  ;;  %v4818_v9 = vor.u32 %v6283_v58, %v4815_v59 }
  0x9d   :  { %v5295_v61 = vld [vmem:[%s9897_s1 + $0x9e0] sm:$0xf0] }
  0x9e   :  { %v6467_v62 = vld [vmem:[%s9897_s1 + $0xbc4] sm:$0xf]  ;;  %3274 = vmatpush.bf16.msra.mxu2 %v4594_v52  ;;  %v5298_v10 = vor.u32 %v6403_v60, %v5295_v61  ;;  %3249 = vmatpush.bf16.msra.mxu0 %v4050_v63 }
  0x9f   :  { %v5551_v0 = vld [vmem:[%s9897_s1 + $0xbe0] sm:$0xf0] }
  0xa0   :  { %v6531_v1 = vld [vmem:[%s9897_s1 + $0xdc4] sm:$0xf]  ;;  %3287 = vmatpush.bf16.msra.mxu3 %v4850_v56  ;;  %v5554_v11 = vor.u32 %v6467_v62, %v5551_v0  ;;  %3262 = vmatpush.bf16.msra.mxu1 %v4306_v3 }
  0xa1   :  { %v5807_v2 = vld [vmem:[%s9897_s1 + $0xde0] sm:$0xf0]  ;;  %3250 = vmatmul.bf16.vlgmr.msra.gmra.mxu0 %v6925_v20 }
  0xa2   :  { %v6595_v7 = vld [vmem:[%s9897_s1 + $0xfc4] sm:$0xf]  ;;  %v5810_v12 = vor.u32 %v6531_v1, %v5807_v2  ;;  %3275 = vmatpush.bf16.msra.mxu2 %v4562_v5  ;;  %3294 = vmatpush.bf16.msrb.mxu0 %v5298_v10 }
  0xa3   :  { %v6063_v8 = vld [vmem:[%s9897_s1 + $0xfe0] sm:$0xf0]  ;;  %3263 = vmatmul.bf16.vlgmr.msra.gmra.mxu1 %v6928_v21 }
  0xa4   :  { %v6395_v13 = vld [vmem:[%s9897_s1 + $0x984] sm:$0xf]  ;;  %v6066_v16 = vor.u32 %v6595_v7, %v6063_v8  ;;  %3288 = vmatpush.bf16.msra.mxu3 %v4818_v9  ;;  %3307 = vmatpush.bf16.msrb.mxu1 %v5554_v11 }
  0xa5   :  { %v5263_v14 = vld [vmem:[%s9897_s1 + $0x9a0] sm:$0xf0]  ;;  %3276 = vmatmul.bf16.vlgmr.msra.gmra.mxu2 %v6893_v4 }
  0xa6   :  { %v6459_v15 = vld [vmem:[%s9897_s1 + $0xb84] sm:$0xf]  ;;  %v5266_v24 = vor.u32 %v6395_v13, %v5263_v14  ;;  %3320 = vmatpush.bf16.msrb.mxu2 %v5810_v12 }
  0xa7   :  { %v5519_v17 = vld [vmem:[%s9897_s1 + $0xba0] sm:$0xf0]  ;;  %3289 = vmatmul.bf16.vlgmr.msra.gmra.mxu3 %v6898_v6 }
  0xa8   :  { %v6523_v18 = vld [vmem:[%s9897_s1 + $0xd84] sm:$0xf]  ;;  %v5522_v25 = vor.u32 %v6459_v15, %v5519_v17  ;;  %3333 = vmatpush.bf16.msrb.mxu3 %v6066_v16  ;;  %3295 = vmatpush.bf16.msrb.mxu0 %v5266_v24 }
  0xa9   :  { %v5775_v19 = vld [vmem:[%s9897_s1 + $0xda0] sm:$0xf0] }
  0xaa   :  { %v6587_v22 = vld [vmem:[%s9897_s1 + $0xf84] sm:$0xf]  ;;  %v5778_v26 = vor.u32 %v6523_v18, %v5775_v19  ;;  %3308 = vmatpush.bf16.msrb.mxu1 %v5522_v25 }
  0xab   :  { %v6031_v23 = vld [vmem:[%s9897_s1 + $0xfa0] sm:$0xf0] }
  0xac   :  { %v6387_v27 = vld [vmem:[%s9897_s1 + $0x944] sm:$0xf]  ;;  %v6034_v30 = vor.u32 %v6587_v22, %v6031_v23  ;;  %3321 = vmatpush.bf16.msrb.mxu2 %v5778_v26 }
  0xad   :  { %v5231_v28 = vld [vmem:[%s9897_s1 + $0x960] sm:$0xf0] }
  0xae   :  { %v6451_v29 = vld [vmem:[%s9897_s1 + $0xb44] sm:$0xf]  ;;  %v5234_v36 = vor.u32 %v6387_v27, %v5231_v28  ;;  %3334 = vmatpush.bf16.msrb.mxu3 %v6034_v30 }
  0xaf   :  { %v5487_v31 = vld [vmem:[%s9897_s1 + $0xb60] sm:$0xf0] }
  0xb0   :  { %v6515_v32 = vld [vmem:[%s9897_s1 + $0xd44] sm:$0xf]  ;;  %v5490_v37 = vor.u32 %v6451_v29, %v5487_v31  ;;  %3296 = vmatpush.bf16.msrb.mxu0 %v5234_v36 }
  0xb1   :  { %v5743_v33 = vld [vmem:[%s9897_s1 + $0xd60] sm:$0xf0] }
  0xb2   :  { %v6579_v34 = vld [vmem:[%s9897_s1 + $0xf44] sm:$0xf]  ;;  %v5746_v39 = vor.u32 %v6515_v32, %v5743_v33  ;;  %3309 = vmatpush.bf16.msrb.mxu1 %v5490_v37 }
  0xb3   :  { %v5999_v35 = vld [vmem:[%s9897_s1 + $0xf60] sm:$0xf0] }
  0xb4   :  { %v6379_v40 = vld [vmem:[%s9897_s1 + $0x904] sm:$0xf]  ;;  %v6002_v46 = vor.u32 %v6579_v34, %v5999_v35  ;;  %3322 = vmatpush.bf16.msrb.mxu2 %v5746_v39 }
  0xb5   :  { %v5199_v43 = vld [vmem:[%s9897_s1 + $0x920] sm:$0xf0] }
  0xb6   :  { %v6443_v45 = vld [vmem:[%s9897_s1 + $0xb04] sm:$0xf]  ;;  %v5202_v52 = vor.u32 %v6379_v40, %v5199_v43  ;;  %3335 = vmatpush.bf16.msrb.mxu3 %v6002_v46  ;;  %v4277_v43 = vld [vmem:[%s9897_s1 + $0x1c8] sm:$0xf] }
  0xb7   :  { %v5455_v47 = vld [vmem:[%s9897_s1 + $0xb20] sm:$0xf0]  ;;  %v4533_v46 = vld [vmem:[%s9897_s1 + $0x3c8] sm:$0xf] }
  0xb8   :  { %v6507_v48 = vld [vmem:[%s9897_s1 + $0xd04] sm:$0xf]  ;;  %v5458_v53 = vor.u32 %v6443_v45, %v5455_v47  ;;  %3297 = vmatpush.bf16.msrb.mxu0 %v5202_v52  ;;  %v6152_v45 = vld [vmem:[%s9897_s1 + $0x1e4] sm:$0xf0] }
  0xb9   :  { %v5711_v49 = vld [vmem:[%s9897_s1 + $0xd20] sm:$0xf0] }
  0xba   :  { %v6571_v50 = vld [vmem:[%s9897_s1 + $0xf04] sm:$0xf]  ;;  %v5714_v54 = vor.u32 %v6507_v48, %v5711_v49  ;;  %3310 = vmatpush.bf16.msrb.mxu1 %v5458_v53  ;;  %v6216_v48 = vld [vmem:[%s9897_s1 + $0x3e4] sm:$0xf0] }
  0xbb   :  { %v5967_v51 = vld [vmem:[%s9897_s1 + $0xf20] sm:$0xf0]  ;;  %v4789_v49 = vld [vmem:[%s9897_s1 + $0x5c8] sm:$0xf] }
  0xbc   :  { %v6371_v55 = vld [vmem:[%s9897_s1 + $0x8c4] sm:$0xf]  ;;  %v5970_v58 = vor.u32 %v6571_v50, %v5967_v51  ;;  %3323 = vmatpush.bf16.msrb.mxu2 %v5714_v54  ;;  %v6280_v50 = vld [vmem:[%s9897_s1 + $0x5e4] sm:$0xf0] }
  0xbd   :  { %v5167_v56 = vld [vmem:[%s9897_s1 + $0x8e0] sm:$0xf0]  ;;  %v5045_v53 = vld [vmem:[%s9897_s1 + $0x7c8] sm:$0xf] }
  0xbe   :  { %v6435_v57 = vld [vmem:[%s9897_s1 + $0xac4] sm:$0xf]  ;;  %v5170_v0 = vor.u32 %v6371_v55, %v5167_v56  ;;  %3336 = vmatpush.bf16.msrb.mxu3 %v5970_v58  ;;  %v6344_v54 = vld [vmem:[%s9897_s1 + $0x7e4] sm:$0xf0]  ;;  %v4278_v56 = vor.u32 %v6152_v45, %v4277_v43  ;;  %v4790_v58 = vor.u32 %v6280_v50, %v4789_v49 }
  0xbf   :  { %v5423_v59 = vld [vmem:[%s9897_s1 + $0xae0] sm:$0xf0]  ;;  %v4661_v43 = vld [vmem:[%s9897_s1 + $0x4c8] sm:$0xf] }
  0xc0   :  { %v6499_v60 = vld [vmem:[%s9897_s1 + $0xcc4] sm:$0xf]  ;;  %v5426_v1 = vor.u32 %v6435_v57, %v5423_v59  ;;  %3298 = vmatpush.bf16.msrb.mxu0 %v5170_v0  ;;  %v4534_v57 = vor.u32 %v6216_v48, %v4533_v46  ;;  %v4245_v59 = vld [vmem:[%s9897_s1 + $0x188] sm:$0xf] }
  0xc1   :  { %v5679_v61 = vld [vmem:[%s9897_s1 + $0xce0] sm:$0xf0]  ;;  %v4757_v0 = vld [vmem:[%s9897_s1 + $0x588] sm:$0xf] }
  0xc2   :  { %v6563_v62 = vld [vmem:[%s9897_s1 + $0xec4] sm:$0xf]  ;;  %v5682_v2 = vor.u32 %v6499_v60, %v5679_v61  ;;  %3311 = vmatpush.bf16.msrb.mxu1 %v5426_v1  ;;  %v6144_v60 = vld [vmem:[%s9897_s1 + $0x1a4] sm:$0xf0] }
  0xc3   :  { %v5935_v63 = vld [vmem:[%s9897_s1 + $0xee0] sm:$0xf0]  ;;  %v4501_v61 = vld [vmem:[%s9897_s1 + $0x388] sm:$0xf] }
  0xc4   :  { %v6363_v3 = vld [vmem:[%s9897_s1 + $0x884] sm:$0xf]  ;;  %v5938_v8 = vor.u32 %v6563_v62, %v5935_v63  ;;  %3324 = vmatpush.bf16.msrb.mxu2 %v5682_v2  ;;  %v5046_v62 = vor.u32 %v6344_v54, %v5045_v53  ;;  %v6208_v63 = vld [vmem:[%s9897_s1 + $0x3a4] sm:$0xf0] }
  0xc5   :  { %v5135_v5 = vld [vmem:[%s9897_s1 + $0x8a0] sm:$0xf0]  ;;  %v6272_v1 = vld [vmem:[%s9897_s1 + $0x5a4] sm:$0xf0] }
  0xc6   :  { %v6427_v7 = vld [vmem:[%s9897_s1 + $0xa84] sm:$0xf]  ;;  %v5138_v14 = vor.u32 %v6363_v3, %v5135_v5  ;;  %3337 = vmatpush.bf16.msrb.mxu3 %v5938_v8  ;;  %v5013_v2 = vld [vmem:[%s9897_s1 + $0x788] sm:$0xf]  ;;  %v4246_v5 = vor.u32 %v6144_v60, %v4245_v59  ;;  %v4758_v8 = vor.u32 %v6272_v1, %v4757_v0 }
  0xc7   :  { %v5391_v9 = vld [vmem:[%s9897_s1 + $0xaa0] sm:$0xf0]  ;;  %v6336_v3 = vld [vmem:[%s9897_s1 + $0x7a4] sm:$0xf0] }
  0xc8   :  { %v6491_v10 = vld [vmem:[%s9897_s1 + $0xc84] sm:$0xf]  ;;  %v5394_v15 = vor.u32 %v6427_v7, %v5391_v9  ;;  %3299 = vmatpush.bf16.msrb.mxu0 %v5138_v14  ;;  %v4502_v7 = vor.u32 %v6208_v63, %v4501_v61  ;;  %v4213_v9 = vld [vmem:[%s9897_s1 + $0x148] sm:$0xf] }
  0xc9   :  { %v5647_v11 = vld [vmem:[%s9897_s1 + $0xca0] sm:$0xf0]  ;;  %v4725_v14 = vld [vmem:[%s9897_s1 + $0x548] sm:$0xf] }
  0xca   :  { %v6555_v12 = vld [vmem:[%s9897_s1 + $0xe84] sm:$0xf]  ;;  %v5650_v16 = vor.u32 %v6491_v10, %v5647_v11  ;;  %3312 = vmatpush.bf16.msrb.mxu1 %v5394_v15  ;;  %v6136_v10 = vld [vmem:[%s9897_s1 + $0x164] sm:$0xf0] }
  0xcb   :  { %v5903_v13 = vld [vmem:[%s9897_s1 + $0xea0] sm:$0xf0]  ;;  %v4469_v11 = vld [vmem:[%s9897_s1 + $0x348] sm:$0xf] }
  0xcc   :  { %v6355_v17 = vld [vmem:[%s9897_s1 + $0x844] sm:$0xf]  ;;  %v5906_v22 = vor.u32 %v6555_v12, %v5903_v13  ;;  %3325 = vmatpush.bf16.msrb.mxu2 %v5650_v16  ;;  %v5014_v12 = vor.u32 %v6336_v3, %v5013_v2  ;;  %v6200_v13 = vld [vmem:[%s9897_s1 + $0x364] sm:$0xf0] }
  0xcd   :  { %v5103_v18 = vld [vmem:[%s9897_s1 + $0x860] sm:$0xf0]  ;;  %v6264_v15 = vld [vmem:[%s9897_s1 + $0x564] sm:$0xf0] }
  0xce   :  { %v6419_v19 = vld [vmem:[%s9897_s1 + $0xa44] sm:$0xf]  ;;  %v5106_v28 = vor.u32 %v6355_v17, %v5103_v18  ;;  %3338 = vmatpush.bf16.msrb.mxu3 %v5906_v22  ;;  %v4981_v16 = vld [vmem:[%s9897_s1 + $0x748] sm:$0xf]  ;;  %v4214_v18 = vor.u32 %v6136_v10, %v4213_v9  ;;  %v4726_v22 = vor.u32 %v6264_v15, %v4725_v14 }
  0xcf   :  { %v5359_v23 = vld [vmem:[%s9897_s1 + $0xa60] sm:$0xf0]  ;;  %v6328_v17 = vld [vmem:[%s9897_s1 + $0x764] sm:$0xf0] }
  0xd0   :  { %v6483_v24 = vld [vmem:[%s9897_s1 + $0xc44] sm:$0xf]  ;;  %v5362_v31 = vor.u32 %v6419_v19, %v5359_v23  ;;  %3300 = vmatpush.bf16.msrb.mxu0 %v5106_v28  ;;  %v4470_v19 = vor.u32 %v6200_v13, %v4469_v11  ;;  %v4181_v23 = vld [vmem:[%s9897_s1 + $0x108] sm:$0xf] }
  0xd1   :  { %v5615_v25 = vld [vmem:[%s9897_s1 + $0xc60] sm:$0xf0]  ;;  %v4693_v28 = vld [vmem:[%s9897_s1 + $0x508] sm:$0xf] }
  0xd2   :  { %v6547_v26 = vld [vmem:[%s9897_s1 + $0xe44] sm:$0xf]  ;;  %v5618_v32 = vor.u32 %v6483_v24, %v5615_v25  ;;  %3313 = vmatpush.bf16.msrb.mxu1 %v5362_v31  ;;  %v6128_v24 = vld [vmem:[%s9897_s1 + $0x124] sm:$0xf0] }
  0xd3   :  { %v5871_v27 = vld [vmem:[%s9897_s1 + $0xe60] sm:$0xf0]  ;;  %v4437_v25 = vld [vmem:[%s9897_s1 + $0x308] sm:$0xf] }
  0xd4   :  { %v6347_v29 = vld [vmem:[%s9897_s1 + $0x804] sm:$0xf]  ;;  %v5874_v36 = vor.u32 %v6547_v26, %v5871_v27  ;;  %3326 = vmatpush.bf16.msrb.mxu2 %v5618_v32  ;;  %v4982_v26 = vor.u32 %v6328_v17, %v4981_v16  ;;  %v6192_v27 = vld [vmem:[%s9897_s1 + $0x324] sm:$0xf0]  ;;  %v4182_v32 = vor.u32 %v6128_v24, %v4181_v23 }
  0xd5   :  { %v5071_v30 = vld [vmem:[%s9897_s1 + $0x820] sm:$0xf0]  ;;  %v6320_v31 = vld [vmem:[%s9897_s1 + $0x724] sm:$0xf0] }
  0xd6   :  { %v6411_v33 = vld [vmem:[%s9897_s1 + $0xa04] sm:$0xf]  ;;  %v5074_v47 = vor.u32 %v6347_v29, %v5071_v30  ;;  %3339 = vmatpush.bf16.msrb.mxu3 %v5874_v36  ;;  %v6256_v29 = vld [vmem:[%s9897_s1 + $0x524] sm:$0xf0] }
  0xd7   :  { %v5327_v34 = vld [vmem:[%s9897_s1 + $0xa20] sm:$0xf0]  ;;  %v4949_v30 = vld [vmem:[%s9897_s1 + $0x708] sm:$0xf] }
  0xd8   :  { %v6475_v35 = vld [vmem:[%s9897_s1 + $0xc04] sm:$0xf]  ;;  %v5330_v51 = vor.u32 %v6411_v33, %v5327_v34  ;;  %3301 = vmatpush.bf16.msrb.mxu0 %v5074_v47  ;;  %v4438_v33 = vor.u32 %v6192_v27, %v4437_v25  ;;  %v4694_v34 = vor.u32 %v6256_v29, %v4693_v28  ;;  %v6120_v36 = vld [vmem:[%s9897_s1 + $0xe4] sm:$0xf0] }
  0xd9   :  { %v5583_v37 = vld [vmem:[%s9897_s1 + $0xc20] sm:$0xf0]  ;;  %v6248_v45 = vld [vmem:[%s9897_s1 + $0x4e4] sm:$0xf0] }
  0xda   :  { %v6539_v39 = vld [vmem:[%s9897_s1 + $0xe04] sm:$0xf]  ;;  %v5586_v52 = vor.u32 %v6475_v35, %v5583_v37  ;;  %3314 = vmatpush.bf16.msrb.mxu1 %v5330_v51  ;;  %v4149_v35 = vld [vmem:[%s9897_s1 + $0xc8] sm:$0xf]  ;;  %v4662_v50 = vor.u32 %v6248_v45, %v4661_v43 }
  0xdb   :  { %v5839_v40 = vld [vmem:[%s9897_s1 + $0xe20] sm:$0xf0]  ;;  %3302 = vmatmul.bf16.vlgmr.msrb.gmra.mxu0 %v7084_v41  ;;  %v4405_v37 = vld [vmem:[%s9897_s1 + $0x2c8] sm:$0xf]  ;;  %v4150_v48 = vor.u32 %v6120_v36, %v4149_v35 }
  0xdc   :  { %v5842_v55 = vor.u32 %v6539_v39, %v5839_v40  ;;  %3327 = vmatpush.bf16.msrb.mxu2 %v5586_v52  ;;  %3346 = vmatpush.bf16.msra.mxu0 %v4278_v56  ;;  %v4950_v39 = vor.u32 %v6320_v31, %v4949_v30  ;;  %v6184_v40 = vld [vmem:[%s9897_s1 + $0x2e4] sm:$0xf0] }
  0xdd   :  { %3315 = vmatmul.bf16.vlgmr.msrb.gmra.mxu1 %v7088_v44  ;;  %v4917_v46 = vld [vmem:[%s9897_s1 + $0x6c8] sm:$0xf]  ;;  %v4406_v49 = vor.u32 %v6184_v40, %v4405_v37 }
  0xde   :  { %3340 = vmatpush.bf16.msrb.mxu3 %v5842_v55  ;;  %3359 = vmatpush.bf16.msra.mxu1 %v4534_v57  ;;  %v6312_v47 = vld [vmem:[%s9897_s1 + $0x6e4] sm:$0xf0] }
  0xdf   :  { %3328 = vmatmul.bf16.vlgmr.msrb.gmra.mxu2 %v7076_v38  ;;  %v4117_v51 = vld [vmem:[%s9897_s1 + $0x88] sm:$0xf]  ;;  %v4918_v54 = vor.u32 %v6312_v47, %v4917_v46 }
  0xe0   :  { %3372 = vmatpush.bf16.msra.mxu2 %v4790_v58  ;;  %3347 = vmatpush.bf16.msra.mxu0 %v4246_v5  ;;  %v6112_v52 = vld [vmem:[%s9897_s1 + $0xa4] sm:$0xf0] }
  0xe1   :  { %3341 = vmatmul.bf16.vlgmr.msrb.gmra.mxu3 %v7086_v42  ;;  %v4373_v53 = vld [vmem:[%s9897_s1 + $0x288] sm:$0xf]  ;;  %v4118_v60 = vor.u32 %v6112_v52, %v4117_v51 }
  0xe2   :  { %3385 = vmatpush.bf16.msra.mxu3 %v5046_v62  ;;  %3360 = vmatpush.bf16.msra.mxu1 %v4502_v7  ;;  %v6176_v55 = vld [vmem:[%s9897_s1 + $0x2a4] sm:$0xf0] }
  0xe3   :  { %v4629_v56 = vld [vmem:[%s9897_s1 + $0x488] sm:$0xf]  ;;  %v4374_v61 = vor.u32 %v6176_v55, %v4373_v53 }
  0xe4   :  { %3373 = vmatpush.bf16.msra.mxu2 %v4758_v8  ;;  %3348 = vmatpush.bf16.msra.mxu0 %v4214_v18  ;;  %v6240_v57 = vld [vmem:[%s9897_s1 + $0x4a4] sm:$0xf0] }
  0xe5   :  { %v4885_v58 = vld [vmem:[%s9897_s1 + $0x688] sm:$0xf]  ;;  %v4630_v62 = vor.u32 %v6240_v57, %v4629_v56 }
  0xe6   :  { %3386 = vmatpush.bf16.msra.mxu3 %v5014_v12  ;;  %3361 = vmatpush.bf16.msra.mxu1 %v4470_v19  ;;  %v6304_v59 = vld [vmem:[%s9897_s1 + $0x6a4] sm:$0xf0] }
  0xe7   :  { %v4085_v63 = vld [vmem:[%s9897_s1 + $0x48] sm:$0xf]  ;;  %v4886_v2 = vor.u32 %v6304_v59, %v4885_v58 }
  0xe8   :  { %3374 = vmatpush.bf16.msra.mxu2 %v4726_v22  ;;  %3349 = vmatpush.bf16.msra.mxu0 %v4182_v32  ;;  %v6104_v0 = vld [vmem:[%s9897_s1 + $0x64] sm:$0xf0] }
  0xe9   :  { %v4341_v1 = vld [vmem:[%s9897_s1 + $0x248] sm:$0xf]  ;;  %v4086_v10 = vor.u32 %v6104_v0, %v4085_v63 }
  0xea   :  { %3387 = vmatpush.bf16.msra.mxu3 %v4982_v26  ;;  %3362 = vmatpush.bf16.msra.mxu1 %v4438_v33  ;;  %v6168_v3 = vld [vmem:[%s9897_s1 + $0x264] sm:$0xf0] }
  0xeb   :  { %v4597_v5 = vld [vmem:[%s9897_s1 + $0x448] sm:$0xf]  ;;  %v4342_v13 = vor.u32 %v6168_v3, %v4341_v1 }
  0xec   :  { %3375 = vmatpush.bf16.msra.mxu2 %v4694_v34  ;;  %3350 = vmatpush.bf16.msra.mxu0 %v4150_v48  ;;  %v6232_v7 = vld [vmem:[%s9897_s1 + $0x464] sm:$0xf0] }
  0xed   :  { %v4853_v8 = vld [vmem:[%s9897_s1 + $0x648] sm:$0xf]  ;;  %v4598_v14 = vor.u32 %v6232_v7, %v4597_v5 }
  0xee   :  { %3388 = vmatpush.bf16.msra.mxu3 %v4950_v39  ;;  %3363 = vmatpush.bf16.msra.mxu1 %v4406_v49  ;;  %v6296_v9 = vld [vmem:[%s9897_s1 + $0x664] sm:$0xf0] }
  0xef   :  { %v4053_v11 = vld [vmem:[%s9897_s1 + $0x8] sm:$0xf]  ;;  %v4854_v18 = vor.u32 %v6296_v9, %v4853_v8 }
  0xf0   :  { %3376 = vmatpush.bf16.msra.mxu2 %v4662_v50  ;;  %3351 = vmatpush.bf16.msra.mxu0 %v4118_v60  ;;  %v6096_v12 = vld [vmem:[%s9897_s1 + $0x24] sm:$0xf0] }
  0xf1   :  { %v4309_v15 = vld [vmem:[%s9897_s1 + $0x208] sm:$0xf]  ;;  %v4054_v27 = vor.u32 %v6096_v12, %v4053_v11 }
  0xf2   :  { %3389 = vmatpush.bf16.msra.mxu3 %v4918_v54  ;;  %3364 = vmatpush.bf16.msra.mxu1 %v4374_v61  ;;  %v6160_v16 = vld [vmem:[%s9897_s1 + $0x224] sm:$0xf0] }
  0xf3   :  { %v4565_v17 = vld [vmem:[%s9897_s1 + $0x408] sm:$0xf]  ;;  %v4310_v31 = vor.u32 %v6160_v16, %v4309_v15 }
  0xf4   :  { %3377 = vmatpush.bf16.msra.mxu2 %v4630_v62  ;;  %v6224_v19 = vld [vmem:[%s9897_s1 + $0x424] sm:$0xf0]  ;;  %3352 = vmatpush.bf16.msra.mxu0 %v4086_v10 }
  0xf5   :  { %v4821_v22 = vld [vmem:[%s9897_s1 + $0x608] sm:$0xf]  ;;  %v4566_v32 = vor.u32 %v6224_v19, %v4565_v17 }
  0xf6   :  { %3390 = vmatpush.bf16.msra.mxu3 %v4886_v2  ;;  %v6288_v23 = vld [vmem:[%s9897_s1 + $0x624] sm:$0xf0]  ;;  %3365 = vmatpush.bf16.msra.mxu1 %v4342_v13 }
  0xf7   :  { %v5301_v24 = vld [vmem:[%s9897_s1 + $0x9c8] sm:$0xf]  ;;  %v4822_v35 = vor.u32 %v6288_v23, %v4821_v22 }
  0xf8   :  { %v6408_v25 = vld [vmem:[%s9897_s1 + $0x9e4] sm:$0xf0]  ;;  %3378 = vmatpush.bf16.msra.mxu2 %v4598_v14  ;;  %3353 = vmatpush.bf16.msra.mxu0 %v4054_v27 }
  0xf9   :  { %v5557_v26 = vld [vmem:[%s9897_s1 + $0xbc8] sm:$0xf]  ;;  %v5302_v36 = vor.u32 %v6408_v25, %v5301_v24 }
  0xfa   :  { %v6472_v28 = vld [vmem:[%s9897_s1 + $0xbe4] sm:$0xf0]  ;;  %3391 = vmatpush.bf16.msra.mxu3 %v4854_v18  ;;  %3366 = vmatpush.bf16.msra.mxu1 %v4310_v31 }
  0xfb   :  { %v5813_v29 = vld [vmem:[%s9897_s1 + $0xdc8] sm:$0xf]  ;;  %v5558_v37 = vor.u32 %v6472_v28, %v5557_v26  ;;  %3354 = vmatmul.bf16.vlgmr.msra.gmra.mxu0 %v6925_v20 }
  0xfc   :  { %v6536_v30 = vld [vmem:[%s9897_s1 + $0xde4] sm:$0xf0]  ;;  %3379 = vmatpush.bf16.msra.mxu2 %v4566_v32  ;;  %3398 = vmatpush.bf16.msrb.mxu0 %v5302_v36 }
  0xfd   :  { %v6069_v33 = vld [vmem:[%s9897_s1 + $0xfc8] sm:$0xf]  ;;  %v5814_v39 = vor.u32 %v6536_v30, %v5813_v29  ;;  %3367 = vmatmul.bf16.vlgmr.msra.gmra.mxu1 %v6928_v21 }
  0xfe   :  { %v6600_v34 = vld [vmem:[%s9897_s1 + $0xfe4] sm:$0xf0]  ;;  %3392 = vmatpush.bf16.msra.mxu3 %v4822_v35  ;;  %3411 = vmatpush.bf16.msrb.mxu1 %v5558_v37 }
  0xff   :  { %v5269_v40 = vld [vmem:[%s9897_s1 + $0x988] sm:$0xf]  ;;  %v6070_v46 = vor.u32 %v6600_v34, %v6069_v33  ;;  %3380 = vmatmul.bf16.vlgmr.msra.gmra.mxu2 %v6893_v4 }
 0x100   :  { %v6400_v43 = vld [vmem:[%s9897_s1 + $0x9a4] sm:$0xf0]  ;;  %3424 = vmatpush.bf16.msrb.mxu2 %v5814_v39 }
 0x101   :  { %v5525_v45 = vld [vmem:[%s9897_s1 + $0xb88] sm:$0xf]  ;;  %v5270_v52 = vor.u32 %v6400_v43, %v5269_v40  ;;  %3393 = vmatmul.bf16.vlgmr.msra.gmra.mxu3 %v6898_v6  ;;  %v3147_v43 = vpop.f32.mrf.mxu0 }
 0x102   :  { %v6464_v47 = vld [vmem:[%s9897_s1 + $0xba4] sm:$0xf0]  ;;  %3437 = vmatpush.bf16.msrb.mxu3 %v6070_v46  ;;  %v3160_v46 = vpop.f32.mrf.mxu1 }
 0x103   :  { %v5781_v48 = vld [vmem:[%s9897_s1 + $0xd88] sm:$0xf]  ;;  %v5526_v53 = vor.u32 %v6464_v47, %v5525_v45  ;;  %3399 = vmatpush.bf16.msrb.mxu0 %v5270_v52  ;;  %v7787_v52 = vpop.f32.mrf.mxu2 }
 0x104   :  { %v6528_v49 = vld [vmem:[%s9897_s1 + $0xda4] sm:$0xf0] }
 0x105   :  { %v6037_v50 = vld [vmem:[%s9897_s1 + $0xf88] sm:$0xf]  ;;  %v5782_v54 = vor.u32 %v6528_v49, %v5781_v48  ;;  %3412 = vmatpush.bf16.msrb.mxu1 %v5526_v53 }
 0x106   :  { %v6592_v51 = vld [vmem:[%s9897_s1 + $0xfa4] sm:$0xf0] }
 0x107   :  { %v5237_v55 = vld [vmem:[%s9897_s1 + $0x948] sm:$0xf]  ;;  %v6038_v58 = vor.u32 %v6592_v51, %v6037_v50  ;;  %3425 = vmatpush.bf16.msrb.mxu2 %v5782_v54 }
 0x108   :  { %v6392_v56 = vld [vmem:[%s9897_s1 + $0x964] sm:$0xf0] }
 0x109   :  { %v5493_v57 = vld [vmem:[%s9897_s1 + $0xb48] sm:$0xf]  ;;  %v5238_v0 = vor.u32 %v6392_v56, %v5237_v55  ;;  %3438 = vmatpush.bf16.msrb.mxu3 %v6038_v58 }
 0x10a   :  { %v6456_v59 = vld [vmem:[%s9897_s1 + $0xb64] sm:$0xf0] }
 0x10b   :  { %v5749_v60 = vld [vmem:[%s9897_s1 + $0xd48] sm:$0xf]  ;;  %v5494_v1 = vor.u32 %v6456_v59, %v5493_v57  ;;  %3400 = vmatpush.bf16.msrb.mxu0 %v5238_v0  ;;  %v7798_v57 = vpop.f32.mrf.mxu3 }
 0x10c   :  { %v6520_v61 = vld [vmem:[%s9897_s1 + $0xd64] sm:$0xf0] }
 0x10d   :  { %v6005_v62 = vld [vmem:[%s9897_s1 + $0xf48] sm:$0xf]  ;;  %v5750_v2 = vor.u32 %v6520_v61, %v5749_v60  ;;  %3413 = vmatpush.bf16.msrb.mxu1 %v5494_v1 }
 0x10e   :  { %v6584_v63 = vld [vmem:[%s9897_s1 + $0xf64] sm:$0xf0] }
 0x10f   :  { %v5205_v3 = vld [vmem:[%s9897_s1 + $0x908] sm:$0xf]  ;;  %v6006_v8 = vor.u32 %v6584_v63, %v6005_v62  ;;  %3426 = vmatpush.bf16.msrb.mxu2 %v5750_v2 }
 0x110   :  { %v6384_v5 = vld [vmem:[%s9897_s1 + $0x924] sm:$0xf0] }
 0x111   :  { %v5461_v7 = vld [vmem:[%s9897_s1 + $0xb08] sm:$0xf]  ;;  %v5206_v14 = vor.u32 %v6384_v5, %v5205_v3  ;;  %3439 = vmatpush.bf16.msrb.mxu3 %v6006_v8 }
 0x112   :  { %v6448_v9 = vld [vmem:[%s9897_s1 + $0xb24] sm:$0xf0] }
 0x113   :  { %v5717_v10 = vld [vmem:[%s9897_s1 + $0xd08] sm:$0xf]  ;;  %v5462_v15 = vor.u32 %v6448_v9, %v5461_v7  ;;  %3401 = vmatpush.bf16.msrb.mxu0 %v5206_v14 }
 0x114   :  { %v6512_v11 = vld [vmem:[%s9897_s1 + $0xd24] sm:$0xf0] }
 0x115   :  { %v5973_v12 = vld [vmem:[%s9897_s1 + $0xf08] sm:$0xf]  ;;  %v5718_v16 = vor.u32 %v6512_v11, %v5717_v10  ;;  %3414 = vmatpush.bf16.msrb.mxu1 %v5462_v15  ;;  %v6148_v10 = vld [vmem:[%s9897_s1 + $0x1cc] sm:$0xf] }
 0x116   :  { %v6576_v13 = vld [vmem:[%s9897_s1 + $0xf24] sm:$0xf0]  ;;  %v4279_v11 = vld [vmem:[%s9897_s1 + $0x1e8] sm:$0xf0] }
 0x117   :  { %v5173_v17 = vld [vmem:[%s9897_s1 + $0x8c8] sm:$0xf]  ;;  %v5974_v22 = vor.u32 %v6576_v13, %v5973_v12  ;;  %3427 = vmatpush.bf16.msrb.mxu2 %v5718_v16  ;;  %v6212_v12 = vld [vmem:[%s9897_s1 + $0x3cc] sm:$0xf]  ;;  %v3149_v13 = vpop.f32.mrf.mxu0 }
 0x118   :  { %v6376_v18 = vld [vmem:[%s9897_s1 + $0x8e4] sm:$0xf0]  ;;  %v4535_v15 = vld [vmem:[%s9897_s1 + $0x3e8] sm:$0xf0] }
 0x119   :  { %v5429_v19 = vld [vmem:[%s9897_s1 + $0xac8] sm:$0xf]  ;;  %v5174_v28 = vor.u32 %v6376_v18, %v5173_v17  ;;  %3440 = vmatpush.bf16.msrb.mxu3 %v5974_v22  ;;  %v6276_v16 = vld [vmem:[%s9897_s1 + $0x5cc] sm:$0xf]  ;;  %v3162_v18 = vpop.f32.mrf.mxu1 }
 0x11a   :  { %v6440_v23 = vld [vmem:[%s9897_s1 + $0xae4] sm:$0xf0]  ;;  %v4791_v17 = vld [vmem:[%s9897_s1 + $0x5e8] sm:$0xf0] }
 0x11b   :  { %v5685_v24 = vld [vmem:[%s9897_s1 + $0xcc8] sm:$0xf]  ;;  %v5430_v29 = vor.u32 %v6440_v23, %v5429_v19  ;;  %3402 = vmatpush.bf16.msrb.mxu0 %v5174_v28  ;;  %v6340_v23 = vld [vmem:[%s9897_s1 + $0x7cc] sm:$0xf]  ;;  %v3188_v28 = vpop.f32.mrf.mxu3 }
 0x11c   :  { %v6504_v25 = vld [vmem:[%s9897_s1 + $0xce4] sm:$0xf0]  ;;  %v6116_v13 = vld [vmem:[%s9897_s1 + $0xcc] sm:$0xf] }
 0x11d   :  { %v5941_v26 = vld [vmem:[%s9897_s1 + $0xec8] sm:$0xf]  ;;  %v5686_v30 = vor.u32 %v6504_v25, %v5685_v24  ;;  %3415 = vmatpush.bf16.msrb.mxu1 %v5430_v29  ;;  %v5047_v24 = vld [vmem:[%s9897_s1 + $0x7e8] sm:$0xf0]  ;;  %v3175_v25 = vpop.f32.mrf.mxu2  ;;  %v4538_v29 = vor.u32 %v6212_v12, %v4535_v15 }
 0x11e   :  { %v6568_v27 = vld [vmem:[%s9897_s1 + $0xee4] sm:$0xf0]  ;;  %v6180_v15 = vld [vmem:[%s9897_s1 + $0x2cc] sm:$0xf] }
 0x11f   :  { %v5141_v31 = vld [vmem:[%s9897_s1 + $0x888] sm:$0xf]  ;;  %v5942_v34 = vor.u32 %v6568_v27, %v5941_v26  ;;  %3428 = vmatpush.bf16.msrb.mxu2 %v5686_v30  ;;  %v4282_v27 = vor.u32 %v6148_v10, %v4279_v11  ;;  %v4794_v30 = vor.u32 %v6276_v16, %v4791_v17  ;;  %v3199_v10 = vpop.f32.mrf.mxu0  ;;  %v4919_v25 = vld [vmem:[%s9897_s1 + $0x6e8] sm:$0xf0] }
 0x120   :  { %v6368_v32 = vld [vmem:[%s9897_s1 + $0x8a4] sm:$0xf0]  ;;  %v6108_v28 = vld [vmem:[%s9897_s1 + $0x8c] sm:$0xf] }
 0x121   :  { %v5397_v33 = vld [vmem:[%s9897_s1 + $0xa88] sm:$0xf]  ;;  %v5142_v45 = vor.u32 %v6368_v32, %v5141_v31  ;;  %3441 = vmatpush.bf16.msrb.mxu3 %v5942_v34  ;;  %v3161_v31 = vadd.f32 %v3160_v46, %v3147_v43  ;;  %v6140_v32 = vld [vmem:[%s9897_s1 + $0x18c] sm:$0xf]  ;;  %v3212_v17 = vpop.f32.mrf.mxu1 }
 0x122   :  { %v6432_v35 = vld [vmem:[%s9897_s1 + $0xaa4] sm:$0xf0]  ;;  %v6204_v34 = vld [vmem:[%s9897_s1 + $0x38c] sm:$0xf] }
 0x123   :  { %v5653_v36 = vld [vmem:[%s9897_s1 + $0xc88] sm:$0xf]  ;;  %v5398_v47 = vor.u32 %v6432_v35, %v5397_v33  ;;  %3403 = vmatpush.bf16.msrb.mxu0 %v5142_v45  ;;  %v4247_v33 = vld [vmem:[%s9897_s1 + $0x1a8] sm:$0xf0]  ;;  %v5050_v35 = vor.u32 %v6340_v23, %v5047_v24 }
 0x124   :  { %v6496_v37 = vld [vmem:[%s9897_s1 + $0xca4] sm:$0xf0]  ;;  %v5015_v43 = vld [vmem:[%s9897_s1 + $0x7a8] sm:$0xf0]  ;;  %v4250_v45 = vor.u32 %v6140_v32, %v4247_v33 }
 0x125   :  { %v5909_v39 = vld [vmem:[%s9897_s1 + $0xe88] sm:$0xf]  ;;  %v5654_v48 = vor.u32 %v6496_v37, %v5653_v36  ;;  %3416 = vmatpush.bf16.msrb.mxu1 %v5398_v47  ;;  %v4503_v36 = vld [vmem:[%s9897_s1 + $0x3a8] sm:$0xf0]  ;;  %v3225_v33 = vpop.f32.mrf.mxu2 }
 0x126   :  { %v6560_v40 = vld [vmem:[%s9897_s1 + $0xea4] sm:$0xf0]  ;;  %v6268_v37 = vld [vmem:[%s9897_s1 + $0x58c] sm:$0xf]  ;;  %v4506_v46 = vor.u32 %v6204_v34, %v4503_v36  ;;  %v7968_v34 = vld [vmem:[%s9899_s2] sm:$0xff] }
 0x127   :  { %v5109_v49 = vld [vmem:[%s9897_s1 + $0x848] sm:$0xf]  ;;  %v5910_v53 = vor.u32 %v6560_v40, %v5909_v39  ;;  %3429 = vmatpush.bf16.msrb.mxu2 %v5654_v48  ;;  %v4759_v39 = vld [vmem:[%s9897_s1 + $0x5a8] sm:$0xf0]  ;;  %v3174_v48 = vadd.f32 %v7787_v52, %v3161_v31 }
 0x128   :  { %v6360_v50 = vld [vmem:[%s9897_s1 + $0x864] sm:$0xf0]  ;;  %v6332_v40 = vld [vmem:[%s9897_s1 + $0x78c] sm:$0xf]  ;;  %v4762_v47 = vor.u32 %v6268_v37, %v4759_v39 }
 0x129   :  { %v5365_v51 = vld [vmem:[%s9897_s1 + $0xa48] sm:$0xf]  ;;  %v5110_v60 = vor.u32 %v6360_v50, %v5109_v49  ;;  %3442 = vmatpush.bf16.msrb.mxu3 %v5910_v53  ;;  %v6132_v49 = vld [vmem:[%s9897_s1 + $0x14c] sm:$0xf]  ;;  %v5018_v53 = vor.u32 %v6332_v40, %v5015_v43  ;;  %v3238_v43 = vpop.f32.mrf.mxu3 }
 0x12a   :  { %v6424_v54 = vld [vmem:[%s9897_s1 + $0xa64] sm:$0xf0]  ;;  %v4215_v50 = vld [vmem:[%s9897_s1 + $0x168] sm:$0xf0] }
 0x12b   :  { %v5621_v55 = vld [vmem:[%s9897_s1 + $0xc48] sm:$0xf]  ;;  %v5366_v63 = vor.u32 %v6424_v54, %v5365_v51  ;;  %3404 = vmatpush.bf16.msrb.mxu0 %v5110_v60  ;;  %v6196_v51 = vld [vmem:[%s9897_s1 + $0x34c] sm:$0xf]  ;;  %v3187_v60 = vadd.f32 %v7798_v57, %v3174_v48 }
 0x12c   :  { %v6488_v56 = vld [vmem:[%s9897_s1 + $0xc64] sm:$0xf0]  ;;  %v4471_v52 = vld [vmem:[%s9897_s1 + $0x368] sm:$0xf0] }
 0x12d   :  { %v5877_v58 = vld [vmem:[%s9897_s1 + $0xe48] sm:$0xf]  ;;  %v5622_v0 = vor.u32 %v6488_v56, %v5621_v55  ;;  %3417 = vmatpush.bf16.msrb.mxu1 %v5366_v63  ;;  %v6260_v54 = vld [vmem:[%s9897_s1 + $0x54c] sm:$0xf]  ;;  %v3200_v16 = vadd.f32 %v3199_v10, %v3187_v60 }
 0x12e   :  { %v6552_v59 = vld [vmem:[%s9897_s1 + $0xe64] sm:$0xf0]  ;;  %v4727_v55 = vld [vmem:[%s9897_s1 + $0x568] sm:$0xf0] }
 0x12f   :  { %v5077_v61 = vld [vmem:[%s9897_s1 + $0x808] sm:$0xf]  ;;  %v5878_v5 = vor.u32 %v6552_v59, %v5877_v58  ;;  %3430 = vmatpush.bf16.msrb.mxu2 %v5622_v0  ;;  %v6324_v56 = vld [vmem:[%s9897_s1 + $0x74c] sm:$0xf]  ;;  %v4218_v59 = vor.u32 %v6132_v49, %v4215_v50  ;;  %v3999_v49 = vperm.slane %v7968_v34, 0  ;;  %v3201_v50 = vpop.f32.mrf.mxu0 }
 0x130   :  { %v6352_v62 = vld [vmem:[%s9897_s1 + $0x824] sm:$0xf0]  ;;  %v4983_v58 = vld [vmem:[%s9897_s1 + $0x768] sm:$0xf0] }
 0x131   :  { %v5333_v1 = vld [vmem:[%s9897_s1 + $0xa08] sm:$0xf]  ;;  %v5078_v14 = vor.u32 %v6352_v62, %v5077_v61  ;;  %3443 = vmatpush.bf16.msrb.mxu3 %v5878_v5  ;;  %v4474_v61 = vor.u32 %v6196_v51, %v4471_v52  ;;  %v4730_v62 = vor.u32 %v6260_v54, %v4727_v55  ;;  %v6124_v63 = vld [vmem:[%s9897_s1 + $0x10c] sm:$0xf] }
 0x132   :  { %v6416_v2 = vld [vmem:[%s9897_s1 + $0xa24] sm:$0xf0]  ;;  %v4183_v0 = vld [vmem:[%s9897_s1 + $0x128] sm:$0xf0] }
 0x133   :  { %v5589_v3 = vld [vmem:[%s9897_s1 + $0xc08] sm:$0xf]  ;;  %v5334_v19 = vor.u32 %v6416_v2, %v5333_v1  ;;  %3405 = vmatpush.bf16.msrb.mxu0 %v5078_v14  ;;  %v6188_v1 = vld [vmem:[%s9897_s1 + $0x30c] sm:$0xf]  ;;  %v4986_v2 = vor.u32 %v6324_v56, %v4983_v58  ;;  %v3214_v56 = vpop.f32.mrf.mxu1 }
 0x134   :  { %v6480_v7 = vld [vmem:[%s9897_s1 + $0xc24] sm:$0xf0]  ;;  %v4439_v57 = vld [vmem:[%s9897_s1 + $0x328] sm:$0xf0] }
 0x135   :  { %v5845_v8 = vld [vmem:[%s9897_s1 + $0xe08] sm:$0xf]  ;;  %v5590_v22 = vor.u32 %v6480_v7, %v5589_v3  ;;  %3418 = vmatpush.bf16.msrb.mxu1 %v5334_v19  ;;  %v6252_v3 = vld [vmem:[%s9897_s1 + $0x50c] sm:$0xf]  ;;  %v4442_v11 = vor.u32 %v6188_v1, %v4439_v57 }
 0x136   :  { %v6544_v9 = vld [vmem:[%s9897_s1 + $0xe24] sm:$0xf0]  ;;  %3406 = vmatmul.bf16.vlgmr.msrb.gmra.mxu0 %v7084_v41  ;;  %v4695_v5 = vld [vmem:[%s9897_s1 + $0x528] sm:$0xf0] }
 0x137   :  { %v5846_v26 = vor.u32 %v6544_v9, %v5845_v8  ;;  %3431 = vmatpush.bf16.msrb.mxu2 %v5590_v22  ;;  %3450 = vmatpush.bf16.msra.mxu0 %v4282_v27  ;;  %v6316_v7 = vld [vmem:[%s9897_s1 + $0x70c] sm:$0xf]  ;;  %v4186_v9 = vor.u32 %v6124_v63, %v4183_v0  ;;  %v4698_v12 = vor.u32 %v6252_v3, %v4695_v5 }
 0x138   :  { %3419 = vmatmul.bf16.vlgmr.msrb.gmra.mxu1 %v7088_v44  ;;  %v4951_v8 = vld [vmem:[%s9897_s1 + $0x728] sm:$0xf0] }
 0x139   :  { %3444 = vmatpush.bf16.msrb.mxu3 %v5846_v26  ;;  %3463 = vmatpush.bf16.msra.mxu1 %v4538_v29  ;;  %v4151_v14 = vld [vmem:[%s9897_s1 + $0xe8] sm:$0xf0]  ;;  %v4954_v18 = vor.u32 %v6316_v7, %v4951_v8  ;;  %v3213_v26 = vadd.f32 %v3212_v17, %v3200_v16  ;;  %v3240_v16 = vpop.f32.mrf.mxu3 }
 0x13a   :  { %3432 = vmatmul.bf16.vlgmr.msrb.gmra.mxu2 %v7076_v38  ;;  %v4407_v19 = vld [vmem:[%s9897_s1 + $0x2e8] sm:$0xf0]  ;;  %v4154_v27 = vor.u32 %v6116_v13, %v4151_v14 }
 0x13b   :  { %3476 = vmatpush.bf16.msra.mxu2 %v4794_v30  ;;  %3451 = vmatpush.bf16.msra.mxu0 %v4250_v45  ;;  %v6244_v22 = vld [vmem:[%s9897_s1 + $0x4cc] sm:$0xf]  ;;  %v4410_v29 = vor.u32 %v6180_v15, %v4407_v19  ;;  %v3226_v40 = vadd.f32 %v3225_v33, %v3213_v26 }
 0x13c   :  { %3445 = vmatmul.bf16.vlgmr.msrb.gmra.mxu3 %v7086_v42  ;;  %v4663_v23 = vld [vmem:[%s9897_s1 + $0x4e8] sm:$0xf0] }
 0x13d   :  { %3489 = vmatpush.bf16.msra.mxu3 %v5050_v35  ;;  %3464 = vmatpush.bf16.msra.mxu1 %v4506_v46  ;;  %v6308_v24 = vld [vmem:[%s9897_s1 + $0x6cc] sm:$0xf]  ;;  %v4666_v30 = vor.u32 %v6244_v22, %v4663_v23  ;;  %v3239_v48 = vadd.f32 %v3238_v43, %v3226_v40 }
 0x13e   :  { %v4119_v31 = vld [vmem:[%s9897_s1 + $0xa8] sm:$0xf0]  ;;  %v4922_v35 = vor.u32 %v6308_v24, %v4919_v25 }
 0x13f   :  { %3477 = vmatpush.bf16.msra.mxu2 %v4762_v47  ;;  %3452 = vmatpush.bf16.msra.mxu0 %v4218_v59  ;;  %v6172_v32 = vld [vmem:[%s9897_s1 + $0x28c] sm:$0xf]  ;;  %v4122_v47 = vor.u32 %v6108_v28, %v4119_v31  ;;  %v4015_v0 = vadd.f32 %v3999_v49, %v3239_v48 }
 0x140   :  { %v4375_v36 = vld [vmem:[%s9897_s1 + $0x2a8] sm:$0xf0] }
 0x141   :  { %3490 = vmatpush.bf16.msra.mxu3 %v5018_v53  ;;  %3465 = vmatpush.bf16.msra.mxu1 %v4474_v61  ;;  %v6236_v37 = vld [vmem:[%s9897_s1 + $0x48c] sm:$0xf]  ;;  %v4378_v51 = vor.u32 %v6172_v32, %v4375_v36 }
 0x142   :  { %v4631_v39 = vld [vmem:[%s9897_s1 + $0x4a8] sm:$0xf0] }
 0x143   :  { %3478 = vmatpush.bf16.msra.mxu2 %v4730_v62  ;;  %3453 = vmatpush.bf16.msra.mxu0 %v4186_v9  ;;  %v6300_v45 = vld [vmem:[%s9897_s1 + $0x68c] sm:$0xf]  ;;  %v4634_v53 = vor.u32 %v6236_v37, %v4631_v39 }
 0x144   :  { %v4887_v46 = vld [vmem:[%s9897_s1 + $0x6a8] sm:$0xf0] }
 0x145   :  { %3491 = vmatpush.bf16.msra.mxu3 %v4986_v2  ;;  %3466 = vmatpush.bf16.msra.mxu1 %v4442_v11  ;;  %v6100_v52 = vld [vmem:[%s9897_s1 + $0x4c] sm:$0xf]  ;;  %v4890_v58 = vor.u32 %v6300_v45, %v4887_v46  ;;  %v3227_v11 = vpop.f32.mrf.mxu2 }
 0x146   :  { %v4087_v54 = vld [vmem:[%s9897_s1 + $0x68] sm:$0xf0]  ;;  %v8137_v11 = vpop.f32.mrf.mxu0 }
 0x147   :  { %3479 = vmatpush.bf16.msra.mxu2 %v4698_v12  ;;  %3454 = vmatpush.bf16.msra.mxu0 %v4154_v27  ;;  %v6164_v55 = vld [vmem:[%s9897_s1 + $0x24c] sm:$0xf]  ;;  %v4090_v1 = vor.u32 %v6100_v52, %v4087_v54  ;;  %v4023_v12 = vmax.f32 %v4015_v0, 0.0 }
 0x148   :  { %v4343_v59 = vld [vmem:[%s9897_s1 + $0x268] sm:$0xf0] }
 0x149   :  { %3492 = vmatpush.bf16.msra.mxu3 %v4954_v18  ;;  %3467 = vmatpush.bf16.msra.mxu1 %v4410_v29  ;;  %v6228_v60 = vld [vmem:[%s9897_s1 + $0x44c] sm:$0xf]  ;;  %v4346_v5 = vor.u32 %v6164_v55, %v4343_v59  ;;  %4031 = vst [vmem:[%s9900_s3] sm:$0xff] %v4023_v12 }
 0x14a   :  { %v4599_v61 = vld [vmem:[%s9897_s1 + $0x468] sm:$0xf0] }
 0x14b   :  { %3480 = vmatpush.bf16.msra.mxu2 %v4666_v30  ;;  %v6292_v62 = vld [vmem:[%s9897_s1 + $0x64c] sm:$0xf]  ;;  %3455 = vmatpush.bf16.msra.mxu0 %v4122_v47  ;;  %v4602_v7 = vor.u32 %v6228_v60, %v4599_v61 }
 0x14c   :  { %v4855_v63 = vld [vmem:[%s9897_s1 + $0x668] sm:$0xf0] }
 0x14d   :  { %3493 = vmatpush.bf16.msra.mxu3 %v4922_v35  ;;  %v6092_v2 = vld [vmem:[%s9897_s1 + $0xc] sm:$0xf]  ;;  %3468 = vmatpush.bf16.msra.mxu1 %v4378_v51  ;;  %v4858_v13 = vor.u32 %v6292_v62, %v4855_v63 }
 0x14e   :  { %v4055_v57 = vld [vmem:[%s9897_s1 + $0x28] sm:$0xf0] }
 0x14f   :  { %v6156_v3 = vld [vmem:[%s9897_s1 + $0x20c] sm:$0xf]  ;;  %3481 = vmatpush.bf16.msra.mxu2 %v4634_v53  ;;  %3456 = vmatpush.bf16.msra.mxu0 %v4090_v1  ;;  %v4058_v22 = vor.u32 %v6092_v2, %v4055_v57 }
 0x150   :  { %v4311_v8 = vld [vmem:[%s9897_s1 + $0x228] sm:$0xf0] }
 0x151   :  { %v6220_v9 = vld [vmem:[%s9897_s1 + $0x40c] sm:$0xf]  ;;  %3494 = vmatpush.bf16.msra.mxu3 %v4890_v58  ;;  %3469 = vmatpush.bf16.msra.mxu1 %v4346_v5  ;;  %v4314_v26 = vor.u32 %v6156_v3, %v4311_v8 }
 0x152   :  { %v4567_v10 = vld [vmem:[%s9897_s1 + $0x428] sm:$0xf0] }
 0x153   :  { %v6284_v14 = vld [vmem:[%s9897_s1 + $0x60c] sm:$0xf]  ;;  %3482 = vmatpush.bf16.msra.mxu2 %v4602_v7  ;;  %v4570_v27 = vor.u32 %v6220_v9, %v4567_v10  ;;  %3457 = vmatpush.bf16.msra.mxu0 %v4058_v22 }
 0x154   :  { %v4823_v15 = vld [vmem:[%s9897_s1 + $0x628] sm:$0xf0] }
 0x155   :  { %v6404_v17 = vld [vmem:[%s9897_s1 + $0x9cc] sm:$0xf]  ;;  %3495 = vmatpush.bf16.msra.mxu3 %v4858_v13  ;;  %v4826_v30 = vor.u32 %v6284_v14, %v4823_v15  ;;  %3470 = vmatpush.bf16.msra.mxu1 %v4314_v26 }
 0x156   :  { %v5303_v18 = vld [vmem:[%s9897_s1 + $0x9e8] sm:$0xf0]  ;;  %3458 = vmatmul.bf16.vlgmr.msra.gmra.mxu0 %v6925_v20 }
 0x157   :  { %v6468_v19 = vld [vmem:[%s9897_s1 + $0xbcc] sm:$0xf]  ;;  %v5306_v31 = vor.u32 %v6404_v17, %v5303_v18  ;;  %3483 = vmatpush.bf16.msra.mxu2 %v4570_v27  ;;  %v8148_v17 = vpop.f32.mrf.mxu1 }
 0x158   :  { %v5559_v23 = vld [vmem:[%s9897_s1 + $0xbe8] sm:$0xf0]  ;;  %3471 = vmatmul.bf16.vlgmr.msra.gmra.mxu1 %v6928_v21 }
 0x159   :  { %v6532_v24 = vld [vmem:[%s9897_s1 + $0xdcc] sm:$0xf]  ;;  %v5562_v32 = vor.u32 %v6468_v19, %v5559_v23  ;;  %3496 = vmatpush.bf16.msra.mxu3 %v4826_v30  ;;  %3502 = vmatpush.bf16.msrb.mxu0 %v5306_v31 }
 0x15a   :  { %v5815_v25 = vld [vmem:[%s9897_s1 + $0xde8] sm:$0xf0]  ;;  %3484 = vmatmul.bf16.vlgmr.msra.gmra.mxu2 %v6893_v4 }
 0x15b   :  { %v6596_v28 = vld [vmem:[%s9897_s1 + $0xfcc] sm:$0xf]  ;;  %v5818_v33 = vor.u32 %v6532_v24, %v5815_v25  ;;  %3515 = vmatpush.bf16.msrb.mxu1 %v5562_v32  ;;  %v8174_v32 = vpop.f32.mrf.mxu2 }
 0x15c   :  { %v6071_v29 = vld [vmem:[%s9897_s1 + $0xfe8] sm:$0xf0]  ;;  %3497 = vmatmul.bf16.vlgmr.msra.gmra.mxu3 %v6898_v6 }
 0x15d   :  { %v6396_v35 = vld [vmem:[%s9897_s1 + $0x98c] sm:$0xf]  ;;  %v6074_v39 = vor.u32 %v6596_v28, %v6071_v29  ;;  %3528 = vmatpush.bf16.msrb.mxu2 %v5818_v33 }
 0x15e   :  { %v5271_v36 = vld [vmem:[%s9897_s1 + $0x9a8] sm:$0xf0] }
 0x15f   :  { %v6460_v37 = vld [vmem:[%s9897_s1 + $0xb8c] sm:$0xf]  ;;  %v5274_v48 = vor.u32 %v6396_v35, %v5271_v36  ;;  %3541 = vmatpush.bf16.msrb.mxu3 %v6074_v39  ;;  %v8185_v39 = vpop.f32.mrf.mxu3 }
 0x160   :  { %v5527_v40 = vld [vmem:[%s9897_s1 + $0xba8] sm:$0xf0] }
 0x161   :  { %v6524_v43 = vld [vmem:[%s9897_s1 + $0xd8c] sm:$0xf]  ;;  %v5530_v49 = vor.u32 %v6460_v37, %v5527_v40  ;;  %3503 = vmatpush.bf16.msrb.mxu0 %v5274_v48 }
 0x162   :  { %v5783_v45 = vld [vmem:[%s9897_s1 + $0xda8] sm:$0xf0] }
 0x163   :  { %v6588_v46 = vld [vmem:[%s9897_s1 + $0xf8c] sm:$0xf]  ;;  %v5786_v50 = vor.u32 %v6524_v43, %v5783_v45  ;;  %3516 = vmatpush.bf16.msrb.mxu1 %v5530_v49 }
 0x164   :  { %v6039_v47 = vld [vmem:[%s9897_s1 + $0xfa8] sm:$0xf0] }
 0x165   :  { %v6388_v51 = vld [vmem:[%s9897_s1 + $0x94c] sm:$0xf]  ;;  %v6042_v54 = vor.u32 %v6588_v46, %v6039_v47  ;;  %3529 = vmatpush.bf16.msrb.mxu2 %v5786_v50  ;;  %v3253_v46 = vpop.f32.mrf.mxu0 }
 0x166   :  { %v5239_v53 = vld [vmem:[%s9897_s1 + $0x968] sm:$0xf0] }
 0x167   :  { %v6452_v52 = vld [vmem:[%s9897_s1 + $0xb4c] sm:$0xf]  ;;  %v5242_v61 = vor.u32 %v6388_v51, %v5239_v53  ;;  %3542 = vmatpush.bf16.msrb.mxu3 %v6042_v54  ;;  %v3266_v53 = vpop.f32.mrf.mxu1 }
 0x168   :  { %v5495_v55 = vld [vmem:[%s9897_s1 + $0xb68] sm:$0xf0] }
 0x169   :  { %v6516_v56 = vld [vmem:[%s9897_s1 + $0xd4c] sm:$0xf]  ;;  %v5498_v62 = vor.u32 %v6452_v52, %v5495_v55  ;;  %3504 = vmatpush.bf16.msrb.mxu0 %v5242_v61 }
 0x16a   :  { %v5751_v58 = vld [vmem:[%s9897_s1 + $0xd68] sm:$0xf0] }
 0x16b   :  { %v6580_v59 = vld [vmem:[%s9897_s1 + $0xf4c] sm:$0xf]  ;;  %v5754_v63 = vor.u32 %v6516_v56, %v5751_v58  ;;  %3517 = vmatpush.bf16.msrb.mxu1 %v5498_v62 }
 0x16c   :  { %v6007_v60 = vld [vmem:[%s9897_s1 + $0xf68] sm:$0xf0] }
 0x16d   :  { %v6380_v0 = vld [vmem:[%s9897_s1 + $0x90c] sm:$0xf]  ;;  %v6010_v57 = vor.u32 %v6580_v59, %v6007_v60  ;;  %3530 = vmatpush.bf16.msrb.mxu2 %v5754_v63 }
 0x16e   :  { %v5207_v1 = vld [vmem:[%s9897_s1 + $0x928] sm:$0xf0] }
 0x16f   :  { %v6444_v2 = vld [vmem:[%s9897_s1 + $0xb0c] sm:$0xf]  ;;  %v5210_v10 = vor.u32 %v6380_v0, %v5207_v1  ;;  %3543 = vmatpush.bf16.msrb.mxu3 %v6010_v57 }
 0x170   :  { %v5463_v3 = vld [vmem:[%s9897_s1 + $0xb28] sm:$0xf0] }
 0x171   :  { %v6508_v5 = vld [vmem:[%s9897_s1 + $0xd0c] sm:$0xf]  ;;  %v5466_v12 = vor.u32 %v6444_v2, %v5463_v3  ;;  %3505 = vmatpush.bf16.msrb.mxu0 %v5210_v10  ;;  %v3279_v3 = vpop.f32.mrf.mxu2  ;;  %v3292_v10 = vpop.f32.mrf.mxu3 }
 0x172   :  { %v5719_v7 = vld [vmem:[%s9897_s1 + $0xd28] sm:$0xf0]  ;;  %v4957_v3 = vld [vmem:[%s9897_s1 + $0x710] sm:$0xf] }
 0x173   :  { %v6572_v8 = vld [vmem:[%s9897_s1 + $0xf0c] sm:$0xf]  ;;  %v5722_v13 = vor.u32 %v6508_v5, %v5719_v7  ;;  %3518 = vmatpush.bf16.msrb.mxu1 %v5466_v12  ;;  %v4285_v12 = vld [vmem:[%s9897_s1 + $0x1d0] sm:$0xf] }
 0x174   :  { %v5975_v9 = vld [vmem:[%s9897_s1 + $0xf28] sm:$0xf0] }
 0x175   :  { %v6372_v14 = vld [vmem:[%s9897_s1 + $0x8cc] sm:$0xf]  ;;  %v5978_v18 = vor.u32 %v6572_v8, %v5975_v9  ;;  %3531 = vmatpush.bf16.msrb.mxu2 %v5722_v13  ;;  %v6153_v13 = vld [vmem:[%s9897_s1 + $0x1ec] sm:$0xf0] }
 0x176   :  { %v5175_v15 = vld [vmem:[%s9897_s1 + $0x8e8] sm:$0xf0] }
 0x177   :  { %v6436_v16 = vld [vmem:[%s9897_s1 + $0xacc] sm:$0xf]  ;;  %v5178_v26 = vor.u32 %v6372_v14, %v5175_v15  ;;  %3544 = vmatpush.bf16.msrb.mxu3 %v5978_v18  ;;  %v4541_v14 = vld [vmem:[%s9897_s1 + $0x3d0] sm:$0xf] }
 0x178   :  { %v5431_v19 = vld [vmem:[%s9897_s1 + $0xae8] sm:$0xf0]  ;;  %v4797_v18 = vld [vmem:[%s9897_s1 + $0x5d0] sm:$0xf] }
 0x179   :  { %v6500_v22 = vld [vmem:[%s9897_s1 + $0xccc] sm:$0xf]  ;;  %v5434_v27 = vor.u32 %v6436_v16, %v5431_v19  ;;  %3506 = vmatpush.bf16.msrb.mxu0 %v5178_v26  ;;  %v6217_v16 = vld [vmem:[%s9897_s1 + $0x3ec] sm:$0xf0] }
 0x17a   :  { %v5687_v23 = vld [vmem:[%s9897_s1 + $0xce8] sm:$0xf0]  ;;  %v6281_v19 = vld [vmem:[%s9897_s1 + $0x5ec] sm:$0xf0] }
 0x17b   :  { %v6564_v24 = vld [vmem:[%s9897_s1 + $0xecc] sm:$0xf]  ;;  %v5690_v28 = vor.u32 %v6500_v22, %v5687_v23  ;;  %3519 = vmatpush.bf16.msrb.mxu1 %v5434_v27  ;;  %v4286_v27 = vor.u32 %v6153_v13, %v4285_v12  ;;  %v4157_v12 = vld [vmem:[%s9897_s1 + $0xd0] sm:$0xf] }
 0x17c   :  { %v5943_v25 = vld [vmem:[%s9897_s1 + $0xee8] sm:$0xf0]  ;;  %v6121_v13 = vld [vmem:[%s9897_s1 + $0xec] sm:$0xf0] }
 0x17d   :  { %v6364_v29 = vld [vmem:[%s9897_s1 + $0x88c] sm:$0xf]  ;;  %v5946_v33 = vor.u32 %v6564_v24, %v5943_v25  ;;  %3532 = vmatpush.bf16.msrb.mxu2 %v5690_v28  ;;  %v5053_v24 = vld [vmem:[%s9897_s1 + $0x7d0] sm:$0xf]  ;;  %v4542_v28 = vor.u32 %v6217_v16, %v4541_v14  ;;  %v3316_v16 = vpop.f32.mrf.mxu1 }
 0x17e   :  { %v5143_v30 = vld [vmem:[%s9897_s1 + $0x8a8] sm:$0xf0]  ;;  %v6345_v25 = vld [vmem:[%s9897_s1 + $0x7ec] sm:$0xf0] }
 0x17f   :  { %v6428_v31 = vld [vmem:[%s9897_s1 + $0xa8c] sm:$0xf]  ;;  %v5146_v45 = vor.u32 %v6364_v29, %v5143_v30  ;;  %3545 = vmatpush.bf16.msrb.mxu3 %v5946_v33  ;;  %v4798_v29 = vor.u32 %v6281_v19, %v4797_v18  ;;  %v3265_v30 = vadd.f32 %v8148_v17, %v8137_v11  ;;  %v6145_v33 = vld [vmem:[%s9897_s1 + $0x1ac] sm:$0xf0] }
 0x180   :  { %v5399_v35 = vld [vmem:[%s9897_s1 + $0xaa8] sm:$0xf0]  ;;  %v4765_v11 = vld [vmem:[%s9897_s1 + $0x590] sm:$0xf] }
 0x181   :  { %v6492_v36 = vld [vmem:[%s9897_s1 + $0xc8c] sm:$0xf]  ;;  %v5402_v47 = vor.u32 %v6428_v31, %v5399_v35  ;;  %3507 = vmatpush.bf16.msrb.mxu0 %v5146_v45  ;;  %v4253_v31 = vld [vmem:[%s9897_s1 + $0x190] sm:$0xf] }
 0x182   :  { %v5655_v37 = vld [vmem:[%s9897_s1 + $0xca8] sm:$0xf0]  ;;  %v4509_v35 = vld [vmem:[%s9897_s1 + $0x390] sm:$0xf]  ;;  %v4254_v45 = vor.u32 %v6145_v33, %v4253_v31 }
 0x183   :  { %v6556_v40 = vld [vmem:[%s9897_s1 + $0xe8c] sm:$0xf]  ;;  %v5658_v48 = vor.u32 %v6492_v36, %v5655_v37  ;;  %3520 = vmatpush.bf16.msrb.mxu1 %v5402_v47  ;;  %v5054_v36 = vor.u32 %v6345_v25, %v5053_v24  ;;  %v6209_v37 = vld [vmem:[%s9897_s1 + $0x3ac] sm:$0xf0] }
 0x184   :  { %v5911_v43 = vld [vmem:[%s9897_s1 + $0xea8] sm:$0xf0]  ;;  %v6273_v17 = vld [vmem:[%s9897_s1 + $0x5ac] sm:$0xf0]  ;;  %v4510_v46 = vor.u32 %v6209_v37, %v4509_v35  ;;  %v3329_v35 = vpop.f32.mrf.mxu2 }
 0x185   :  { %v6356_v49 = vld [vmem:[%s9897_s1 + $0x84c] sm:$0xf]  ;;  %v5914_v52 = vor.u32 %v6556_v40, %v5911_v43  ;;  %3533 = vmatpush.bf16.msrb.mxu2 %v5658_v48  ;;  %v5021_v40 = vld [vmem:[%s9897_s1 + $0x790] sm:$0xf]  ;;  %v4766_v47 = vor.u32 %v6273_v17, %v4765_v11  ;;  %v3278_v48 = vadd.f32 %v8174_v32, %v3265_v30 }
 0x186   :  { %v5111_v50 = vld [vmem:[%s9897_s1 + $0x868] sm:$0xf0]  ;;  %v6337_v43 = vld [vmem:[%s9897_s1 + $0x7ac] sm:$0xf0] }
 0x187   :  { %v6420_v51 = vld [vmem:[%s9897_s1 + $0xa4c] sm:$0xf]  ;;  %v5114_v60 = vor.u32 %v6356_v49, %v5111_v50  ;;  %3546 = vmatpush.bf16.msrb.mxu3 %v5914_v52  ;;  %v4221_v49 = vld [vmem:[%s9897_s1 + $0x150] sm:$0xf]  ;;  %v5022_v53 = vor.u32 %v6337_v43, %v5021_v40  ;;  %v3342_v43 = vpop.f32.mrf.mxu3 }
 0x188   :  { %v5367_v54 = vld [vmem:[%s9897_s1 + $0xa68] sm:$0xf0]  ;;  %v6137_v50 = vld [vmem:[%s9897_s1 + $0x16c] sm:$0xf0] }
 0x189   :  { %v6484_v55 = vld [vmem:[%s9897_s1 + $0xc4c] sm:$0xf]  ;;  %v5370_v63 = vor.u32 %v6420_v51, %v5367_v54  ;;  %3508 = vmatpush.bf16.msrb.mxu0 %v5114_v60  ;;  %v4477_v51 = vld [vmem:[%s9897_s1 + $0x350] sm:$0xf] }
 0x18a   :  { %v5623_v56 = vld [vmem:[%s9897_s1 + $0xc68] sm:$0xf0]  ;;  %v6201_v32 = vld [vmem:[%s9897_s1 + $0x36c] sm:$0xf0] }
 0x18b   :  { %v6548_v58 = vld [vmem:[%s9897_s1 + $0xe4c] sm:$0xf]  ;;  %v5626_v0 = vor.u32 %v6484_v55, %v5623_v56  ;;  %3521 = vmatpush.bf16.msrb.mxu1 %v5370_v63  ;;  %v4733_v52 = vld [vmem:[%s9897_s1 + $0x550] sm:$0xf]  ;;  %v4478_v60 = vor.u32 %v6201_v32, %v4477_v51 }
 0x18c   :  { %v5879_v59 = vld [vmem:[%s9897_s1 + $0xe68] sm:$0xf0]  ;;  %v6265_v54 = vld [vmem:[%s9897_s1 + $0x56c] sm:$0xf0] }
 0x18d   :  { %v6348_v61 = vld [vmem:[%s9897_s1 + $0x80c] sm:$0xf]  ;;  %v5882_v5 = vor.u32 %v6548_v58, %v5879_v59  ;;  %3534 = vmatpush.bf16.msrb.mxu2 %v5626_v0  ;;  %v4989_v55 = vld [vmem:[%s9897_s1 + $0x750] sm:$0xf]  ;;  %v4222_v58 = vor.u32 %v6137_v50, %v4221_v49  ;;  %v3291_v59 = vadd.f32 %v8185_v39, %v3278_v48  ;;  %v4000_v49 = vperm.slane %v7968_v34, 1 }
 0x18e   :  { %v5079_v62 = vld [vmem:[%s9897_s1 + $0x828] sm:$0xf0]  ;;  %v6329_v56 = vld [vmem:[%s9897_s1 + $0x76c] sm:$0xf0] }
 0x18f   :  { %v6412_v1 = vld [vmem:[%s9897_s1 + $0xa0c] sm:$0xf]  ;;  %v5082_v15 = vor.u32 %v6348_v61, %v5079_v62  ;;  %3547 = vmatpush.bf16.msrb.mxu3 %v5882_v5  ;;  %v4734_v61 = vor.u32 %v6265_v54, %v4733_v52  ;;  %v4189_v62 = vld [vmem:[%s9897_s1 + $0x110] sm:$0xf] }
 0x190   :  { %v5335_v2 = vld [vmem:[%s9897_s1 + $0xa28] sm:$0xf0]  ;;  %v6129_v63 = vld [vmem:[%s9897_s1 + $0x12c] sm:$0xf0] }
 0x191   :  { %v6476_v57 = vld [vmem:[%s9897_s1 + $0xc0c] sm:$0xf]  ;;  %v5338_v22 = vor.u32 %v6412_v1, %v5335_v2  ;;  %3509 = vmatpush.bf16.msrb.mxu0 %v5082_v15  ;;  %v4445_v0 = vld [vmem:[%s9897_s1 + $0x310] sm:$0xf]  ;;  %v4990_v1 = vor.u32 %v6329_v56, %v4989_v55  ;;  %v3318_v55 = vpop.f32.mrf.mxu1 }
 0x192   :  { %v5591_v7 = vld [vmem:[%s9897_s1 + $0xc28] sm:$0xf0]  ;;  %v6193_v39 = vld [vmem:[%s9897_s1 + $0x32c] sm:$0xf0] }
 0x193   :  { %v6540_v8 = vld [vmem:[%s9897_s1 + $0xe0c] sm:$0xf]  ;;  %v5594_v23 = vor.u32 %v6476_v57, %v5591_v7  ;;  %3522 = vmatpush.bf16.msrb.mxu1 %v5338_v22  ;;  %v4701_v2 = vld [vmem:[%s9897_s1 + $0x510] sm:$0xf]  ;;  %v4190_v7 = vor.u32 %v6129_v63, %v4189_v62 }
 0x194   :  { %v5847_v9 = vld [vmem:[%s9897_s1 + $0xe28] sm:$0xf0]  ;;  %3510 = vmatmul.bf16.vlgmr.msrb.gmra.mxu0 %v7084_v41  ;;  %v6257_v57 = vld [vmem:[%s9897_s1 + $0x52c] sm:$0xf0] }
 0x195   :  { %v5850_v26 = vor.u32 %v6540_v8, %v5847_v9  ;;  %3535 = vmatpush.bf16.msrb.mxu2 %v5594_v23  ;;  %3554 = vmatpush.bf16.msra.mxu0 %v4286_v27  ;;  %v6321_v5 = vld [vmem:[%s9897_s1 + $0x72c] sm:$0xf0]  ;;  %v3303_v8 = vpop.f32.mrf.mxu0  ;;  %v4446_v9 = vor.u32 %v6193_v39, %v4445_v0  ;;  %v4702_v10 = vor.u32 %v6257_v57, %v4701_v2 }
 0x196   :  { %3523 = vmatmul.bf16.vlgmr.msrb.gmra.mxu1 %v7088_v44  ;;  %v4413_v14 = vld [vmem:[%s9897_s1 + $0x2d0] sm:$0xf]  ;;  %v3304_v15 = vadd.f32 %v3303_v8, %v3291_v59  ;;  %v4958_v18 = vor.u32 %v6321_v5, %v4957_v3  ;;  %v4158_v27 = vor.u32 %v6121_v13, %v4157_v12 }
 0x197   :  { %3548 = vmatpush.bf16.msrb.mxu3 %v5850_v26  ;;  %3567 = vmatpush.bf16.msra.mxu1 %v4542_v28  ;;  %v6185_v19 = vld [vmem:[%s9897_s1 + $0x2ec] sm:$0xf0] }
 0x198   :  { %3536 = vmatmul.bf16.vlgmr.msrb.gmra.mxu2 %v7076_v38  ;;  %v4669_v22 = vld [vmem:[%s9897_s1 + $0x4d0] sm:$0xf]  ;;  %v3317_v26 = vadd.f32 %v3316_v16, %v3304_v15  ;;  %v4414_v28 = vor.u32 %v6185_v19, %v4413_v14  ;;  %v3344_v15 = vpop.f32.mrf.mxu3 }
 0x199   :  { %3580 = vmatpush.bf16.msra.mxu2 %v4798_v29  ;;  %3555 = vmatpush.bf16.msra.mxu0 %v4254_v45  ;;  %v6249_v23 = vld [vmem:[%s9897_s1 + $0x4ec] sm:$0xf0] }
 0x19a   :  { %3549 = vmatmul.bf16.vlgmr.msrb.gmra.mxu3 %v7086_v42  ;;  %v4925_v24 = vld [vmem:[%s9897_s1 + $0x6d0] sm:$0xf]  ;;  %v4670_v29 = vor.u32 %v6249_v23, %v4669_v22  ;;  %v3330_v40 = vadd.f32 %v3329_v35, %v3317_v26 }
 0x19b   :  { %3593 = vmatpush.bf16.msra.mxu3 %v5054_v36  ;;  %3568 = vmatpush.bf16.msra.mxu1 %v4510_v46  ;;  %v6313_v25 = vld [vmem:[%s9897_s1 + $0x6ec] sm:$0xf0] }
 0x19c   :  { %v4125_v30 = vld [vmem:[%s9897_s1 + $0x90] sm:$0xf]  ;;  %v4926_v36 = vor.u32 %v6313_v25, %v4925_v24  ;;  %v3343_v48 = vadd.f32 %v3342_v43, %v3330_v40 }
 0x19d   :  { %3581 = vmatpush.bf16.msra.mxu2 %v4766_v47  ;;  %3556 = vmatpush.bf16.msra.mxu0 %v4222_v58  ;;  %v6113_v31 = vld [vmem:[%s9897_s1 + $0xac] sm:$0xf0]  ;;  %v3305_v50 = vpop.f32.mrf.mxu0 }
 0x19e   :  { %v4381_v33 = vld [vmem:[%s9897_s1 + $0x290] sm:$0xf]  ;;  %v4126_v47 = vor.u32 %v6113_v31, %v4125_v30  ;;  %v4016_v63 = vadd.f32 %v4000_v49, %v3343_v48 }
 0x19f   :  { %3594 = vmatpush.bf16.msra.mxu3 %v5022_v53  ;;  %3569 = vmatpush.bf16.msra.mxu1 %v4478_v60  ;;  %v6177_v37 = vld [vmem:[%s9897_s1 + $0x2ac] sm:$0xf0] }
 0x1a0   :  { %v4637_v11 = vld [vmem:[%s9897_s1 + $0x490] sm:$0xf]  ;;  %v4382_v51 = vor.u32 %v6177_v37, %v4381_v33 }
 0x1a1   :  { %3582 = vmatpush.bf16.msra.mxu2 %v4734_v61  ;;  %3557 = vmatpush.bf16.msra.mxu0 %v4190_v7  ;;  %v6241_v17 = vld [vmem:[%s9897_s1 + $0x4ac] sm:$0xf0] }
 0x1a2   :  { %v4893_v45 = vld [vmem:[%s9897_s1 + $0x690] sm:$0xf]  ;;  %v4638_v53 = vor.u32 %v6241_v17, %v4637_v11 }
 0x1a3   :  { %3595 = vmatpush.bf16.msra.mxu3 %v4990_v1  ;;  %3570 = vmatpush.bf16.msra.mxu1 %v4446_v9  ;;  %v6305_v46 = vld [vmem:[%s9897_s1 + $0x6ac] sm:$0xf0]  ;;  %v3331_v9 = vpop.f32.mrf.mxu2 }
 0x1a4   :  { %v4093_v32 = vld [vmem:[%s9897_s1 + $0x50] sm:$0xf]  ;;  %v4894_v34 = vor.u32 %v6305_v46, %v4893_v45 }
 0x1a5   :  { %3583 = vmatpush.bf16.msra.mxu2 %v4702_v10  ;;  %3558 = vmatpush.bf16.msra.mxu0 %v4158_v27  ;;  %v6105_v52 = vld [vmem:[%s9897_s1 + $0x6c] sm:$0xf0]  ;;  %v4024_v10 = vmax.f32 %v4016_v63, 0.0 }
 0x1a6   :  { %v4349_v54 = vld [vmem:[%s9897_s1 + $0x250] sm:$0xf]  ;;  %v4094_v0 = vor.u32 %v6105_v52, %v4093_v32 }
 0x1a7   :  { %3596 = vmatpush.bf16.msra.mxu3 %v4958_v18  ;;  %3571 = vmatpush.bf16.msra.mxu1 %v4414_v28  ;;  %v6169_v56 = vld [vmem:[%s9897_s1 + $0x26c] sm:$0xf0]  ;;  %4032 = vst [vmem:[%s9900_s3 + $0x8] sm:$0xff] %v4024_v10 }
 0x1a8   :  { %v4605_v58 = vld [vmem:[%s9897_s1 + $0x450] sm:$0xf]  ;;  %v4350_v57 = vor.u32 %v6169_v56, %v4349_v54 }
 0x1a9   :  { %3584 = vmatpush.bf16.msra.mxu2 %v4670_v29  ;;  %v6233_v59 = vld [vmem:[%s9897_s1 + $0x46c] sm:$0xf0]  ;;  %3559 = vmatpush.bf16.msra.mxu0 %v4126_v47 }
 0x1aa   :  { %v4861_v60 = vld [vmem:[%s9897_s1 + $0x650] sm:$0xf]  ;;  %v4606_v3 = vor.u32 %v6233_v59, %v4605_v58 }
 0x1ab   :  { %3597 = vmatpush.bf16.msra.mxu3 %v4926_v36  ;;  %v6297_v61 = vld [vmem:[%s9897_s1 + $0x66c] sm:$0xf0]  ;;  %3572 = vmatpush.bf16.msra.mxu1 %v4382_v51 }
 0x1ac   :  { %v4061_v62 = vld [vmem:[%s9897_s1 + $0x10] sm:$0xf]  ;;  %v4862_v12 = vor.u32 %v6297_v61, %v4861_v60 }
 0x1ad   :  { %v6097_v1 = vld [vmem:[%s9897_s1 + $0x2c] sm:$0xf0]  ;;  %3585 = vmatpush.bf16.msra.mxu2 %v4638_v53  ;;  %3560 = vmatpush.bf16.msra.mxu0 %v4094_v0 }
 0x1ae   :  { %v4317_v39 = vld [vmem:[%s9897_s1 + $0x210] sm:$0xf]  ;;  %v4062_v22 = vor.u32 %v6097_v1, %v4061_v62 }
 0x1af   :  { %v6161_v2 = vld [vmem:[%s9897_s1 + $0x22c] sm:$0xf0]  ;;  %3598 = vmatpush.bf16.msra.mxu3 %v4894_v34  ;;  %3573 = vmatpush.bf16.msra.mxu1 %v4350_v57 }
 0x1b0   :  { %v4573_v5 = vld [vmem:[%s9897_s1 + $0x410] sm:$0xf]  ;;  %v4318_v25 = vor.u32 %v6161_v2, %v4317_v39 }
 0x1b1   :  { %v6225_v7 = vld [vmem:[%s9897_s1 + $0x42c] sm:$0xf0]  ;;  %3586 = vmatpush.bf16.msra.mxu2 %v4606_v3  ;;  %3561 = vmatpush.bf16.msra.mxu0 %v4062_v22 }
 0x1b2   :  { %v4829_v8 = vld [vmem:[%s9897_s1 + $0x610] sm:$0xf]  ;;  %v4574_v26 = vor.u32 %v6225_v7, %v4573_v5  ;;  %v8545_v7 = vpop.f32.mrf.mxu0 }
 0x1b3   :  { %v6289_v13 = vld [vmem:[%s9897_s1 + $0x62c] sm:$0xf0]  ;;  %3599 = vmatpush.bf16.msra.mxu3 %v4862_v12  ;;  %3574 = vmatpush.bf16.msra.mxu1 %v4318_v25 }
 0x1b4   :  { %v5309_v14 = vld [vmem:[%s9897_s1 + $0x9d0] sm:$0xf]  ;;  %v4830_v29 = vor.u32 %v6289_v13, %v4829_v8  ;;  %3562 = vmatmul.bf16.vlgmr.msra.gmra.mxu0 %v6925_v20 }
 0x1b5   :  { %v6409_v16 = vld [vmem:[%s9897_s1 + $0x9ec] sm:$0xf0]  ;;  %3587 = vmatpush.bf16.msra.mxu2 %v4574_v26 }
 0x1b6   :  { %v5565_v18 = vld [vmem:[%s9897_s1 + $0xbd0] sm:$0xf]  ;;  %v5310_v30 = vor.u32 %v6409_v16, %v5309_v14  ;;  %3575 = vmatmul.bf16.vlgmr.msra.gmra.mxu1 %v6928_v21  ;;  %v8556_v14 = vpop.f32.mrf.mxu1 }
 0x1b7   :  { %v6473_v19 = vld [vmem:[%s9897_s1 + $0xbec] sm:$0xf0]  ;;  %3600 = vmatpush.bf16.msra.mxu3 %v4830_v29 }
 0x1b8   :  { %v5821_v23 = vld [vmem:[%s9897_s1 + $0xdd0] sm:$0xf]  ;;  %v5566_v31 = vor.u32 %v6473_v19, %v5565_v18  ;;  %3606 = vmatpush.bf16.msrb.mxu0 %v5310_v30  ;;  %3588 = vmatmul.bf16.vlgmr.msra.gmra.mxu2 %v6893_v4  ;;  %v8582_v30 = vpop.f32.mrf.mxu2 }
 0x1b9   :  { %v6537_v24 = vld [vmem:[%s9897_s1 + $0xdec] sm:$0xf0] }
 0x1ba   :  { %v6077_v27 = vld [vmem:[%s9897_s1 + $0xfd0] sm:$0xf]  ;;  %v5822_v33 = vor.u32 %v6537_v24, %v5821_v23  ;;  %3619 = vmatpush.bf16.msrb.mxu1 %v5566_v31  ;;  %3601 = vmatmul.bf16.vlgmr.msra.gmra.mxu3 %v6898_v6 }
 0x1bb   :  { %v6601_v28 = vld [vmem:[%s9897_s1 + $0xfec] sm:$0xf0] }
 0x1bc   :  { %v5277_v35 = vld [vmem:[%s9897_s1 + $0x990] sm:$0xf]  ;;  %v6078_v11 = vor.u32 %v6601_v28, %v6077_v27  ;;  %3632 = vmatpush.bf16.msrb.mxu2 %v5822_v33 }
 0x1bd   :  { %v6401_v36 = vld [vmem:[%s9897_s1 + $0x9ac] sm:$0xf0] }
 0x1be   :  { %v5533_v37 = vld [vmem:[%s9897_s1 + $0xb90] sm:$0xf]  ;;  %v5278_v47 = vor.u32 %v6401_v36, %v5277_v35  ;;  %3645 = vmatpush.bf16.msrb.mxu3 %v6078_v11 }
 0x1bf   :  { %v6465_v17 = vld [vmem:[%s9897_s1 + $0xbac] sm:$0xf0] }
 0x1c0   :  { %v5789_v40 = vld [vmem:[%s9897_s1 + $0xd90] sm:$0xf]  ;;  %v5534_v48 = vor.u32 %v6465_v17, %v5533_v37  ;;  %3607 = vmatpush.bf16.msrb.mxu0 %v5278_v47  ;;  %v8593_v37 = vpop.f32.mrf.mxu3 }
 0x1c1   :  { %v6529_v43 = vld [vmem:[%s9897_s1 + $0xdac] sm:$0xf0] }
 0x1c2   :  { %v6045_v45 = vld [vmem:[%s9897_s1 + $0xf90] sm:$0xf]  ;;  %v5790_v49 = vor.u32 %v6529_v43, %v5789_v40  ;;  %3620 = vmatpush.bf16.msrb.mxu1 %v5534_v48  ;;  %v3357_v43 = vpop.f32.mrf.mxu0 }
 0x1c3   :  { %v6593_v46 = vld [vmem:[%s9897_s1 + $0xfac] sm:$0xf0] }
 0x1c4   :  { %v5245_v50 = vld [vmem:[%s9897_s1 + $0x950] sm:$0xf]  ;;  %v6046_v32 = vor.u32 %v6593_v46, %v6045_v45  ;;  %3633 = vmatpush.bf16.msrb.mxu2 %v5790_v49 }
 0x1c5   :  { %v6393_v51 = vld [vmem:[%s9897_s1 + $0x96c] sm:$0xf0] }
 0x1c6   :  { %v5501_v53 = vld [vmem:[%s9897_s1 + $0xb50] sm:$0xf]  ;;  %v5246_v58 = vor.u32 %v6393_v51, %v5245_v50  ;;  %3646 = vmatpush.bf16.msrb.mxu3 %v6046_v32  ;;  %v3370_v50 = vpop.f32.mrf.mxu1 }
 0x1c7   :  { %v6457_v52 = vld [vmem:[%s9897_s1 + $0xb6c] sm:$0xf0]  ;;  %v6261_v50 = vld [vmem:[%s9897_s1 + $0x554] sm:$0xf] }
 0x1c8   :  { %v5757_v54 = vld [vmem:[%s9897_s1 + $0xd50] sm:$0xf]  ;;  %v5502_v59 = vor.u32 %v6457_v52, %v5501_v53  ;;  %3608 = vmatpush.bf16.msrb.mxu0 %v5246_v58 }
 0x1c9   :  { %v6521_v55 = vld [vmem:[%s9897_s1 + $0xd6c] sm:$0xf0] }
 0x1ca   :  { %v6013_v34 = vld [vmem:[%s9897_s1 + $0xf50] sm:$0xf]  ;;  %v5758_v60 = vor.u32 %v6521_v55, %v5757_v54  ;;  %3621 = vmatpush.bf16.msrb.mxu1 %v5502_v59 }
 0x1cb   :  { %v6585_v56 = vld [vmem:[%s9897_s1 + $0xf6c] sm:$0xf0] }
 0x1cc   :  { %v5213_v61 = vld [vmem:[%s9897_s1 + $0x910] sm:$0xf]  ;;  %v6014_v0 = vor.u32 %v6585_v56, %v6013_v34  ;;  %3634 = vmatpush.bf16.msrb.mxu2 %v5758_v60 }
 0x1cd   :  { %v6385_v62 = vld [vmem:[%s9897_s1 + $0x92c] sm:$0xf0] }
 0x1ce   :  { %v5469_v63 = vld [vmem:[%s9897_s1 + $0xb10] sm:$0xf]  ;;  %v5214_v5 = vor.u32 %v6385_v62, %v5213_v61  ;;  %3647 = vmatpush.bf16.msrb.mxu3 %v6014_v0  ;;  %v3383_v0 = vpop.f32.mrf.mxu2 }
 0x1cf   :  { %v6449_v1 = vld [vmem:[%s9897_s1 + $0xb2c] sm:$0xf0]  ;;  %v4959_v0 = vld [vmem:[%s9897_s1 + $0x730] sm:$0xf0] }
 0x1d0   :  { %v5725_v39 = vld [vmem:[%s9897_s1 + $0xd10] sm:$0xf]  ;;  %v5470_v8 = vor.u32 %v6449_v1, %v5469_v63  ;;  %3609 = vmatpush.bf16.msrb.mxu0 %v5214_v5  ;;  %v6149_v5 = vld [vmem:[%s9897_s1 + $0x1d4] sm:$0xf] }
 0x1d1   :  { %v6513_v2 = vld [vmem:[%s9897_s1 + $0xd2c] sm:$0xf0] }
 0x1d2   :  { %v5981_v57 = vld [vmem:[%s9897_s1 + $0xf10] sm:$0xf]  ;;  %v5726_v9 = vor.u32 %v6513_v2, %v5725_v39  ;;  %3622 = vmatpush.bf16.msrb.mxu1 %v5470_v8  ;;  %v4287_v8 = vld [vmem:[%s9897_s1 + $0x1f0] sm:$0xf0] }
 0x1d3   :  { %v6577_v3 = vld [vmem:[%s9897_s1 + $0xf2c] sm:$0xf0] }
 0x1d4   :  { %v5181_v10 = vld [vmem:[%s9897_s1 + $0x8d0] sm:$0xf]  ;;  %v5982_v15 = vor.u32 %v6577_v3, %v5981_v57  ;;  %3635 = vmatpush.bf16.msrb.mxu2 %v5726_v9  ;;  %v3396_v3 = vpop.f32.mrf.mxu3  ;;  %v6213_v9 = vld [vmem:[%s9897_s1 + $0x3d4] sm:$0xf] }
 0x1d5   :  { %v6377_v12 = vld [vmem:[%s9897_s1 + $0x8ec] sm:$0xf0]  ;;  %v6117_v3 = vld [vmem:[%s9897_s1 + $0xd4] sm:$0xf] }
 0x1d6   :  { %v5437_v13 = vld [vmem:[%s9897_s1 + $0xad0] sm:$0xf]  ;;  %v5182_v24 = vor.u32 %v6377_v12, %v5181_v10  ;;  %3648 = vmatpush.bf16.msrb.mxu3 %v5982_v15  ;;  %v4543_v12 = vld [vmem:[%s9897_s1 + $0x3f0] sm:$0xf0] }
 0x1d7   :  { %v6441_v16 = vld [vmem:[%s9897_s1 + $0xaec] sm:$0xf0]  ;;  %v4799_v15 = vld [vmem:[%s9897_s1 + $0x5f0] sm:$0xf0] }
 0x1d8   :  { %v5693_v18 = vld [vmem:[%s9897_s1 + $0xcd0] sm:$0xf]  ;;  %v5438_v25 = vor.u32 %v6441_v16, %v5437_v13  ;;  %3610 = vmatpush.bf16.msrb.mxu0 %v5182_v24  ;;  %v6277_v13 = vld [vmem:[%s9897_s1 + $0x5d4] sm:$0xf]  ;;  %v4290_v24 = vor.u32 %v6149_v5, %v4287_v8 }
 0x1d9   :  { %v6505_v19 = vld [vmem:[%s9897_s1 + $0xcec] sm:$0xf0]  ;;  %v4159_v5 = vld [vmem:[%s9897_s1 + $0xf0] sm:$0xf0] }
 0x1da   :  { %v5949_v22 = vld [vmem:[%s9897_s1 + $0xed0] sm:$0xf]  ;;  %v5694_v26 = vor.u32 %v6505_v19, %v5693_v18  ;;  %3623 = vmatpush.bf16.msrb.mxu1 %v5438_v25  ;;  %v6341_v19 = vld [vmem:[%s9897_s1 + $0x7d4] sm:$0xf]  ;;  %v4546_v25 = vor.u32 %v6213_v9, %v4543_v12 }
 0x1db   :  { %v6569_v23 = vld [vmem:[%s9897_s1 + $0xeec] sm:$0xf0]  ;;  %v6181_v8 = vld [vmem:[%s9897_s1 + $0x2d4] sm:$0xf] }
 0x1dc   :  { %v5149_v27 = vld [vmem:[%s9897_s1 + $0x890] sm:$0xf]  ;;  %v5950_v31 = vor.u32 %v6569_v23, %v5949_v22  ;;  %3636 = vmatpush.bf16.msrb.mxu2 %v5694_v26  ;;  %v5055_v22 = vld [vmem:[%s9897_s1 + $0x7f0] sm:$0xf0]  ;;  %v4802_v26 = vor.u32 %v6277_v13, %v4799_v15 }
 0x1dd   :  { %v6369_v28 = vld [vmem:[%s9897_s1 + $0x8ac] sm:$0xf0]  ;;  %v4415_v13 = vld [vmem:[%s9897_s1 + $0x2f0] sm:$0xf0] }
 0x1de   :  { %v5405_v29 = vld [vmem:[%s9897_s1 + $0xa90] sm:$0xf]  ;;  %v5150_v40 = vor.u32 %v6369_v28, %v5149_v27  ;;  %3649 = vmatpush.bf16.msrb.mxu3 %v5950_v31  ;;  %v3369_v27 = vadd.f32 %v8556_v14, %v8545_v7  ;;  %v6141_v28 = vld [vmem:[%s9897_s1 + $0x194] sm:$0xf] }
 0x1df   :  { %v6433_v33 = vld [vmem:[%s9897_s1 + $0xaac] sm:$0xf0]  ;;  %v6205_v31 = vld [vmem:[%s9897_s1 + $0x394] sm:$0xf] }
 0x1e0   :  { %v5661_v35 = vld [vmem:[%s9897_s1 + $0xc90] sm:$0xf]  ;;  %v5406_v45 = vor.u32 %v6433_v33, %v5405_v29  ;;  %3611 = vmatpush.bf16.msrb.mxu0 %v5150_v40  ;;  %v4255_v29 = vld [vmem:[%s9897_s1 + $0x1b0] sm:$0xf0]  ;;  %v5058_v33 = vor.u32 %v6341_v19, %v5055_v22 }
 0x1e1   :  { %v6497_v36 = vld [vmem:[%s9897_s1 + $0xcac] sm:$0xf0]  ;;  %v6269_v7 = vld [vmem:[%s9897_s1 + $0x594] sm:$0xf] }
 0x1e2   :  { %v5917_v11 = vld [vmem:[%s9897_s1 + $0xe90] sm:$0xf]  ;;  %v5662_v46 = vor.u32 %v6497_v36, %v5661_v35  ;;  %3624 = vmatpush.bf16.msrb.mxu1 %v5406_v45  ;;  %v4511_v35 = vld [vmem:[%s9897_s1 + $0x3b0] sm:$0xf0]  ;;  %v3382_v45 = vadd.f32 %v8582_v30, %v3369_v27 }
 0x1e3   :  { %v6561_v17 = vld [vmem:[%s9897_s1 + $0xeac] sm:$0xf0]  ;;  %v4767_v14 = vld [vmem:[%s9897_s1 + $0x5b0] sm:$0xf0]  ;;  %v4514_v40 = vor.u32 %v6205_v31, %v4511_v35 }
 0x1e4   :  { %v5117_v47 = vld [vmem:[%s9897_s1 + $0x850] sm:$0xf]  ;;  %v5918_v51 = vor.u32 %v6561_v17, %v5917_v11  ;;  %3637 = vmatpush.bf16.msrb.mxu2 %v5662_v46  ;;  %v6333_v36 = vld [vmem:[%s9897_s1 + $0x794] sm:$0xf]  ;;  %v4258_v17 = vor.u32 %v6141_v28, %v4255_v29  ;;  %v4770_v43 = vor.u32 %v6269_v7, %v4767_v14  ;;  %v3433_v29 = vpop.f32.mrf.mxu2 }
 0x1e5   :  { %v6361_v48 = vld [vmem:[%s9897_s1 + $0x86c] sm:$0xf0]  ;;  %v5023_v11 = vld [vmem:[%s9897_s1 + $0x7b0] sm:$0xf0] }
 0x1e6   :  { %v5373_v49 = vld [vmem:[%s9897_s1 + $0xa50] sm:$0xf]  ;;  %v5118_v34 = vor.u32 %v6361_v48, %v5117_v47  ;;  %3650 = vmatpush.bf16.msrb.mxu3 %v5918_v51  ;;  %v6133_v46 = vld [vmem:[%s9897_s1 + $0x154] sm:$0xf] }
 0x1e7   :  { %v6425_v53 = vld [vmem:[%s9897_s1 + $0xa6c] sm:$0xf0]  ;;  %v4223_v47 = vld [vmem:[%s9897_s1 + $0x170] sm:$0xf0] }
 0x1e8   :  { %v5629_v32 = vld [vmem:[%s9897_s1 + $0xc50] sm:$0xf]  ;;  %v5374_v59 = vor.u32 %v6425_v53, %v5373_v49  ;;  %3612 = vmatpush.bf16.msrb.mxu0 %v5118_v34  ;;  %v6197_v48 = vld [vmem:[%s9897_s1 + $0x354] sm:$0xf]  ;;  %v5026_v49 = vor.u32 %v6333_v36, %v5023_v11  ;;  %v3446_v36 = vpop.f32.mrf.mxu3 }
 0x1e9   :  { %v6489_v52 = vld [vmem:[%s9897_s1 + $0xc6c] sm:$0xf0]  ;;  %v4479_v30 = vld [vmem:[%s9897_s1 + $0x370] sm:$0xf0] }
 0x1ea   :  { %v5885_v54 = vld [vmem:[%s9897_s1 + $0xe50] sm:$0xf]  ;;  %v5630_v60 = vor.u32 %v6489_v52, %v5629_v32  ;;  %3625 = vmatpush.bf16.msrb.mxu1 %v5374_v59  ;;  %v4735_v51 = vld [vmem:[%s9897_s1 + $0x570] sm:$0xf0]  ;;  %v4226_v52 = vor.u32 %v6133_v46, %v4223_v47 }
 0x1eb   :  { %v6553_v55 = vld [vmem:[%s9897_s1 + $0xe6c] sm:$0xf0]  ;;  %v6325_v53 = vld [vmem:[%s9897_s1 + $0x754] sm:$0xf]  ;;  %v4738_v34 = vor.u32 %v6261_v50, %v4735_v51 }
 0x1ec   :  { %v5085_v56 = vld [vmem:[%s9897_s1 + $0x810] sm:$0xf]  ;;  %v5886_v1 = vor.u32 %v6553_v55, %v5885_v54  ;;  %3638 = vmatpush.bf16.msrb.mxu2 %v5630_v60  ;;  %v4991_v32 = vld [vmem:[%s9897_s1 + $0x770] sm:$0xf0]  ;;  %v3395_v54 = vadd.f32 %v8593_v37, %v3382_v45  ;;  %v4482_v55 = vor.u32 %v6197_v48, %v4479_v30  ;;  %v8804_v45 = vld [vmem:[%s9899_s2] sm:$0xff] }
 0x1ed   :  { %v6353_v58 = vld [vmem:[%s9897_s1 + $0x82c] sm:$0xf0]  ;;  %v6189_v59 = vld [vmem:[%s9897_s1 + $0x314] sm:$0xf]  ;;  %v4994_v60 = vor.u32 %v6325_v53, %v4991_v32  ;;  %v4001_v46 = vperm.slane %v8804_v45, 2 }
 0x1ee   :  { %v5341_v61 = vld [vmem:[%s9897_s1 + $0xa10] sm:$0xf]  ;;  %v5086_v10 = vor.u32 %v6353_v58, %v5085_v56  ;;  %3651 = vmatpush.bf16.msrb.mxu3 %v5886_v1  ;;  %v6125_v56 = vld [vmem:[%s9897_s1 + $0x114] sm:$0xf] }
 0x1ef   :  { %v6417_v62 = vld [vmem:[%s9897_s1 + $0xa2c] sm:$0xf0]  ;;  %v4191_v58 = vld [vmem:[%s9897_s1 + $0x130] sm:$0xf0] }
 0x1f0   :  { %v5597_v63 = vld [vmem:[%s9897_s1 + $0xc10] sm:$0xf]  ;;  %v5342_v16 = vor.u32 %v6417_v62, %v5341_v61  ;;  %3613 = vmatpush.bf16.msrb.mxu0 %v5086_v10  ;;  %v4447_v37 = vld [vmem:[%s9897_s1 + $0x330] sm:$0xf0]  ;;  %v4194_v1 = vor.u32 %v6125_v56, %v4191_v58  ;;  %v3420_v10 = vpop.f32.mrf.mxu1 }
 0x1f1   :  { %v6481_v39 = vld [vmem:[%s9897_s1 + $0xc2c] sm:$0xf0]  ;;  %v6253_v61 = vld [vmem:[%s9897_s1 + $0x514] sm:$0xf] }
 0x1f2   :  { %v5853_v2 = vld [vmem:[%s9897_s1 + $0xe10] sm:$0xf]  ;;  %v5598_v18 = vor.u32 %v6481_v39, %v5597_v63  ;;  %3626 = vmatpush.bf16.msrb.mxu1 %v5342_v16  ;;  %v4703_v62 = vld [vmem:[%s9897_s1 + $0x530] sm:$0xf0]  ;;  %v3407_v39 = vpop.f32.mrf.mxu0 }
 0x1f3   :  { %v6545_v57 = vld [vmem:[%s9897_s1 + $0xe2c] sm:$0xf0]  ;;  %3614 = vmatmul.bf16.vlgmr.msrb.gmra.mxu0 %v7084_v41  ;;  %v6317_v63 = vld [vmem:[%s9897_s1 + $0x714] sm:$0xf]  ;;  %v3408_v9 = vadd.f32 %v3407_v39, %v3395_v54 }
 0x1f4   :  { %v5854_v23 = vor.u32 %v6545_v57, %v5853_v2  ;;  %3639 = vmatpush.bf16.msrb.mxu2 %v5598_v18  ;;  %3658 = vmatpush.bf16.msra.mxu0 %v4290_v24  ;;  %v4450_v2 = vor.u32 %v6189_v59, %v4447_v37  ;;  %v4706_v57 = vor.u32 %v6253_v61, %v4703_v62  ;;  %v6245_v15 = vld [vmem:[%s9897_s1 + $0x4d4] sm:$0xf] }
 0x1f5   :  { %3627 = vmatmul.bf16.vlgmr.msrb.gmra.mxu1 %v7088_v44  ;;  %v4962_v12 = vor.u32 %v6317_v63, %v4959_v0  ;;  %v4671_v16 = vld [vmem:[%s9897_s1 + $0x4f0] sm:$0xf0]  ;;  %v3421_v22 = vadd.f32 %v3420_v10, %v3408_v9  ;;  %v4418_v24 = vor.u32 %v6181_v8, %v4415_v13  ;;  %v3448_v10 = vpop.f32.mrf.mxu3 }
 0x1f6   :  { %3652 = vmatpush.bf16.msrb.mxu3 %v5854_v23  ;;  %3671 = vmatpush.bf16.msra.mxu1 %v4546_v25  ;;  %v6309_v18 = vld [vmem:[%s9897_s1 + $0x6d4] sm:$0xf]  ;;  %v4162_v23 = vor.u32 %v6117_v3, %v4159_v5  ;;  %v4674_v25 = vor.u32 %v6245_v15, %v4671_v16 }
 0x1f7   :  { %3640 = vmatmul.bf16.vlgmr.msrb.gmra.mxu2 %v7076_v38  ;;  %v4927_v19 = vld [vmem:[%s9897_s1 + $0x6f0] sm:$0xf0]  ;;  %v3434_v14 = vadd.f32 %v3433_v29, %v3421_v22 }
 0x1f8   :  { %3684 = vmatpush.bf16.msra.mxu2 %v4802_v26  ;;  %3659 = vmatpush.bf16.msra.mxu0 %v4258_v17  ;;  %v6109_v26 = vld [vmem:[%s9897_s1 + $0x94] sm:$0xf]  ;;  %v4930_v31 = vor.u32 %v6309_v18, %v4927_v19  ;;  %v3422_v53 = vpop.f32.mrf.mxu1 }
 0x1f9   :  { %3653 = vmatmul.bf16.vlgmr.msrb.gmra.mxu3 %v7086_v42  ;;  %v4127_v27 = vld [vmem:[%s9897_s1 + $0xb0] sm:$0xf0] }
 0x1fa   :  { %3697 = vmatpush.bf16.msra.mxu3 %v5058_v33  ;;  %3672 = vmatpush.bf16.msra.mxu1 %v4514_v40  ;;  %v6173_v28 = vld [vmem:[%s9897_s1 + $0x294] sm:$0xf]  ;;  %v4130_v40 = vor.u32 %v6109_v26, %v4127_v27  ;;  %v3409_v47 = vpop.f32.mrf.mxu0 }
 0x1fb   :  { %v4383_v33 = vld [vmem:[%s9897_s1 + $0x2b0] sm:$0xf0] }
 0x1fc   :  { %3685 = vmatpush.bf16.msra.mxu2 %v4770_v43  ;;  %3660 = vmatpush.bf16.msra.mxu0 %v4226_v52  ;;  %v6237_v35 = vld [vmem:[%s9897_s1 + $0x494] sm:$0xf]  ;;  %v3447_v43 = vadd.f32 %v3446_v36, %v3434_v14  ;;  %v4386_v48 = vor.u32 %v6173_v28, %v4383_v33 }
 0x1fd   :  { %v4639_v7 = vld [vmem:[%s9897_s1 + $0x4b0] sm:$0xf0] }
 0x1fe   :  { %3698 = vmatpush.bf16.msra.mxu3 %v5026_v49  ;;  %3673 = vmatpush.bf16.msra.mxu1 %v4482_v55  ;;  %v6301_v11 = vld [vmem:[%s9897_s1 + $0x694] sm:$0xf]  ;;  %v4642_v49 = vor.u32 %v6237_v35, %v4639_v7  ;;  %v4017_v59 = vadd.f32 %v4001_v46, %v3447_v43 }
 0x1ff   :  { %v4895_v17 = vld [vmem:[%s9897_s1 + $0x6b0] sm:$0xf0] }
 0x200   :  { %3686 = vmatpush.bf16.msra.mxu2 %v4738_v34  ;;  %3661 = vmatpush.bf16.msra.mxu0 %v4194_v1  ;;  %v6101_v30 = vld [vmem:[%s9897_s1 + $0x54] sm:$0xf]  ;;  %v4898_v32 = vor.u32 %v6301_v11, %v4895_v17  ;;  %v4025_v3 = vmax.f32 %v4017_v59, 0.0  ;;  %v8969_v10 = vpop.f32.mrf.mxu1 }
 0x201   :  { %v4095_v50 = vld [vmem:[%s9897_s1 + $0x70] sm:$0xf0] }
 0x202   :  { %3699 = vmatpush.bf16.msra.mxu3 %v4994_v60  ;;  %3674 = vmatpush.bf16.msra.mxu1 %v4450_v2  ;;  %v6165_v51 = vld [vmem:[%s9897_s1 + $0x254] sm:$0xf]  ;;  %v4098_v60 = vor.u32 %v6101_v30, %v4095_v50  ;;  %4033 = vst [vmem:[%s9900_s3 + $0x10] sm:$0xff] %v4025_v3 }
 0x203   :  { %v4351_v52 = vld [vmem:[%s9897_s1 + $0x270] sm:$0xf0] }
 0x204   :  { %3687 = vmatpush.bf16.msra.mxu2 %v4706_v57  ;;  %3662 = vmatpush.bf16.msra.mxu0 %v4162_v23  ;;  %v6229_v54 = vld [vmem:[%s9897_s1 + $0x454] sm:$0xf]  ;;  %v4354_v63 = vor.u32 %v6165_v51, %v4351_v52  ;;  %v3435_v57 = vpop.f32.mrf.mxu2 }
 0x205   :  { %v4607_v55 = vld [vmem:[%s9897_s1 + $0x470] sm:$0xf0] }
 0x206   :  { %3700 = vmatpush.bf16.msra.mxu3 %v4962_v12  ;;  %3675 = vmatpush.bf16.msra.mxu1 %v4418_v24  ;;  %v6293_v34 = vld [vmem:[%s9897_s1 + $0x654] sm:$0xf]  ;;  %v4610_v0 = vor.u32 %v6229_v54, %v4607_v55 }
 0x207   :  { %v4863_v56 = vld [vmem:[%s9897_s1 + $0x670] sm:$0xf0] }
 0x208   :  { %3688 = vmatpush.bf16.msra.mxu2 %v4674_v25  ;;  %v6093_v58 = vld [vmem:[%s9897_s1 + $0x14] sm:$0xf]  ;;  %3663 = vmatpush.bf16.msra.mxu0 %v4130_v40  ;;  %v4866_v5 = vor.u32 %v6293_v34, %v4863_v56 }
 0x209   :  { %v4063_v37 = vld [vmem:[%s9897_s1 + $0x30] sm:$0xf0] }
 0x20a   :  { %3701 = vmatpush.bf16.msra.mxu3 %v4930_v31  ;;  %v6157_v61 = vld [vmem:[%s9897_s1 + $0x214] sm:$0xf]  ;;  %3676 = vmatpush.bf16.msra.mxu1 %v4386_v48  ;;  %v4066_v16 = vor.u32 %v6093_v58, %v4063_v37 }
 0x20b   :  { %v4319_v62 = vld [vmem:[%s9897_s1 + $0x230] sm:$0xf0] }
 0x20c   :  { %3689 = vmatpush.bf16.msra.mxu2 %v4642_v49  ;;  %v6221_v1 = vld [vmem:[%s9897_s1 + $0x414] sm:$0xf]  ;;  %3664 = vmatpush.bf16.msra.mxu0 %v4098_v60  ;;  %v4322_v22 = vor.u32 %v6157_v61, %v4319_v62 }
 0x20d   :  { %v4575_v39 = vld [vmem:[%s9897_s1 + $0x430] sm:$0xf0] }
 0x20e   :  { %v6285_v2 = vld [vmem:[%s9897_s1 + $0x614] sm:$0xf]  ;;  %3702 = vmatpush.bf16.msra.mxu3 %v4898_v32  ;;  %3677 = vmatpush.bf16.msra.mxu1 %v4354_v63  ;;  %v4578_v23 = vor.u32 %v6221_v1, %v4575_v39 }
 0x20f   :  { %v4831_v8 = vld [vmem:[%s9897_s1 + $0x630] sm:$0xf0] }
 0x210   :  { %v6405_v9 = vld [vmem:[%s9897_s1 + $0x9d4] sm:$0xf]  ;;  %3690 = vmatpush.bf16.msra.mxu2 %v4610_v0  ;;  %v4834_v26 = vor.u32 %v6285_v2, %v4831_v8  ;;  %3665 = vmatpush.bf16.msra.mxu0 %v4066_v16  ;;  %v8958_v2 = vpop.f32.mrf.mxu0 }
 0x211   :  { %v5311_v12 = vld [vmem:[%s9897_s1 + $0x9f0] sm:$0xf0] }
 0x212   :  { %v6469_v13 = vld [vmem:[%s9897_s1 + $0xbd4] sm:$0xf]  ;;  %3703 = vmatpush.bf16.msra.mxu3 %v4866_v5  ;;  %v5314_v27 = vor.u32 %v6405_v9, %v5311_v12  ;;  %3678 = vmatpush.bf16.msra.mxu1 %v4322_v22 }
 0x213   :  { %v5567_v15 = vld [vmem:[%s9897_s1 + $0xbf0] sm:$0xf0]  ;;  %3666 = vmatmul.bf16.vlgmr.msra.gmra.mxu0 %v6925_v20 }
 0x214   :  { %v6533_v18 = vld [vmem:[%s9897_s1 + $0xdd4] sm:$0xf]  ;;  %v5570_v28 = vor.u32 %v6469_v13, %v5567_v15  ;;  %3691 = vmatpush.bf16.msra.mxu2 %v4578_v23  ;;  %3710 = vmatpush.bf16.msrb.mxu0 %v5314_v27 }
 0x215   :  { %v5823_v19 = vld [vmem:[%s9897_s1 + $0xdf0] sm:$0xf0]  ;;  %3679 = vmatmul.bf16.vlgmr.msra.gmra.mxu1 %v6928_v21 }
 0x216   :  { %v6597_v24 = vld [vmem:[%s9897_s1 + $0xfd4] sm:$0xf]  ;;  %v5826_v29 = vor.u32 %v6533_v18, %v5823_v19  ;;  %3704 = vmatpush.bf16.msra.mxu3 %v4834_v26  ;;  %3723 = vmatpush.bf16.msrb.mxu1 %v5570_v28  ;;  %v8995_v28 = vpop.f32.mrf.mxu2 }
 0x217   :  { %v6079_v25 = vld [vmem:[%s9897_s1 + $0xff0] sm:$0xf0]  ;;  %3692 = vmatmul.bf16.vlgmr.msra.gmra.mxu2 %v6893_v4 }
 0x218   :  { %v6397_v31 = vld [vmem:[%s9897_s1 + $0x994] sm:$0xf]  ;;  %v6082_v7 = vor.u32 %v6597_v24, %v6079_v25  ;;  %3736 = vmatpush.bf16.msrb.mxu2 %v5826_v29 }
 0x219   :  { %v5279_v33 = vld [vmem:[%s9897_s1 + $0x9b0] sm:$0xf0]  ;;  %3705 = vmatmul.bf16.vlgmr.msra.gmra.mxu3 %v6898_v6 }
 0x21a   :  { %v6461_v35 = vld [vmem:[%s9897_s1 + $0xb94] sm:$0xf]  ;;  %v5282_v43 = vor.u32 %v6397_v31, %v5279_v33  ;;  %3749 = vmatpush.bf16.msrb.mxu3 %v6082_v7  ;;  %v9006_v7 = vpop.f32.mrf.mxu3 }
 0x21b   :  { %v5535_v14 = vld [vmem:[%s9897_s1 + $0xbb0] sm:$0xf0] }
 0x21c   :  { %v6525_v36 = vld [vmem:[%s9897_s1 + $0xd94] sm:$0xf]  ;;  %v5538_v46 = vor.u32 %v6461_v35, %v5535_v14  ;;  %3711 = vmatpush.bf16.msrb.mxu0 %v5282_v43 }
 0x21d   :  { %v5791_v11 = vld [vmem:[%s9897_s1 + $0xdb0] sm:$0xf0] }
 0x21e   :  { %v6589_v17 = vld [vmem:[%s9897_s1 + $0xf94] sm:$0xf]  ;;  %v5794_v47 = vor.u32 %v6525_v36, %v5791_v11  ;;  %3724 = vmatpush.bf16.msrb.mxu1 %v5538_v46 }
 0x21f   :  { %v6047_v40 = vld [vmem:[%s9897_s1 + $0xfb0] sm:$0xf0] }
 0x220   :  { %v6389_v48 = vld [vmem:[%s9897_s1 + $0x954] sm:$0xf]  ;;  %v6050_v50 = vor.u32 %v6589_v17, %v6047_v40  ;;  %3737 = vmatpush.bf16.msrb.mxu2 %v5794_v47  ;;  %v3461_v17 = vpop.f32.mrf.mxu0 }
 0x221   :  { %v5247_v49 = vld [vmem:[%s9897_s1 + $0x970] sm:$0xf0] }
 0x222   :  { %v6453_v30 = vld [vmem:[%s9897_s1 + $0xb54] sm:$0xf]  ;;  %v5250_v55 = vor.u32 %v6389_v48, %v5247_v49  ;;  %3750 = vmatpush.bf16.msrb.mxu3 %v6050_v50  ;;  %v3474_v49 = vpop.f32.mrf.mxu1 }
 0x223   :  { %v5503_v51 = vld [vmem:[%s9897_s1 + $0xb70] sm:$0xf0] }
 0x224   :  { %v6517_v53 = vld [vmem:[%s9897_s1 + $0xd54] sm:$0xf]  ;;  %v5506_v34 = vor.u32 %v6453_v30, %v5503_v51  ;;  %3712 = vmatpush.bf16.msrb.mxu0 %v5250_v55 }
 0x225   :  { %v5759_v32 = vld [vmem:[%s9897_s1 + $0xd70] sm:$0xf0] }
 0x226   :  { %v6581_v52 = vld [vmem:[%s9897_s1 + $0xf54] sm:$0xf]  ;;  %v5762_v56 = vor.u32 %v6517_v53, %v5759_v32  ;;  %3725 = vmatpush.bf16.msrb.mxu1 %v5506_v34 }
 0x227   :  { %v6015_v54 = vld [vmem:[%s9897_s1 + $0xf70] sm:$0xf0] }
 0x228   :  { %v6381_v58 = vld [vmem:[%s9897_s1 + $0x914] sm:$0xf]  ;;  %v6018_v37 = vor.u32 %v6581_v52, %v6015_v54  ;;  %3738 = vmatpush.bf16.msrb.mxu2 %v5762_v56 }
 0x229   :  { %v5215_v59 = vld [vmem:[%s9897_s1 + $0x930] sm:$0xf0] }
 0x22a   :  { %v6445_v60 = vld [vmem:[%s9897_s1 + $0xb14] sm:$0xf]  ;;  %v5218_v39 = vor.u32 %v6381_v58, %v5215_v59  ;;  %3751 = vmatpush.bf16.msrb.mxu3 %v6018_v37 }
 0x22b   :  { %v5471_v61 = vld [vmem:[%s9897_s1 + $0xb30] sm:$0xf0] }
 0x22c   :  { %v6509_v62 = vld [vmem:[%s9897_s1 + $0xd14] sm:$0xf]  ;;  %v5474_v57 = vor.u32 %v6445_v60, %v5471_v61  ;;  %3713 = vmatpush.bf16.msrb.mxu0 %v5218_v39  ;;  %v3487_v61 = vpop.f32.mrf.mxu2  ;;  %v3500_v39 = vpop.f32.mrf.mxu3 }
 0x22d   :  { %v5727_v63 = vld [vmem:[%s9897_s1 + $0xd30] sm:$0xf0]  ;;  %v4965_v61 = vld [vmem:[%s9897_s1 + $0x718] sm:$0xf] }
 0x22e   :  { %v6573_v0 = vld [vmem:[%s9897_s1 + $0xf14] sm:$0xf]  ;;  %v5730_v3 = vor.u32 %v6509_v62, %v5727_v63  ;;  %3726 = vmatpush.bf16.msrb.mxu1 %v5474_v57  ;;  %v4293_v57 = vld [vmem:[%s9897_s1 + $0x1d8] sm:$0xf] }
 0x22f   :  { %v5983_v1 = vld [vmem:[%s9897_s1 + $0xf30] sm:$0xf0] }
 0x230   :  { %v6373_v5 = vld [vmem:[%s9897_s1 + $0x8d4] sm:$0xf]  ;;  %v5986_v12 = vor.u32 %v6573_v0, %v5983_v1  ;;  %3739 = vmatpush.bf16.msrb.mxu2 %v5730_v3  ;;  %v6154_v3 = vld [vmem:[%s9897_s1 + $0x1f4] sm:$0xf0] }
 0x231   :  { %v5183_v8 = vld [vmem:[%s9897_s1 + $0x8f0] sm:$0xf0] }
 0x232   :  { %v6437_v9 = vld [vmem:[%s9897_s1 + $0xad4] sm:$0xf]  ;;  %v5186_v22 = vor.u32 %v6373_v5, %v5183_v8  ;;  %3752 = vmatpush.bf16.msrb.mxu3 %v5986_v12  ;;  %v4549_v5 = vld [vmem:[%s9897_s1 + $0x3d8] sm:$0xf] }
 0x233   :  { %v5439_v13 = vld [vmem:[%s9897_s1 + $0xaf0] sm:$0xf0]  ;;  %v4805_v12 = vld [vmem:[%s9897_s1 + $0x5d8] sm:$0xf] }
 0x234   :  { %v6501_v15 = vld [vmem:[%s9897_s1 + $0xcd4] sm:$0xf]  ;;  %v5442_v23 = vor.u32 %v6437_v9, %v5439_v13  ;;  %3714 = vmatpush.bf16.msrb.mxu0 %v5186_v22  ;;  %v6218_v9 = vld [vmem:[%s9897_s1 + $0x3f4] sm:$0xf0] }
 0x235   :  { %v5695_v16 = vld [vmem:[%s9897_s1 + $0xcf0] sm:$0xf0]  ;;  %v6282_v13 = vld [vmem:[%s9897_s1 + $0x5f4] sm:$0xf0] }
 0x236   :  { %v6565_v18 = vld [vmem:[%s9897_s1 + $0xed4] sm:$0xf]  ;;  %v5698_v24 = vor.u32 %v6501_v15, %v5695_v16  ;;  %3727 = vmatpush.bf16.msrb.mxu1 %v5442_v23  ;;  %v4294_v23 = vor.u32 %v6154_v3, %v4293_v57  ;;  %v4165_v57 = vld [vmem:[%s9897_s1 + $0xd8] sm:$0xf] }
 0x237   :  { %v5951_v19 = vld [vmem:[%s9897_s1 + $0xef0] sm:$0xf0]  ;;  %v6122_v3 = vld [vmem:[%s9897_s1 + $0xf4] sm:$0xf0] }
 0x238   :  { %v6365_v25 = vld [vmem:[%s9897_s1 + $0x894] sm:$0xf]  ;;  %v5954_v29 = vor.u32 %v6565_v18, %v5951_v19  ;;  %3740 = vmatpush.bf16.msrb.mxu2 %v5698_v24  ;;  %v5061_v18 = vld [vmem:[%s9897_s1 + $0x7d8] sm:$0xf]  ;;  %v4550_v24 = vor.u32 %v6218_v9, %v4549_v5  ;;  %v3524_v9 = vpop.f32.mrf.mxu1 }
 0x239   :  { %v5151_v26 = vld [vmem:[%s9897_s1 + $0x8b0] sm:$0xf0]  ;;  %v6346_v19 = vld [vmem:[%s9897_s1 + $0x7f4] sm:$0xf0] }
 0x23a   :  { %v6429_v27 = vld [vmem:[%s9897_s1 + $0xa94] sm:$0xf]  ;;  %v5154_v11 = vor.u32 %v6365_v25, %v5151_v26  ;;  %3753 = vmatpush.bf16.msrb.mxu3 %v5954_v29  ;;  %v4806_v25 = vor.u32 %v6282_v13, %v4805_v12  ;;  %v3473_v26 = vadd.f32 %v8969_v10, %v8958_v2  ;;  %v6146_v29 = vld [vmem:[%s9897_s1 + $0x1b4] sm:$0xf0] }
 0x23b   :  { %v5407_v31 = vld [vmem:[%s9897_s1 + $0xab0] sm:$0xf0]  ;;  %v4773_v2 = vld [vmem:[%s9897_s1 + $0x598] sm:$0xf] }
 0x23c   :  { %v6493_v33 = vld [vmem:[%s9897_s1 + $0xc94] sm:$0xf]  ;;  %v5410_v40 = vor.u32 %v6429_v27, %v5407_v31  ;;  %3715 = vmatpush.bf16.msrb.mxu0 %v5154_v11  ;;  %v4261_v27 = vld [vmem:[%s9897_s1 + $0x198] sm:$0xf] }
 0x23d   :  { %v5663_v35 = vld [vmem:[%s9897_s1 + $0xcb0] sm:$0xf0]  ;;  %v4517_v31 = vld [vmem:[%s9897_s1 + $0x398] sm:$0xf]  ;;  %v4262_v11 = vor.u32 %v6146_v29, %v4261_v27 }
 0x23e   :  { %v6557_v14 = vld [vmem:[%s9897_s1 + $0xe94] sm:$0xf]  ;;  %v5666_v43 = vor.u32 %v6493_v33, %v5663_v35  ;;  %3728 = vmatpush.bf16.msrb.mxu1 %v5410_v40  ;;  %v5062_v33 = vor.u32 %v6346_v19, %v5061_v18  ;;  %v6210_v35 = vld [vmem:[%s9897_s1 + $0x3b4] sm:$0xf0] }
 0x23f   :  { %v5919_v36 = vld [vmem:[%s9897_s1 + $0xeb0] sm:$0xf0]  ;;  %v6274_v10 = vld [vmem:[%s9897_s1 + $0x5b4] sm:$0xf0]  ;;  %v4518_v17 = vor.u32 %v6210_v35, %v4517_v31  ;;  %v3537_v31 = vpop.f32.mrf.mxu2 }
 0x240   :  { %v6357_v46 = vld [vmem:[%s9897_s1 + $0x854] sm:$0xf]  ;;  %v5922_v30 = vor.u32 %v6557_v14, %v5919_v36  ;;  %3741 = vmatpush.bf16.msrb.mxu2 %v5666_v43  ;;  %v5029_v14 = vld [vmem:[%s9897_s1 + $0x798] sm:$0xf]  ;;  %v4774_v40 = vor.u32 %v6274_v10, %v4773_v2  ;;  %v3486_v43 = vadd.f32 %v8995_v28, %v3473_v26 }
 0x241   :  { %v5119_v47 = vld [vmem:[%s9897_s1 + $0x870] sm:$0xf0]  ;;  %v6338_v36 = vld [vmem:[%s9897_s1 + $0x7b4] sm:$0xf0] }
 0x242   :  { %v6421_v48 = vld [vmem:[%s9897_s1 + $0xa54] sm:$0xf]  ;;  %v5122_v54 = vor.u32 %v6357_v46, %v5119_v47  ;;  %3754 = vmatpush.bf16.msrb.mxu3 %v5922_v30  ;;  %v4229_v46 = vld [vmem:[%s9897_s1 + $0x158] sm:$0xf]  ;;  %v5030_v49 = vor.u32 %v6338_v36, %v5029_v14  ;;  %v3550_v36 = vpop.f32.mrf.mxu3 }
 0x243   :  { %v5375_v50 = vld [vmem:[%s9897_s1 + $0xa70] sm:$0xf0]  ;;  %v6138_v47 = vld [vmem:[%s9897_s1 + $0x174] sm:$0xf0] }
 0x244   :  { %v6485_v51 = vld [vmem:[%s9897_s1 + $0xc54] sm:$0xf]  ;;  %v5378_v56 = vor.u32 %v6421_v48, %v5375_v50  ;;  %3716 = vmatpush.bf16.msrb.mxu0 %v5122_v54  ;;  %v4485_v48 = vld [vmem:[%s9897_s1 + $0x358] sm:$0xf] }
 0x245   :  { %v5631_v53 = vld [vmem:[%s9897_s1 + $0xc70] sm:$0xf0]  ;;  %v6202_v28 = vld [vmem:[%s9897_s1 + $0x374] sm:$0xf0] }
 0x246   :  { %v6549_v32 = vld [vmem:[%s9897_s1 + $0xe54] sm:$0xf]  ;;  %v5634_v58 = vor.u32 %v6485_v51, %v5631_v53  ;;  %3729 = vmatpush.bf16.msrb.mxu1 %v5378_v56  ;;  %v4741_v30 = vld [vmem:[%s9897_s1 + $0x558] sm:$0xf]  ;;  %v4486_v54 = vor.u32 %v6202_v28, %v4485_v48 }
 0x247   :  { %v5887_v52 = vld [vmem:[%s9897_s1 + $0xe70] sm:$0xf0]  ;;  %v6266_v50 = vld [vmem:[%s9897_s1 + $0x574] sm:$0xf0] }
 0x248   :  { %v6349_v55 = vld [vmem:[%s9897_s1 + $0x814] sm:$0xf]  ;;  %v5890_v62 = vor.u32 %v6549_v32, %v5887_v52  ;;  %3742 = vmatpush.bf16.msrb.mxu2 %v5634_v58  ;;  %v4997_v51 = vld [vmem:[%s9897_s1 + $0x758] sm:$0xf]  ;;  %v4230_v32 = vor.u32 %v6138_v47, %v4229_v46  ;;  %v3499_v52 = vadd.f32 %v9006_v7, %v3486_v43  ;;  %v4002_v46 = vperm.slane %v8804_v45, 3 }
 0x249   :  { %v5087_v34 = vld [vmem:[%s9897_s1 + $0x830] sm:$0xf0]  ;;  %v6330_v53 = vld [vmem:[%s9897_s1 + $0x774] sm:$0xf0] }
 0x24a   :  { %v6413_v59 = vld [vmem:[%s9897_s1 + $0xa14] sm:$0xf]  ;;  %v5090_v8 = vor.u32 %v6349_v55, %v5087_v34  ;;  %3755 = vmatpush.bf16.msrb.mxu3 %v5890_v62  ;;  %v4742_v55 = vor.u32 %v6266_v50, %v4741_v30  ;;  %v4197_v34 = vld [vmem:[%s9897_s1 + $0x118] sm:$0xf] }
 0x24b   :  { %v5343_v60 = vld [vmem:[%s9897_s1 + $0xa30] sm:$0xf0]  ;;  %v6130_v56 = vld [vmem:[%s9897_s1 + $0x134] sm:$0xf0] }
 0x24c   :  { %v6477_v37 = vld [vmem:[%s9897_s1 + $0xc14] sm:$0xf]  ;;  %v5346_v15 = vor.u32 %v6413_v59, %v5343_v60  ;;  %3717 = vmatpush.bf16.msrb.mxu0 %v5090_v8  ;;  %v4453_v58 = vld [vmem:[%s9897_s1 + $0x318] sm:$0xf]  ;;  %v4998_v59 = vor.u32 %v6330_v53, %v4997_v51  ;;  %v3526_v51 = vpop.f32.mrf.mxu1 }
 0x24d   :  { %v5599_v63 = vld [vmem:[%s9897_s1 + $0xc30] sm:$0xf0]  ;;  %v6194_v7 = vld [vmem:[%s9897_s1 + $0x334] sm:$0xf0] }
 0x24e   :  { %v6541_v0 = vld [vmem:[%s9897_s1 + $0xe14] sm:$0xf]  ;;  %v5602_v16 = vor.u32 %v6477_v37, %v5599_v63  ;;  %3730 = vmatpush.bf16.msrb.mxu1 %v5346_v15  ;;  %v4709_v60 = vld [vmem:[%s9897_s1 + $0x518] sm:$0xf]  ;;  %v4198_v63 = vor.u32 %v6130_v56, %v4197_v34 }
 0x24f   :  { %v5855_v1 = vld [vmem:[%s9897_s1 + $0xe30] sm:$0xf0]  ;;  %3718 = vmatmul.bf16.vlgmr.msrb.gmra.mxu0 %v7084_v41  ;;  %v6258_v37 = vld [vmem:[%s9897_s1 + $0x534] sm:$0xf0] }
 0x250   :  { %v5858_v22 = vor.u32 %v6541_v0, %v5855_v1  ;;  %3743 = vmatpush.bf16.msrb.mxu2 %v5602_v16  ;;  %3762 = vmatpush.bf16.msra.mxu0 %v4294_v23  ;;  %v6322_v62 = vld [vmem:[%s9897_s1 + $0x734] sm:$0xf0]  ;;  %v3511_v0 = vpop.f32.mrf.mxu0  ;;  %v4454_v1 = vor.u32 %v6194_v7, %v4453_v58  ;;  %v4710_v39 = vor.u32 %v6258_v37, %v4709_v60 }
 0x251   :  { %3731 = vmatmul.bf16.vlgmr.msrb.gmra.mxu1 %v7088_v44  ;;  %v4421_v5 = vld [vmem:[%s9897_s1 + $0x2d8] sm:$0xf]  ;;  %v3512_v8 = vadd.f32 %v3511_v0, %v3499_v52  ;;  %v4966_v12 = vor.u32 %v6322_v62, %v4965_v61  ;;  %v4166_v23 = vor.u32 %v6122_v3, %v4165_v57 }
 0x252   :  { %3756 = vmatpush.bf16.msrb.mxu3 %v5858_v22  ;;  %3775 = vmatpush.bf16.msra.mxu1 %v4550_v24  ;;  %v6186_v13 = vld [vmem:[%s9897_s1 + $0x2f4] sm:$0xf0] }
 0x253   :  { %3744 = vmatmul.bf16.vlgmr.msrb.gmra.mxu2 %v7076_v38  ;;  %v4677_v15 = vld [vmem:[%s9897_s1 + $0x4d8] sm:$0xf]  ;;  %v3525_v22 = vadd.f32 %v3524_v9, %v3512_v8  ;;  %v4422_v24 = vor.u32 %v6186_v13, %v4421_v5  ;;  %v3552_v8 = vpop.f32.mrf.mxu3 }
 0x254   :  { %3788 = vmatpush.bf16.msra.mxu2 %v4806_v25  ;;  %3763 = vmatpush.bf16.msra.mxu0 %v4262_v11  ;;  %v6250_v16 = vld [vmem:[%s9897_s1 + $0x4f4] sm:$0xf0] }
 0x255   :  { %3757 = vmatmul.bf16.vlgmr.msrb.gmra.mxu3 %v7086_v42  ;;  %v4933_v18 = vld [vmem:[%s9897_s1 + $0x6d8] sm:$0xf]  ;;  %v4678_v25 = vor.u32 %v6250_v16, %v4677_v15  ;;  %v3538_v14 = vadd.f32 %v3537_v31, %v3525_v22 }
 0x256   :  { %3801 = vmatpush.bf16.msra.mxu3 %v5062_v33  ;;  %3776 = vmatpush.bf16.msra.mxu1 %v4518_v17  ;;  %v6314_v19 = vld [vmem:[%s9897_s1 + $0x6f4] sm:$0xf0] }
 0x257   :  { %v4133_v26 = vld [vmem:[%s9897_s1 + $0x98] sm:$0xf]  ;;  %v4934_v33 = vor.u32 %v6314_v19, %v4933_v18  ;;  %v3551_v43 = vadd.f32 %v3550_v36, %v3538_v14 }
 0x258   :  { %3789 = vmatpush.bf16.msra.mxu2 %v4774_v40  ;;  %3764 = vmatpush.bf16.msra.mxu0 %v4230_v32  ;;  %v6114_v27 = vld [vmem:[%s9897_s1 + $0xb4] sm:$0xf0]  ;;  %v3513_v47 = vpop.f32.mrf.mxu0 }
 0x259   :  { %v4389_v29 = vld [vmem:[%s9897_s1 + $0x298] sm:$0xf]  ;;  %v4134_v40 = vor.u32 %v6114_v27, %v4133_v26  ;;  %v4018_v56 = vadd.f32 %v4002_v46, %v3551_v43 }
 0x25a   :  { %3802 = vmatpush.bf16.msra.mxu3 %v5030_v49  ;;  %3777 = vmatpush.bf16.msra.mxu1 %v4486_v54  ;;  %v6178_v35 = vld [vmem:[%s9897_s1 + $0x2b4] sm:$0xf0] }
 0x25b   :  { %v4645_v2 = vld [vmem:[%s9897_s1 + $0x498] sm:$0xf]  ;;  %v4390_v48 = vor.u32 %v6178_v35, %v4389_v29 }
 0x25c   :  { %3790 = vmatpush.bf16.msra.mxu2 %v4742_v55  ;;  %3765 = vmatpush.bf16.msra.mxu0 %v4198_v63  ;;  %v6242_v10 = vld [vmem:[%s9897_s1 + $0x4b4] sm:$0xf0] }
 0x25d   :  { %v4901_v11 = vld [vmem:[%s9897_s1 + $0x698] sm:$0xf]  ;;  %v4646_v49 = vor.u32 %v6242_v10, %v4645_v2 }
 0x25e   :  { %3803 = vmatpush.bf16.msra.mxu3 %v4998_v59  ;;  %3778 = vmatpush.bf16.msra.mxu1 %v4454_v1  ;;  %v6306_v17 = vld [vmem:[%s9897_s1 + $0x6b4] sm:$0xf0]  ;;  %v3539_v1 = vpop.f32.mrf.mxu2 }
 0x25f   :  { %v4101_v28 = vld [vmem:[%s9897_s1 + $0x58] sm:$0xf]  ;;  %v4902_v45 = vor.u32 %v6306_v17, %v4901_v11 }
 0x260   :  { %3791 = vmatpush.bf16.msra.mxu2 %v4710_v39  ;;  %3766 = vmatpush.bf16.msra.mxu0 %v4166_v23  ;;  %v6106_v30 = vld [vmem:[%s9897_s1 + $0x74] sm:$0xf0]  ;;  %v4026_v39 = vmax.f32 %v4018_v56, 0.0 }
 0x261   :  { %v4357_v50 = vld [vmem:[%s9897_s1 + $0x258] sm:$0xf]  ;;  %v4102_v58 = vor.u32 %v6106_v30, %v4101_v28 }
 0x262   :  { %3804 = vmatpush.bf16.msra.mxu3 %v4966_v12  ;;  %3779 = vmatpush.bf16.msra.mxu1 %v4422_v24  ;;  %v6170_v53 = vld [vmem:[%s9897_s1 + $0x274] sm:$0xf0]  ;;  %4034 = vst [vmem:[%s9900_s3 + $0x18] sm:$0xff] %v4026_v39 }
 0x263   :  { %v4613_v32 = vld [vmem:[%s9897_s1 + $0x458] sm:$0xf]  ;;  %v4358_v37 = vor.u32 %v6170_v53, %v4357_v50 }
 0x264   :  { %3792 = vmatpush.bf16.msra.mxu2 %v4678_v25  ;;  %v6234_v52 = vld [vmem:[%s9897_s1 + $0x474] sm:$0xf0]  ;;  %3767 = vmatpush.bf16.msra.mxu0 %v4134_v40 }
 0x265   :  { %v4869_v54 = vld [vmem:[%s9897_s1 + $0x658] sm:$0xf]  ;;  %v4614_v61 = vor.u32 %v6234_v52, %v4613_v32 }
 0x266   :  { %3805 = vmatpush.bf16.msra.mxu3 %v4934_v33  ;;  %v6298_v55 = vld [vmem:[%s9897_s1 + $0x674] sm:$0xf0]  ;;  %3780 = vmatpush.bf16.msra.mxu1 %v4390_v48 }
 0x267   :  { %v4069_v34 = vld [vmem:[%s9897_s1 + $0x18] sm:$0xf]  ;;  %v4870_v57 = vor.u32 %v6298_v55, %v4869_v54 }
 0x268   :  { %v6098_v59 = vld [vmem:[%s9897_s1 + $0x34] sm:$0xf0]  ;;  %3793 = vmatpush.bf16.msra.mxu2 %v4646_v49  ;;  %3768 = vmatpush.bf16.msra.mxu0 %v4102_v58 }
 0x269   :  { %v4325_v7 = vld [vmem:[%s9897_s1 + $0x218] sm:$0xf]  ;;  %v4070_v15 = vor.u32 %v6098_v59, %v4069_v34 }
 0x26a   :  { %v6162_v60 = vld [vmem:[%s9897_s1 + $0x234] sm:$0xf0]  ;;  %3806 = vmatpush.bf16.msra.mxu3 %v4902_v45  ;;  %3781 = vmatpush.bf16.msra.mxu1 %v4358_v37 }
 0x26b   :  { %v4581_v62 = vld [vmem:[%s9897_s1 + $0x418] sm:$0xf]  ;;  %v4326_v19 = vor.u32 %v6162_v60, %v4325_v7 }
 0x26c   :  { %v6226_v63 = vld [vmem:[%s9897_s1 + $0x434] sm:$0xf0]  ;;  %3794 = vmatpush.bf16.msra.mxu2 %v4614_v61  ;;  %3769 = vmatpush.bf16.msra.mxu0 %v4070_v15 }
 0x26d   :  { %v4837_v0 = vld [vmem:[%s9897_s1 + $0x618] sm:$0xf]  ;;  %v4582_v22 = vor.u32 %v6226_v63, %v4581_v62  ;;  %v9366_v63 = vpop.f32.mrf.mxu0 }
 0x26e   :  { %v6290_v3 = vld [vmem:[%s9897_s1 + $0x634] sm:$0xf0]  ;;  %3807 = vmatpush.bf16.msra.mxu3 %v4870_v57  ;;  %3782 = vmatpush.bf16.msra.mxu1 %v4326_v19 }
 0x26f   :  { %v5317_v5 = vld [vmem:[%s9897_s1 + $0x9d8] sm:$0xf]  ;;  %v4838_v25 = vor.u32 %v6290_v3, %v4837_v0  ;;  %3770 = vmatmul.bf16.vlgmr.msra.gmra.mxu0 %v6925_v20 }
 0x270   :  { %v6410_v9 = vld [vmem:[%s9897_s1 + $0x9f4] sm:$0xf0]  ;;  %3795 = vmatpush.bf16.msra.mxu2 %v4582_v22 }
 0x271   :  { %v5573_v12 = vld [vmem:[%s9897_s1 + $0xbd8] sm:$0xf]  ;;  %v5318_v26 = vor.u32 %v6410_v9, %v5317_v5  ;;  %3783 = vmatmul.bf16.vlgmr.msra.gmra.mxu1 %v6928_v21  ;;  %v9377_v5 = vpop.f32.mrf.mxu1 }
 0x272   :  { %v6474_v13 = vld [vmem:[%s9897_s1 + $0xbf4] sm:$0xf0]  ;;  %3808 = vmatpush.bf16.msra.mxu3 %v4838_v25 }
 0x273   :  { %v5829_v16 = vld [vmem:[%s9897_s1 + $0xdd8] sm:$0xf]  ;;  %v5574_v27 = vor.u32 %v6474_v13, %v5573_v12  ;;  %3814 = vmatpush.bf16.msrb.mxu0 %v5318_v26  ;;  %3796 = vmatmul.bf16.vlgmr.msra.gmra.mxu2 %v6893_v4  ;;  %v9403_v26 = vpop.f32.mrf.mxu2 }
 0x274   :  { %v6538_v18 = vld [vmem:[%s9897_s1 + $0xdf4] sm:$0xf0] }
 0x275   :  { %v6085_v23 = vld [vmem:[%s9897_s1 + $0xfd8] sm:$0xf]  ;;  %v5830_v29 = vor.u32 %v6538_v18, %v5829_v16  ;;  %3827 = vmatpush.bf16.msrb.mxu1 %v5574_v27  ;;  %3809 = vmatmul.bf16.vlgmr.msra.gmra.mxu3 %v6898_v6 }
 0x276   :  { %v6602_v24 = vld [vmem:[%s9897_s1 + $0xff4] sm:$0xf0] }
 0x277   :  { %v5285_v31 = vld [vmem:[%s9897_s1 + $0x998] sm:$0xf]  ;;  %v6086_v2 = vor.u32 %v6602_v24, %v6085_v23  ;;  %3840 = vmatpush.bf16.msrb.mxu2 %v5830_v29 }
 0x278   :  { %v6402_v33 = vld [vmem:[%s9897_s1 + $0x9b4] sm:$0xf0] }
 0x279   :  { %v5541_v35 = vld [vmem:[%s9897_s1 + $0xb98] sm:$0xf]  ;;  %v5286_v40 = vor.u32 %v6402_v33, %v5285_v31  ;;  %3853 = vmatpush.bf16.msrb.mxu3 %v6086_v2 }
 0x27a   :  { %v6466_v10 = vld [vmem:[%s9897_s1 + $0xbb4] sm:$0xf0] }
 0x27b   :  { %v5797_v14 = vld [vmem:[%s9897_s1 + $0xd98] sm:$0xf]  ;;  %v5542_v43 = vor.u32 %v6466_v10, %v5541_v35  ;;  %3815 = vmatpush.bf16.msrb.mxu0 %v5286_v40  ;;  %v9414_v35 = vpop.f32.mrf.mxu3 }
 0x27c   :  { %v6530_v36 = vld [vmem:[%s9897_s1 + $0xdb4] sm:$0xf0] }
 0x27d   :  { %v6053_v11 = vld [vmem:[%s9897_s1 + $0xf98] sm:$0xf]  ;;  %v5798_v46 = vor.u32 %v6530_v36, %v5797_v14  ;;  %3828 = vmatpush.bf16.msrb.mxu1 %v5542_v43  ;;  %v3565_v36 = vpop.f32.mrf.mxu0 }
 0x27e   :  { %v6594_v17 = vld [vmem:[%s9897_s1 + $0xfb4] sm:$0xf0] }
 0x27f   :  { %v5253_v47 = vld [vmem:[%s9897_s1 + $0x958] sm:$0xf]  ;;  %v6054_v28 = vor.u32 %v6594_v17, %v6053_v11  ;;  %3841 = vmatpush.bf16.msrb.mxu2 %v5798_v46 }
 0x280   :  { %v6394_v48 = vld [vmem:[%s9897_s1 + $0x974] sm:$0xf0] }
 0x281   :  { %v5509_v49 = vld [vmem:[%s9897_s1 + $0xb58] sm:$0xf]  ;;  %v5254_v32 = vor.u32 %v6394_v48, %v5253_v47  ;;  %3854 = vmatpush.bf16.msrb.mxu3 %v6054_v28  ;;  %v3578_v47 = vpop.f32.mrf.mxu1 }
 0x282   :  { %v6458_v30 = vld [vmem:[%s9897_s1 + $0xb74] sm:$0xf0]  ;;  %v6262_v47 = vld [vmem:[%s9897_s1 + $0x55c] sm:$0xf] }
 0x283   :  { %v5765_v50 = vld [vmem:[%s9897_s1 + $0xd58] sm:$0xf]  ;;  %v5510_v52 = vor.u32 %v6458_v30, %v5509_v49  ;;  %3816 = vmatpush.bf16.msrb.mxu0 %v5254_v32 }
 0x284   :  { %v6522_v51 = vld [vmem:[%s9897_s1 + $0xd74] sm:$0xf0] }
 0x285   :  { %v6021_v45 = vld [vmem:[%s9897_s1 + $0xf58] sm:$0xf]  ;;  %v5766_v54 = vor.u32 %v6522_v51, %v5765_v50  ;;  %3829 = vmatpush.bf16.msrb.mxu1 %v5510_v52 }
 0x286   :  { %v6586_v53 = vld [vmem:[%s9897_s1 + $0xf74] sm:$0xf0] }
 0x287   :  { %v5221_v55 = vld [vmem:[%s9897_s1 + $0x918] sm:$0xf]  ;;  %v6022_v58 = vor.u32 %v6586_v53, %v6021_v45  ;;  %3842 = vmatpush.bf16.msrb.mxu2 %v5766_v54 }
 0x288   :  { %v6386_v34 = vld [vmem:[%s9897_s1 + $0x934] sm:$0xf0] }
 0x289   :  { %v5477_v56 = vld [vmem:[%s9897_s1 + $0xb18] sm:$0xf]  ;;  %v5222_v62 = vor.u32 %v6386_v34, %v5221_v55  ;;  %3855 = vmatpush.bf16.msrb.mxu3 %v6022_v58  ;;  %v3591_v58 = vpop.f32.mrf.mxu2 }
 0x28a   :  { %v6450_v59 = vld [vmem:[%s9897_s1 + $0xb34] sm:$0xf0]  ;;  %v4967_v58 = vld [vmem:[%s9897_s1 + $0x738] sm:$0xf0] }
 0x28b   :  { %v5733_v7 = vld [vmem:[%s9897_s1 + $0xd18] sm:$0xf]  ;;  %v5478_v0 = vor.u32 %v6450_v59, %v5477_v56  ;;  %3817 = vmatpush.bf16.msrb.mxu0 %v5222_v62  ;;  %v6150_v62 = vld [vmem:[%s9897_s1 + $0x1dc] sm:$0xf] }
 0x28c   :  { %v6514_v60 = vld [vmem:[%s9897_s1 + $0xd34] sm:$0xf0] }
 0x28d   :  { %v5989_v37 = vld [vmem:[%s9897_s1 + $0xf18] sm:$0xf]  ;;  %v5734_v1 = vor.u32 %v6514_v60, %v5733_v7  ;;  %3830 = vmatpush.bf16.msrb.mxu1 %v5478_v0  ;;  %v4295_v0 = vld [vmem:[%s9897_s1 + $0x1f8] sm:$0xf0] }
 0x28e   :  { %v6578_v61 = vld [vmem:[%s9897_s1 + $0xf34] sm:$0xf0] }
 0x28f   :  { %v5189_v39 = vld [vmem:[%s9897_s1 + $0x8d8] sm:$0xf]  ;;  %v5990_v8 = vor.u32 %v6578_v61, %v5989_v37  ;;  %3843 = vmatpush.bf16.msrb.mxu2 %v5734_v1  ;;  %v3604_v61 = vpop.f32.mrf.mxu3  ;;  %v6214_v1 = vld [vmem:[%s9897_s1 + $0x3dc] sm:$0xf] }
 0x290   :  { %v6378_v57 = vld [vmem:[%s9897_s1 + $0x8f4] sm:$0xf0]  ;;  %v6118_v61 = vld [vmem:[%s9897_s1 + $0xdc] sm:$0xf] }
 0x291   :  { %v5445_v3 = vld [vmem:[%s9897_s1 + $0xad8] sm:$0xf]  ;;  %v5190_v18 = vor.u32 %v6378_v57, %v5189_v39  ;;  %3856 = vmatpush.bf16.msrb.mxu3 %v5990_v8  ;;  %v4551_v57 = vld [vmem:[%s9897_s1 + $0x3f8] sm:$0xf0] }
 0x292   :  { %v6442_v9 = vld [vmem:[%s9897_s1 + $0xaf4] sm:$0xf0]  ;;  %v4807_v8 = vld [vmem:[%s9897_s1 + $0x5f8] sm:$0xf0] }
 0x293   :  { %v5701_v12 = vld [vmem:[%s9897_s1 + $0xcd8] sm:$0xf]  ;;  %v5446_v19 = vor.u32 %v6442_v9, %v5445_v3  ;;  %3818 = vmatpush.bf16.msrb.mxu0 %v5190_v18  ;;  %v6278_v3 = vld [vmem:[%s9897_s1 + $0x5dc] sm:$0xf]  ;;  %v4298_v18 = vor.u32 %v6150_v62, %v4295_v0 }
 0x294   :  { %v6506_v13 = vld [vmem:[%s9897_s1 + $0xcf4] sm:$0xf0]  ;;  %v4167_v62 = vld [vmem:[%s9897_s1 + $0xf8] sm:$0xf0] }
 0x295   :  { %v5957_v15 = vld [vmem:[%s9897_s1 + $0xed8] sm:$0xf]  ;;  %v5702_v22 = vor.u32 %v6506_v13, %v5701_v12  ;;  %3831 = vmatpush.bf16.msrb.mxu1 %v5446_v19  ;;  %v6342_v13 = vld [vmem:[%s9897_s1 + $0x7dc] sm:$0xf]  ;;  %v4554_v19 = vor.u32 %v6214_v1, %v4551_v57 }
 0x296   :  { %v6570_v16 = vld [vmem:[%s9897_s1 + $0xef4] sm:$0xf0]  ;;  %v6182_v0 = vld [vmem:[%s9897_s1 + $0x2dc] sm:$0xf] }
 0x297   :  { %v5157_v23 = vld [vmem:[%s9897_s1 + $0x898] sm:$0xf]  ;;  %v5958_v27 = vor.u32 %v6570_v16, %v5957_v15  ;;  %3844 = vmatpush.bf16.msrb.mxu2 %v5702_v22  ;;  %v5063_v15 = vld [vmem:[%s9897_s1 + $0x7f8] sm:$0xf0]  ;;  %v4810_v22 = vor.u32 %v6278_v3, %v4807_v8 }
 0x298   :  { %v6370_v24 = vld [vmem:[%s9897_s1 + $0x8b4] sm:$0xf0]  ;;  %v4423_v3 = vld [vmem:[%s9897_s1 + $0x2f8] sm:$0xf0] }
 0x299   :  { %v5413_v25 = vld [vmem:[%s9897_s1 + $0xa98] sm:$0xf]  ;;  %v5158_v14 = vor.u32 %v6370_v24, %v5157_v23  ;;  %3857 = vmatpush.bf16.msrb.mxu3 %v5958_v27  ;;  %v3577_v23 = vadd.f32 %v9377_v5, %v9366_v63  ;;  %v6142_v24 = vld [vmem:[%s9897_s1 + $0x19c] sm:$0xf] }
 0x29a   :  { %v6434_v29 = vld [vmem:[%s9897_s1 + $0xab4] sm:$0xf0]  ;;  %v6206_v27 = vld [vmem:[%s9897_s1 + $0x39c] sm:$0xf] }
 0x29b   :  { %v5669_v31 = vld [vmem:[%s9897_s1 + $0xc98] sm:$0xf]  ;;  %v5414_v11 = vor.u32 %v6434_v29, %v5413_v25  ;;  %3819 = vmatpush.bf16.msrb.mxu0 %v5158_v14  ;;  %v4263_v25 = vld [vmem:[%s9897_s1 + $0x1b8] sm:$0xf0]  ;;  %v5066_v29 = vor.u32 %v6342_v13, %v5063_v15 }
 0x29c   :  { %v6498_v33 = vld [vmem:[%s9897_s1 + $0xcb4] sm:$0xf0]  ;;  %v6270_v63 = vld [vmem:[%s9897_s1 + $0x59c] sm:$0xf] }
 0x29d   :  { %v5925_v2 = vld [vmem:[%s9897_s1 + $0xe98] sm:$0xf]  ;;  %v5670_v17 = vor.u32 %v6498_v33, %v5669_v31  ;;  %3832 = vmatpush.bf16.msrb.mxu1 %v5414_v11  ;;  %v4519_v31 = vld [vmem:[%s9897_s1 + $0x3b8] sm:$0xf0]  ;;  %v3590_v11 = vadd.f32 %v9403_v26, %v3577_v23 }
 0x29e   :  { %v6562_v10 = vld [vmem:[%s9897_s1 + $0xeb4] sm:$0xf0]  ;;  %v4775_v5 = vld [vmem:[%s9897_s1 + $0x5b8] sm:$0xf0]  ;;  %v4522_v14 = vor.u32 %v6206_v27, %v4519_v31 }
 0x29f   :  { %v5125_v40 = vld [vmem:[%s9897_s1 + $0x858] sm:$0xf]  ;;  %v5926_v48 = vor.u32 %v6562_v10, %v5925_v2  ;;  %3845 = vmatpush.bf16.msrb.mxu2 %v5670_v17  ;;  %v6334_v33 = vld [vmem:[%s9897_s1 + $0x79c] sm:$0xf]  ;;  %v4266_v10 = vor.u32 %v6142_v24, %v4263_v25  ;;  %v4778_v36 = vor.u32 %v6270_v63, %v4775_v5  ;;  %v3641_v25 = vpop.f32.mrf.mxu2 }
 0x2a0   :  { %v6362_v43 = vld [vmem:[%s9897_s1 + $0x874] sm:$0xf0]  ;;  %v5031_v2 = vld [vmem:[%s9897_s1 + $0x7b8] sm:$0xf0] }
 0x2a1   :  { %v5381_v46 = vld [vmem:[%s9897_s1 + $0xa58] sm:$0xf]  ;;  %v5126_v45 = vor.u32 %v6362_v43, %v5125_v40  ;;  %3858 = vmatpush.bf16.msrb.mxu3 %v5926_v48  ;;  %v6134_v17 = vld [vmem:[%s9897_s1 + $0x15c] sm:$0xf] }
 0x2a2   :  { %v6426_v49 = vld [vmem:[%s9897_s1 + $0xa74] sm:$0xf0]  ;;  %v4231_v40 = vld [vmem:[%s9897_s1 + $0x178] sm:$0xf0] }
 0x2a3   :  { %v5637_v28 = vld [vmem:[%s9897_s1 + $0xc58] sm:$0xf]  ;;  %v5382_v52 = vor.u32 %v6426_v49, %v5381_v46  ;;  %3820 = vmatpush.bf16.msrb.mxu0 %v5126_v45  ;;  %v6198_v43 = vld [vmem:[%s9897_s1 + $0x35c] sm:$0xf]  ;;  %v5034_v46 = vor.u32 %v6334_v33, %v5031_v2  ;;  %v3654_v33 = vpop.f32.mrf.mxu3 }
 0x2a4   :  { %v6490_v30 = vld [vmem:[%s9897_s1 + $0xc74] sm:$0xf0]  ;;  %v4487_v26 = vld [vmem:[%s9897_s1 + $0x378] sm:$0xf0] }
 0x2a5   :  { %v5893_v50 = vld [vmem:[%s9897_s1 + $0xe58] sm:$0xf]  ;;  %v5638_v54 = vor.u32 %v6490_v30, %v5637_v28  ;;  %3833 = vmatpush.bf16.msrb.mxu1 %v5382_v52  ;;  %v4743_v48 = vld [vmem:[%s9897_s1 + $0x578] sm:$0xf0]  ;;  %v4234_v30 = vor.u32 %v6134_v17, %v4231_v40 }
 0x2a6   :  { %v6554_v51 = vld [vmem:[%s9897_s1 + $0xe74] sm:$0xf0]  ;;  %v6326_v49 = vld [vmem:[%s9897_s1 + $0x75c] sm:$0xf]  ;;  %v4746_v45 = vor.u32 %v6262_v47, %v4743_v48 }
 0x2a7   :  { %v5093_v53 = vld [vmem:[%s9897_s1 + $0x818] sm:$0xf]  ;;  %v5894_v59 = vor.u32 %v6554_v51, %v5893_v50  ;;  %3846 = vmatpush.bf16.msrb.mxu2 %v5638_v54  ;;  %v4999_v28 = vld [vmem:[%s9897_s1 + $0x778] sm:$0xf0]  ;;  %v3603_v50 = vadd.f32 %v9414_v35, %v3590_v11  ;;  %v4490_v51 = vor.u32 %v6198_v43, %v4487_v26  ;;  %v9625_v11 = vld [vmem:[%s9899_s2] sm:$0xff] }
 0x2a8   :  { %v6354_v32 = vld [vmem:[%s9897_s1 + $0x834] sm:$0xf0]  ;;  %v6190_v52 = vld [vmem:[%s9897_s1 + $0x31c] sm:$0xf]  ;;  %v5002_v54 = vor.u32 %v6326_v49, %v4999_v28  ;;  %v4003_v17 = vperm.slane %v9625_v11, 4 }
 0x2a9   :  { %v5349_v55 = vld [vmem:[%s9897_s1 + $0xa18] sm:$0xf]  ;;  %v5094_v39 = vor.u32 %v6354_v32, %v5093_v53  ;;  %3859 = vmatpush.bf16.msrb.mxu3 %v5894_v59  ;;  %v6126_v53 = vld [vmem:[%s9897_s1 + $0x11c] sm:$0xf] }
 0x2aa   :  { %v6418_v34 = vld [vmem:[%s9897_s1 + $0xa34] sm:$0xf0]  ;;  %v4199_v32 = vld [vmem:[%s9897_s1 + $0x138] sm:$0xf0] }
 0x2ab   :  { %v5605_v56 = vld [vmem:[%s9897_s1 + $0xc18] sm:$0xf]  ;;  %v5350_v9 = vor.u32 %v6418_v34, %v5349_v55  ;;  %3821 = vmatpush.bf16.msrb.mxu0 %v5094_v39  ;;  %v4455_v35 = vld [vmem:[%s9897_s1 + $0x338] sm:$0xf0]  ;;  %v4202_v59 = vor.u32 %v6126_v53, %v4199_v32  ;;  %v3628_v39 = vpop.f32.mrf.mxu1 }
 0x2ac   :  { %v6482_v7 = vld [vmem:[%s9897_s1 + $0xc34] sm:$0xf0]  ;;  %v6254_v55 = vld [vmem:[%s9897_s1 + $0x51c] sm:$0xf] }
 0x2ad   :  { %v5861_v60 = vld [vmem:[%s9897_s1 + $0xe18] sm:$0xf]  ;;  %v5606_v12 = vor.u32 %v6482_v7, %v5605_v56  ;;  %3834 = vmatpush.bf16.msrb.mxu1 %v5350_v9  ;;  %v4711_v34 = vld [vmem:[%s9897_s1 + $0x538] sm:$0xf0]  ;;  %v3615_v7 = vpop.f32.mrf.mxu0 }
 0x2ae   :  { %v6546_v37 = vld [vmem:[%s9897_s1 + $0xe34] sm:$0xf0]  ;;  %3822 = vmatmul.bf16.vlgmr.msrb.gmra.mxu0 %v7084_v41  ;;  %v6318_v56 = vld [vmem:[%s9897_s1 + $0x71c] sm:$0xf]  ;;  %v3616_v1 = vadd.f32 %v3615_v7, %v3603_v50 }
 0x2af   :  { %v5862_v16 = vor.u32 %v6546_v37, %v5861_v60  ;;  %3847 = vmatpush.bf16.msrb.mxu2 %v5606_v12  ;;  %3866 = vmatpush.bf16.msra.mxu0 %v4298_v18  ;;  %v4458_v60 = vor.u32 %v6190_v52, %v4455_v35  ;;  %v4714_v37 = vor.u32 %v6254_v55, %v4711_v34  ;;  %v6246_v8 = vld [vmem:[%s9897_s1 + $0x4dc] sm:$0xf] }
 0x2b0   :  { %3835 = vmatmul.bf16.vlgmr.msrb.gmra.mxu1 %v7088_v44  ;;  %v4970_v57 = vor.u32 %v6318_v56, %v4967_v58  ;;  %v4679_v9 = vld [vmem:[%s9897_s1 + $0x4f8] sm:$0xf0]  ;;  %v3629_v15 = vadd.f32 %v3628_v39, %v3616_v1  ;;  %v4426_v18 = vor.u32 %v6182_v0, %v4423_v3  ;;  %v3656_v39 = vpop.f32.mrf.mxu3 }
 0x2b1   :  { %3860 = vmatpush.bf16.msrb.mxu3 %v5862_v16  ;;  %3879 = vmatpush.bf16.msra.mxu1 %v4554_v19  ;;  %v6310_v12 = vld [vmem:[%s9897_s1 + $0x6dc] sm:$0xf]  ;;  %v4170_v16 = vor.u32 %v6118_v61, %v4167_v62  ;;  %v4682_v19 = vor.u32 %v6246_v8, %v4679_v9 }
 0x2b2   :  { %3848 = vmatmul.bf16.vlgmr.msrb.gmra.mxu2 %v7076_v38  ;;  %v4935_v13 = vld [vmem:[%s9897_s1 + $0x6f8] sm:$0xf0]  ;;  %v3642_v5 = vadd.f32 %v3641_v25, %v3629_v15 }
 0x2b3   :  { %3892 = vmatpush.bf16.msra.mxu2 %v4810_v22  ;;  %3867 = vmatpush.bf16.msra.mxu0 %v4266_v10  ;;  %v6110_v22 = vld [vmem:[%s9897_s1 + $0x9c] sm:$0xf]  ;;  %v4938_v27 = vor.u32 %v6310_v12, %v4935_v13  ;;  %v3630_v49 = vpop.f32.mrf.mxu1 }
 0x2b4   :  { %3861 = vmatmul.bf16.vlgmr.msrb.gmra.mxu3 %v7086_v42  ;;  %v4135_v23 = vld [vmem:[%s9897_s1 + $0xb8] sm:$0xf0] }
 0x2b5   :  { %3905 = vmatpush.bf16.msra.mxu3 %v5066_v29  ;;  %3880 = vmatpush.bf16.msra.mxu1 %v4522_v14  ;;  %v6174_v24 = vld [vmem:[%s9897_s1 + $0x29c] sm:$0xf]  ;;  %v4138_v14 = vor.u32 %v6110_v22, %v4135_v23  ;;  %v3617_v40 = vpop.f32.mrf.mxu0 }
 0x2b6   :  { %v4391_v29 = vld [vmem:[%s9897_s1 + $0x2b8] sm:$0xf0] }
 0x2b7   :  { %3893 = vmatpush.bf16.msra.mxu2 %v4778_v36  ;;  %3868 = vmatpush.bf16.msra.mxu0 %v4234_v30  ;;  %v6238_v31 = vld [vmem:[%s9897_s1 + $0x49c] sm:$0xf]  ;;  %v3655_v36 = vadd.f32 %v3654_v33, %v3642_v5  ;;  %v4394_v43 = vor.u32 %v6174_v24, %v4391_v29 }
 0x2b8   :  { %v4647_v63 = vld [vmem:[%s9897_s1 + $0x4b8] sm:$0xf0] }
 0x2b9   :  { %3906 = vmatpush.bf16.msra.mxu3 %v5034_v46  ;;  %3881 = vmatpush.bf16.msra.mxu1 %v4490_v51  ;;  %v6302_v2 = vld [vmem:[%s9897_s1 + $0x69c] sm:$0xf]  ;;  %v4650_v46 = vor.u32 %v6238_v31, %v4647_v63  ;;  %v4019_v52 = vadd.f32 %v4003_v17, %v3655_v36 }
 0x2ba   :  { %v4903_v10 = vld [vmem:[%s9897_s1 + $0x6b8] sm:$0xf0] }
 0x2bb   :  { %3894 = vmatpush.bf16.msra.mxu2 %v4746_v45  ;;  %3869 = vmatpush.bf16.msra.mxu0 %v4202_v59  ;;  %v6102_v26 = vld [vmem:[%s9897_s1 + $0x5c] sm:$0xf]  ;;  %v4906_v28 = vor.u32 %v6302_v2, %v4903_v10  ;;  %v4027_v61 = vmax.f32 %v4019_v52, 0.0 }
 0x2bc   :  { %v4103_v47 = vld [vmem:[%s9897_s1 + $0x78] sm:$0xf0] }
 0x2bd   :  { %3907 = vmatpush.bf16.msra.mxu3 %v5002_v54  ;;  %3882 = vmatpush.bf16.msra.mxu1 %v4458_v60  ;;  %v6166_v48 = vld [vmem:[%s9897_s1 + $0x25c] sm:$0xf]  ;;  %v4106_v54 = vor.u32 %v6102_v26, %v4103_v47  ;;  %4035 = vst [vmem:[%s9900_s3 + $0x20] sm:$0xff] %v4027_v61  ;;  %v9790_v61 = vpop.f32.mrf.mxu1 }
 0x2be   :  { %v4359_v30 = vld [vmem:[%s9897_s1 + $0x278] sm:$0xf0] }
 0x2bf   :  { %3895 = vmatpush.bf16.msra.mxu2 %v4714_v37  ;;  %3870 = vmatpush.bf16.msra.mxu0 %v4170_v16  ;;  %v6230_v50 = vld [vmem:[%s9897_s1 + $0x45c] sm:$0xf]  ;;  %v4362_v56 = vor.u32 %v6166_v48, %v4359_v30  ;;  %v3643_v37 = vpop.f32.mrf.mxu2 }
 0x2c0   :  { %v4615_v51 = vld [vmem:[%s9897_s1 + $0x478] sm:$0xf0] }
 0x2c1   :  { %3908 = vmatpush.bf16.msra.mxu3 %v4970_v57  ;;  %3883 = vmatpush.bf16.msra.mxu1 %v4426_v18  ;;  %v6294_v45 = vld [vmem:[%s9897_s1 + $0x65c] sm:$0xf]  ;;  %v4618_v58 = vor.u32 %v6230_v50, %v4615_v51 }
 0x2c2   :  { %v4871_v53 = vld [vmem:[%s9897_s1 + $0x678] sm:$0xf0] }
 0x2c3   :  { %3896 = vmatpush.bf16.msra.mxu2 %v4682_v19  ;;  %v6094_v32 = vld [vmem:[%s9897_s1 + $0x1c] sm:$0xf]  ;;  %3871 = vmatpush.bf16.msra.mxu0 %v4138_v14  ;;  %v4874_v62 = vor.u32 %v6294_v45, %v4871_v53 }
 0x2c4   :  { %v4071_v35 = vld [vmem:[%s9897_s1 + $0x38] sm:$0xf0] }
 0x2c5   :  { %3909 = vmatpush.bf16.msra.mxu3 %v4938_v27  ;;  %v6158_v55 = vld [vmem:[%s9897_s1 + $0x21c] sm:$0xf]  ;;  %3884 = vmatpush.bf16.msra.mxu1 %v4394_v43  ;;  %v4074_v9 = vor.u32 %v6094_v32, %v4071_v35 }
 0x2c6   :  { %v4327_v34 = vld [vmem:[%s9897_s1 + $0x238] sm:$0xf0] }
 0x2c7   :  { %3897 = vmatpush.bf16.msra.mxu2 %v4650_v46  ;;  %v6222_v59 = vld [vmem:[%s9897_s1 + $0x41c] sm:$0xf]  ;;  %3872 = vmatpush.bf16.msra.mxu0 %v4106_v54  ;;  %v4330_v15 = vor.u32 %v6158_v55, %v4327_v34 }
 0x2c8   :  { %v4583_v7 = vld [vmem:[%s9897_s1 + $0x438] sm:$0xf0] }
 0x2c9   :  { %v6286_v60 = vld [vmem:[%s9897_s1 + $0x61c] sm:$0xf]  ;;  %3910 = vmatpush.bf16.msra.mxu3 %v4906_v28  ;;  %3885 = vmatpush.bf16.msra.mxu1 %v4362_v56  ;;  %v4586_v16 = vor.u32 %v6222_v59, %v4583_v7  ;;  %v9779_v56 = vpop.f32.mrf.mxu0 }
 0x2ca   :  { %v4839_v0 = vld [vmem:[%s9897_s1 + $0x638] sm:$0xf0] }
 0x2cb   :  { %v6406_v1 = vld [vmem:[%s9897_s1 + $0x9dc] sm:$0xf]  ;;  %3898 = vmatpush.bf16.msra.mxu2 %v4618_v58  ;;  %v4842_v22 = vor.u32 %v6286_v60, %v4839_v0  ;;  %3873 = vmatpush.bf16.msra.mxu0 %v4074_v9 }
 0x2cc   :  { %v5319_v57 = vld [vmem:[%s9897_s1 + $0x9f8] sm:$0xf0] }
 0x2cd   :  { %v6470_v3 = vld [vmem:[%s9897_s1 + $0xbdc] sm:$0xf]  ;;  %3911 = vmatpush.bf16.msra.mxu3 %v4874_v62  ;;  %v5322_v23 = vor.u32 %v6406_v1, %v5319_v57  ;;  %3886 = vmatpush.bf16.msra.mxu1 %v4330_v15 }
 0x2ce   :  { %v5575_v8 = vld [vmem:[%s9897_s1 + $0xbf8] sm:$0xf0]  ;;  %3874 = vmatmul.bf16.vlgmr.msra.gmra.mxu0 %v6925_v20 }
 0x2cf   :  { %v6534_v12 = vld [vmem:[%s9897_s1 + $0xddc] sm:$0xf]  ;;  %v5578_v24 = vor.u32 %v6470_v3, %v5575_v8  ;;  %3899 = vmatpush.bf16.msra.mxu2 %v4586_v16  ;;  %3918 = vmatpush.bf16.msrb.mxu0 %v5322_v23 }
 0x2d0   :  { %v5831_v13 = vld [vmem:[%s9897_s1 + $0xdf8] sm:$0xf0]  ;;  %3887 = vmatmul.bf16.vlgmr.msra.gmra.mxu1 %v6928_v21 }
 0x2d1   :  { %v6598_v18 = vld [vmem:[%s9897_s1 + $0xfdc] sm:$0xf]  ;;  %v5834_v25 = vor.u32 %v6534_v12, %v5831_v13  ;;  %3912 = vmatpush.bf16.msra.mxu3 %v4842_v22  ;;  %3931 = vmatpush.bf16.msrb.mxu1 %v5578_v24 }
 0x2d2   :  { %v6087_v19 = vld [vmem:[%s9897_s1 + $0xff8] sm:$0xf0]  ;;  %3900 = vmatmul.bf16.vlgmr.msra.gmra.mxu2 %v6893_v4 }
 0x2d3   :  { %v6398_v27 = vld [vmem:[%s9897_s1 + $0x99c] sm:$0xf]  ;;  %v6090_v63 = vor.u32 %v6598_v18, %v6087_v19  ;;  %3944 = vmatpush.bf16.msrb.mxu2 %v5834_v25  ;;  %v3693_v18 = vpop.f32.mrf.mxu2  ;;  %v3706_v25 = vpop.f32.mrf.mxu3 }
 0x2d4   :  { %v5287_v29 = vld [vmem:[%s9897_s1 + $0x9b8] sm:$0xf0]  ;;  %3913 = vmatmul.bf16.vlgmr.msra.gmra.mxu3 %v6898_v6 }
 0x2d5   :  { %v6462_v31 = vld [vmem:[%s9897_s1 + $0xb9c] sm:$0xf]  ;;  %v5290_v36 = vor.u32 %v6398_v27, %v5287_v29  ;;  %3957 = vmatpush.bf16.msrb.mxu3 %v6090_v63  ;;  %v3669_v63 = vpop.f32.mrf.mxu0 }
 0x2d6   :  { %v5543_v5 = vld [vmem:[%s9897_s1 + $0xbb8] sm:$0xf0] }
 0x2d7   :  { %v6526_v33 = vld [vmem:[%s9897_s1 + $0xd9c] sm:$0xf]  ;;  %v5546_v17 = vor.u32 %v6462_v31, %v5543_v5  ;;  %3919 = vmatpush.bf16.msrb.mxu0 %v5290_v36  ;;  %v3682_v36 = vpop.f32.mrf.mxu1 }
 0x2d8   :  { %v5799_v2 = vld [vmem:[%s9897_s1 + $0xdb8] sm:$0xf0] }
 0x2d9   :  { %v6590_v10 = vld [vmem:[%s9897_s1 + $0xf9c] sm:$0xf]  ;;  %v5802_v40 = vor.u32 %v6526_v33, %v5799_v2  ;;  %3932 = vmatpush.bf16.msrb.mxu1 %v5546_v17 }
 0x2da   :  { %v6055_v14 = vld [vmem:[%s9897_s1 + $0xfb8] sm:$0xf0] }
 0x2db   :  { %v6390_v43 = vld [vmem:[%s9897_s1 + $0x95c] sm:$0xf]  ;;  %v6058_v47 = vor.u32 %v6590_v10, %v6055_v14  ;;  %3945 = vmatpush.bf16.msrb.mxu2 %v5802_v40 }
 0x2dc   :  { %v5255_v46 = vld [vmem:[%s9897_s1 + $0x978] sm:$0xf0] }
 0x2dd   :  { %v6454_v26 = vld [vmem:[%s9897_s1 + $0xb5c] sm:$0xf]  ;;  %v5258_v50 = vor.u32 %v6390_v43, %v5255_v46  ;;  %3958 = vmatpush.bf16.msrb.mxu3 %v6058_v47 }
 0x2de   :  { %v5511_v48 = vld [vmem:[%s9897_s1 + $0xb78] sm:$0xf0] }
 0x2df   :  { %v6518_v49 = vld [vmem:[%s9897_s1 + $0xd5c] sm:$0xf]  ;;  %v5514_v51 = vor.u32 %v6454_v26, %v5511_v48  ;;  %3920 = vmatpush.bf16.msrb.mxu0 %v5258_v50 }
 0x2e0   :  { %v5767_v28 = vld [vmem:[%s9897_s1 + $0xd78] sm:$0xf0] }
 0x2e1   :  { %v6582_v30 = vld [vmem:[%s9897_s1 + $0xf5c] sm:$0xf]  ;;  %v5770_v45 = vor.u32 %v6518_v49, %v5767_v28  ;;  %3933 = vmatpush.bf16.msrb.mxu1 %v5514_v51  ;;  %v3695_v51 = vpop.f32.mrf.mxu2 }
 0x2e2   :  { %v6023_v4 = vld [vmem:[%s9897_s1 + $0xf78] sm:$0xf0] }
 0x2e3   :  { %v6382_v53 = vld [vmem:[%s9897_s1 + $0x91c] sm:$0xf]  ;;  %v6026_v20 = vor.u32 %v6582_v30, %v6023_v4  ;;  %3946 = vmatpush.bf16.msrb.mxu2 %v5770_v45 }
 0x2e4   :  { %v5223_v32 = vld [vmem:[%s9897_s1 + $0x938] sm:$0xf0] }
 0x2e5   :  { %v6446_v6 = vld [vmem:[%s9897_s1 + $0xb1c] sm:$0xf]  ;;  %v5226_v34 = vor.u32 %v6382_v53, %v5223_v32  ;;  %3959 = vmatpush.bf16.msrb.mxu3 %v6026_v20  ;;  %v3708_v20 = vpop.f32.mrf.mxu3 }
 0x2e6   :  { %v5479_v21 = vld [vmem:[%s9897_s1 + $0xb38] sm:$0xf0] }
 0x2e7   :  { %v6510_v52 = vld [vmem:[%s9897_s1 + $0xd1c] sm:$0xf]  ;;  %v5482_v58 = vor.u32 %v6446_v6, %v5479_v21  ;;  %3921 = vmatpush.bf16.msrb.mxu0 %v5226_v34 }
 0x2e8   :  { %v5735_v54 = vld [vmem:[%s9897_s1 + $0xd38] sm:$0xf0] }
 0x2e9   :  { %v6574_v35 = vld [vmem:[%s9897_s1 + $0xf1c] sm:$0xf]  ;;  %v5738_v59 = vor.u32 %v6510_v52, %v5735_v54  ;;  %3934 = vmatpush.bf16.msrb.mxu1 %v5482_v58  ;;  %v3681_v58 = vadd.f32 %v9790_v61, %v9779_v56 }
 0x2ea   :  { %v5991_v55 = vld [vmem:[%s9897_s1 + $0xf38] sm:$0xf0] }
 0x2eb   :  { %v6374_v7 = vld [vmem:[%s9897_s1 + $0x8dc] sm:$0xf]  ;;  %v5994_v62 = vor.u32 %v6574_v35, %v5991_v55  ;;  %3947 = vmatpush.bf16.msrb.mxu2 %v5738_v59  ;;  %v3694_v59 = vadd.f32 %v3693_v18, %v3681_v58 }
 0x2ec   :  { %v5191_v60 = vld [vmem:[%s9897_s1 + $0x8f8] sm:$0xf0] }
 0x2ed   :  { %v6438_v37 = vld [vmem:[%s9897_s1 + $0xadc] sm:$0xf]  ;;  %v5194_v8 = vor.u32 %v6374_v7, %v5191_v60  ;;  %3960 = vmatpush.bf16.msrb.mxu3 %v5994_v62  ;;  %v3707_v7 = vadd.f32 %v3706_v25, %v3694_v59  ;;  %v3719_v60 = vpop.f32.mrf.mxu0  ;;  %v3732_v62 = vpop.f32.mrf.mxu1 }
 0x2ee   :  { %v5447_v0 = vld [vmem:[%s9897_s1 + $0xaf8] sm:$0xf0]  ;;  %v3758_v61 = vpop.f32.mrf.mxu3 }
 0x2ef   :  { %v6502_v1 = vld [vmem:[%s9897_s1 + $0xcdc] sm:$0xf]  ;;  %v5450_v9 = vor.u32 %v6438_v37, %v5447_v0  ;;  %3922 = vmatpush.bf16.msrb.mxu0 %v5194_v8  ;;  %v3720_v37 = vadd.f32 %v3719_v60, %v3707_v7  ;;  %v4006_v7 = vperm.slane %v9625_v11, 7 }
 0x2f0   :  { %v5703_v39 = vld [vmem:[%s9897_s1 + $0xcf8] sm:$0xf0] }
 0x2f1   :  { %v6566_v57 = vld [vmem:[%s9897_s1 + $0xedc] sm:$0xf]  ;;  %v5706_v12 = vor.u32 %v6502_v1, %v5703_v39  ;;  %3935 = vmatpush.bf16.msrb.mxu1 %v5450_v9  ;;  %v3733_v0 = vadd.f32 %v3732_v62, %v3720_v37  ;;  %v3745_v1 = vpop.f32.mrf.mxu2 }
 0x2f2   :  { %v5959_v3 = vld [vmem:[%s9897_s1 + $0xef8] sm:$0xf0] }
 0x2f3   :  { %v6366_v13 = vld [vmem:[%s9897_s1 + $0x89c] sm:$0xf]  ;;  %v5962_v19 = vor.u32 %v6566_v57, %v5959_v3  ;;  %3948 = vmatpush.bf16.msrb.mxu2 %v5706_v12  ;;  %v3746_v56 = vadd.f32 %v3745_v1, %v3733_v0  ;;  %v4004_v57 = vperm.slane %v9625_v11, 5 }
 0x2f4   :  { %v5159_v15 = vld [vmem:[%s9897_s1 + $0x8b8] sm:$0xf0] }
 0x2f5   :  { %v6430_v16 = vld [vmem:[%s9897_s1 + $0xa9c] sm:$0xf]  ;;  %v5162_v31 = vor.u32 %v6366_v13, %v5159_v15  ;;  %3961 = vmatpush.bf16.msrb.mxu3 %v5962_v19  ;;  %v3759_v39 = vadd.f32 %v3758_v61, %v3746_v56  ;;  %v3721_v3 = vpop.f32.mrf.mxu0 }
 0x2f6   :  { %v5415_v22 = vld [vmem:[%s9897_s1 + $0xab8] sm:$0xf0]  ;;  %v3760_v12 = vpop.f32.mrf.mxu3 }
 0x2f7   :  { %v6494_v23 = vld [vmem:[%s9897_s1 + $0xc9c] sm:$0xf]  ;;  %v5418_v5 = vor.u32 %v6430_v16, %v5415_v22  ;;  %3923 = vmatpush.bf16.msrb.mxu0 %v5162_v31  ;;  %v4020_v8 = vadd.f32 %v4004_v57, %v3759_v39 }
 0x2f8   :  { %v5671_v24 = vld [vmem:[%s9897_s1 + $0xcb8] sm:$0xf0] }
 0x2f9   :  { %v6558_v27 = vld [vmem:[%s9897_s1 + $0xe9c] sm:$0xf]  ;;  %v5674_v33 = vor.u32 %v6494_v23, %v5671_v24  ;;  %3936 = vmatpush.bf16.msrb.mxu1 %v5418_v5  ;;  %v3747_v9 = vpop.f32.mrf.mxu2 }
 0x2fa   :  { %v5927_v29 = vld [vmem:[%s9897_s1 + $0xeb8] sm:$0xf0] }
 0x2fb   :  { %v6358_v2 = vld [vmem:[%s9897_s1 + $0x85c] sm:$0xf]  ;;  %v5930_v17 = vor.u32 %v6558_v27, %v5927_v29  ;;  %3949 = vmatpush.bf16.msrb.mxu2 %v5674_v33 }
 0x2fc   :  { %v5127_v10 = vld [vmem:[%s9897_s1 + $0x878] sm:$0xf0] }
 0x2fd   :  { %v6422_v14 = vld [vmem:[%s9897_s1 + $0xa5c] sm:$0xf]  ;;  %v5130_v48 = vor.u32 %v6358_v2, %v5127_v10  ;;  %3962 = vmatpush.bf16.msrb.mxu3 %v5930_v17 }
 0x2fe   :  { %v5383_v40 = vld [vmem:[%s9897_s1 + $0xa78] sm:$0xf0]  ;;  %v3810_v15 = vpop.f32.mrf.mxu3 }
 0x2ff   :  { %v6486_v43 = vld [vmem:[%s9897_s1 + $0xc5c] sm:$0xf]  ;;  %v5386_v49 = vor.u32 %v6422_v14, %v5383_v40  ;;  %3924 = vmatpush.bf16.msrb.mxu0 %v5130_v48  ;;  %v4005_v14 = vperm.slane %v9625_v11, 6 }
 0x300   :  { %v5639_v46 = vld [vmem:[%s9897_s1 + $0xc78] sm:$0xf0] }
 0x301   :  { %v6550_v26 = vld [vmem:[%s9897_s1 + $0xe5c] sm:$0xf]  ;;  %v5642_v28 = vor.u32 %v6486_v43, %v5639_v46  ;;  %3937 = vmatpush.bf16.msrb.mxu1 %v5386_v49  ;;  %v3797_v13 = vpop.f32.mrf.mxu2 }
 0x302   :  { %v5895_v47 = vld [vmem:[%s9897_s1 + $0xe78] sm:$0xf0] }
 0x303   :  { %v6350_v30 = vld [vmem:[%s9897_s1 + $0x81c] sm:$0xf]  ;;  %v5898_v45 = vor.u32 %v6550_v26, %v5895_v47  ;;  %3950 = vmatpush.bf16.msrb.mxu2 %v5642_v28 }
 0x304   :  { %v5095_v4 = vld [vmem:[%s9897_s1 + $0x838] sm:$0xf0] }
 0x305   :  { %v6414_v50 = vld [vmem:[%s9897_s1 + $0xa1c] sm:$0xf]  ;;  %v5098_v54 = vor.u32 %v6350_v30, %v5095_v4  ;;  %3963 = vmatpush.bf16.msrb.mxu3 %v5898_v45 }
 0x306   :  { %v5351_v53 = vld [vmem:[%s9897_s1 + $0xa38] sm:$0xf0]  ;;  %v3812_v22 = vpop.f32.mrf.mxu3 }
 0x307   :  { %v6478_v32 = vld [vmem:[%s9897_s1 + $0xc1c] sm:$0xf]  ;;  %v5354_v35 = vor.u32 %v6414_v50, %v5351_v53  ;;  %3925 = vmatpush.bf16.msrb.mxu0 %v5098_v54 }
 0x308   :  { %v5607_v6 = vld [vmem:[%s9897_s1 + $0xc38] sm:$0xf0] }
 0x309   :  { %v6542_v21 = vld [vmem:[%s9897_s1 + $0xe1c] sm:$0xf]  ;;  %v5610_v55 = vor.u32 %v6478_v32, %v5607_v6  ;;  %3938 = vmatpush.bf16.msrb.mxu1 %v5354_v35  ;;  %v3799_v19 = vpop.f32.mrf.mxu2 }
 0x30a   :  { %v5863_v52 = vld [vmem:[%s9897_s1 + $0xe38] sm:$0xf0]  ;;  %3926 = vmatmul.bf16.vlgmr.msrb.gmra.mxu0 %v7084_v41  ;;  %v3734_v41 = vpop.f32.mrf.mxu1 }
 0x30b   :  { %v5866_v34 = vor.u32 %v6542_v21, %v5863_v52  ;;  %3951 = vmatpush.bf16.msrb.mxu2 %v5610_v55 }
 0x30c   :  { %3939 = vmatmul.bf16.vlgmr.msrb.gmra.mxu1 %v7088_v44  ;;  %v4028_v44 = vmax.f32 %v4020_v8, 0.0 }
 0x30d   :  { %3964 = vmatpush.bf16.msrb.mxu3 %v5866_v34 }
 0x30e   :  { %3952 = vmatmul.bf16.vlgmr.msrb.gmra.mxu2 %v7076_v38  ;;  %4036 = vst [vmem:[%s9900_s3 + $0x28] sm:$0xff] %v4028_v44  ;;  %v3771_v38 = vpop.f32.mrf.mxu0 }
 0x310   :  { %3965 = vmatmul.bf16.vlgmr.msrb.gmra.mxu3 %v7086_v42 }
 0x312   :  { %v3784_v42 = vpop.f32.mrf.mxu1 }
 0x313   :  { %v3785_v23 = vadd.f32 %v3784_v42, %v3771_v38 }
 0x315   :  { %v3798_v24 = vadd.f32 %v3797_v13, %v3785_v23 }
 0x316   :  { %v3773_v16 = vpop.f32.mrf.mxu0 }
 0x317   :  { %v3811_v25 = vadd.f32 %v3810_v15, %v3798_v24 }
 0x31a   :  { %v3786_v18 = vpop.f32.mrf.mxu1 }
 0x32b   :  { %v3823_v27 = vpop.f32.mrf.mxu0 }
 0x32c   :  { %v3824_v29 = vadd.f32 %v3823_v27, %v3811_v25 }
 0x32d   :  { %v3836_v31 = vpop.f32.mrf.mxu1 }
 0x32e   :  { %v3837_v63 = vadd.f32 %v3836_v31, %v3824_v29 }
 0x333   :  { %v3825_v36 = vpop.f32.mrf.mxu0 }
 0x335   :  { %v3849_v5 = vpop.f32.mrf.mxu2  ;;  %v3838_v17 = vpop.f32.mrf.mxu1 }
 0x336   :  { %v3850_v33 = vadd.f32 %v3849_v5, %v3837_v63 }
 0x337   :  { %v3862_v2 = vpop.f32.mrf.mxu3 }
 0x338   :  { %v3863_v10 = vadd.f32 %v3862_v2, %v3850_v33 }
 0x33a   :  { %v4021_v40 = vadd.f32 %v4005_v14, %v3863_v10 }
 0x33c   :  { %v4029_v46 = vmax.f32 %v4021_v40, 0.0 }
 0x33d   :  { %v3851_v43 = vpop.f32.mrf.mxu2 }
 0x33e   :  { %4037 = vst [vmem:[%s9900_s3 + $0x30] sm:$0xff] %v4029_v46 }
 0x33f   :  { %v3864_v26 = vpop.f32.mrf.mxu3 }
 0x34b   :  { %v3875_v47 = vpop.f32.mrf.mxu0 }
 0x34d   :  { %v3888_v48 = vpop.f32.mrf.mxu1 }
 0x34e   :  { %v3889_v45 = vadd.f32 %v3888_v48, %v3875_v47 }
 0x353   :  { %v3877_v30 = vpop.f32.mrf.mxu0 }
 0x355   :  { %v3901_v49 = vpop.f32.mrf.mxu2  ;;  %v3890_v4 = vpop.f32.mrf.mxu1 }
 0x356   :  { %v3902_v53 = vadd.f32 %v3901_v49, %v3889_v45 }
 0x357   :  { %v3914_v28 = vpop.f32.mrf.mxu3 }
 0x358   :  { %v3915_v32 = vadd.f32 %v3914_v28, %v3902_v53 }
 0x35d   :  { %v3903_v50 = vpop.f32.mrf.mxu2 }
 0x35f   :  { %v3916_v51 = vpop.f32.mrf.mxu3 }
 0x387   :  { %v3927_v6 = vpop.f32.mrf.mxu0 }
 0x388   :  { %v3928_v21 = vadd.f32 %v3927_v6, %v3915_v32 }
 0x389   :  { %v3940_v20 = vpop.f32.mrf.mxu1 }
 0x38a   :  { %v3941_v52 = vadd.f32 %v3940_v20, %v3928_v21 }
 0x38f   :  { %v3929_v34 = vpop.f32.mrf.mxu0 }
 0x391   :  { %v3953_v54 = vpop.f32.mrf.mxu2  ;;  %v3942_v58 = vpop.f32.mrf.mxu1 }
 0x392   :  { %v3954_v35 = vadd.f32 %v3953_v54, %v3941_v52 }
 0x393   :  { %v3966_v55 = vpop.f32.mrf.mxu3 }
 0x394   :  { %v3967_v59 = vadd.f32 %v3966_v55, %v3954_v35 }
 0x396   :  { %v4022_v60 = vadd.f32 %v4006_v7, %v3967_v59 }
 0x398   :  { %v4030_v62 = vmax.f32 %v4022_v60, 0.0 }
 0x399   :  { %v3955_v37 = vpop.f32.mrf.mxu2 }
 0x39a   :  { %4038 = vst [vmem:[%s9900_s3 + $0x38] sm:$0xff] %v4030_v62 }
 0x39b   :  { %v3968_v0 = vpop.f32.mrf.mxu3 }

// kernel: simple_nn_forward.3
= control target key start
LH: loop header
LB: loop body
LE: loop exit
PB: predicated region body
PF: predicated region fallthrough
CT: control target
= control target key end

     0   :  { %s14534_s0 = inlined_call_operand.vmem [shape: bf16[8,25088], index: 0, kind: input, shape index: {}]   ;;  %s14535_s1 = inlined_call_operand.hbm [shape: bf16[25088,1024], index: 1, kind: input, shape index: {}]   ;;  %s14536_s2 = inlined_call_operand.hbm [shape: f32[1,1024], index: 2, kind: input, shape index: {}]   ;;  %s14537_s3 = inlined_call_operand.vmem [shape: f32[8,1024], index: 3, kind: output, shape index: {}]  }
   0x1   :  { %14540 = sst [smem:[#allocation10_spill]] %s14535_s1 }
   0x2   :  { %8 = vsyncpa [#allocation3], 0 }
   0x3   :  { %10 = vsyncpa [#allocation3 + $0x1], 0 }
   0x4   :  { %11 = vsyncpa [#allocation5], 0 }
   0x5   :  { %13 = vsyncpa [#allocation5 + $0x1], 0  ;;  %s12227_s12 = smov 0   ;;  %s12229_s13 = smov 0  }
   0x6   :  { %s12231_s14 = smov 0   ;;  %s12233_s15 = smov 0  }
   0x7   :  { %s12235_s16 = smov 0   ;;  %s12237_s17 = smov 0  }
   0x8   :  { %s12239_s18 = smov 0   ;;  %s12241_s19 = smov 0  }
   0x9   :  { %s12243_s20 = smov 0   ;;  %s12245_s21 = smov 0  }
   0xa   :  { %s12247_s22 = smov 0  }
   0xb LB: > { %s31_s23 = sadd.s32 1, %s12193_s20  ;;  %s34_s24 = sadd.s32 1, %s12197_s21  ;;  %s12201_s22 = sphi %s12247_s22, %s19_s22   ;;  %s12197_s21 = sphi %s12245_s21, %s14559_s21   ;;  %s12193_s20 = sphi %s12243_s20, %s14558_s20   ;;  %s12189_s19 = sphi %s12241_s19, %s14557_s19   ;;  %s12185_s18 = sphi %s12239_s18, %s14556_s18   ;;  %s12181_s17 = sphi %s12237_s17, %s14555_s17   ;;  %s12177_s16 = sphi %s12235_s16, %s14554_s16   ;;  %s12173_s15 = sphi %s12233_s15, %s14553_s15   ;;  %s12169_s14 = sphi %s12231_s14, %s14552_s14   ;;  %s12165_s13 = sphi %s12229_s13, %s14551_s13   ;;  %s12161_s12 = sphi %s12227_s12, %s14550_s12  }
   0xc   : > { %p32_p0 = scmp.ge.s32.totalorder %s31_s23, 7  ;;  %p82_p1 = scmp.ne.s32.totalorder %s12181_s17, %s12177_s16 }
   0xd   : > { %p83_p2 = scmp.eq.s32.totalorder %s12201_s22, 0  ;;  %p11954_p4 = scmp.lt.s32.totalorder %s12201_s22, 14 }
   0xe   : > { %s14561_s23 = smov (%p32_p0, %s31_s23), 0  ;;  %s14563_s24 = smov (!%p32_p0, %s34_s24), %s12197_s21 }
   0xf   : > { %14541 = sst [smem:[#allocation8_spill]] %s14561_s23  ;;  %p84_p3 = por %p83_p2, %p82_p1 }
  0x10   : > { %s179_s26 = sand.u32 1, %s12181_s17   ;;  %s7446_s27 = sshll.u32 %s12197_s21, 2 }
  0x11   : > { %s11941_s28 = smul.u32 7168, %s179_s26  ;;  %p11948_p5 = pnand %p11954_p4, %p84_p3 }
  0x12   : > { %s11044_s29 = smul.u32 3584, %s12193_s20  ;;  %s14542_s1 = sld [smem:[#allocation10_spill]] }
  0x13   : > { %s183_s4 = scalar_lea.vmem [#allocation2], %s11941_s28  ;;  %s180_s11 = scalar_lea.sflag [#allocation3], %s179_s26 }
  0x14   : > { %s189_s30 = sadd.s32 %s11044_s29, %s7446_s27  ;;  %s194_s5 = sshll.u32 %s183_s4, 4  ;;  %s195_s5 = int_to_ptr.vmem [resolvable:$true] %s194_s5 }
  0x15   : > { %s7448_s6 = sshll.u32 %s189_s30, 2  ;;  %s12203_s25 = smov 512  }
  0x16   : > { %s12204_s28 = smov 256   ;;  %s12205_s29 = smov 16  }
  0x17   : > { %p7451_p6 = scmp.ge.s32.totalorder %s12201_s22, 1  ;;  %p221_p7 = scmp.lt.s32.totalorder %s12201_s22, 15 }
  0x18   : > { %s191_s9 = scalar_lea.hbm %s14542_s1, %s7448_s6  ;;  %s70_s30 = ssub.s32 %s12193_s20, %s14561_s23 }
  0x19   : > { %s192_s10 = sshll.u32 %s191_s9, 4  ;;  %p12310_p8 = pnand %p7451_p6, %p221_p7  ;;  %s193_s10 = int_to_ptr.hbm [resolvable:$true] %s192_s10 }
  0x1a   : > { %11950 = dma.hbm_to_vmem [thread:$0]  (!%p11948_p5), %s193_s10, 114688, %s195_s5, %s180_s11, %s12203_s25, %s12204_s28, %s12205_s29  }
  0x1b   : > { %s7442_s26 = sadd.s32 4294967295, %s12201_s22   ;;  %p36_p9 = scmp.ge.s32.totalorder %s14563_s24, 2 }
  0x1c   : > { %p88_p10 = scmp.ne.s32.totalorder %s12177_s16, %s12173_s15  ;;  %p89_p11 = scmp.eq.s32.totalorder %s7442_s26, 0 }
  0x1d   : > { %s14565_s24 = smov (%p36_p9, %s14563_s24), 0  ;;  %s101_s5 = sadd.s32 1, %s12169_s14 }
  0x1e   : > { %14544 = sst [smem:[#allocation9_spill]] %s14565_s24  ;;  %p12321_p12 = por %p89_p11, %p88_p10 }
  0x1f   : > { %s71_s6 = ssub.s32 %s12197_s21, %s14565_s24  ;;  %p114_p13 = scmp.ne.s32.totalorder %s12165_s13, %s12161_s12 }
  0x20   : > { %s72_s7 = sor.u32 %s71_s6, %s70_s30  ;;  %p99_p0 = scmp.eq.s32.totalorder %s71_s6, 0 }
  0x21   : > { %p73_p1 = scmp.eq.s32.totalorder %s72_s7, 0  ;;  %p108_p3 = scmp.ne.s32.totalorder %s12169_s14, %s12165_s13 }
  0x22   : > { %s12333_s8 = scalar_select %p99_p0, %s12169_s14, %s101_s5  }
  0x23   : > { %s14546_s15 = sadd.s32 1, %s12181_s17  ;;  %p12340_p5 = por %p114_p13, %p89_p11 }
  0x24   : > { %s12338_s9 = scalar_select %p73_p1, %s12181_s17, %s14546_s15  }
  0x25   : > { %s204_s11 = sand.u32 1, %s12169_s14   ;;  %p110_p6 = por %p108_p3, %p83_p2 }
  0x26   : > { %s7449_s28 = sshll.u32 %s204_s11, 2  ;;  %s212_s30 = scalar_lea.hbm %s14536_s2, %s7446_s27 }
  0x27   : > { %s214_s26 = sshll.u32 %s212_s30, 4  ;;  %s208_s6 = scalar_lea.vmem [#allocation4], %s7449_s28  ;;  %s215_s26 = int_to_ptr.hbm [resolvable:$true] %s214_s26 }
  0x28   : > { %s216_s5 = sshll.u32 %s208_s6, 4  ;;  %p11951_p7 = pnand %p11954_p4, %p110_p6  ;;  %s217_s5 = int_to_ptr.vmem [resolvable:$true] %s216_s5 }
  0x29   : > { %s205_s7 = scalar_lea.sflag [#allocation5], %s204_s11  ;;  %225 = sbr.rel (%p12310_p8) target bundleno = 1122 (0x462), region = 32 }
  0x2a   : > { %11953 = dma.hbm_to_vmem [thread:$0]  (!%p11951_p7), %s215_s26, 64, %s217_s5, %s205_s7  }
  0x2b   : > { %s227_s15 = sand.u32 (!%p12310_p8), 1, %s12177_s16  }
  0x2c   : > { %s11942_s1 = smul.u32 (!%p12310_p8), 7168, %s227_s15  ;;  %s228_s24 = scalar_lea.sflag (!%p12310_p8), [#allocation3], %s227_s15 }
  0x2e   : > { %s12357_s23 = scalar_lea.vmem [#allocation2], %s11942_s1 }
  0x2f   : > { %12152 = dma.done.wait (%p12321_p12), %s228_s24, 114688  }
  0x30   : > { %12154 = vsyncadd (%p12321_p12), %s228_s24, 4294852608  ;;  %s237_s27 = sand.u32 1, %s12165_s13  }
  0x31   : > { %s12364_s11 = sshll.u32 %s237_s27, 2  ;;  %s238_s4 = scalar_lea.sflag [#allocation5], %s237_s27 }
  0x32   : > { %s241_s28 = scalar_lea.vmem [#allocation4], %s12364_s11 }
  0x33   : > { %12156 = dma.done.wait (%p12340_p5), %s238_s4, 64  }
  0x34   : > { %12158 = vsyncadd (%p12340_p5), %s238_s4, 4294967232  ;;  %s283_s1 = smul.u32 28, %s12185_s18  ;;  %s7454_s12 = sshll.u32 %s12189_s19, 2 }
  0x35   : > { %p299_p2 = scmp.lt.s32.totalorder %s7454_s12, 7  ;;  %p7456_p8 = scmp.ne.s32.totalorder %s12185_s18, 0 }
  0x36   : > { %p286_p4 = scmp.lt.s32.totalorder %s283_s1, 195 }
  0x37   : > { %s14567_s12 = smov (!%p299_p2, %s7454_s12), 7  ;;  %309 = sbr.rel (%p7456_p8) target bundleno = 65 (0x41), region = 44 }
  0x38   : > { %s14569_s1 = smov (!%p286_p4, %s283_s1), 195  ;;  %s7455_s24 = sshll.u32 %s14567_s12, 3 }
  0x39   : > { %s7453_s25 = sshll.u32 %s14569_s1, 2  ;;  %s12376_s26 = scalar_lea.vmem %s14537_s3, %s7455_s24 }
  0x3a   : > { %s12381_s10 = scalar_lea.vmem %s14534_s0, %s7453_s25 }
  0x3c   : > { %v12206_v0 = vmov 0.0  }
  0x3d   : > { %310 = vst [vmem:[%s12376_s26] sm:$0xff] %v12206_v0 }
  0x3e   : > { %311 = vst [vmem:[%s12376_s26 + $0x8] sm:$0xff] %v12206_v0 }
  0x3f   : > { %312 = vst [vmem:[%s12376_s26 + $0x10] sm:$0xff] %v12206_v0 }
  0x40   : > { %313 = vst [vmem:[%s12376_s26 + $0x18] sm:$0xff] %v12206_v0 }
  0x41 PF: > { %v7571_v1 = vld [vmem:[%s12357_s23 + $0xe0] sm:$0xf]  ;;  %v11075_v2 = vld [vmem:[%s12357_s23 + $0xec] sm:$0xf0]  ;;  %p11041_p9 = scmp.ne.s32.totalorder %s12185_s18, 6 }
  0x42   : > { %v7699_v3 = vld [vmem:[%s12357_s23 + $0x1e0] sm:$0xf]  ;;  %v7572_v4 = vor.u32 %v11075_v2, %v7571_v1  ;;  %v11107_v5 = vld [vmem:[%s12357_s23 + $0x1ec] sm:$0xf0] }
  0x43   : > { %v7827_v6 = vld [vmem:[%s12357_s23 + $0x2e0] sm:$0xf]  ;;  %v11139_v7 = vld [vmem:[%s12357_s23 + $0x2ec] sm:$0xf0]  ;;  %v7700_v8 = vor.u32 %v11107_v5, %v7699_v3 }
  0x44   : > { %v7828_v9 = vor.u32 %v11139_v7, %v7827_v6  ;;  %v7955_v10 = vld [vmem:[%s12357_s23 + $0x3e0] sm:$0xf]  ;;  %v11171_v11 = vld [vmem:[%s12357_s23 + $0x3ec] sm:$0xf0]  ;;  %5806 = vmatpush.bf16.msra.mxu0 %v7572_v4 }
  0x45   : > { %v7555_v12 = vld [vmem:[%s12357_s23 + $0xc0] sm:$0xf]  ;;  %v7956_v13 = vor.u32 %v11171_v11, %v7955_v10  ;;  %v11071_v14 = vld [vmem:[%s12357_s23 + $0xcc] sm:$0xf0]  ;;  %5819 = vmatpush.bf16.msra.mxu1 %v7700_v8 }
  0x46   : > { %v7683_v15 = vld [vmem:[%s12357_s23 + $0x1c0] sm:$0xf]  ;;  %v11103_v16 = vld [vmem:[%s12357_s23 + $0x1cc] sm:$0xf0]  ;;  %5832 = vmatpush.bf16.msra.mxu2 %v7828_v9  ;;  %v7556_v17 = vor.u32 %v11071_v14, %v7555_v12 }
  0x47   : > { %v7684_v18 = vor.u32 %v11103_v16, %v7683_v15  ;;  %v7811_v19 = vld [vmem:[%s12357_s23 + $0x2c0] sm:$0xf]  ;;  %v11135_v20 = vld [vmem:[%s12357_s23 + $0x2cc] sm:$0xf0]  ;;  %5845 = vmatpush.bf16.msra.mxu3 %v7956_v13 }
  0x48   : > { %v7939_v21 = vld [vmem:[%s12357_s23 + $0x3c0] sm:$0xf]  ;;  %v7812_v22 = vor.u32 %v11135_v20, %v7811_v19  ;;  %v11167_v23 = vld [vmem:[%s12357_s23 + $0x3cc] sm:$0xf0]  ;;  %5807 = vmatpush.bf16.msra.mxu0 %v7556_v17 }
  0x49   : > { %v7539_v24 = vld [vmem:[%s12357_s23 + $0xa0] sm:$0xf]  ;;  %v11067_v25 = vld [vmem:[%s12357_s23 + $0xac] sm:$0xf0]  ;;  %v7940_v26 = vor.u32 %v11167_v23, %v7939_v21  ;;  %5820 = vmatpush.bf16.msra.mxu1 %v7684_v18 }
  0x4a   : > { %v7667_v27 = vld [vmem:[%s12357_s23 + $0x1a0] sm:$0xf]  ;;  %v11099_v28 = vld [vmem:[%s12357_s23 + $0x1ac] sm:$0xf0]  ;;  %v7540_v30 = vor.u32 %v11067_v25, %v7539_v24  ;;  %5833 = vmatpush.bf16.msra.mxu2 %v7812_v22 }
  0x4b   : > { %v7795_v29 = vld [vmem:[%s12357_s23 + $0x2a0] sm:$0xf]  ;;  %v11131_v31 = vld [vmem:[%s12357_s23 + $0x2ac] sm:$0xf0]  ;;  %v7668_v34 = vor.u32 %v11099_v28, %v7667_v27  ;;  %5846 = vmatpush.bf16.msra.mxu3 %v7940_v26 }
  0x4c   : > { %v7923_v32 = vld [vmem:[%s12357_s23 + $0x3a0] sm:$0xf]  ;;  %v11163_v33 = vld [vmem:[%s12357_s23 + $0x3ac] sm:$0xf0]  ;;  %v7796_v35 = vor.u32 %v11131_v31, %v7795_v29  ;;  %5808 = vmatpush.bf16.msra.mxu0 %v7540_v30 }
  0x4d   : > { %v7523_v36 = vld [vmem:[%s12357_s23 + $0x80] sm:$0xf]  ;;  %v11063_v37 = vld [vmem:[%s12357_s23 + $0x8c] sm:$0xf0]  ;;  %v7924_v39 = vor.u32 %v11163_v33, %v7923_v32  ;;  %5821 = vmatpush.bf16.msra.mxu1 %v7668_v34 }
  0x4e   : > { %v7651_v38 = vld [vmem:[%s12357_s23 + $0x180] sm:$0xf]  ;;  %v11095_v40 = vld [vmem:[%s12357_s23 + $0x18c] sm:$0xf0]  ;;  %v7524_v45 = vor.u32 %v11063_v37, %v7523_v36  ;;  %5834 = vmatpush.bf16.msra.mxu2 %v7796_v35 }
  0x4f   : > { %v7779_v41 = vld [vmem:[%s12357_s23 + $0x280] sm:$0xf]  ;;  %v11127_v42 = vld [vmem:[%s12357_s23 + $0x28c] sm:$0xf0]  ;;  %v7652_v46 = vor.u32 %v11095_v40, %v7651_v38  ;;  %5847 = vmatpush.bf16.msra.mxu3 %v7924_v39 }
  0x50   : > { %v7907_v43 = vld [vmem:[%s12357_s23 + $0x380] sm:$0xf]  ;;  %v11159_v44 = vld [vmem:[%s12357_s23 + $0x38c] sm:$0xf0]  ;;  %v7780_v47 = vor.u32 %v11127_v42, %v7779_v41  ;;  %5809 = vmatpush.bf16.msra.mxu0 %v7524_v45 }
  0x51   : > { %v7507_v48 = vld [vmem:[%s12357_s23 + $0x60] sm:$0xf]  ;;  %v11059_v49 = vld [vmem:[%s12357_s23 + $0x6c] sm:$0xf0]  ;;  %v7908_v51 = vor.u32 %v11159_v44, %v7907_v43  ;;  %5822 = vmatpush.bf16.msra.mxu1 %v7652_v46 }
  0x52   : > { %v7635_v50 = vld [vmem:[%s12357_s23 + $0x160] sm:$0xf]  ;;  %v11091_v52 = vld [vmem:[%s12357_s23 + $0x16c] sm:$0xf0]  ;;  %v7508_v57 = vor.u32 %v11059_v49, %v7507_v48  ;;  %5835 = vmatpush.bf16.msra.mxu2 %v7780_v47 }
  0x53   : > { %v7763_v53 = vld [vmem:[%s12357_s23 + $0x260] sm:$0xf]  ;;  %v11123_v54 = vld [vmem:[%s12357_s23 + $0x26c] sm:$0xf0]  ;;  %v7636_v58 = vor.u32 %v11091_v52, %v7635_v50  ;;  %5848 = vmatpush.bf16.msra.mxu3 %v7908_v51 }
  0x54   : > { %v7891_v55 = vld [vmem:[%s12357_s23 + $0x360] sm:$0xf]  ;;  %v11155_v56 = vld [vmem:[%s12357_s23 + $0x36c] sm:$0xf0]  ;;  %v7764_v59 = vor.u32 %v11123_v54, %v7763_v53  ;;  %5810 = vmatpush.bf16.msra.mxu0 %v7508_v57 }
  0x55   : > { %v7491_v60 = vld [vmem:[%s12357_s23 + $0x40] sm:$0xf]  ;;  %v11055_v61 = vld [vmem:[%s12357_s23 + $0x4c] sm:$0xf0]  ;;  %v7892_v63 = vor.u32 %v11155_v56, %v7891_v55  ;;  %5823 = vmatpush.bf16.msra.mxu1 %v7636_v58 }
  0x56   : > { %v7619_v62 = vld [vmem:[%s12357_s23 + $0x140] sm:$0xf]  ;;  %v11087_v0 = vld [vmem:[%s12357_s23 + $0x14c] sm:$0xf0]  ;;  %v7492_v5 = vor.u32 %v11055_v61, %v7491_v60  ;;  %5836 = vmatpush.bf16.msra.mxu2 %v7764_v59  ;;  %v319_v59 = vld [vmem:[%s12381_s10 + $0x8] sm:$0xff] }
  0x57   : > { %v7747_v1 = vld [vmem:[%s12357_s23 + $0x240] sm:$0xf]  ;;  %v11119_v2 = vld [vmem:[%s12357_s23 + $0x24c] sm:$0xf0]  ;;  %v7620_v6 = vor.u32 %v11087_v0, %v7619_v62  ;;  %5849 = vmatpush.bf16.msra.mxu3 %v7892_v63  ;;  %v1244_v0 = vunpack.c.l.b16 %v319_v59 }
  0x58   : > { %v7875_v3 = vld [vmem:[%s12357_s23 + $0x340] sm:$0xf]  ;;  %v11151_v4 = vld [vmem:[%s12357_s23 + $0x34c] sm:$0xf0]  ;;  %v7748_v7 = vor.u32 %v11119_v2, %v7747_v1  ;;  %5811 = vmatpush.bf16.msra.mxu0 %v7492_v5  ;;  %v1245_v1 = vunpack.c.h.b16 %v319_v59 }
  0x59   : > { %v7475_v8 = vld [vmem:[%s12357_s23 + $0x20] sm:$0xf]  ;;  %v11051_v9 = vld [vmem:[%s12357_s23 + $0x2c] sm:$0xf0]  ;;  %v7876_v11 = vor.u32 %v11151_v4, %v7875_v3  ;;  %5824 = vmatpush.bf16.msra.mxu1 %v7620_v6  ;;  %v12477_v5 = vpack.c.b16 %v1244_v0, %v1244_v0 }
  0x5a   : > { %v7603_v10 = vld [vmem:[%s12357_s23 + $0x120] sm:$0xf]  ;;  %v11083_v12 = vld [vmem:[%s12357_s23 + $0x12c] sm:$0xf0]  ;;  %v7476_v17 = vor.u32 %v11051_v9, %v7475_v8  ;;  %5837 = vmatpush.bf16.msra.mxu2 %v7748_v7  ;;  %v12480_v7 = vpack.c.b16 %v1245_v1, %v1245_v1 }
  0x5b   : > { %v7731_v13 = vld [vmem:[%s12357_s23 + $0x220] sm:$0xf]  ;;  %v11115_v14 = vld [vmem:[%s12357_s23 + $0x22c] sm:$0xf0]  ;;  %v7604_v20 = vor.u32 %v11083_v12, %v7603_v10  ;;  %5850 = vmatpush.bf16.msra.mxu3 %v7876_v11 }
  0x5c   : > { %v7859_v15 = vld [vmem:[%s12357_s23 + $0x320] sm:$0xf]  ;;  %v11147_v16 = vld [vmem:[%s12357_s23 + $0x32c] sm:$0xf0]  ;;  %v7732_v21 = vor.u32 %v11115_v14, %v7731_v13  ;;  %5812 = vmatpush.bf16.msra.mxu0 %v7476_v17 }
  0x5d   : > { %v7459_v18 = vld [vmem:[%s12357_s23] sm:$0xf]  ;;  %v11047_v19 = vld [vmem:[%s12357_s23 + $0xc] sm:$0xf0]  ;;  %v7860_v25 = vor.u32 %v11147_v16, %v7859_v15  ;;  %5825 = vmatpush.bf16.msra.mxu1 %v7604_v20 }
  0x5e   : > { %v7587_v22 = vld [vmem:[%s12357_s23 + $0x100] sm:$0xf]  ;;  %v11079_v23 = vld [vmem:[%s12357_s23 + $0x10c] sm:$0xf0]  ;;  %v7460_v32 = vor.u32 %v11047_v19, %v7459_v18  ;;  %5838 = vmatpush.bf16.msra.mxu2 %v7732_v21 }
  0x5f   : > { %v7715_v24 = vld [vmem:[%s12357_s23 + $0x200] sm:$0xf]  ;;  %v11111_v26 = vld [vmem:[%s12357_s23 + $0x20c] sm:$0xf0]  ;;  %v7588_v36 = vor.u32 %v11079_v23, %v7587_v22  ;;  %5851 = vmatpush.bf16.msra.mxu3 %v7860_v25 }
  0x60   : > { %v7843_v27 = vld [vmem:[%s12357_s23 + $0x300] sm:$0xf]  ;;  %v11143_v28 = vld [vmem:[%s12357_s23 + $0x30c] sm:$0xf0]  ;;  %v7716_v37 = vor.u32 %v11111_v26, %v7715_v24  ;;  %5813 = vmatpush.bf16.msra.mxu0 %v7460_v32 }
  0x61   : > { %v8083_v29 = vld [vmem:[%s12357_s23 + $0x4e0] sm:$0xf]  ;;  %v11203_v30 = vld [vmem:[%s12357_s23 + $0x4ec] sm:$0xf0]  ;;  %v7844_v40 = vor.u32 %v11143_v28, %v7843_v27  ;;  %5826 = vmatpush.bf16.msra.mxu1 %v7588_v36 }
  0x62   : > { %v8211_v31 = vld [vmem:[%s12357_s23 + $0x5e0] sm:$0xf]  ;;  %v11235_v33 = vld [vmem:[%s12357_s23 + $0x5ec] sm:$0xf0]  ;;  %v8084_v41 = vor.u32 %v11203_v30, %v8083_v29  ;;  %5839 = vmatpush.bf16.msra.mxu2 %v7716_v37 }
  0x63   : > { %v8339_v34 = vld [vmem:[%s12357_s23 + $0x6e0] sm:$0xf]  ;;  %v11267_v35 = vld [vmem:[%s12357_s23 + $0x6ec] sm:$0xf0]  ;;  %v8212_v42 = vor.u32 %v11235_v33, %v8211_v31  ;;  %5852 = vmatpush.bf16.msra.mxu3 %v7844_v40 }
  0x64   : > { %v8467_v38 = vld [vmem:[%s12357_s23 + $0x7e0] sm:$0xf]  ;;  %v11299_v39 = vld [vmem:[%s12357_s23 + $0x7ec] sm:$0xf0]  ;;  %v8340_v43 = vor.u32 %v11267_v35, %v8339_v34  ;;  %5858 = vmatpush.bf16.msrb.mxu0 %v8084_v41 }
  0x65   : > { %v8067_v44 = vld [vmem:[%s12357_s23 + $0x4c0] sm:$0xf]  ;;  %v11199_v45 = vld [vmem:[%s12357_s23 + $0x4cc] sm:$0xf0]  ;;  %v8468_v47 = vor.u32 %v11299_v39, %v8467_v38  ;;  %5871 = vmatpush.bf16.msrb.mxu1 %v8212_v42  ;;  %5840 = vmatmul.bf16.vlgmr.msra.gmra.mxu2 %v12477_v5 }
  0x66   : > { %v8195_v46 = vld [vmem:[%s12357_s23 + $0x5c0] sm:$0xf]  ;;  %v11231_v48 = vld [vmem:[%s12357_s23 + $0x5cc] sm:$0xf0]  ;;  %v8068_v53 = vor.u32 %v11199_v45, %v8067_v44  ;;  %5884 = vmatpush.bf16.msrb.mxu2 %v8340_v43  ;;  %5853 = vmatmul.bf16.vlgmr.msra.gmra.mxu3 %v12480_v7 }
  0x67   : > { %v8323_v49 = vld [vmem:[%s12357_s23 + $0x6c0] sm:$0xf]  ;;  %v11263_v50 = vld [vmem:[%s12357_s23 + $0x6cc] sm:$0xf0]  ;;  %v8196_v55 = vor.u32 %v11231_v48, %v8195_v46  ;;  %5897 = vmatpush.bf16.msrb.mxu3 %v8468_v47 }
  0x68   : > { %v8451_v51 = vld [vmem:[%s12357_s23 + $0x7c0] sm:$0xf]  ;;  %v11295_v52 = vld [vmem:[%s12357_s23 + $0x7cc] sm:$0xf0]  ;;  %v8324_v56 = vor.u32 %v11263_v50, %v8323_v49  ;;  %5859 = vmatpush.bf16.msrb.mxu0 %v8068_v53 }
  0x69   : > { %v8051_v54 = vld [vmem:[%s12357_s23 + $0x4a0] sm:$0xf]  ;;  %v11195_v57 = vld [vmem:[%s12357_s23 + $0x4ac] sm:$0xf0]  ;;  %v8452_v60 = vor.u32 %v11295_v52, %v8451_v51  ;;  %5872 = vmatpush.bf16.msrb.mxu1 %v8196_v55 }
  0x6a   : > { %v8179_v58 = vld [vmem:[%s12357_s23 + $0x5a0] sm:$0xf]  ;;  %v11227_v61 = vld [vmem:[%s12357_s23 + $0x5ac] sm:$0xf0]  ;;  %v8052_v4 = vor.u32 %v11195_v57, %v8051_v54  ;;  %5885 = vmatpush.bf16.msrb.mxu2 %v8324_v56 }
  0x6b   : > { %v8307_v62 = vld [vmem:[%s12357_s23 + $0x6a0] sm:$0xf]  ;;  %v11259_v63 = vld [vmem:[%s12357_s23 + $0x6ac] sm:$0xf0]  ;;  %v8180_v8 = vor.u32 %v11227_v61, %v8179_v58  ;;  %5898 = vmatpush.bf16.msrb.mxu3 %v8452_v60 }
  0x6c   : > { %v8435_v2 = vld [vmem:[%s12357_s23 + $0x7a0] sm:$0xf]  ;;  %v11291_v3 = vld [vmem:[%s12357_s23 + $0x7ac] sm:$0xf0]  ;;  %v8308_v9 = vor.u32 %v11259_v63, %v8307_v62  ;;  %5860 = vmatpush.bf16.msrb.mxu0 %v8052_v4  ;;  %v321_v4 = vld [vmem:[%s12381_s10 + $0x18] sm:$0xff] }
  0x6d   : > { %v318_v6 = vld [vmem:[%s12381_s10] sm:$0xff]  ;;  %v11191_v11 = vld [vmem:[%s12357_s23 + $0x48c] sm:$0xf0]  ;;  %v8436_v15 = vor.u32 %v11291_v3, %v8435_v2  ;;  %5873 = vmatpush.bf16.msrb.mxu1 %v8180_v8 }
  0x6e   : > { %v8035_v10 = vld [vmem:[%s12357_s23 + $0x480] sm:$0xf]  ;;  %v1242_v13 = vunpack.c.l.b16 %v318_v6  ;;  %v1243_v14 = vunpack.c.h.b16 %v318_v6  ;;  %v11223_v16 = vld [vmem:[%s12357_s23 + $0x58c] sm:$0xf0]  ;;  %5886 = vmatpush.bf16.msrb.mxu2 %v8308_v9 }
  0x6f   : > { %v8163_v12 = vld [vmem:[%s12357_s23 + $0x580] sm:$0xf]  ;;  %v11255_v18 = vld [vmem:[%s12357_s23 + $0x68c] sm:$0xf0]  ;;  %v8036_v23 = vor.u32 %v11191_v11, %v8035_v10  ;;  %5899 = vmatpush.bf16.msrb.mxu3 %v8436_v15 }
  0x70   : > { %v8291_v17 = vld [vmem:[%s12357_s23 + $0x680] sm:$0xf]  ;;  %v11287_v20 = vld [vmem:[%s12357_s23 + $0x78c] sm:$0xf0]  ;;  %v12491_v21 = vpack.c.b16 %v1242_v13, %v1242_v13  ;;  %v12494_v22 = vpack.c.b16 %v1243_v14, %v1243_v14  ;;  %v8164_v24 = vor.u32 %v11223_v16, %v8163_v12 }
  0x71   : > { %v8419_v19 = vld [vmem:[%s12357_s23 + $0x780] sm:$0xf]  ;;  %v8292_v25 = vor.u32 %v11255_v18, %v8291_v17  ;;  %v11187_v27 = vld [vmem:[%s12357_s23 + $0x46c] sm:$0xf0]  ;;  %5861 = vmatpush.bf16.msrb.mxu0 %v8036_v23  ;;  %v1248_v18 = vunpack.c.l.b16 %v321_v4 }
  0x72   : > { %v8019_v26 = vld [vmem:[%s12357_s23 + $0x460] sm:$0xf]  ;;  %v8420_v29 = vor.u32 %v11287_v20, %v8419_v19  ;;  %v11219_v30 = vld [vmem:[%s12357_s23 + $0x56c] sm:$0xf0]  ;;  %5814 = vmatmul.bf16.vlgmr.msra.gmra.mxu0 %v12491_v21  ;;  %5827 = vmatmul.bf16.vlgmr.msra.gmra.mxu1 %v12494_v22 }
  0x73   : > { %v8147_v28 = vld [vmem:[%s12357_s23 + $0x560] sm:$0xf]  ;;  %v11251_v32 = vld [vmem:[%s12357_s23 + $0x66c] sm:$0xf0]  ;;  %v8020_v35 = vor.u32 %v11187_v27, %v8019_v26  ;;  %5874 = vmatpush.bf16.msrb.mxu1 %v8164_v24  ;;  %5887 = vmatpush.bf16.msrb.mxu2 %v8292_v25  ;;  %v1249_v26 = vunpack.c.h.b16 %v321_v4 }
  0x74   : > { %v8275_v31 = vld [vmem:[%s12357_s23 + $0x660] sm:$0xf]  ;;  %v11283_v34 = vld [vmem:[%s12357_s23 + $0x76c] sm:$0xf0]  ;;  %v8148_v36 = vor.u32 %v11219_v30, %v8147_v28  ;;  %5900 = vmatpush.bf16.msrb.mxu3 %v8420_v29 }
  0x75   : > { %v8403_v33 = vld [vmem:[%s12357_s23 + $0x760] sm:$0xf]  ;;  %v8276_v37 = vor.u32 %v11251_v32, %v8275_v31  ;;  %v11183_v39 = vld [vmem:[%s12357_s23 + $0x44c] sm:$0xf0]  ;;  %5862 = vmatpush.bf16.msrb.mxu0 %v8020_v35 }
  0x76   : > { %v8003_v38 = vld [vmem:[%s12357_s23 + $0x440] sm:$0xf]  ;;  %v8404_v41 = vor.u32 %v11283_v34, %v8403_v33  ;;  %v11215_v42 = vld [vmem:[%s12357_s23 + $0x54c] sm:$0xf0] }
  0x77   : > { %v8131_v40 = vld [vmem:[%s12357_s23 + $0x540] sm:$0xf]  ;;  %v11247_v44 = vld [vmem:[%s12357_s23 + $0x64c] sm:$0xf0]  ;;  %v8004_v47 = vor.u32 %v11183_v39, %v8003_v38  ;;  %5875 = vmatpush.bf16.msrb.mxu1 %v8148_v36  ;;  %5888 = vmatpush.bf16.msrb.mxu2 %v8276_v37  ;;  %v12546_v39 = vpack.c.b16 %v1248_v18, %v1248_v18 }
  0x78   : > { %v8259_v43 = vld [vmem:[%s12357_s23 + $0x640] sm:$0xf]  ;;  %v11279_v46 = vld [vmem:[%s12357_s23 + $0x74c] sm:$0xf0]  ;;  %v8132_v48 = vor.u32 %v11215_v42, %v8131_v40  ;;  %5901 = vmatpush.bf16.msrb.mxu3 %v8404_v41 }
  0x79   : > { %v8387_v45 = vld [vmem:[%s12357_s23 + $0x740] sm:$0xf]  ;;  %v8260_v49 = vor.u32 %v11247_v44, %v8259_v43  ;;  %v11179_v51 = vld [vmem:[%s12357_s23 + $0x42c] sm:$0xf0]  ;;  %5863 = vmatpush.bf16.msrb.mxu0 %v8004_v47  ;;  %v12552_v43 = vpack.c.b16 %v1249_v26, %v1249_v26 }
  0x7a   : > { %v7987_v50 = vld [vmem:[%s12357_s23 + $0x420] sm:$0xf]  ;;  %v8388_v53 = vor.u32 %v11279_v46, %v8387_v45  ;;  %v11211_v54 = vld [vmem:[%s12357_s23 + $0x52c] sm:$0xf0] }
  0x7b   : > { %v8115_v52 = vld [vmem:[%s12357_s23 + $0x520] sm:$0xf]  ;;  %v11243_v56 = vld [vmem:[%s12357_s23 + $0x62c] sm:$0xf0]  ;;  %v7988_v60 = vor.u32 %v11179_v51, %v7987_v50  ;;  %5876 = vmatpush.bf16.msrb.mxu1 %v8132_v48  ;;  %5889 = vmatpush.bf16.msrb.mxu2 %v8260_v49 }
  0x7c   : > { %v8243_v55 = vld [vmem:[%s12357_s23 + $0x620] sm:$0xf]  ;;  %v11275_v58 = vld [vmem:[%s12357_s23 + $0x72c] sm:$0xf0]  ;;  %v8116_v0 = vor.u32 %v11211_v54, %v8115_v52  ;;  %5902 = vmatpush.bf16.msrb.mxu3 %v8388_v53 }
  0x7d   : > { %v8371_v57 = vld [vmem:[%s12357_s23 + $0x720] sm:$0xf]  ;;  %v11175_v61 = vld [vmem:[%s12357_s23 + $0x40c] sm:$0xf0]  ;;  %v8244_v1 = vor.u32 %v11243_v56, %v8243_v55  ;;  %5864 = vmatpush.bf16.msrb.mxu0 %v7988_v60 }
  0x7e   : > { %v7971_v59 = vld [vmem:[%s12357_s23 + $0x400] sm:$0xf]  ;;  %v11207_v63 = vld [vmem:[%s12357_s23 + $0x50c] sm:$0xf0]  ;;  %v8372_v6 = vor.u32 %v11275_v58, %v8371_v57 }
  0x7f   : > { %v8099_v62 = vld [vmem:[%s12357_s23 + $0x500] sm:$0xf]  ;;  %v11239_v3 = vld [vmem:[%s12357_s23 + $0x60c] sm:$0xf0]  ;;  %v7972_v14 = vor.u32 %v11175_v61, %v7971_v59  ;;  %5877 = vmatpush.bf16.msrb.mxu1 %v8116_v0  ;;  %5890 = vmatpush.bf16.msrb.mxu2 %v8244_v1 }
  0x80   : > { %v8227_v2 = vld [vmem:[%s12357_s23 + $0x600] sm:$0xf]  ;;  %v11271_v9 = vld [vmem:[%s12357_s23 + $0x70c] sm:$0xf0]  ;;  %v8100_v19 = vor.u32 %v11207_v63, %v8099_v62  ;;  %5903 = vmatpush.bf16.msrb.mxu3 %v8372_v6 }
  0x81   : > { %v8355_v8 = vld [vmem:[%s12357_s23 + $0x700] sm:$0xf]  ;;  %v320_v10 = vld [vmem:[%s12381_s10 + $0x10] sm:$0xff]  ;;  %v8228_v20 = vor.u32 %v11239_v3, %v8227_v2  ;;  %5865 = vmatpush.bf16.msrb.mxu0 %v7972_v14 }
  0x82   : > { %v8595_v11 = vld [vmem:[%s12357_s23 + $0x8e0] sm:$0xf]  ;;  %v11331_v12 = vld [vmem:[%s12357_s23 + $0x8ec] sm:$0xf0]  ;;  %v1246_v25 = vunpack.c.l.b16 %v320_v10  ;;  %v8356_v27 = vor.u32 %v11271_v9, %v8355_v8  ;;  %v1247_v29 = vunpack.c.h.b16 %v320_v10 }
  0x83   : > { %v8723_v13 = vld [vmem:[%s12357_s23 + $0x9e0] sm:$0xf]  ;;  %v11363_v15 = vld [vmem:[%s12357_s23 + $0x9ec] sm:$0xf0]  ;;  %v8596_v28 = vor.u32 %v11331_v12, %v8595_v11  ;;  %5878 = vmatpush.bf16.msrb.mxu1 %v8100_v19  ;;  %5891 = vmatpush.bf16.msrb.mxu2 %v8228_v20 }
  0x84   : > { %v8851_v16 = vld [vmem:[%s12357_s23 + $0xae0] sm:$0xf]  ;;  %v11395_v17 = vld [vmem:[%s12357_s23 + $0xaec] sm:$0xf0]  ;;  %v8724_v30 = vor.u32 %v11363_v15, %v8723_v13  ;;  %v12550_v42 = vpack.c.b16 %v1246_v25, %v1246_v25  ;;  %5904 = vmatpush.bf16.msrb.mxu3 %v8356_v27  ;;  %v12554_v45 = vpack.c.b16 %v1247_v29, %v1247_v29 }
  0x85   : > { %v8979_v23 = vld [vmem:[%s12357_s23 + $0xbe0] sm:$0xf]  ;;  %v11427_v24 = vld [vmem:[%s12357_s23 + $0xbec] sm:$0xf0]  ;;  %v8852_v31 = vor.u32 %v11395_v17, %v8851_v16  ;;  %5910 = vmatpush.bf16.msra.mxu0 %v8596_v28 }
  0x86   : > { %v8579_v32 = vld [vmem:[%s12357_s23 + $0x8c0] sm:$0xf]  ;;  %v11327_v33 = vld [vmem:[%s12357_s23 + $0x8cc] sm:$0xf0]  ;;  %v8980_v35 = vor.u32 %v11427_v24, %v8979_v23  ;;  %5892 = vmatmul.bf16.vlgmr.msrb.gmra.mxu2 %v12546_v39  ;;  %5866 = vmatmul.bf16.vlgmr.msrb.gmra.mxu0 %v12550_v42 }
  0x87   : > { %v8707_v34 = vld [vmem:[%s12357_s23 + $0x9c0] sm:$0xf]  ;;  %v11359_v36 = vld [vmem:[%s12357_s23 + $0x9cc] sm:$0xf0]  ;;  %v8580_v44 = vor.u32 %v11327_v33, %v8579_v32  ;;  %5923 = vmatpush.bf16.msra.mxu1 %v8724_v30  ;;  %5936 = vmatpush.bf16.msra.mxu2 %v8852_v31 }
  0x88   : > { %v8835_v37 = vld [vmem:[%s12357_s23 + $0xac0] sm:$0xf]  ;;  %v11391_v38 = vld [vmem:[%s12357_s23 + $0xacc] sm:$0xf0]  ;;  %v8708_v46 = vor.u32 %v11359_v36, %v8707_v34  ;;  %5949 = vmatpush.bf16.msra.mxu3 %v8980_v35  ;;  %5879 = vmatmul.bf16.vlgmr.msrb.gmra.mxu1 %v12554_v45 }
  0x89   : > { %v8963_v40 = vld [vmem:[%s12357_s23 + $0xbc0] sm:$0xf]  ;;  %v11423_v41 = vld [vmem:[%s12357_s23 + $0xbcc] sm:$0xf0]  ;;  %v8836_v47 = vor.u32 %v11391_v38, %v8835_v37  ;;  %5905 = vmatmul.bf16.vlgmr.msrb.gmra.mxu3 %v12552_v43  ;;  %5911 = vmatpush.bf16.msra.mxu0 %v8580_v44 }
  0x8a   : > { %v8563_v48 = vld [vmem:[%s12357_s23 + $0x8a0] sm:$0xf]  ;;  %v11323_v49 = vld [vmem:[%s12357_s23 + $0x8ac] sm:$0xf0]  ;;  %v8964_v51 = vor.u32 %v11423_v41, %v8963_v40 }
  0x8b   : > { %v8691_v50 = vld [vmem:[%s12357_s23 + $0x9a0] sm:$0xf]  ;;  %v11355_v52 = vld [vmem:[%s12357_s23 + $0x9ac] sm:$0xf0]  ;;  %v8564_v57 = vor.u32 %v11323_v49, %v8563_v48  ;;  %5924 = vmatpush.bf16.msra.mxu1 %v8708_v46  ;;  %5937 = vmatpush.bf16.msra.mxu2 %v8836_v47 }
  0x8c   : > { %v8819_v53 = vld [vmem:[%s12357_s23 + $0xaa0] sm:$0xf]  ;;  %v11387_v54 = vld [vmem:[%s12357_s23 + $0xaac] sm:$0xf0]  ;;  %v8692_v58 = vor.u32 %v11355_v52, %v8691_v50  ;;  %5950 = vmatpush.bf16.msra.mxu3 %v8964_v51 }
  0x8d   : > { %v8947_v55 = vld [vmem:[%s12357_s23 + $0xba0] sm:$0xf]  ;;  %v11419_v56 = vld [vmem:[%s12357_s23 + $0xbac] sm:$0xf0]  ;;  %v8820_v59 = vor.u32 %v11387_v54, %v8819_v53  ;;  %5912 = vmatpush.bf16.msra.mxu0 %v8564_v57 }
  0x8e   : > { %v8547_v60 = vld [vmem:[%s12357_s23 + $0x880] sm:$0xf]  ;;  %v11319_v61 = vld [vmem:[%s12357_s23 + $0x88c] sm:$0xf0]  ;;  %v8948_v63 = vor.u32 %v11419_v56, %v8947_v55 }
  0x8f   : > { %v8675_v62 = vld [vmem:[%s12357_s23 + $0x980] sm:$0xf]  ;;  %v11351_v0 = vld [vmem:[%s12357_s23 + $0x98c] sm:$0xf0]  ;;  %v8548_v6 = vor.u32 %v11319_v61, %v8547_v60  ;;  %5925 = vmatpush.bf16.msra.mxu1 %v8692_v58  ;;  %5938 = vmatpush.bf16.msra.mxu2 %v8820_v59 }
  0x90   : > { %v8803_v1 = vld [vmem:[%s12357_s23 + $0xa80] sm:$0xf]  ;;  %v11383_v2 = vld [vmem:[%s12357_s23 + $0xa8c] sm:$0xf0]  ;;  %v8676_v8 = vor.u32 %v11351_v0, %v8675_v62  ;;  %5951 = vmatpush.bf16.msra.mxu3 %v8948_v63  ;;  %v323_v62 = vld [vmem:[%s12381_s10 + $0x28] sm:$0xff] }
  0x91   : > { %v8931_v3 = vld [vmem:[%s12357_s23 + $0xb80] sm:$0xf]  ;;  %v11415_v4 = vld [vmem:[%s12357_s23 + $0xb8c] sm:$0xf0]  ;;  %v8804_v9 = vor.u32 %v11383_v2, %v8803_v1  ;;  %5913 = vmatpush.bf16.msra.mxu0 %v8548_v6 }
  0x92   : > { %v8531_v10 = vld [vmem:[%s12357_s23 + $0x860] sm:$0xf]  ;;  %v11315_v11 = vld [vmem:[%s12357_s23 + $0x86c] sm:$0xf0]  ;;  %v8932_v13 = vor.u32 %v11415_v4, %v8931_v3 }
  0x93   : > { %v8659_v12 = vld [vmem:[%s12357_s23 + $0x960] sm:$0xf]  ;;  %v11347_v14 = vld [vmem:[%s12357_s23 + $0x96c] sm:$0xf0]  ;;  %v8532_v19 = vor.u32 %v11315_v11, %v8531_v10  ;;  %5926 = vmatpush.bf16.msra.mxu1 %v8676_v8  ;;  %5939 = vmatpush.bf16.msra.mxu2 %v8804_v9 }
  0x94   : > { %v8787_v15 = vld [vmem:[%s12357_s23 + $0xa60] sm:$0xf]  ;;  %v11379_v16 = vld [vmem:[%s12357_s23 + $0xa6c] sm:$0xf0]  ;;  %v8660_v20 = vor.u32 %v11347_v14, %v8659_v12  ;;  %5952 = vmatpush.bf16.msra.mxu3 %v8932_v13  ;;  %v1252_v13 = vunpack.c.l.b16 %v323_v62 }
  0x95   : > { %v8915_v17 = vld [vmem:[%s12357_s23 + $0xb60] sm:$0xf]  ;;  %v11411_v18 = vld [vmem:[%s12357_s23 + $0xb6c] sm:$0xf0]  ;;  %v8788_v23 = vor.u32 %v11379_v16, %v8787_v15  ;;  %5914 = vmatpush.bf16.msra.mxu0 %v8532_v19 }
  0x96   : > { %v8515_v24 = vld [vmem:[%s12357_s23 + $0x840] sm:$0xf]  ;;  %v11311_v25 = vld [vmem:[%s12357_s23 + $0x84c] sm:$0xf0]  ;;  %v8916_v27 = vor.u32 %v11411_v18, %v8915_v17  ;;  %v1253_v17 = vunpack.c.h.b16 %v323_v62 }
  0x97   : > { %v8643_v26 = vld [vmem:[%s12357_s23 + $0x940] sm:$0xf]  ;;  %v11343_v28 = vld [vmem:[%s12357_s23 + $0x94c] sm:$0xf0]  ;;  %v8516_v33 = vor.u32 %v11311_v25, %v8515_v24  ;;  %5927 = vmatpush.bf16.msra.mxu1 %v8660_v20  ;;  %5940 = vmatpush.bf16.msra.mxu2 %v8788_v23 }
  0x98   : > { %v8771_v29 = vld [vmem:[%s12357_s23 + $0xa40] sm:$0xf]  ;;  %v11375_v30 = vld [vmem:[%s12357_s23 + $0xa4c] sm:$0xf0]  ;;  %v8644_v34 = vor.u32 %v11343_v28, %v8643_v26  ;;  %5953 = vmatpush.bf16.msra.mxu3 %v8916_v27 }
  0x99   : > { %v8899_v31 = vld [vmem:[%s12357_s23 + $0xb40] sm:$0xf]  ;;  %v11407_v32 = vld [vmem:[%s12357_s23 + $0xb4c] sm:$0xf0]  ;;  %v8772_v35 = vor.u32 %v11375_v30, %v8771_v29  ;;  %5915 = vmatpush.bf16.msra.mxu0 %v8516_v33  ;;  %v12626_v30 = vpack.c.b16 %v1252_v13, %v1252_v13 }
  0x9a   : > { %v8499_v36 = vld [vmem:[%s12357_s23 + $0x820] sm:$0xf]  ;;  %v11307_v37 = vld [vmem:[%s12357_s23 + $0x82c] sm:$0xf0]  ;;  %v8900_v40 = vor.u32 %v11407_v32, %v8899_v31 }
  0x9b   : > { %v8627_v38 = vld [vmem:[%s12357_s23 + $0x920] sm:$0xf]  ;;  %v11339_v41 = vld [vmem:[%s12357_s23 + $0x92c] sm:$0xf0]  ;;  %v8500_v50 = vor.u32 %v11307_v37, %v8499_v36  ;;  %5928 = vmatpush.bf16.msra.mxu1 %v8644_v34  ;;  %5941 = vmatpush.bf16.msra.mxu2 %v8772_v35  ;;  %v12632_v34 = vpack.c.b16 %v1253_v17, %v1253_v17 }
  0x9c   : > { %v8755_v44 = vld [vmem:[%s12357_s23 + $0xa20] sm:$0xf]  ;;  %v11371_v46 = vld [vmem:[%s12357_s23 + $0xa2c] sm:$0xf0]  ;;  %v8628_v54 = vor.u32 %v11339_v41, %v8627_v38  ;;  %5954 = vmatpush.bf16.msra.mxu3 %v8900_v40 }
  0x9d   : > { %v8883_v47 = vld [vmem:[%s12357_s23 + $0xb20] sm:$0xf]  ;;  %v11403_v48 = vld [vmem:[%s12357_s23 + $0xb2c] sm:$0xf0]  ;;  %v8756_v55 = vor.u32 %v11371_v46, %v8755_v44  ;;  %5916 = vmatpush.bf16.msra.mxu0 %v8500_v50 }
  0x9e   : > { %v8483_v49 = vld [vmem:[%s12357_s23 + $0x800] sm:$0xf]  ;;  %v11303_v51 = vld [vmem:[%s12357_s23 + $0x80c] sm:$0xf0]  ;;  %v8884_v59 = vor.u32 %v11403_v48, %v8883_v47 }
  0x9f   : > { %v8611_v52 = vld [vmem:[%s12357_s23 + $0x900] sm:$0xf]  ;;  %v11335_v53 = vld [vmem:[%s12357_s23 + $0x90c] sm:$0xf0]  ;;  %v8484_v2 = vor.u32 %v11303_v51, %v8483_v49  ;;  %5929 = vmatpush.bf16.msra.mxu1 %v8628_v54  ;;  %5942 = vmatpush.bf16.msra.mxu2 %v8756_v55 }
  0xa0   : > { %v8739_v56 = vld [vmem:[%s12357_s23 + $0xa00] sm:$0xf]  ;;  %v11367_v57 = vld [vmem:[%s12357_s23 + $0xa0c] sm:$0xf0]  ;;  %v8612_v9 = vor.u32 %v11335_v53, %v8611_v52  ;;  %5955 = vmatpush.bf16.msra.mxu3 %v8884_v59 }
  0xa1   : > { %v322_v58 = vld [vmem:[%s12381_s10 + $0x20] sm:$0xff]  ;;  %v11399_v61 = vld [vmem:[%s12357_s23 + $0xb0c] sm:$0xf0]  ;;  %v8740_v10 = vor.u32 %v11367_v57, %v8739_v56  ;;  %5917 = vmatpush.bf16.msra.mxu0 %v8484_v2 }
  0xa2   : > { %v8867_v60 = vld [vmem:[%s12357_s23 + $0xb00] sm:$0xf]  ;;  %v11459_v0 = vld [vmem:[%s12357_s23 + $0xcec] sm:$0xf0]  ;;  %v1250_v8 = vunpack.c.l.b16 %v322_v58  ;;  %v1251_v14 = vunpack.c.h.b16 %v322_v58 }
  0xa3   : > { %v9107_v63 = vld [vmem:[%s12357_s23 + $0xce0] sm:$0xf]  ;;  %v11491_v3 = vld [vmem:[%s12357_s23 + $0xdec] sm:$0xf0]  ;;  %v8868_v15 = vor.u32 %v11399_v61, %v8867_v60  ;;  %5930 = vmatpush.bf16.msra.mxu1 %v8612_v9  ;;  %5943 = vmatpush.bf16.msra.mxu2 %v8740_v10 }
  0xa4   : > { %v9235_v1 = vld [vmem:[%s12357_s23 + $0xde0] sm:$0xf]  ;;  %v11523_v6 = vld [vmem:[%s12357_s23 + $0xeec] sm:$0xf0]  ;;  %v9108_v16 = vor.u32 %v11459_v0, %v9107_v63  ;;  %v12621_v26 = vpack.c.b16 %v1250_v8, %v1250_v8  ;;  %v12628_v31 = vpack.c.b16 %v1251_v14, %v1251_v14 }
  0xa5   : > { %v9363_v4 = vld [vmem:[%s12357_s23 + $0xee0] sm:$0xf]  ;;  %v11555_v12 = vld [vmem:[%s12357_s23 + $0xfec] sm:$0xf0]  ;;  %v9236_v18 = vor.u32 %v11491_v3, %v9235_v1  ;;  %5956 = vmatpush.bf16.msra.mxu3 %v8868_v15 }
  0xa6   : > { %v9491_v11 = vld [vmem:[%s12357_s23 + $0xfe0] sm:$0xf]  ;;  %v9364_v19 = vor.u32 %v11523_v6, %v9363_v4  ;;  %v11455_v23 = vld [vmem:[%s12357_s23 + $0xccc] sm:$0xf0]  ;;  %5962 = vmatpush.bf16.msrb.mxu0 %v9108_v16  ;;  %5944 = vmatmul.bf16.vlgmr.msra.gmra.mxu2 %v12626_v30 }
  0xa7   : > { %v9091_v20 = vld [vmem:[%s12357_s23 + $0xcc0] sm:$0xf]  ;;  %v9492_v25 = vor.u32 %v11555_v12, %v9491_v11  ;;  %v11487_v27 = vld [vmem:[%s12357_s23 + $0xdcc] sm:$0xf0]  ;;  %5975 = vmatpush.bf16.msrb.mxu1 %v9236_v18  ;;  %5918 = vmatmul.bf16.vlgmr.msra.gmra.mxu0 %v12621_v26 }
  0xa8   : > { %v9219_v24 = vld [vmem:[%s12357_s23 + $0xdc0] sm:$0xf]  ;;  %v11519_v29 = vld [vmem:[%s12357_s23 + $0xecc] sm:$0xf0]  ;;  %v9092_v35 = vor.u32 %v11455_v23, %v9091_v20  ;;  %5988 = vmatpush.bf16.msrb.mxu2 %v9364_v19  ;;  %5931 = vmatmul.bf16.vlgmr.msra.gmra.mxu1 %v12628_v31 }
  0xa9   : > { %v9347_v28 = vld [vmem:[%s12357_s23 + $0xec0] sm:$0xf]  ;;  %v11551_v33 = vld [vmem:[%s12357_s23 + $0xfcc] sm:$0xf0]  ;;  %v9220_v36 = vor.u32 %v11487_v27, %v9219_v24  ;;  %6001 = vmatpush.bf16.msrb.mxu3 %v9492_v25 }
  0xaa   : > { %v9475_v32 = vld [vmem:[%s12357_s23 + $0xfc0] sm:$0xf]  ;;  %v9348_v37 = vor.u32 %v11519_v29, %v9347_v28  ;;  %v11451_v40 = vld [vmem:[%s12357_s23 + $0xcac] sm:$0xf0]  ;;  %5957 = vmatmul.bf16.vlgmr.msra.gmra.mxu3 %v12632_v34  ;;  %5963 = vmatpush.bf16.msrb.mxu0 %v9092_v35 }
  0xab   : > { %v9075_v38 = vld [vmem:[%s12357_s23 + $0xca0] sm:$0xf]  ;;  %v9476_v44 = vor.u32 %v11551_v33, %v9475_v32  ;;  %v11483_v46 = vld [vmem:[%s12357_s23 + $0xdac] sm:$0xf0]  ;;  %5976 = vmatpush.bf16.msrb.mxu1 %v9220_v36 }
  0xac   : > { %v9203_v41 = vld [vmem:[%s12357_s23 + $0xda0] sm:$0xf]  ;;  %v11515_v48 = vld [vmem:[%s12357_s23 + $0xeac] sm:$0xf0]  ;;  %v9076_v51 = vor.u32 %v11451_v40, %v9075_v38  ;;  %5989 = vmatpush.bf16.msrb.mxu2 %v9348_v37 }
  0xad   : > { %v9331_v47 = vld [vmem:[%s12357_s23 + $0xea0] sm:$0xf]  ;;  %v11547_v50 = vld [vmem:[%s12357_s23 + $0xfac] sm:$0xf0]  ;;  %v9204_v52 = vor.u32 %v11483_v46, %v9203_v41  ;;  %6002 = vmatpush.bf16.msrb.mxu3 %v9476_v44 }
  0xae   : > { %v9459_v49 = vld [vmem:[%s12357_s23 + $0xfa0] sm:$0xf]  ;;  %v9332_v53 = vor.u32 %v11515_v48, %v9331_v47  ;;  %v11447_v55 = vld [vmem:[%s12357_s23 + $0xc8c] sm:$0xf0]  ;;  %5964 = vmatpush.bf16.msrb.mxu0 %v9076_v51 }
  0xaf   : > { %v9059_v54 = vld [vmem:[%s12357_s23 + $0xc80] sm:$0xf]  ;;  %v9460_v57 = vor.u32 %v11547_v50, %v9459_v49  ;;  %v11479_v58 = vld [vmem:[%s12357_s23 + $0xd8c] sm:$0xf0]  ;;  %5977 = vmatpush.bf16.msrb.mxu1 %v9204_v52 }
  0xb0   : > { %v9187_v56 = vld [vmem:[%s12357_s23 + $0xd80] sm:$0xf]  ;;  %v11511_v60 = vld [vmem:[%s12357_s23 + $0xe8c] sm:$0xf0]  ;;  %v9060_v63 = vor.u32 %v11447_v55, %v9059_v54  ;;  %5990 = vmatpush.bf16.msrb.mxu2 %v9332_v53 }
  0xb1   : > { %v9315_v59 = vld [vmem:[%s12357_s23 + $0xe80] sm:$0xf]  ;;  %v11543_v62 = vld [vmem:[%s12357_s23 + $0xf8c] sm:$0xf0]  ;;  %v9188_v0 = vor.u32 %v11479_v58, %v9187_v56  ;;  %6003 = vmatpush.bf16.msrb.mxu3 %v9460_v57 }
  0xb2   : > { %v9443_v61 = vld [vmem:[%s12357_s23 + $0xf80] sm:$0xf]  ;;  %v9316_v1 = vor.u32 %v11511_v60, %v9315_v59  ;;  %v11443_v3 = vld [vmem:[%s12357_s23 + $0xc6c] sm:$0xf0]  ;;  %5965 = vmatpush.bf16.msrb.mxu0 %v9060_v63  ;;  %v325_v60 = vld [vmem:[%s12381_s10 + $0x38] sm:$0xff] }
  0xb3   : > { %v9043_v2 = vld [vmem:[%s12357_s23 + $0xc60] sm:$0xf]  ;;  %v9444_v6 = vor.u32 %v11543_v62, %v9443_v61  ;;  %v11475_v8 = vld [vmem:[%s12357_s23 + $0xd6c] sm:$0xf0]  ;;  %5978 = vmatpush.bf16.msrb.mxu1 %v9188_v0 }
  0xb4   : > { %v9171_v4 = vld [vmem:[%s12357_s23 + $0xd60] sm:$0xf]  ;;  %v11507_v10 = vld [vmem:[%s12357_s23 + $0xe6c] sm:$0xf0]  ;;  %v9044_v13 = vor.u32 %v11443_v3, %v9043_v2  ;;  %5991 = vmatpush.bf16.msrb.mxu2 %v9316_v1 }
  0xb5   : > { %v9299_v9 = vld [vmem:[%s12357_s23 + $0xe60] sm:$0xf]  ;;  %v11539_v12 = vld [vmem:[%s12357_s23 + $0xf6c] sm:$0xf0]  ;;  %v9172_v14 = vor.u32 %v11475_v8, %v9171_v4  ;;  %6004 = vmatpush.bf16.msrb.mxu3 %v9444_v6 }
  0xb6   : > { %v9427_v11 = vld [vmem:[%s12357_s23 + $0xf60] sm:$0xf]  ;;  %v9300_v15 = vor.u32 %v11507_v10, %v9299_v9  ;;  %v11439_v17 = vld [vmem:[%s12357_s23 + $0xc4c] sm:$0xf0]  ;;  %5966 = vmatpush.bf16.msrb.mxu0 %v9044_v13 }
  0xb7   : > { %v9027_v16 = vld [vmem:[%s12357_s23 + $0xc40] sm:$0xf]  ;;  %v9428_v19 = vor.u32 %v11539_v12, %v9427_v11  ;;  %v11471_v20 = vld [vmem:[%s12357_s23 + $0xd4c] sm:$0xf0]  ;;  %5979 = vmatpush.bf16.msrb.mxu1 %v9172_v14  ;;  %v1256_v11 = vunpack.c.l.b16 %v325_v60 }
  0xb8   : > { %v9155_v18 = vld [vmem:[%s12357_s23 + $0xd40] sm:$0xf]  ;;  %v11503_v24 = vld [vmem:[%s12357_s23 + $0xe4c] sm:$0xf0]  ;;  %v9028_v28 = vor.u32 %v11439_v17, %v9027_v16  ;;  %5992 = vmatpush.bf16.msrb.mxu2 %v9300_v15  ;;  %v1257_v15 = vunpack.c.h.b16 %v325_v60 }
  0xb9   : > { %v9283_v23 = vld [vmem:[%s12357_s23 + $0xe40] sm:$0xf]  ;;  %v11535_v27 = vld [vmem:[%s12357_s23 + $0xf4c] sm:$0xf0]  ;;  %v9156_v29 = vor.u32 %v11471_v20, %v9155_v18  ;;  %6005 = vmatpush.bf16.msrb.mxu3 %v9428_v19 }
  0xba   : > { %v9411_v25 = vld [vmem:[%s12357_s23 + $0xf40] sm:$0xf]  ;;  %v9284_v32 = vor.u32 %v11503_v24, %v9283_v23  ;;  %v11435_v35 = vld [vmem:[%s12357_s23 + $0xc2c] sm:$0xf0]  ;;  %5967 = vmatpush.bf16.msrb.mxu0 %v9028_v28 }
  0xbb   : > { %v9011_v33 = vld [vmem:[%s12357_s23 + $0xc20] sm:$0xf]  ;;  %v9412_v37 = vor.u32 %v11535_v27, %v9411_v25  ;;  %v11467_v38 = vld [vmem:[%s12357_s23 + $0xd2c] sm:$0xf0]  ;;  %5980 = vmatpush.bf16.msrb.mxu1 %v9156_v29  ;;  %v12704_v29 = vpack.c.b16 %v1256_v11, %v1256_v11 }
  0xbc   : > { %v9139_v36 = vld [vmem:[%s12357_s23 + $0xd20] sm:$0xf]  ;;  %v11499_v41 = vld [vmem:[%s12357_s23 + $0xe2c] sm:$0xf0]  ;;  %v9012_v48 = vor.u32 %v11435_v35, %v9011_v33  ;;  %5993 = vmatpush.bf16.msrb.mxu2 %v9284_v32 }
  0xbd   : > { %v9267_v40 = vld [vmem:[%s12357_s23 + $0xe20] sm:$0xf]  ;;  %v11531_v46 = vld [vmem:[%s12357_s23 + $0xf2c] sm:$0xf0]  ;;  %v9140_v52 = vor.u32 %v11467_v38, %v9139_v36  ;;  %6006 = vmatpush.bf16.msrb.mxu3 %v9412_v37  ;;  %v12710_v36 = vpack.c.b16 %v1257_v15, %v1257_v15 }
  0xbe   : > { %v9395_v44 = vld [vmem:[%s12357_s23 + $0xf20] sm:$0xf]  ;;  %v11431_v49 = vld [vmem:[%s12357_s23 + $0xc0c] sm:$0xf0]  ;;  %v9268_v53 = vor.u32 %v11499_v41, %v9267_v40  ;;  %5968 = vmatpush.bf16.msrb.mxu0 %v9012_v48 }
  0xbf   : > { %v8995_v47 = vld [vmem:[%s12357_s23 + $0xc00] sm:$0xf]  ;;  %v11463_v51 = vld [vmem:[%s12357_s23 + $0xd0c] sm:$0xf0]  ;;  %v9396_v57 = vor.u32 %v11531_v46, %v9395_v44  ;;  %5981 = vmatpush.bf16.msrb.mxu1 %v9140_v52 }
  0xc0   : > { %v9123_v50 = vld [vmem:[%s12357_s23 + $0xd00] sm:$0xf]  ;;  %v11495_v55 = vld [vmem:[%s12357_s23 + $0xe0c] sm:$0xf0]  ;;  %v8996_v0 = vor.u32 %v11431_v49, %v8995_v47  ;;  %5994 = vmatpush.bf16.msrb.mxu2 %v9268_v53 }
  0xc1   : > { %v9251_v54 = vld [vmem:[%s12357_s23 + $0xe00] sm:$0xf]  ;;  %v324_v56 = vld [vmem:[%s12381_s10 + $0x30] sm:$0xff]  ;;  %v9124_v6 = vor.u32 %v11463_v51, %v9123_v50  ;;  %6007 = vmatpush.bf16.msrb.mxu3 %v9396_v57 }
  0xc2   : > { %v9379_v58 = vld [vmem:[%s12357_s23 + $0xf00] sm:$0xf]  ;;  %v11527_v59 = vld [vmem:[%s12357_s23 + $0xf0c] sm:$0xf0]  ;;  %v1254_v4 = vunpack.c.l.b16 %v324_v56  ;;  %v9252_v8 = vor.u32 %v11495_v55, %v9251_v54  ;;  %v1255_v12 = vunpack.c.h.b16 %v324_v56  ;;  %5969 = vmatpush.bf16.msrb.mxu0 %v8996_v0 }
  0xc3   : > { %v9619_v61 = vld [vmem:[%s12357_s23 + $0x10e0] sm:$0xf]  ;;  %v11587_v62 = vld [vmem:[%s12357_s23 + $0x10ec] sm:$0xf0]  ;;  %v9380_v13 = vor.u32 %v11527_v59, %v9379_v58  ;;  %5982 = vmatpush.bf16.msrb.mxu1 %v9124_v6 }
  0xc4   : > { %v9747_v63 = vld [vmem:[%s12357_s23 + $0x11e0] sm:$0xf]  ;;  %v11619_v1 = vld [vmem:[%s12357_s23 + $0x11ec] sm:$0xf0]  ;;  %v9620_v14 = vor.u32 %v11587_v62, %v9619_v61  ;;  %v12699_v24 = vpack.c.b16 %v1254_v4, %v1254_v4  ;;  %5995 = vmatpush.bf16.msrb.mxu2 %v9252_v8  ;;  %v12706_v32 = vpack.c.b16 %v1255_v12, %v1255_v12 }
  0xc5   : > { %v9875_v2 = vld [vmem:[%s12357_s23 + $0x12e0] sm:$0xf]  ;;  %v11651_v3 = vld [vmem:[%s12357_s23 + $0x12ec] sm:$0xf0]  ;;  %v9748_v16 = vor.u32 %v11619_v1, %v9747_v63  ;;  %6008 = vmatpush.bf16.msrb.mxu3 %v9380_v13 }
  0xc6   : > { %v10003_v9 = vld [vmem:[%s12357_s23 + $0x13e0] sm:$0xf]  ;;  %v11683_v10 = vld [vmem:[%s12357_s23 + $0x13ec] sm:$0xf0]  ;;  %v9876_v17 = vor.u32 %v11651_v3, %v9875_v2  ;;  %6014 = vmatpush.bf16.msra.mxu0 %v9620_v14  ;;  %5983 = vmatmul.bf16.vlgmr.msrb.gmra.mxu1 %v12706_v32 }
  0xc7   : > { %v9603_v18 = vld [vmem:[%s12357_s23 + $0x10c0] sm:$0xf]  ;;  %v11583_v19 = vld [vmem:[%s12357_s23 + $0x10cc] sm:$0xf0]  ;;  %v10004_v23 = vor.u32 %v11683_v10, %v10003_v9  ;;  %6027 = vmatpush.bf16.msra.mxu1 %v9748_v16  ;;  %5970 = vmatmul.bf16.vlgmr.msrb.gmra.mxu0 %v12699_v24 }
  0xc8   : > { %v9731_v20 = vld [vmem:[%s12357_s23 + $0x11c0] sm:$0xf]  ;;  %v11615_v25 = vld [vmem:[%s12357_s23 + $0x11cc] sm:$0xf0]  ;;  %v9604_v37 = vor.u32 %v11583_v19, %v9603_v18  ;;  %6040 = vmatpush.bf16.msra.mxu2 %v9876_v17  ;;  %6009 = vmatmul.bf16.vlgmr.msrb.gmra.mxu3 %v12710_v36 }
  0xc9   : > { %v9859_v27 = vld [vmem:[%s12357_s23 + $0x12c0] sm:$0xf]  ;;  %v11647_v28 = vld [vmem:[%s12357_s23 + $0x12cc] sm:$0xf0]  ;;  %v9732_v38 = vor.u32 %v11615_v25, %v9731_v20  ;;  %6053 = vmatpush.bf16.msra.mxu3 %v10004_v23  ;;  %5996 = vmatmul.bf16.vlgmr.msrb.gmra.mxu2 %v12704_v29 }
  0xca   : > { %v9987_v33 = vld [vmem:[%s12357_s23 + $0x13c0] sm:$0xf]  ;;  %v11679_v35 = vld [vmem:[%s12357_s23 + $0x13cc] sm:$0xf0]  ;;  %v9860_v40 = vor.u32 %v11647_v28, %v9859_v27  ;;  %6015 = vmatpush.bf16.msra.mxu0 %v9604_v37 }
  0xcb   : > { %v9587_v41 = vld [vmem:[%s12357_s23 + $0x10a0] sm:$0xf]  ;;  %v11579_v44 = vld [vmem:[%s12357_s23 + $0x10ac] sm:$0xf0]  ;;  %v9988_v47 = vor.u32 %v11679_v35, %v9987_v33  ;;  %6028 = vmatpush.bf16.msra.mxu1 %v9732_v38 }
  0xcc   : > { %v9715_v46 = vld [vmem:[%s12357_s23 + $0x11a0] sm:$0xf]  ;;  %v11611_v48 = vld [vmem:[%s12357_s23 + $0x11ac] sm:$0xf0]  ;;  %v9588_v53 = vor.u32 %v11579_v44, %v9587_v41  ;;  %6041 = vmatpush.bf16.msra.mxu2 %v9860_v40 }
  0xcd   : > { %v9843_v49 = vld [vmem:[%s12357_s23 + $0x12a0] sm:$0xf]  ;;  %v11643_v50 = vld [vmem:[%s12357_s23 + $0x12ac] sm:$0xf0]  ;;  %v9716_v54 = vor.u32 %v11611_v48, %v9715_v46  ;;  %6054 = vmatpush.bf16.msra.mxu3 %v9988_v47 }
  0xce   : > { %v9971_v51 = vld [vmem:[%s12357_s23 + $0x13a0] sm:$0xf]  ;;  %v11675_v52 = vld [vmem:[%s12357_s23 + $0x13ac] sm:$0xf0]  ;;  %v9844_v55 = vor.u32 %v11643_v50, %v9843_v49  ;;  %6016 = vmatpush.bf16.msra.mxu0 %v9588_v53 }
  0xcf   : > { %v9571_v56 = vld [vmem:[%s12357_s23 + $0x1080] sm:$0xf]  ;;  %v11575_v57 = vld [vmem:[%s12357_s23 + $0x108c] sm:$0xf0]  ;;  %v9972_v59 = vor.u32 %v11675_v52, %v9971_v51  ;;  %6029 = vmatpush.bf16.msra.mxu1 %v9716_v54 }
  0xd0   : > { %v9699_v58 = vld [vmem:[%s12357_s23 + $0x1180] sm:$0xf]  ;;  %v11607_v60 = vld [vmem:[%s12357_s23 + $0x118c] sm:$0xf0]  ;;  %v9572_v1 = vor.u32 %v11575_v57, %v9571_v56  ;;  %6042 = vmatpush.bf16.msra.mxu2 %v9844_v55 }
  0xd1   : > { %v9827_v61 = vld [vmem:[%s12357_s23 + $0x1280] sm:$0xf]  ;;  %v11639_v62 = vld [vmem:[%s12357_s23 + $0x128c] sm:$0xf0]  ;;  %v9700_v2 = vor.u32 %v11607_v60, %v9699_v58  ;;  %6055 = vmatpush.bf16.msra.mxu3 %v9972_v59 }
  0xd2   : > { %v9955_v63 = vld [vmem:[%s12357_s23 + $0x1380] sm:$0xf]  ;;  %v11671_v0 = vld [vmem:[%s12357_s23 + $0x138c] sm:$0xf0]  ;;  %v9828_v3 = vor.u32 %v11639_v62, %v9827_v61  ;;  %6017 = vmatpush.bf16.msra.mxu0 %v9572_v1 }
  0xd3   : > { %v9555_v4 = vld [vmem:[%s12357_s23 + $0x1060] sm:$0xf]  ;;  %v11571_v6 = vld [vmem:[%s12357_s23 + $0x106c] sm:$0xf0]  ;;  %v9956_v9 = vor.u32 %v11671_v0, %v9955_v63  ;;  %6030 = vmatpush.bf16.msra.mxu1 %v9700_v2  ;;  %v327_v2 = vld [vmem:[%s12381_s10 + $0x48] sm:$0xff] }
  0xd4   : > { %v9683_v8 = vld [vmem:[%s12357_s23 + $0x1160] sm:$0xf]  ;;  %v11603_v10 = vld [vmem:[%s12357_s23 + $0x116c] sm:$0xf0]  ;;  %v9556_v15 = vor.u32 %v11571_v6, %v9555_v4  ;;  %6043 = vmatpush.bf16.msra.mxu2 %v9828_v3 }
  0xd5   : > { %v9811_v11 = vld [vmem:[%s12357_s23 + $0x1260] sm:$0xf]  ;;  %v11635_v12 = vld [vmem:[%s12357_s23 + $0x126c] sm:$0xf0]  ;;  %v9684_v16 = vor.u32 %v11603_v10, %v9683_v8  ;;  %6056 = vmatpush.bf16.msra.mxu3 %v9956_v9 }
  0xd6   : > { %v9939_v13 = vld [vmem:[%s12357_s23 + $0x1360] sm:$0xf]  ;;  %v11667_v14 = vld [vmem:[%s12357_s23 + $0x136c] sm:$0xf0]  ;;  %v9812_v17 = vor.u32 %v11635_v12, %v9811_v11  ;;  %6018 = vmatpush.bf16.msra.mxu0 %v9556_v15 }
  0xd7   : > { %v9539_v18 = vld [vmem:[%s12357_s23 + $0x1040] sm:$0xf]  ;;  %v11567_v19 = vld [vmem:[%s12357_s23 + $0x104c] sm:$0xf0]  ;;  %v9940_v23 = vor.u32 %v11667_v14, %v9939_v13  ;;  %6031 = vmatpush.bf16.msra.mxu1 %v9684_v16 }
  0xd8   : > { %v9667_v20 = vld [vmem:[%s12357_s23 + $0x1140] sm:$0xf]  ;;  %v11599_v25 = vld [vmem:[%s12357_s23 + $0x114c] sm:$0xf0]  ;;  %v9540_v37 = vor.u32 %v11567_v19, %v9539_v18  ;;  %6044 = vmatpush.bf16.msra.mxu2 %v9812_v17  ;;  %v1260_v17 = vunpack.c.l.b16 %v327_v2 }
  0xd9   : > { %v9795_v27 = vld [vmem:[%s12357_s23 + $0x1240] sm:$0xf]  ;;  %v11631_v28 = vld [vmem:[%s12357_s23 + $0x124c] sm:$0xf0]  ;;  %v9668_v38 = vor.u32 %v11599_v25, %v9667_v20  ;;  %6057 = vmatpush.bf16.msra.mxu3 %v9940_v23  ;;  %v1261_v23 = vunpack.c.h.b16 %v327_v2 }
  0xda   : > { %v9923_v33 = vld [vmem:[%s12357_s23 + $0x1340] sm:$0xf]  ;;  %v11663_v35 = vld [vmem:[%s12357_s23 + $0x134c] sm:$0xf0]  ;;  %v9796_v40 = vor.u32 %v11631_v28, %v9795_v27  ;;  %6019 = vmatpush.bf16.msra.mxu0 %v9540_v37 }
  0xdb   : > { %v9523_v41 = vld [vmem:[%s12357_s23 + $0x1020] sm:$0xf]  ;;  %v11563_v44 = vld [vmem:[%s12357_s23 + $0x102c] sm:$0xf0]  ;;  %v9924_v47 = vor.u32 %v11663_v35, %v9923_v33  ;;  %6032 = vmatpush.bf16.msra.mxu1 %v9668_v38 }
  0xdc   : > { %v9651_v46 = vld [vmem:[%s12357_s23 + $0x1120] sm:$0xf]  ;;  %v11595_v48 = vld [vmem:[%s12357_s23 + $0x112c] sm:$0xf0]  ;;  %v9524_v54 = vor.u32 %v11563_v44, %v9523_v41  ;;  %6045 = vmatpush.bf16.msra.mxu2 %v9796_v40 }
  0xdd   : > { %v9779_v49 = vld [vmem:[%s12357_s23 + $0x1220] sm:$0xf]  ;;  %v11627_v50 = vld [vmem:[%s12357_s23 + $0x122c] sm:$0xf0]  ;;  %v9652_v58 = vor.u32 %v11595_v48, %v9651_v46  ;;  %6058 = vmatpush.bf16.msra.mxu3 %v9924_v47  ;;  %v12782_v46 = vpack.c.b16 %v1260_v17, %v1260_v17 }
  0xde   : > { %v9907_v51 = vld [vmem:[%s12357_s23 + $0x1320] sm:$0xf]  ;;  %v11659_v52 = vld [vmem:[%s12357_s23 + $0x132c] sm:$0xf0]  ;;  %v9780_v59 = vor.u32 %v11627_v50, %v9779_v49  ;;  %6020 = vmatpush.bf16.msra.mxu0 %v9524_v54  ;;  %v12788_v50 = vpack.c.b16 %v1261_v23, %v1261_v23 }
  0xdf   : > { %v9507_v53 = vld [vmem:[%s12357_s23 + $0x1000] sm:$0xf]  ;;  %v11559_v55 = vld [vmem:[%s12357_s23 + $0x100c] sm:$0xf0]  ;;  %v9908_v63 = vor.u32 %v11659_v52, %v9907_v51  ;;  %6033 = vmatpush.bf16.msra.mxu1 %v9652_v58 }
  0xe0   : > { %v9635_v56 = vld [vmem:[%s12357_s23 + $0x1100] sm:$0xf]  ;;  %v11591_v57 = vld [vmem:[%s12357_s23 + $0x110c] sm:$0xf0]  ;;  %v9508_v8 = vor.u32 %v11559_v55, %v9507_v53  ;;  %6046 = vmatpush.bf16.msra.mxu2 %v9780_v59 }
  0xe1   : > { %v9763_v60 = vld [vmem:[%s12357_s23 + $0x1200] sm:$0xf]  ;;  %v11623_v61 = vld [vmem:[%s12357_s23 + $0x120c] sm:$0xf0]  ;;  %v9636_v13 = vor.u32 %v11591_v57, %v9635_v56  ;;  %6059 = vmatpush.bf16.msra.mxu3 %v9908_v63 }
  0xe2   : > { %v326_v62 = vld [vmem:[%s12381_s10 + $0x40] sm:$0xff]  ;;  %v11655_v1 = vld [vmem:[%s12357_s23 + $0x130c] sm:$0xf0]  ;;  %v9764_v14 = vor.u32 %v11623_v61, %v9763_v60  ;;  %6021 = vmatpush.bf16.msra.mxu0 %v9508_v8 }
  0xe3   : > { %v9891_v0 = vld [vmem:[%s12357_s23 + $0x1300] sm:$0xf]  ;;  %v11715_v4 = vld [vmem:[%s12357_s23 + $0x14ec] sm:$0xf0]  ;;  %v1258_v12 = vunpack.c.l.b16 %v326_v62  ;;  %v1259_v18 = vunpack.c.h.b16 %v326_v62  ;;  %6034 = vmatpush.bf16.msra.mxu1 %v9636_v13 }
  0xe4   : > { %v10131_v3 = vld [vmem:[%s12357_s23 + $0x14e0] sm:$0xf]  ;;  %v11747_v9 = vld [vmem:[%s12357_s23 + $0x15ec] sm:$0xf0]  ;;  %v9892_v19 = vor.u32 %v11655_v1, %v9891_v0  ;;  %6047 = vmatpush.bf16.msra.mxu2 %v9764_v14 }
  0xe5   : > { %v10259_v6 = vld [vmem:[%s12357_s23 + $0x15e0] sm:$0xf]  ;;  %v11779_v11 = vld [vmem:[%s12357_s23 + $0x16ec] sm:$0xf0]  ;;  %v10132_v20 = vor.u32 %v11715_v4, %v10131_v3  ;;  %v12777_v38 = vpack.c.b16 %v1258_v12, %v1258_v12  ;;  %v12784_v47 = vpack.c.b16 %v1259_v18, %v1259_v18 }
  0xe6   : > { %v10387_v10 = vld [vmem:[%s12357_s23 + $0x16e0] sm:$0xf]  ;;  %v11811_v16 = vld [vmem:[%s12357_s23 + $0x17ec] sm:$0xf0]  ;;  %v10260_v25 = vor.u32 %v11747_v9, %v10259_v6  ;;  %6060 = vmatpush.bf16.msra.mxu3 %v9892_v19 }
  0xe7   : > { %v10515_v15 = vld [vmem:[%s12357_s23 + $0x17e0] sm:$0xf]  ;;  %v10388_v27 = vor.u32 %v11779_v11, %v10387_v10  ;;  %v11711_v33 = vld [vmem:[%s12357_s23 + $0x14cc] sm:$0xf0]  ;;  %6066 = vmatpush.bf16.msrb.mxu0 %v10132_v20  ;;  %6048 = vmatmul.bf16.vlgmr.msra.gmra.mxu2 %v12782_v46 }
  0xe8   : > { %v10115_v28 = vld [vmem:[%s12357_s23 + $0x14c0] sm:$0xf]  ;;  %v10516_v37 = vor.u32 %v11811_v16, %v10515_v15  ;;  %v11743_v40 = vld [vmem:[%s12357_s23 + $0x15cc] sm:$0xf0]  ;;  %6079 = vmatpush.bf16.msrb.mxu1 %v10260_v25  ;;  %6022 = vmatmul.bf16.vlgmr.msra.gmra.mxu0 %v12777_v38 }
  0xe9   : > { %v10243_v35 = vld [vmem:[%s12357_s23 + $0x15c0] sm:$0xf]  ;;  %v11775_v44 = vld [vmem:[%s12357_s23 + $0x16cc] sm:$0xf0]  ;;  %v10116_v51 = vor.u32 %v11711_v33, %v10115_v28  ;;  %6092 = vmatpush.bf16.msrb.mxu2 %v10388_v27  ;;  %6035 = vmatmul.bf16.vlgmr.msra.gmra.mxu1 %v12784_v47 }
  0xea   : > { %v10371_v41 = vld [vmem:[%s12357_s23 + $0x16c0] sm:$0xf]  ;;  %v11807_v49 = vld [vmem:[%s12357_s23 + $0x17cc] sm:$0xf0]  ;;  %v10244_v52 = vor.u32 %v11743_v40, %v10243_v35  ;;  %6105 = vmatpush.bf16.msrb.mxu3 %v10516_v37 }
  0xeb   : > { %v10499_v48 = vld [vmem:[%s12357_s23 + $0x17c0] sm:$0xf]  ;;  %v10372_v53 = vor.u32 %v11775_v44, %v10371_v41  ;;  %v11707_v55 = vld [vmem:[%s12357_s23 + $0x14ac] sm:$0xf0]  ;;  %6061 = vmatmul.bf16.vlgmr.msra.gmra.mxu3 %v12788_v50  ;;  %6067 = vmatpush.bf16.msrb.mxu0 %v10116_v51 }
  0xec   : > { %v10099_v54 = vld [vmem:[%s12357_s23 + $0x14a0] sm:$0xf]  ;;  %v10500_v57 = vor.u32 %v11807_v49, %v10499_v48  ;;  %v11739_v58 = vld [vmem:[%s12357_s23 + $0x15ac] sm:$0xf0]  ;;  %6080 = vmatpush.bf16.msrb.mxu1 %v10244_v52 }
  0xed   : > { %v10227_v56 = vld [vmem:[%s12357_s23 + $0x15a0] sm:$0xf]  ;;  %v11771_v60 = vld [vmem:[%s12357_s23 + $0x16ac] sm:$0xf0]  ;;  %v10100_v63 = vor.u32 %v11707_v55, %v10099_v54  ;;  %6093 = vmatpush.bf16.msrb.mxu2 %v10372_v53 }
  0xee   : > { %v10355_v59 = vld [vmem:[%s12357_s23 + $0x16a0] sm:$0xf]  ;;  %v11803_v62 = vld [vmem:[%s12357_s23 + $0x17ac] sm:$0xf0]  ;;  %v10228_v0 = vor.u32 %v11739_v58, %v10227_v56  ;;  %6106 = vmatpush.bf16.msrb.mxu3 %v10500_v57 }
  0xef   : > { %v10483_v61 = vld [vmem:[%s12357_s23 + $0x17a0] sm:$0xf]  ;;  %v10356_v1 = vor.u32 %v11771_v60, %v10355_v59  ;;  %v11703_v3 = vld [vmem:[%s12357_s23 + $0x148c] sm:$0xf0]  ;;  %6068 = vmatpush.bf16.msrb.mxu0 %v10100_v63  ;;  %v5815_v55 = vpop.f32.mrf.mxu0  ;;  %v5828_v57 = vpop.f32.mrf.mxu1 }
  0xf0   : > { %v10083_v2 = vld [vmem:[%s12357_s23 + $0x1480] sm:$0xf]  ;;  %v10484_v6 = vor.u32 %v11803_v62, %v10483_v61  ;;  %v11735_v8 = vld [vmem:[%s12357_s23 + $0x158c] sm:$0xf0]  ;;  %6081 = vmatpush.bf16.msrb.mxu1 %v10228_v0  ;;  %v5829_v63 = vadd.f32 %v5828_v57, %v5815_v55  ;;  %v5841_v0 = vpop.f32.mrf.mxu2 }
  0xf1   : > { %v10211_v4 = vld [vmem:[%s12357_s23 + $0x1580] sm:$0xf]  ;;  %v11767_v10 = vld [vmem:[%s12357_s23 + $0x168c] sm:$0xf0]  ;;  %v10084_v13 = vor.u32 %v11703_v3, %v10083_v2  ;;  %6094 = vmatpush.bf16.msrb.mxu2 %v10356_v1 }
  0xf2   : > { %v10339_v9 = vld [vmem:[%s12357_s23 + $0x1680] sm:$0xf]  ;;  %v11799_v12 = vld [vmem:[%s12357_s23 + $0x178c] sm:$0xf0]  ;;  %v10212_v14 = vor.u32 %v11735_v8, %v10211_v4  ;;  %6107 = vmatpush.bf16.msrb.mxu3 %v10484_v6  ;;  %v5854_v6 = vpop.f32.mrf.mxu3 }
  0xf3   : > { %v10467_v11 = vld [vmem:[%s12357_s23 + $0x1780] sm:$0xf]  ;;  %v10340_v15 = vor.u32 %v11767_v10, %v10339_v9  ;;  %v11699_v17 = vld [vmem:[%s12357_s23 + $0x146c] sm:$0xf0]  ;;  %6069 = vmatpush.bf16.msrb.mxu0 %v10084_v13 }
  0xf4   : > { %v10067_v16 = vld [vmem:[%s12357_s23 + $0x1460] sm:$0xf]  ;;  %v10468_v19 = vor.u32 %v11799_v12, %v10467_v11  ;;  %v11731_v20 = vld [vmem:[%s12357_s23 + $0x156c] sm:$0xf0]  ;;  %6082 = vmatpush.bf16.msrb.mxu1 %v10212_v14  ;;  %v5842_v11 = vadd.f32 %v5841_v0, %v5829_v63 }
  0xf5   : > { %v10195_v18 = vld [vmem:[%s12357_s23 + $0x1560] sm:$0xf]  ;;  %v11763_v25 = vld [vmem:[%s12357_s23 + $0x166c] sm:$0xf0]  ;;  %v10068_v33 = vor.u32 %v11699_v17, %v10067_v16  ;;  %6095 = vmatpush.bf16.msrb.mxu2 %v10340_v15 }
  0xf6   : > { %v10323_v23 = vld [vmem:[%s12357_s23 + $0x1660] sm:$0xf]  ;;  %v11795_v28 = vld [vmem:[%s12357_s23 + $0x176c] sm:$0xf0]  ;;  %v10196_v35 = vor.u32 %v11731_v20, %v10195_v18  ;;  %6108 = vmatpush.bf16.msrb.mxu3 %v10468_v19 }
  0xf7   : > { %v10451_v27 = vld [vmem:[%s12357_s23 + $0x1760] sm:$0xf]  ;;  %v10324_v37 = vor.u32 %v11763_v25, %v10323_v23  ;;  %v11695_v41 = vld [vmem:[%s12357_s23 + $0x144c] sm:$0xf0]  ;;  %6070 = vmatpush.bf16.msrb.mxu0 %v10068_v33  ;;  %v12841_v23 = vadd.f32 %v5854_v6, %v5842_v11  ;;  %v329_v33 = vld [vmem:[%s12381_s10 + $0x58] sm:$0xff] }
  0xf8   : > { %v10051_v40 = vld [vmem:[%s12357_s23 + $0x1440] sm:$0xf]  ;;  %v10452_v48 = vor.u32 %v11795_v28, %v10451_v27  ;;  %v11727_v49 = vld [vmem:[%s12357_s23 + $0x154c] sm:$0xf0]  ;;  %6083 = vmatpush.bf16.msrb.mxu1 %v10196_v35  ;;  %v1265_v63 = vunpack.c.h.b16 %v329_v33 }
  0xf9   : > { %v10179_v44 = vld [vmem:[%s12357_s23 + $0x1540] sm:$0xf]  ;;  %v11759_v52 = vld [vmem:[%s12357_s23 + $0x164c] sm:$0xf0]  ;;  %v10052_v56 = vor.u32 %v11695_v41, %v10051_v40  ;;  %6096 = vmatpush.bf16.msrb.mxu2 %v10324_v37  ;;  %v5817_v41 = vpop.f32.mrf.mxu0 }
  0xfa   : > { %v10307_v51 = vld [vmem:[%s12357_s23 + $0x1640] sm:$0xf]  ;;  %v11791_v54 = vld [vmem:[%s12357_s23 + $0x174c] sm:$0xf0]  ;;  %v10180_v58 = vor.u32 %v11727_v49, %v10179_v44  ;;  %6109 = vmatpush.bf16.msrb.mxu3 %v10452_v48  ;;  %v5856_v0 = vpop.f32.mrf.mxu3 }
  0xfb   : > { %v10435_v53 = vld [vmem:[%s12357_s23 + $0x1740] sm:$0xf]  ;;  %v10308_v59 = vor.u32 %v11759_v52, %v10307_v51  ;;  %v11691_v61 = vld [vmem:[%s12357_s23 + $0x142c] sm:$0xf0]  ;;  %6071 = vmatpush.bf16.msrb.mxu0 %v10052_v56 }
  0xfc   : > { %v10035_v60 = vld [vmem:[%s12357_s23 + $0x1420] sm:$0xf]  ;;  %v10436_v1 = vor.u32 %v11791_v54, %v10435_v53  ;;  %v11723_v2 = vld [vmem:[%s12357_s23 + $0x152c] sm:$0xf0]  ;;  %6084 = vmatpush.bf16.msrb.mxu1 %v10180_v58  ;;  %v5830_v53 = vpop.f32.mrf.mxu1  ;;  %v1264_v58 = vunpack.c.l.b16 %v329_v33 }
  0xfd   : > { %v10163_v62 = vld [vmem:[%s12357_s23 + $0x1520] sm:$0xf]  ;;  %v11755_v4 = vld [vmem:[%s12357_s23 + $0x162c] sm:$0xf0]  ;;  %v10036_v12 = vor.u32 %v11691_v61, %v10035_v60  ;;  %6097 = vmatpush.bf16.msrb.mxu2 %v10308_v59  ;;  %v5843_v60 = vpop.f32.mrf.mxu2 }
  0xfe   : > { %v10291_v3 = vld [vmem:[%s12357_s23 + $0x1620] sm:$0xf]  ;;  %v11787_v9 = vld [vmem:[%s12357_s23 + $0x172c] sm:$0xf0]  ;;  %v10164_v16 = vor.u32 %v11723_v2, %v10163_v62  ;;  %6110 = vmatpush.bf16.msrb.mxu3 %v10436_v1 }
  0xff   : > { %v10419_v8 = vld [vmem:[%s12357_s23 + $0x1720] sm:$0xf]  ;;  %v11687_v13 = vld [vmem:[%s12357_s23 + $0x140c] sm:$0xf0]  ;;  %v10292_v17 = vor.u32 %v11755_v4, %v10291_v3  ;;  %6072 = vmatpush.bf16.msrb.mxu0 %v10036_v12 }
 0x100   : > { %v10019_v10 = vld [vmem:[%s12357_s23 + $0x1400] sm:$0xf]  ;;  %v11719_v15 = vld [vmem:[%s12357_s23 + $0x150c] sm:$0xf0]  ;;  %v10420_v25 = vor.u32 %v11787_v9, %v10419_v8  ;;  %6085 = vmatpush.bf16.msrb.mxu1 %v10164_v16 }
 0x101   : > { %v10147_v14 = vld [vmem:[%s12357_s23 + $0x1500] sm:$0xf]  ;;  %v11751_v19 = vld [vmem:[%s12357_s23 + $0x160c] sm:$0xf0]  ;;  %v10020_v44 = vor.u32 %v11687_v13, %v10019_v10  ;;  %6098 = vmatpush.bf16.msrb.mxu2 %v10292_v17  ;;  %v12862_v13 = vpack.c.b16 %v1264_v58, %v1264_v58  ;;  %v12868_v17 = vpack.c.b16 %v1265_v63, %v1265_v63 }
 0x102   : > { %v10275_v18 = vld [vmem:[%s12357_s23 + $0x1600] sm:$0xf]  ;;  %v328_v20 = vld [vmem:[%s12381_s10 + $0x50] sm:$0xff]  ;;  %v10148_v54 = vor.u32 %v11719_v15, %v10147_v14  ;;  %6111 = vmatpush.bf16.msrb.mxu3 %v10420_v25 }
 0x103   : > { %v10403_v27 = vld [vmem:[%s12357_s23 + $0x1700] sm:$0xf]  ;;  %v11783_v28 = vld [vmem:[%s12357_s23 + $0x170c] sm:$0xf0]  ;;  %v1262_v52 = vunpack.c.l.b16 %v328_v20  ;;  %v10276_v55 = vor.u32 %v11751_v19, %v10275_v18  ;;  %v1263_v59 = vunpack.c.h.b16 %v328_v20  ;;  %6073 = vmatpush.bf16.msrb.mxu0 %v10020_v44 }
 0x104   : > { %v10643_v35 = vld [vmem:[%s12357_s23 + $0x18e0] sm:$0xf]  ;;  %v11843_v37 = vld [vmem:[%s12357_s23 + $0x18ec] sm:$0xf0]  ;;  %v10404_v61 = vor.u32 %v11783_v28, %v10403_v27  ;;  %6086 = vmatpush.bf16.msrb.mxu1 %v10148_v54 }
 0x105   : > { %v10771_v40 = vld [vmem:[%s12357_s23 + $0x19e0] sm:$0xf]  ;;  %v11875_v48 = vld [vmem:[%s12357_s23 + $0x19ec] sm:$0xf0]  ;;  %v10644_v62 = vor.u32 %v11843_v37, %v10643_v35  ;;  %v12857_v9 = vpack.c.b16 %v1262_v52, %v1262_v52  ;;  %6099 = vmatpush.bf16.msrb.mxu2 %v10276_v55  ;;  %v12864_v14 = vpack.c.b16 %v1263_v59, %v1263_v59 }
 0x106   : > { %v10899_v49 = vld [vmem:[%s12357_s23 + $0x1ae0] sm:$0xf]  ;;  %v11907_v51 = vld [vmem:[%s12357_s23 + $0x1aec] sm:$0xf0]  ;;  %v10772_v1 = vor.u32 %v11875_v48, %v10771_v40  ;;  %6112 = vmatpush.bf16.msrb.mxu3 %v10404_v61 }
 0x107   : > { %v11027_v56 = vld [vmem:[%s12357_s23 + $0x1be0] sm:$0xf]  ;;  %v11939_v57 = vld [vmem:[%s12357_s23 + $0x1bec] sm:$0xf0]  ;;  %v10900_v2 = vor.u32 %v11907_v51, %v10899_v49  ;;  %6118 = vmatpush.bf16.msra.mxu0 %v10644_v62  ;;  %6087 = vmatmul.bf16.vlgmr.msrb.gmra.mxu1 %v12864_v14  ;;  %v5867_v62 = vpop.f32.mrf.mxu0 }
 0x108   : > { %v10627_v3 = vld [vmem:[%s12357_s23 + $0x18c0] sm:$0xf]  ;;  %v11839_v4 = vld [vmem:[%s12357_s23 + $0x18cc] sm:$0xf0]  ;;  %v11028_v8 = vor.u32 %v11939_v57, %v11027_v56  ;;  %6131 = vmatpush.bf16.msra.mxu1 %v10772_v1  ;;  %6074 = vmatmul.bf16.vlgmr.msrb.gmra.mxu0 %v12857_v9 }
 0x109   : > { %v10755_v6 = vld [vmem:[%s12357_s23 + $0x19c0] sm:$0xf]  ;;  %v11871_v10 = vld [vmem:[%s12357_s23 + $0x19cc] sm:$0xf0]  ;;  %v10628_v18 = vor.u32 %v11839_v4, %v10627_v3  ;;  %6144 = vmatpush.bf16.msra.mxu2 %v10900_v2  ;;  %6113 = vmatmul.bf16.vlgmr.msrb.gmra.mxu3 %v12868_v17  ;;  %v5868_v4 = vadd.f32 %v5867_v62, %v12841_v23 }
 0x10a   : > { %v10883_v11 = vld [vmem:[%s12357_s23 + $0x1ac0] sm:$0xf]  ;;  %v11903_v12 = vld [vmem:[%s12357_s23 + $0x1acc] sm:$0xf0]  ;;  %v10756_v19 = vor.u32 %v11871_v10, %v10755_v6  ;;  %6157 = vmatpush.bf16.msra.mxu3 %v11028_v8  ;;  %6100 = vmatmul.bf16.vlgmr.msrb.gmra.mxu2 %v12862_v13  ;;  %v5880_v6 = vpop.f32.mrf.mxu1 }
 0x10b   : > { %v11011_v15 = vld [vmem:[%s12357_s23 + $0x1bc0] sm:$0xf]  ;;  %v11935_v16 = vld [vmem:[%s12357_s23 + $0x1bcc] sm:$0xf0]  ;;  %v10884_v20 = vor.u32 %v11903_v12, %v10883_v11  ;;  %6119 = vmatpush.bf16.msra.mxu0 %v10628_v18  ;;  %v5881_v18 = vadd.f32 %v5880_v6, %v5868_v4 }
 0x10c   : > { %v10611_v25 = vld [vmem:[%s12357_s23 + $0x18a0] sm:$0xf]  ;;  %v11835_v27 = vld [vmem:[%s12357_s23 + $0x18ac] sm:$0xf0]  ;;  %v11012_v33 = vor.u32 %v11935_v16, %v11011_v15  ;;  %6132 = vmatpush.bf16.msra.mxu1 %v10756_v19 }
 0x10d   : > { %v10739_v28 = vld [vmem:[%s12357_s23 + $0x19a0] sm:$0xf]  ;;  %v11867_v35 = vld [vmem:[%s12357_s23 + $0x19ac] sm:$0xf0]  ;;  %v10612_v48 = vor.u32 %v11835_v27, %v10611_v25  ;;  %6145 = vmatpush.bf16.msra.mxu2 %v10884_v20 }
 0x10e   : > { %v10867_v37 = vld [vmem:[%s12357_s23 + $0x1aa0] sm:$0xf]  ;;  %v11899_v40 = vld [vmem:[%s12357_s23 + $0x1aac] sm:$0xf0]  ;;  %v10740_v49 = vor.u32 %v11867_v35, %v10739_v28  ;;  %6158 = vmatpush.bf16.msra.mxu3 %v11012_v33  ;;  %v5893_v33 = vpop.f32.mrf.mxu2 }
 0x10f   : > { %v10995_v41 = vld [vmem:[%s12357_s23 + $0x1ba0] sm:$0xf]  ;;  %v11931_v44 = vld [vmem:[%s12357_s23 + $0x1bac] sm:$0xf0]  ;;  %v10868_v51 = vor.u32 %v11899_v40, %v10867_v37  ;;  %6120 = vmatpush.bf16.msra.mxu0 %v10612_v48  ;;  %v5906_v48 = vpop.f32.mrf.mxu3 }
 0x110   : > { %v10595_v52 = vld [vmem:[%s12357_s23 + $0x1880] sm:$0xf]  ;;  %v11831_v53 = vld [vmem:[%s12357_s23 + $0x188c] sm:$0xf0]  ;;  %v10996_v55 = vor.u32 %v11931_v44, %v10995_v41  ;;  %6133 = vmatpush.bf16.msra.mxu1 %v10740_v49  ;;  %v5894_v44 = vadd.f32 %v5893_v33, %v5881_v18  ;;  %v11073_v33 = vld [vmem:[%s12357_s23 + $0xe4] sm:$0xf] }
 0x111   : > { %v10723_v54 = vld [vmem:[%s12357_s23 + $0x1980] sm:$0xf]  ;;  %v11863_v56 = vld [vmem:[%s12357_s23 + $0x198c] sm:$0xf0]  ;;  %v10596_v61 = vor.u32 %v11831_v53, %v10595_v52  ;;  %6146 = vmatpush.bf16.msra.mxu2 %v10868_v51 }
 0x112   : > { %v10851_v57 = vld [vmem:[%s12357_s23 + $0x1a80] sm:$0xf]  ;;  %v11895_v58 = vld [vmem:[%s12357_s23 + $0x1a8c] sm:$0xf0]  ;;  %v10724_v63 = vor.u32 %v11863_v56, %v10723_v54  ;;  %6159 = vmatpush.bf16.msra.mxu3 %v10996_v55  ;;  %v12907_v53 = vadd.f32 %v5906_v48, %v5894_v44  ;;  %v5869_v54 = vpop.f32.mrf.mxu0  ;;  %v11137_v44 = vld [vmem:[%s12357_s23 + $0x2e4] sm:$0xf] }
 0x113   : > { %v10979_v59 = vld [vmem:[%s12357_s23 + $0x1b80] sm:$0xf]  ;;  %v11927_v60 = vld [vmem:[%s12357_s23 + $0x1b8c] sm:$0xf0]  ;;  %v10852_v0 = vor.u32 %v11895_v58, %v10851_v57  ;;  %6121 = vmatpush.bf16.msra.mxu0 %v10596_v61  ;;  %v7829_v48 = vld [vmem:[%s12357_s23 + $0x2f0] sm:$0xf0] }
 0x114   : > { %v10579_v1 = vld [vmem:[%s12357_s23 + $0x1860] sm:$0xf]  ;;  %v11827_v2 = vld [vmem:[%s12357_s23 + $0x186c] sm:$0xf0]  ;;  %v10980_v8 = vor.u32 %v11927_v60, %v10979_v59  ;;  %6134 = vmatpush.bf16.msra.mxu1 %v10724_v63  ;;  %v5882_v60 = vpop.f32.mrf.mxu1  ;;  %v11169_v54 = vld [vmem:[%s12357_s23 + $0x3e4] sm:$0xf] }
 0x115   : > { %v10707_v3 = vld [vmem:[%s12357_s23 + $0x1960] sm:$0xf]  ;;  %v11859_v10 = vld [vmem:[%s12357_s23 + $0x196c] sm:$0xf0]  ;;  %v10580_v19 = vor.u32 %v11827_v2, %v10579_v1  ;;  %6147 = vmatpush.bf16.msra.mxu2 %v10852_v0 }
 0x116   : > { %v10835_v11 = vld [vmem:[%s12357_s23 + $0x1a60] sm:$0xf]  ;;  %v11891_v12 = vld [vmem:[%s12357_s23 + $0x1a6c] sm:$0xf0]  ;;  %v10708_v23 = vor.u32 %v11859_v10, %v10707_v3  ;;  %6160 = vmatpush.bf16.msra.mxu3 %v10980_v8 }
 0x117   : > { %v10963_v15 = vld [vmem:[%s12357_s23 + $0x1b60] sm:$0xf]  ;;  %v11923_v16 = vld [vmem:[%s12357_s23 + $0x1b6c] sm:$0xf0]  ;;  %v10836_v20 = vor.u32 %v11891_v12, %v10835_v11  ;;  %6122 = vmatpush.bf16.msra.mxu0 %v10580_v19  ;;  %v5895_v19 = vpop.f32.mrf.mxu2 }
 0x118   : > { %v10563_v25 = vld [vmem:[%s12357_s23 + $0x1840] sm:$0xf]  ;;  %v11823_v27 = vld [vmem:[%s12357_s23 + $0x184c] sm:$0xf0]  ;;  %v10964_v35 = vor.u32 %v11923_v16, %v10963_v15  ;;  %6135 = vmatpush.bf16.msra.mxu1 %v10708_v23 }
 0x119   : > { %v10691_v28 = vld [vmem:[%s12357_s23 + $0x1940] sm:$0xf]  ;;  %v11855_v37 = vld [vmem:[%s12357_s23 + $0x194c] sm:$0xf0]  ;;  %v10564_v52 = vor.u32 %v11823_v27, %v10563_v25  ;;  %6148 = vmatpush.bf16.msra.mxu2 %v10836_v20  ;;  %v331_v27 = vld [vmem:[%s12381_s10 + $0x68] sm:$0xff] }
 0x11a   : > { %v10819_v40 = vld [vmem:[%s12357_s23 + $0x1a40] sm:$0xf]  ;;  %v11887_v41 = vld [vmem:[%s12357_s23 + $0x1a4c] sm:$0xf0]  ;;  %v10692_v55 = vor.u32 %v11855_v37, %v10691_v28  ;;  %6161 = vmatpush.bf16.msra.mxu3 %v10964_v35  ;;  %v5908_v28 = vpop.f32.mrf.mxu3  ;;  %v7573_v35 = vld [vmem:[%s12357_s23 + $0xf0] sm:$0xf0]  ;;  %v1269_v60 = vunpack.c.h.b16 %v331_v27 }
 0x11b   : > { %v10947_v49 = vld [vmem:[%s12357_s23 + $0x1b40] sm:$0xf]  ;;  %v11919_v51 = vld [vmem:[%s12357_s23 + $0x1b4c] sm:$0xf0]  ;;  %v10820_v56 = vor.u32 %v11887_v41, %v10819_v40  ;;  %6123 = vmatpush.bf16.msra.mxu0 %v10564_v52  ;;  %v11105_v37 = vld [vmem:[%s12357_s23 + $0x1e4] sm:$0xf] }
 0x11c   : > { %v10547_v57 = vld [vmem:[%s12357_s23 + $0x1820] sm:$0xf]  ;;  %v11819_v58 = vld [vmem:[%s12357_s23 + $0x182c] sm:$0xf0]  ;;  %v10948_v61 = vor.u32 %v11919_v51, %v10947_v49  ;;  %6136 = vmatpush.bf16.msra.mxu1 %v10692_v55  ;;  %v7701_v41 = vld [vmem:[%s12357_s23 + $0x1f0] sm:$0xf0] }
 0x11d   : > { %v10675_v59 = vld [vmem:[%s12357_s23 + $0x1920] sm:$0xf]  ;;  %v11851_v62 = vld [vmem:[%s12357_s23 + $0x192c] sm:$0xf0]  ;;  %v10548_v4 = vor.u32 %v11819_v58, %v10547_v57  ;;  %6149 = vmatpush.bf16.msra.mxu2 %v10820_v56  ;;  %v7957_v55 = vld [vmem:[%s12357_s23 + $0x3f0] sm:$0xf0]  ;;  %v1268_v56 = vunpack.c.l.b16 %v331_v27 }
 0x11e   : > { %v10803_v63 = vld [vmem:[%s12357_s23 + $0x1a20] sm:$0xf]  ;;  %v11883_v0 = vld [vmem:[%s12357_s23 + $0x1a2c] sm:$0xf0]  ;;  %v10676_v11 = vor.u32 %v11851_v62, %v10675_v59  ;;  %6162 = vmatpush.bf16.msra.mxu3 %v10948_v61  ;;  %v7576_v59 = vor.u32 %v11073_v33, %v7573_v35  ;;  %v7704_v61 = vor.u32 %v11105_v37, %v7701_v41  ;;  %v7832_v62 = vor.u32 %v11137_v44, %v7829_v48  ;;  %v11097_v27 = vld [vmem:[%s12357_s23 + $0x1a4] sm:$0xf] }
 0x11f   : > { %v10931_v1 = vld [vmem:[%s12357_s23 + $0x1b20] sm:$0xf]  ;;  %v11915_v2 = vld [vmem:[%s12357_s23 + $0x1b2c] sm:$0xf0]  ;;  %v10804_v12 = vor.u32 %v11883_v0, %v10803_v63  ;;  %6124 = vmatpush.bf16.msra.mxu0 %v10548_v4  ;;  %v11069_v63 = vld [vmem:[%s12357_s23 + $0xc4] sm:$0xf] }
 0x120   : > { %v10531_v3 = vld [vmem:[%s12357_s23 + $0x1800] sm:$0xf]  ;;  %v11815_v6 = vld [vmem:[%s12357_s23 + $0x180c] sm:$0xf0]  ;;  %v10932_v23 = vor.u32 %v11915_v2, %v10931_v1  ;;  %6137 = vmatpush.bf16.msra.mxu1 %v10676_v11  ;;  %v7557_v0 = vld [vmem:[%s12357_s23 + $0xd0] sm:$0xf0]  ;;  %v7960_v2 = vor.u32 %v11169_v54, %v7957_v55 }
 0x121   : > { %v10659_v8 = vld [vmem:[%s12357_s23 + $0x1900] sm:$0xf]  ;;  %v11847_v10 = vld [vmem:[%s12357_s23 + $0x190c] sm:$0xf0]  ;;  %v10532_v40 = vor.u32 %v11815_v6, %v10531_v3  ;;  %6150 = vmatpush.bf16.msra.mxu2 %v10804_v12  ;;  %v11101_v1 = vld [vmem:[%s12357_s23 + $0x1c4] sm:$0xf] }
 0x122   : > { %v10787_v15 = vld [vmem:[%s12357_s23 + $0x1a00] sm:$0xf]  ;;  %v11879_v16 = vld [vmem:[%s12357_s23 + $0x1a0c] sm:$0xf0]  ;;  %v10660_v51 = vor.u32 %v11847_v10, %v10659_v8  ;;  %6163 = vmatpush.bf16.msra.mxu3 %v10932_v23  ;;  %v7685_v4 = vld [vmem:[%s12357_s23 + $0x1d0] sm:$0xf0]  ;;  %v12943_v10 = vpack.c.b16 %v1268_v56, %v1268_v56 }
 0x123   : > { %v330_v18 = vld [vmem:[%s12381_s10 + $0x60] sm:$0xff]  ;;  %v11911_v25 = vld [vmem:[%s12357_s23 + $0x1b0c] sm:$0xf0]  ;;  %v10788_v52 = vor.u32 %v11879_v16, %v10787_v15  ;;  %6125 = vmatpush.bf16.msra.mxu0 %v10532_v40  ;;  %v7813_v8 = vld [vmem:[%s12357_s23 + $0x2d0] sm:$0xf0]  ;;  %v12949_v16 = vpack.c.b16 %v1269_v60, %v1269_v60  ;;  %v7688_v19 = vor.u32 %v11101_v1, %v7685_v4 }
 0x124   : > { %v10915_v20 = vld [vmem:[%s12357_s23 + $0x1b00] sm:$0xf]  ;;  %v1266_v49 = vunpack.c.l.b16 %v330_v18  ;;  %v1267_v57 = vunpack.c.h.b16 %v330_v18  ;;  %v11133_v6 = vld [vmem:[%s12357_s23 + $0x2c4] sm:$0xf]  ;;  %6138 = vmatpush.bf16.msra.mxu1 %v10660_v51  ;;  %v7941_v15 = vld [vmem:[%s12357_s23 + $0x3d0] sm:$0xf0]  ;;  %v7560_v18 = vor.u32 %v11069_v63, %v7557_v0 }
 0x125   : > { %v10916_v58 = vor.u32 %v11911_v25, %v10915_v20  ;;  %6151 = vmatpush.bf16.msra.mxu2 %v10788_v52  ;;  %v11165_v12 = vld [vmem:[%s12357_s23 + $0x3c4] sm:$0xf]  ;;  %v7816_v23 = vor.u32 %v11133_v6, %v7813_v8  ;;  %v7541_v25 = vld [vmem:[%s12357_s23 + $0xb0] sm:$0xf0]  ;;  %v5932_v0 = vpop.f32.mrf.mxu1 }
 0x126   : > { %v12938_v3 = vpack.c.b16 %v1266_v49, %v1266_v49  ;;  %v12945_v11 = vpack.c.b16 %v1267_v57, %v1267_v57  ;;  %v11065_v20 = vld [vmem:[%s12357_s23 + $0xa4] sm:$0xf]  ;;  %v7944_v28 = vor.u32 %v11165_v12, %v7941_v15  ;;  %v7669_v33 = vld [vmem:[%s12357_s23 + $0x1b0] sm:$0xf0] }
 0x127   : > { %6164 = vmatpush.bf16.msra.mxu3 %v10916_v58  ;;  %6170 = vmatpush.bf16.msrb.mxu0 %v7576_v59  ;;  %v11129_v35 = vld [vmem:[%s12357_s23 + $0x2a4] sm:$0xf]  ;;  %v7797_v37 = vld [vmem:[%s12357_s23 + $0x2b0] sm:$0xf0]  ;;  %v7544_v44 = vor.u32 %v11065_v20, %v7541_v25  ;;  %v7672_v48 = vor.u32 %v11097_v27, %v7669_v33  ;;  %v5919_v59 = vpop.f32.mrf.mxu0 }
 0x128   : > { %6183 = vmatpush.bf16.msrb.mxu1 %v7704_v61  ;;  %6126 = vmatmul.bf16.vlgmr.msra.gmra.mxu0 %v12938_v3  ;;  %v11161_v40 = vld [vmem:[%s12357_s23 + $0x3a4] sm:$0xf]  ;;  %v7925_v41 = vld [vmem:[%s12357_s23 + $0x3b0] sm:$0xf0]  ;;  %v7800_v49 = vor.u32 %v11129_v35, %v7797_v37 }
 0x129   : > { %6196 = vmatpush.bf16.msrb.mxu2 %v7832_v62  ;;  %6139 = vmatmul.bf16.vlgmr.msra.gmra.mxu1 %v12945_v11  ;;  %v11061_v51 = vld [vmem:[%s12357_s23 + $0x84] sm:$0xf]  ;;  %v7525_v52 = vld [vmem:[%s12357_s23 + $0x90] sm:$0xf0]  ;;  %v7928_v55 = vor.u32 %v11161_v40, %v7925_v41  ;;  %v5920_v62 = vadd.f32 %v5919_v59, %v12907_v53  ;;  %v5945_v41 = vpop.f32.mrf.mxu2 }
 0x12a   : > { %6152 = vmatmul.bf16.vlgmr.msra.gmra.mxu2 %v12943_v10  ;;  %6165 = vmatmul.bf16.vlgmr.msra.gmra.mxu3 %v12949_v16  ;;  %v11093_v54 = vld [vmem:[%s12357_s23 + $0x184] sm:$0xf]  ;;  %v7653_v56 = vld [vmem:[%s12357_s23 + $0x190] sm:$0xf0]  ;;  %v7528_v63 = vor.u32 %v11061_v51, %v7525_v52 }
 0x12b   : > { %6209 = vmatpush.bf16.msrb.mxu3 %v7960_v2  ;;  %6171 = vmatpush.bf16.msrb.mxu0 %v7560_v18  ;;  %v11125_v57 = vld [vmem:[%s12357_s23 + $0x284] sm:$0xf]  ;;  %v7781_v58 = vld [vmem:[%s12357_s23 + $0x290] sm:$0xf0]  ;;  %v7656_v1 = vor.u32 %v11093_v54, %v7653_v56  ;;  %v5933_v15 = vadd.f32 %v5932_v0, %v5920_v62 }
 0x12c   : > { %6184 = vmatpush.bf16.msrb.mxu1 %v7688_v19  ;;  %v11157_v60 = vld [vmem:[%s12357_s23 + $0x384] sm:$0xf]  ;;  %v7909_v61 = vld [vmem:[%s12357_s23 + $0x390] sm:$0xf0]  ;;  %v7784_v2 = vor.u32 %v11125_v57, %v7781_v58 }
 0x12d   : > { %6197 = vmatpush.bf16.msrb.mxu2 %v7816_v23  ;;  %v11057_v4 = vld [vmem:[%s12357_s23 + $0x64] sm:$0xf]  ;;  %v7509_v6 = vld [vmem:[%s12357_s23 + $0x70] sm:$0xf0]  ;;  %v7912_v12 = vor.u32 %v11157_v60, %v7909_v61  ;;  %v5946_v51 = vadd.f32 %v5945_v41, %v5933_v15  ;;  %v5958_v52 = vpop.f32.mrf.mxu3  ;;  %v5934_v58 = vpop.f32.mrf.mxu1 }
 0x12e   : > { %v11089_v8 = vld [vmem:[%s12357_s23 + $0x164] sm:$0xf]  ;;  %v7637_v18 = vld [vmem:[%s12357_s23 + $0x170] sm:$0xf0]  ;;  %v7512_v25 = vor.u32 %v11057_v4, %v7509_v6 }
 0x12f   : > { %6210 = vmatpush.bf16.msrb.mxu3 %v7944_v28  ;;  %6172 = vmatpush.bf16.msrb.mxu0 %v7544_v44  ;;  %v11121_v19 = vld [vmem:[%s12357_s23 + $0x264] sm:$0xf]  ;;  %v7765_v53 = vld [vmem:[%s12357_s23 + $0x270] sm:$0xf0]  ;;  %v7640_v27 = vor.u32 %v11089_v8, %v7637_v18  ;;  %v5921_v56 = vpop.f32.mrf.mxu0  ;;  %v12988_v59 = vadd.f32 %v5958_v52, %v5946_v51 }
 0x130   : > { %6185 = vmatpush.bf16.msrb.mxu1 %v7672_v48  ;;  %v11153_v23 = vld [vmem:[%s12357_s23 + $0x364] sm:$0xf]  ;;  %v7893_v20 = vld [vmem:[%s12357_s23 + $0x370] sm:$0xf0]  ;;  %v7768_v28 = vor.u32 %v11121_v19, %v7765_v53 }
 0x131   : > { %6198 = vmatpush.bf16.msrb.mxu2 %v7800_v49  ;;  %v11053_v33 = vld [vmem:[%s12357_s23 + $0x44] sm:$0xf]  ;;  %v7493_v35 = vld [vmem:[%s12357_s23 + $0x50] sm:$0xf0]  ;;  %v7896_v40 = vor.u32 %v11153_v23, %v7893_v20 }
 0x132   : > { %v11085_v37 = vld [vmem:[%s12357_s23 + $0x144] sm:$0xf]  ;;  %v7621_v44 = vld [vmem:[%s12357_s23 + $0x150] sm:$0xf0]  ;;  %v7496_v57 = vor.u32 %v11053_v33, %v7493_v35 }
 0x133   : > { %6211 = vmatpush.bf16.msrb.mxu3 %v7928_v55  ;;  %6173 = vmatpush.bf16.msrb.mxu0 %v7528_v63  ;;  %v11117_v48 = vld [vmem:[%s12357_s23 + $0x244] sm:$0xf]  ;;  %v7749_v49 = vld [vmem:[%s12357_s23 + $0x250] sm:$0xf0]  ;;  %v7624_v60 = vor.u32 %v11085_v37, %v7621_v44 }
 0x134   : > { %6186 = vmatpush.bf16.msrb.mxu1 %v7656_v1  ;;  %v11149_v54 = vld [vmem:[%s12357_s23 + $0x344] sm:$0xf]  ;;  %v7877_v55 = vld [vmem:[%s12357_s23 + $0x350] sm:$0xf0]  ;;  %v7752_v61 = vor.u32 %v11117_v48, %v7749_v49 }
 0x135   : > { %6199 = vmatpush.bf16.msrb.mxu2 %v7784_v2  ;;  %v11049_v62 = vld [vmem:[%s12357_s23 + $0x24] sm:$0xf]  ;;  %v7477_v63 = vld [vmem:[%s12357_s23 + $0x30] sm:$0xf0]  ;;  %v7880_v1 = vor.u32 %v11149_v54, %v7877_v55  ;;  %v5960_v49 = vpop.f32.mrf.mxu3 }
 0x136   : > { %v11081_v0 = vld [vmem:[%s12357_s23 + $0x124] sm:$0xf]  ;;  %v7605_v2 = vld [vmem:[%s12357_s23 + $0x130] sm:$0xf0]  ;;  %v7480_v15 = vor.u32 %v11049_v62, %v7477_v63 }
 0x137   : > { %6212 = vmatpush.bf16.msrb.mxu3 %v7912_v12  ;;  %6174 = vmatpush.bf16.msrb.mxu0 %v7512_v25  ;;  %v11113_v4 = vld [vmem:[%s12357_s23 + $0x224] sm:$0xf]  ;;  %v7733_v6 = vld [vmem:[%s12357_s23 + $0x230] sm:$0xf0]  ;;  %v7608_v53 = vor.u32 %v11081_v0, %v7605_v2 }
 0x138   : > { %6187 = vmatpush.bf16.msrb.mxu1 %v7640_v27  ;;  %v11145_v8 = vld [vmem:[%s12357_s23 + $0x324] sm:$0xf]  ;;  %v7861_v12 = vld [vmem:[%s12357_s23 + $0x330] sm:$0xf0]  ;;  %v7736_v23 = vor.u32 %v11113_v4, %v7733_v6 }
 0x139   : > { %6200 = vmatpush.bf16.msrb.mxu2 %v7768_v28  ;;  %v11045_v18 = vld [vmem:[%s12357_s23 + $0x4] sm:$0xf]  ;;  %v7461_v19 = vld [vmem:[%s12357_s23 + $0x10] sm:$0xf0]  ;;  %v7864_v28 = vor.u32 %v11145_v8, %v7861_v12 }
 0x13a   : > { %v11077_v20 = vld [vmem:[%s12357_s23 + $0x104] sm:$0xf]  ;;  %v7589_v25 = vld [vmem:[%s12357_s23 + $0x110] sm:$0xf0]  ;;  %v7464_v51 = vor.u32 %v11045_v18, %v7461_v19 }
 0x13b   : > { %6213 = vmatpush.bf16.msrb.mxu3 %v7896_v40  ;;  %6175 = vmatpush.bf16.msrb.mxu0 %v7496_v57  ;;  %v11109_v27 = vld [vmem:[%s12357_s23 + $0x204] sm:$0xf]  ;;  %v7717_v33 = vld [vmem:[%s12357_s23 + $0x210] sm:$0xf0]  ;;  %v5947_v40 = vpop.f32.mrf.mxu2  ;;  %v7592_v56 = vor.u32 %v11077_v20, %v7589_v25 }
 0x13c   : > { %6188 = vmatpush.bf16.msrb.mxu1 %v7624_v60  ;;  %v11141_v35 = vld [vmem:[%s12357_s23 + $0x304] sm:$0xf]  ;;  %v7845_v37 = vld [vmem:[%s12357_s23 + $0x310] sm:$0xf0]  ;;  %v7720_v57 = vor.u32 %v11109_v27, %v7717_v33 }
 0x13d   : > { %6201 = vmatpush.bf16.msrb.mxu2 %v7752_v61  ;;  %v11201_v41 = vld [vmem:[%s12357_s23 + $0x4e4] sm:$0xf]  ;;  %v8085_v44 = vld [vmem:[%s12357_s23 + $0x4f0] sm:$0xf0]  ;;  %v7848_v61 = vor.u32 %v11141_v35, %v7845_v37 }
 0x13e   : > { %v11233_v48 = vld [vmem:[%s12357_s23 + $0x5e4] sm:$0xf]  ;;  %v8213_v52 = vld [vmem:[%s12357_s23 + $0x5f0] sm:$0xf0]  ;;  %v8088_v62 = vor.u32 %v11201_v41, %v8085_v44 }
 0x13f   : > { %6214 = vmatpush.bf16.msrb.mxu3 %v7880_v1  ;;  %6176 = vmatpush.bf16.msrb.mxu0 %v7480_v15  ;;  %v11265_v54 = vld [vmem:[%s12357_s23 + $0x6e4] sm:$0xf]  ;;  %v8341_v55 = vld [vmem:[%s12357_s23 + $0x6f0] sm:$0xf0]  ;;  %v8216_v63 = vor.u32 %v11233_v48, %v8213_v52 }
 0x140   : > { %6189 = vmatpush.bf16.msrb.mxu1 %v7608_v53  ;;  %v11297_v58 = vld [vmem:[%s12357_s23 + $0x7e4] sm:$0xf]  ;;  %v8469_v60 = vld [vmem:[%s12357_s23 + $0x7f0] sm:$0xf0]  ;;  %v8344_v0 = vor.u32 %v11265_v54, %v8341_v55 }
 0x141   : > { %6202 = vmatpush.bf16.msrb.mxu2 %v7736_v23  ;;  %v11197_v1 = vld [vmem:[%s12357_s23 + $0x4c4] sm:$0xf]  ;;  %v8069_v2 = vld [vmem:[%s12357_s23 + $0x4d0] sm:$0xf0]  ;;  %v8472_v6 = vor.u32 %v11297_v58, %v8469_v60 }
 0x142   : > { %v11229_v4 = vld [vmem:[%s12357_s23 + $0x5c4] sm:$0xf]  ;;  %v8197_v8 = vld [vmem:[%s12357_s23 + $0x5d0] sm:$0xf0]  ;;  %v8072_v53 = vor.u32 %v11197_v1, %v8069_v2 }
 0x143   : > { %6215 = vmatpush.bf16.msrb.mxu3 %v7864_v28  ;;  %6177 = vmatpush.bf16.msrb.mxu0 %v7464_v51  ;;  %v11261_v12 = vld [vmem:[%s12357_s23 + $0x6c4] sm:$0xf]  ;;  %v8325_v15 = vld [vmem:[%s12357_s23 + $0x6d0] sm:$0xf0]  ;;  %v8200_v23 = vor.u32 %v11229_v4, %v8197_v8  ;;  %v5984_v2 = vpop.f32.mrf.mxu1 }
 0x144   : > { %6190 = vmatpush.bf16.msrb.mxu1 %v7592_v56  ;;  %v11293_v18 = vld [vmem:[%s12357_s23 + $0x7c4] sm:$0xf]  ;;  %v8453_v19 = vld [vmem:[%s12357_s23 + $0x7d0] sm:$0xf0]  ;;  %v8328_v20 = vor.u32 %v11261_v12, %v8325_v15 }
 0x145   : > { %6203 = vmatpush.bf16.msrb.mxu2 %v7720_v57  ;;  %v11193_v25 = vld [vmem:[%s12357_s23 + $0x4a4] sm:$0xf]  ;;  %v8053_v27 = vld [vmem:[%s12357_s23 + $0x4b0] sm:$0xf0]  ;;  %v8456_v33 = vor.u32 %v11293_v18, %v8453_v19 }
 0x146   : > { %v11225_v28 = vld [vmem:[%s12357_s23 + $0x5a4] sm:$0xf]  ;;  %v8181_v35 = vld [vmem:[%s12357_s23 + $0x5b0] sm:$0xf0]  ;;  %6178 = vmatmul.bf16.vlgmr.msrb.gmra.mxu0 %v12491_v21  ;;  %v8056_v48 = vor.u32 %v11193_v25, %v8053_v27 }
 0x147   : > { %6216 = vmatpush.bf16.msrb.mxu3 %v7848_v61  ;;  %6222 = vmatpush.bf16.msra.mxu0 %v8088_v62  ;;  %v11257_v37 = vld [vmem:[%s12357_s23 + $0x6a4] sm:$0xf]  ;;  %v8309_v40 = vld [vmem:[%s12357_s23 + $0x6b0] sm:$0xf0]  ;;  %v8184_v49 = vor.u32 %v11225_v28, %v8181_v35  ;;  %v5971_v61 = vpop.f32.mrf.mxu0 }
 0x148   : > { %6235 = vmatpush.bf16.msra.mxu1 %v8216_v63  ;;  %6204 = vmatmul.bf16.vlgmr.msrb.gmra.mxu2 %v12477_v5  ;;  %v11289_v41 = vld [vmem:[%s12357_s23 + $0x7a4] sm:$0xf]  ;;  %v8437_v44 = vld [vmem:[%s12357_s23 + $0x7b0] sm:$0xf0]  ;;  %v8312_v51 = vor.u32 %v11257_v37, %v8309_v40 }
 0x149   : > { %6248 = vmatpush.bf16.msra.mxu2 %v8344_v0  ;;  %6191 = vmatmul.bf16.vlgmr.msrb.gmra.mxu1 %v12494_v22  ;;  %v11189_v52 = vld [vmem:[%s12357_s23 + $0x484] sm:$0xf]  ;;  %v8037_v54 = vld [vmem:[%s12357_s23 + $0x490] sm:$0xf0]  ;;  %v8440_v56 = vor.u32 %v11289_v41, %v8437_v44  ;;  %v5972_v0 = vadd.f32 %v5971_v61, %v12988_v59 }
 0x14a   : > { %6217 = vmatmul.bf16.vlgmr.msrb.gmra.mxu3 %v12480_v7  ;;  %v11221_v55 = vld [vmem:[%s12357_s23 + $0x584] sm:$0xf]  ;;  %v8165_v57 = vld [vmem:[%s12357_s23 + $0x590] sm:$0xf0]  ;;  %v8040_v1 = vor.u32 %v11189_v52, %v8037_v54 }
 0x14b   : > { %6261 = vmatpush.bf16.msra.mxu3 %v8472_v6  ;;  %6223 = vmatpush.bf16.msra.mxu0 %v8072_v53  ;;  %v11253_v58 = vld [vmem:[%s12357_s23 + $0x684] sm:$0xf]  ;;  %v8293_v60 = vld [vmem:[%s12357_s23 + $0x690] sm:$0xf0]  ;;  %v8168_v4 = vor.u32 %v11221_v55, %v8165_v57  ;;  %v5985_v19 = vadd.f32 %v5984_v2, %v5972_v0  ;;  %v6010_v54 = vpop.f32.mrf.mxu3 }
 0x14c   : > { %6236 = vmatpush.bf16.msra.mxu1 %v8200_v23  ;;  %v11285_v62 = vld [vmem:[%s12357_s23 + $0x784] sm:$0xf]  ;;  %v8421_v63 = vld [vmem:[%s12357_s23 + $0x790] sm:$0xf0]  ;;  %v8296_v6 = vor.u32 %v11253_v58, %v8293_v60  ;;  %v5997_v44 = vpop.f32.mrf.mxu2  ;;  %v5986_v60 = vpop.f32.mrf.mxu1 }
 0x14d   : > { %6249 = vmatpush.bf16.msra.mxu2 %v8328_v20  ;;  %v11185_v8 = vld [vmem:[%s12357_s23 + $0x464] sm:$0xf]  ;;  %v8021_v12 = vld [vmem:[%s12357_s23 + $0x470] sm:$0xf0]  ;;  %v8424_v18 = vor.u32 %v11285_v62, %v8421_v63  ;;  %v5998_v52 = vadd.f32 %v5997_v44, %v5985_v19 }
 0x14e   : > { %v11217_v15 = vld [vmem:[%s12357_s23 + $0x564] sm:$0xf]  ;;  %v8149_v53 = vld [vmem:[%s12357_s23 + $0x570] sm:$0xf0]  ;;  %v8024_v27 = vor.u32 %v11185_v8, %v8021_v12 }
 0x14f   : > { %6262 = vmatpush.bf16.msra.mxu3 %v8456_v33  ;;  %6224 = vmatpush.bf16.msra.mxu0 %v8056_v48  ;;  %v11249_v23 = vld [vmem:[%s12357_s23 + $0x664] sm:$0xf]  ;;  %v8277_v59 = vld [vmem:[%s12357_s23 + $0x670] sm:$0xf0]  ;;  %v8152_v28 = vor.u32 %v11217_v15, %v8149_v53  ;;  %v5973_v57 = vpop.f32.mrf.mxu0  ;;  %v13059_v61 = vadd.f32 %v6010_v54, %v5998_v52 }
 0x150   : > { %6237 = vmatpush.bf16.msra.mxu1 %v8184_v49  ;;  %v11281_v20 = vld [vmem:[%s12357_s23 + $0x764] sm:$0xf]  ;;  %v8405_v25 = vld [vmem:[%s12357_s23 + $0x770] sm:$0xf0]  ;;  %v8280_v33 = vor.u32 %v11249_v23, %v8277_v59 }
 0x151   : > { %6250 = vmatpush.bf16.msra.mxu2 %v8312_v51  ;;  %v11181_v35 = vld [vmem:[%s12357_s23 + $0x444] sm:$0xf]  ;;  %v8005_v37 = vld [vmem:[%s12357_s23 + $0x450] sm:$0xf0]  ;;  %v8408_v41 = vor.u32 %v11281_v20, %v8405_v25 }
 0x152   : > { %v11213_v40 = vld [vmem:[%s12357_s23 + $0x544] sm:$0xf]  ;;  %v8133_v48 = vld [vmem:[%s12357_s23 + $0x550] sm:$0xf0]  ;;  %v8008_v58 = vor.u32 %v11181_v35, %v8005_v37 }
 0x153   : > { %6263 = vmatpush.bf16.msra.mxu3 %v8440_v56  ;;  %6225 = vmatpush.bf16.msra.mxu0 %v8040_v1  ;;  %v11245_v49 = vld [vmem:[%s12357_s23 + $0x644] sm:$0xf]  ;;  %v8261_v51 = vld [vmem:[%s12357_s23 + $0x650] sm:$0xf0]  ;;  %v8136_v62 = vor.u32 %v11213_v40, %v8133_v48 }
 0x154   : > { %6238 = vmatpush.bf16.msra.mxu1 %v8168_v4  ;;  %v11277_v55 = vld [vmem:[%s12357_s23 + $0x744] sm:$0xf]  ;;  %v8389_v56 = vld [vmem:[%s12357_s23 + $0x750] sm:$0xf0]  ;;  %v8264_v63 = vor.u32 %v11245_v49, %v8261_v51  ;;  %v6012_v51 = vpop.f32.mrf.mxu3 }
 0x155   : > { %6251 = vmatpush.bf16.msra.mxu2 %v8296_v6  ;;  %v11177_v0 = vld [vmem:[%s12357_s23 + $0x424] sm:$0xf]  ;;  %v7989_v1 = vld [vmem:[%s12357_s23 + $0x430] sm:$0xf0]  ;;  %v8392_v4 = vor.u32 %v11277_v55, %v8389_v56 }
 0x156   : > { %v11209_v2 = vld [vmem:[%s12357_s23 + $0x524] sm:$0xf]  ;;  %v8117_v6 = vld [vmem:[%s12357_s23 + $0x530] sm:$0xf0]  ;;  %v7992_v19 = vor.u32 %v11177_v0, %v7989_v1 }
 0x157   : > { %6264 = vmatpush.bf16.msra.mxu3 %v8424_v18  ;;  %6226 = vmatpush.bf16.msra.mxu0 %v8024_v27  ;;  %v11241_v8 = vld [vmem:[%s12357_s23 + $0x624] sm:$0xf]  ;;  %v8245_v12 = vld [vmem:[%s12357_s23 + $0x630] sm:$0xf0]  ;;  %v8120_v59 = vor.u32 %v11209_v2, %v8117_v6 }
 0x158   : > { %6239 = vmatpush.bf16.msra.mxu1 %v8152_v28  ;;  %v11273_v15 = vld [vmem:[%s12357_s23 + $0x724] sm:$0xf]  ;;  %v8373_v18 = vld [vmem:[%s12357_s23 + $0x730] sm:$0xf0]  ;;  %v8248_v20 = vor.u32 %v11241_v8, %v8245_v12 }
 0x159   : > { %6252 = vmatpush.bf16.msra.mxu2 %v8280_v33  ;;  %v11173_v53 = vld [vmem:[%s12357_s23 + $0x404] sm:$0xf]  ;;  %v7973_v23 = vld [vmem:[%s12357_s23 + $0x410] sm:$0xf0]  ;;  %v8376_v33 = vor.u32 %v11273_v15, %v8373_v18 }
 0x15a   : > { %v11205_v25 = vld [vmem:[%s12357_s23 + $0x504] sm:$0xf]  ;;  %v8101_v27 = vld [vmem:[%s12357_s23 + $0x510] sm:$0xf0]  ;;  %v7976_v52 = vor.u32 %v11173_v53, %v7973_v23 }
 0x15b   : > { %6265 = vmatpush.bf16.msra.mxu3 %v8408_v41  ;;  %6227 = vmatpush.bf16.msra.mxu0 %v8008_v58  ;;  %v11237_v28 = vld [vmem:[%s12357_s23 + $0x604] sm:$0xf]  ;;  %v8229_v35 = vld [vmem:[%s12357_s23 + $0x610] sm:$0xf0]  ;;  %v5999_v41 = vpop.f32.mrf.mxu2  ;;  %v8104_v57 = vor.u32 %v11205_v25, %v8101_v27 }
 0x15c   : > { %6240 = vmatpush.bf16.msra.mxu1 %v8136_v62  ;;  %v11269_v37 = vld [vmem:[%s12357_s23 + $0x704] sm:$0xf]  ;;  %v8357_v40 = vld [vmem:[%s12357_s23 + $0x710] sm:$0xf0]  ;;  %v8232_v58 = vor.u32 %v11237_v28, %v8229_v35 }
 0x15d   : > { %6253 = vmatpush.bf16.msra.mxu2 %v8264_v63  ;;  %v11329_v44 = vld [vmem:[%s12357_s23 + $0x8e4] sm:$0xf]  ;;  %v8597_v48 = vld [vmem:[%s12357_s23 + $0x8f0] sm:$0xf0]  ;;  %v8360_v63 = vor.u32 %v11269_v37, %v8357_v40 }
 0x15e   : > { %v11361_v49 = vld [vmem:[%s12357_s23 + $0x9e4] sm:$0xf]  ;;  %v8725_v54 = vld [vmem:[%s12357_s23 + $0x9f0] sm:$0xf0]  ;;  %v8600_v0 = vor.u32 %v11329_v44, %v8597_v48 }
 0x15f   : > { %6266 = vmatpush.bf16.msra.mxu3 %v8392_v4  ;;  %6228 = vmatpush.bf16.msra.mxu0 %v7992_v19  ;;  %v11393_v55 = vld [vmem:[%s12357_s23 + $0xae4] sm:$0xf]  ;;  %v8853_v56 = vld [vmem:[%s12357_s23 + $0xaf0] sm:$0xf0]  ;;  %v8728_v1 = vor.u32 %v11361_v49, %v8725_v54 }
 0x160   : > { %6241 = vmatpush.bf16.msra.mxu1 %v8120_v59  ;;  %v11425_v60 = vld [vmem:[%s12357_s23 + $0xbe4] sm:$0xf]  ;;  %v8981_v62 = vld [vmem:[%s12357_s23 + $0xbf0] sm:$0xf0]  ;;  %v8856_v2 = vor.u32 %v11393_v55, %v8853_v56 }
 0x161   : > { %6254 = vmatpush.bf16.msra.mxu2 %v8248_v20  ;;  %v11325_v4 = vld [vmem:[%s12357_s23 + $0x8c4] sm:$0xf]  ;;  %v8581_v6 = vld [vmem:[%s12357_s23 + $0x8d0] sm:$0xf0]  ;;  %v8984_v12 = vor.u32 %v11425_v60, %v8981_v62 }
 0x162   : > { %v11357_v8 = vld [vmem:[%s12357_s23 + $0x9c4] sm:$0xf]  ;;  %v8709_v15 = vld [vmem:[%s12357_s23 + $0x9d0] sm:$0xf0]  ;;  %v8584_v59 = vor.u32 %v11325_v4, %v8581_v6 }
 0x163   : > { %6267 = vmatpush.bf16.msra.mxu3 %v8376_v33  ;;  %6229 = vmatpush.bf16.msra.mxu0 %v7976_v52  ;;  %v11389_v18 = vld [vmem:[%s12357_s23 + $0xac4] sm:$0xf]  ;;  %v8837_v19 = vld [vmem:[%s12357_s23 + $0xad0] sm:$0xf0]  ;;  %v8712_v20 = vor.u32 %v11357_v8, %v8709_v15 }
 0x164   : > { %6242 = vmatpush.bf16.msra.mxu1 %v8104_v57  ;;  %v11421_v53 = vld [vmem:[%s12357_s23 + $0xbc4] sm:$0xf]  ;;  %v8965_v23 = vld [vmem:[%s12357_s23 + $0xbd0] sm:$0xf0]  ;;  %v8840_v25 = vor.u32 %v11389_v18, %v8837_v19 }
 0x165   : > { %6255 = vmatpush.bf16.msra.mxu2 %v8232_v58  ;;  %v11321_v27 = vld [vmem:[%s12357_s23 + $0x8a4] sm:$0xf]  ;;  %v8565_v28 = vld [vmem:[%s12357_s23 + $0x8b0] sm:$0xf0]  ;;  %v8968_v35 = vor.u32 %v11421_v53, %v8965_v23 }
 0x166   : > { %v11353_v33 = vld [vmem:[%s12357_s23 + $0x9a4] sm:$0xf]  ;;  %v8693_v37 = vld [vmem:[%s12357_s23 + $0x9b0] sm:$0xf0]  ;;  %6230 = vmatmul.bf16.vlgmr.msra.gmra.mxu0 %v12550_v42  ;;  %v8568_v49 = vor.u32 %v11321_v27, %v8565_v28  ;;  %v13115_v4 = vpop.f32.mrf.mxu1 }
 0x167   : > { %6268 = vmatpush.bf16.msra.mxu3 %v8360_v63  ;;  %6274 = vmatpush.bf16.msrb.mxu0 %v8600_v0  ;;  %v11385_v40 = vld [vmem:[%s12357_s23 + $0xaa4] sm:$0xf]  ;;  %v8821_v41 = vld [vmem:[%s12357_s23 + $0xab0] sm:$0xf0]  ;;  %v8696_v51 = vor.u32 %v11353_v33, %v8693_v37  ;;  %v13111_v63 = vpop.f32.mrf.mxu0 }
 0x168   : > { %6287 = vmatpush.bf16.msrb.mxu1 %v8728_v1  ;;  %6256 = vmatmul.bf16.vlgmr.msra.gmra.mxu2 %v12546_v39  ;;  %v11417_v44 = vld [vmem:[%s12357_s23 + $0xba4] sm:$0xf]  ;;  %v8949_v48 = vld [vmem:[%s12357_s23 + $0xbb0] sm:$0xf0]  ;;  %v8824_v52 = vor.u32 %v11385_v40, %v8821_v41 }
 0x169   : > { %6300 = vmatpush.bf16.msrb.mxu2 %v8856_v2  ;;  %6243 = vmatmul.bf16.vlgmr.msra.gmra.mxu1 %v12554_v45  ;;  %v11317_v54 = vld [vmem:[%s12357_s23 + $0x884] sm:$0xf]  ;;  %v8549_v55 = vld [vmem:[%s12357_s23 + $0x890] sm:$0xf0]  ;;  %v8952_v57 = vor.u32 %v11417_v44, %v8949_v48 }
 0x16a   : > { %6269 = vmatmul.bf16.vlgmr.msra.gmra.mxu3 %v12552_v43  ;;  %v11349_v56 = vld [vmem:[%s12357_s23 + $0x984] sm:$0xf]  ;;  %v8677_v58 = vld [vmem:[%s12357_s23 + $0x990] sm:$0xf0]  ;;  %v8552_v2 = vor.u32 %v11317_v54, %v8549_v55  ;;  %v13128_v44 = vpop.f32.mrf.mxu2 }
 0x16b   : > { %6313 = vmatpush.bf16.msrb.mxu3 %v8984_v12  ;;  %6275 = vmatpush.bf16.msrb.mxu0 %v8584_v59  ;;  %v11381_v60 = vld [vmem:[%s12357_s23 + $0xa84] sm:$0xf]  ;;  %v8805_v62 = vld [vmem:[%s12357_s23 + $0xa90] sm:$0xf0]  ;;  %v8680_v6 = vor.u32 %v11349_v56, %v8677_v58 }
 0x16c   : > { %6288 = vmatpush.bf16.msrb.mxu1 %v8712_v20  ;;  %v11413_v0 = vld [vmem:[%s12357_s23 + $0xb84] sm:$0xf]  ;;  %v8933_v1 = vld [vmem:[%s12357_s23 + $0xb90] sm:$0xf0]  ;;  %v8808_v8 = vor.u32 %v11381_v60, %v8805_v62 }
 0x16d   : > { %6301 = vmatpush.bf16.msrb.mxu2 %v8840_v25  ;;  %v11313_v12 = vld [vmem:[%s12357_s23 + $0x864] sm:$0xf]  ;;  %v8533_v15 = vld [vmem:[%s12357_s23 + $0x870] sm:$0xf0]  ;;  %v8936_v19 = vor.u32 %v11413_v0, %v8933_v1 }
 0x16e   : > { %v11345_v18 = vld [vmem:[%s12357_s23 + $0x964] sm:$0xf]  ;;  %v8661_v53 = vld [vmem:[%s12357_s23 + $0x970] sm:$0xf0]  ;;  %v8536_v27 = vor.u32 %v11313_v12, %v8533_v15  ;;  %v6038_v58 = vpop.f32.mrf.mxu1 }
 0x16f   : > { %6314 = vmatpush.bf16.msrb.mxu3 %v8968_v35  ;;  %6276 = vmatpush.bf16.msrb.mxu0 %v8568_v49  ;;  %v11377_v23 = vld [vmem:[%s12357_s23 + $0xa64] sm:$0xf]  ;;  %v8789_v59 = vld [vmem:[%s12357_s23 + $0xa70] sm:$0xf0]  ;;  %v8664_v28 = vor.u32 %v11345_v18, %v8661_v53  ;;  %v6025_v56 = vpop.f32.mrf.mxu0 }
 0x170   : > { %6289 = vmatpush.bf16.msrb.mxu1 %v8696_v51  ;;  %v11409_v20 = vld [vmem:[%s12357_s23 + $0xb64] sm:$0xf]  ;;  %v8917_v25 = vld [vmem:[%s12357_s23 + $0xb70] sm:$0xf0]  ;;  %v8792_v33 = vor.u32 %v11377_v23, %v8789_v59 }
 0x171   : > { %6302 = vmatpush.bf16.msrb.mxu2 %v8824_v52  ;;  %v11309_v35 = vld [vmem:[%s12357_s23 + $0x844] sm:$0xf]  ;;  %v8517_v37 = vld [vmem:[%s12357_s23 + $0x850] sm:$0xf0]  ;;  %v8920_v41 = vor.u32 %v11409_v20, %v8917_v25  ;;  %v13133_v52 = vpop.f32.mrf.mxu3 }
 0x172   : > { %v11341_v40 = vld [vmem:[%s12357_s23 + $0x944] sm:$0xf]  ;;  %v8645_v48 = vld [vmem:[%s12357_s23 + $0x950] sm:$0xf0] }
 0x173   : > { %6315 = vmatpush.bf16.msrb.mxu3 %v8952_v57  ;;  %6277 = vmatpush.bf16.msrb.mxu0 %v8552_v2  ;;  %v11373_v49 = vld [vmem:[%s12357_s23 + $0xa44] sm:$0xf]  ;;  %v8773_v51 = vld [vmem:[%s12357_s23 + $0xa50] sm:$0xf0]  ;;  %v8520_v57 = vor.u32 %v11309_v35, %v8517_v37  ;;  %v8648_v60 = vor.u32 %v11341_v40, %v8645_v48  ;;  %v6051_v48 = vpop.f32.mrf.mxu2 }
 0x174   : > { %6290 = vmatpush.bf16.msrb.mxu1 %v8680_v6  ;;  %v11405_v54 = vld [vmem:[%s12357_s23 + $0xb44] sm:$0xf]  ;;  %v8901_v55 = vld [vmem:[%s12357_s23 + $0xb50] sm:$0xf0]  ;;  %v8776_v62 = vor.u32 %v11373_v49, %v8773_v51 }
 0x175   : > { %6303 = vmatpush.bf16.msrb.mxu2 %v8808_v8  ;;  %v11305_v0 = vld [vmem:[%s12357_s23 + $0x824] sm:$0xf]  ;;  %v8501_v1 = vld [vmem:[%s12357_s23 + $0x830] sm:$0xf0]  ;;  %v8904_v6 = vor.u32 %v11405_v54, %v8901_v55 }
 0x176   : > { %v11337_v2 = vld [vmem:[%s12357_s23 + $0x924] sm:$0xf]  ;;  %v8629_v8 = vld [vmem:[%s12357_s23 + $0x930] sm:$0xf0]  ;;  %v8504_v53 = vor.u32 %v11305_v0, %v8501_v1 }
 0x177   : > { %6316 = vmatpush.bf16.msrb.mxu3 %v8936_v19  ;;  %6278 = vmatpush.bf16.msrb.mxu0 %v8536_v27  ;;  %v11369_v12 = vld [vmem:[%s12357_s23 + $0xa24] sm:$0xf]  ;;  %v8757_v15 = vld [vmem:[%s12357_s23 + $0xa30] sm:$0xf0]  ;;  %v8632_v20 = vor.u32 %v11337_v2, %v8629_v8 }
 0x178   : > { %6291 = vmatpush.bf16.msrb.mxu1 %v8664_v28  ;;  %v11401_v18 = vld [vmem:[%s12357_s23 + $0xb24] sm:$0xf]  ;;  %v8885_v19 = vld [vmem:[%s12357_s23 + $0xb30] sm:$0xf0]  ;;  %v8760_v25 = vor.u32 %v11369_v12, %v8757_v15 }
 0x179   : > { %6304 = vmatpush.bf16.msrb.mxu2 %v8792_v33  ;;  %v11301_v23 = vld [vmem:[%s12357_s23 + $0x804] sm:$0xf]  ;;  %v8485_v59 = vld [vmem:[%s12357_s23 + $0x810] sm:$0xf0]  ;;  %v8888_v35 = vor.u32 %v11401_v18, %v8885_v19  ;;  %v6064_v55 = vpop.f32.mrf.mxu3 }
 0x17a   : > { %v11333_v27 = vld [vmem:[%s12357_s23 + $0x904] sm:$0xf]  ;;  %v8613_v28 = vld [vmem:[%s12357_s23 + $0x910] sm:$0xf0]  ;;  %v8488_v56 = vor.u32 %v11301_v23, %v8485_v59 }
 0x17b   : > { %6317 = vmatpush.bf16.msrb.mxu3 %v8920_v41  ;;  %6279 = vmatpush.bf16.msrb.mxu0 %v8520_v57  ;;  %v11365_v33 = vld [vmem:[%s12357_s23 + $0xa04] sm:$0xf]  ;;  %v8741_v37 = vld [vmem:[%s12357_s23 + $0xa10] sm:$0xf0] }
 0x17c   : > { %6292 = vmatpush.bf16.msrb.mxu1 %v8648_v60  ;;  %v11397_v40 = vld [vmem:[%s12357_s23 + $0xb04] sm:$0xf]  ;;  %v8869_v41 = vld [vmem:[%s12357_s23 + $0xb10] sm:$0xf0]  ;;  %v8744_v0 = vor.u32 %v11365_v33, %v8741_v37 }
 0x17d   : > { %6305 = vmatpush.bf16.msrb.mxu2 %v8776_v62  ;;  %v11457_v49 = vld [vmem:[%s12357_s23 + $0xce4] sm:$0xf]  ;;  %v9109_v51 = vld [vmem:[%s12357_s23 + $0xcf0] sm:$0xf0]  ;;  %v8616_v62 = vor.u32 %v11333_v27, %v8613_v28 }
 0x17e   : > { %v11489_v54 = vld [vmem:[%s12357_s23 + $0xde4] sm:$0xf]  ;;  %v9237_v57 = vld [vmem:[%s12357_s23 + $0xdf0] sm:$0xf0]  ;;  %v9112_v8 = vor.u32 %v11457_v49, %v9109_v51 }
 0x17f   : > { %6318 = vmatpush.bf16.msrb.mxu3 %v8904_v6  ;;  %6280 = vmatpush.bf16.msrb.mxu0 %v8504_v53  ;;  %v11521_v58 = vld [vmem:[%s12357_s23 + $0xee4] sm:$0xf]  ;;  %v9365_v60 = vld [vmem:[%s12357_s23 + $0xef0] sm:$0xf0]  ;;  %v8872_v6 = vor.u32 %v11397_v40, %v8869_v41  ;;  %v9240_v12 = vor.u32 %v11489_v54, %v9237_v57 }
 0x180   : > { %6293 = vmatpush.bf16.msrb.mxu1 %v8632_v20  ;;  %v11553_v1 = vld [vmem:[%s12357_s23 + $0xfe4] sm:$0xf]  ;;  %v9493_v2 = vld [vmem:[%s12357_s23 + $0xff0] sm:$0xf0]  ;;  %v9368_v15 = vor.u32 %v11521_v58, %v9365_v60 }
 0x181   : > { %6306 = vmatpush.bf16.msrb.mxu2 %v8760_v25  ;;  %v11453_v18 = vld [vmem:[%s12357_s23 + $0xcc4] sm:$0xf]  ;;  %v9093_v19 = vld [vmem:[%s12357_s23 + $0xcd0] sm:$0xf0]  ;;  %v9496_v23 = vor.u32 %v11553_v1, %v9493_v2 }
 0x182   : > { %v11485_v53 = vld [vmem:[%s12357_s23 + $0xdc4] sm:$0xf]  ;;  %v9221_v59 = vld [vmem:[%s12357_s23 + $0xdd0] sm:$0xf0]  ;;  %v9096_v33 = vor.u32 %v11453_v18, %v9093_v19 }
 0x183   : > { %6319 = vmatpush.bf16.msrb.mxu3 %v8888_v35  ;;  %6281 = vmatpush.bf16.msrb.mxu0 %v8488_v56  ;;  %v11517_v20 = vld [vmem:[%s12357_s23 + $0xec4] sm:$0xf]  ;;  %v9349_v25 = vld [vmem:[%s12357_s23 + $0xed0] sm:$0xf0]  ;;  %v9224_v35 = vor.u32 %v11485_v53, %v9221_v59 }
 0x184   : > { %6294 = vmatpush.bf16.msrb.mxu1 %v8616_v62  ;;  %v11549_v27 = vld [vmem:[%s12357_s23 + $0xfc4] sm:$0xf]  ;;  %v9477_v28 = vld [vmem:[%s12357_s23 + $0xfd0] sm:$0xf0]  ;;  %v9352_v37 = vor.u32 %v11517_v20, %v9349_v25  ;;  %v13191_v59 = vpop.f32.mrf.mxu1 }
 0x185   : > { %6307 = vmatpush.bf16.msrb.mxu2 %v8744_v0  ;;  %v11449_v40 = vld [vmem:[%s12357_s23 + $0xca4] sm:$0xf]  ;;  %v9077_v41 = vld [vmem:[%s12357_s23 + $0xcb0] sm:$0xf0]  ;;  %v9480_v49 = vor.u32 %v11549_v27, %v9477_v28  ;;  %v13187_v18 = vpop.f32.mrf.mxu0 }
 0x186   : > { %v11481_v48 = vld [vmem:[%s12357_s23 + $0xda4] sm:$0xf]  ;;  %6282 = vmatmul.bf16.vlgmr.msrb.gmra.mxu0 %v12621_v26  ;;  %v9205_v51 = vld [vmem:[%s12357_s23 + $0xdb0] sm:$0xf0]  ;;  %v9080_v58 = vor.u32 %v11449_v40, %v9077_v41 }
 0x187   : > { %6320 = vmatpush.bf16.msrb.mxu3 %v8872_v6  ;;  %6326 = vmatpush.bf16.msra.mxu0 %v9112_v8  ;;  %v11513_v54 = vld [vmem:[%s12357_s23 + $0xea4] sm:$0xf]  ;;  %v9333_v55 = vld [vmem:[%s12357_s23 + $0xeb0] sm:$0xf0]  ;;  %v9208_v60 = vor.u32 %v11481_v48, %v9205_v51 }
 0x188   : > { %6339 = vmatpush.bf16.msra.mxu1 %v9240_v12  ;;  %6308 = vmatmul.bf16.vlgmr.msrb.gmra.mxu2 %v12626_v30  ;;  %v11545_v56 = vld [vmem:[%s12357_s23 + $0xfa4] sm:$0xf]  ;;  %v9461_v57 = vld [vmem:[%s12357_s23 + $0xfb0] sm:$0xf0]  ;;  %v9336_v62 = vor.u32 %v11513_v54, %v9333_v55 }
 0x189   : > { %6352 = vmatpush.bf16.msra.mxu2 %v9368_v15  ;;  %6295 = vmatmul.bf16.vlgmr.msrb.gmra.mxu1 %v12628_v31  ;;  %v11445_v0 = vld [vmem:[%s12357_s23 + $0xc84] sm:$0xf]  ;;  %v9061_v1 = vld [vmem:[%s12357_s23 + $0xc90] sm:$0xf0]  ;;  %v9464_v6 = vor.u32 %v11545_v56, %v9461_v57 }
 0x18a   : > { %6321 = vmatmul.bf16.vlgmr.msrb.gmra.mxu3 %v12632_v34  ;;  %v11477_v2 = vld [vmem:[%s12357_s23 + $0xd84] sm:$0xf]  ;;  %v9189_v8 = vld [vmem:[%s12357_s23 + $0xd90] sm:$0xf0] }
 0x18b   : > { %6365 = vmatpush.bf16.msra.mxu3 %v9496_v23  ;;  %6327 = vmatpush.bf16.msra.mxu0 %v9096_v33  ;;  %v11509_v12 = vld [vmem:[%s12357_s23 + $0xe84] sm:$0xf]  ;;  %v9317_v15 = vld [vmem:[%s12357_s23 + $0xe90] sm:$0xf0]  ;;  %v9064_v23 = vor.u32 %v11445_v0, %v9061_v1  ;;  %v9192_v20 = vor.u32 %v11477_v2, %v9189_v8 }
 0x18c   : > { %6340 = vmatpush.bf16.msra.mxu1 %v9224_v35  ;;  %v11541_v19 = vld [vmem:[%s12357_s23 + $0xf84] sm:$0xf]  ;;  %v9445_v53 = vld [vmem:[%s12357_s23 + $0xf90] sm:$0xf0]  ;;  %v9320_v25 = vor.u32 %v11509_v12, %v9317_v15  ;;  %v13211_v8 = vpop.f32.mrf.mxu3 }
 0x18d   : > { %6353 = vmatpush.bf16.msra.mxu2 %v9352_v37  ;;  %v11441_v27 = vld [vmem:[%s12357_s23 + $0xc64] sm:$0xf]  ;;  %v9045_v28 = vld [vmem:[%s12357_s23 + $0xc70] sm:$0xf0]  ;;  %v9448_v35 = vor.u32 %v11541_v19, %v9445_v53  ;;  %v6077_v19 = vpop.f32.mrf.mxu0 }
 0x18e   : > { %v11473_v33 = vld [vmem:[%s12357_s23 + $0xd64] sm:$0xf]  ;;  %v9173_v37 = vld [vmem:[%s12357_s23 + $0xd70] sm:$0xf0]  ;;  %v9048_v51 = vor.u32 %v11441_v27, %v9045_v28 }
 0x18f   : > { %6366 = vmatpush.bf16.msra.mxu3 %v9480_v49  ;;  %6328 = vmatpush.bf16.msra.mxu0 %v9080_v58  ;;  %v11505_v40 = vld [vmem:[%s12357_s23 + $0xe64] sm:$0xf]  ;;  %v9301_v41 = vld [vmem:[%s12357_s23 + $0xe70] sm:$0xf0]  ;;  %v9176_v54 = vor.u32 %v11473_v33, %v9173_v37 }
 0x190   : > { %6341 = vmatpush.bf16.msra.mxu1 %v9208_v60  ;;  %v11537_v48 = vld [vmem:[%s12357_s23 + $0xf64] sm:$0xf]  ;;  %v9429_v49 = vld [vmem:[%s12357_s23 + $0xf70] sm:$0xf0]  ;;  %v9304_v55 = vor.u32 %v11505_v40, %v9301_v41 }
 0x191   : > { %6354 = vmatpush.bf16.msra.mxu2 %v9336_v62  ;;  %v11437_v56 = vld [vmem:[%s12357_s23 + $0xc44] sm:$0xf]  ;;  %v9029_v57 = vld [vmem:[%s12357_s23 + $0xc50] sm:$0xf0]  ;;  %v9432_v60 = vor.u32 %v11537_v48, %v9429_v49  ;;  %v13204_v62 = vpop.f32.mrf.mxu2 }
 0x192   : > { %v11469_v58 = vld [vmem:[%s12357_s23 + $0xd44] sm:$0xf]  ;;  %v9157_v0 = vld [vmem:[%s12357_s23 + $0xd50] sm:$0xf0]  ;;  %v9032_v53 = vor.u32 %v11437_v56, %v9029_v57 }
 0x193   : > { %6367 = vmatpush.bf16.msra.mxu3 %v9464_v6  ;;  %6329 = vmatpush.bf16.msra.mxu0 %v9064_v23  ;;  %v11501_v1 = vld [vmem:[%s12357_s23 + $0xe44] sm:$0xf]  ;;  %v9285_v2 = vld [vmem:[%s12357_s23 + $0xe50] sm:$0xf0]  ;;  %v6024_v6 = vadd.f32 %v13111_v63, %v13059_v61  ;;  %v6090_v23 = vpop.f32.mrf.mxu1 }
 0x194   : > { %6342 = vmatpush.bf16.msra.mxu1 %v9192_v20  ;;  %v11533_v12 = vld [vmem:[%s12357_s23 + $0xf44] sm:$0xf]  ;;  %v9413_v15 = vld [vmem:[%s12357_s23 + $0xf50] sm:$0xf0]  ;;  %v9160_v20 = vor.u32 %v11469_v58, %v9157_v0 }
 0x195   : > { %6355 = vmatpush.bf16.msra.mxu2 %v9320_v25  ;;  %v9288_v25 = vor.u32 %v11501_v1, %v9285_v2  ;;  %v11433_v61 = vld [vmem:[%s12357_s23 + $0xc24] sm:$0xf]  ;;  %v9013_v63 = vld [vmem:[%s12357_s23 + $0xc30] sm:$0xf0]  ;;  %v9416_v28 = vor.u32 %v11533_v12, %v9413_v15  ;;  %v6037_v40 = vadd.f32 %v13115_v4, %v6024_v6 }
 0x196   : > { %v11465_v27 = vld [vmem:[%s12357_s23 + $0xd24] sm:$0xf]  ;;  %v9141_v33 = vld [vmem:[%s12357_s23 + $0xd30] sm:$0xf0]  ;;  %v9016_v49 = vor.u32 %v11433_v61, %v9013_v63 }
 0x197   : > { %6368 = vmatpush.bf16.msra.mxu3 %v9448_v35  ;;  %6330 = vmatpush.bf16.msra.mxu0 %v9048_v51  ;;  %v11497_v35 = vld [vmem:[%s12357_s23 + $0xe24] sm:$0xf]  ;;  %v9269_v37 = vld [vmem:[%s12357_s23 + $0xe30] sm:$0xf0]  ;;  %v9144_v56 = vor.u32 %v11465_v27, %v9141_v33 }
 0x198   : > { %6343 = vmatpush.bf16.msra.mxu1 %v9176_v54  ;;  %v11529_v41 = vld [vmem:[%s12357_s23 + $0xf24] sm:$0xf]  ;;  %v9397_v48 = vld [vmem:[%s12357_s23 + $0xf30] sm:$0xf0]  ;;  %v9272_v57 = vor.u32 %v11497_v35, %v9269_v37 }
 0x199   : > { %6356 = vmatpush.bf16.msra.mxu2 %v9304_v55  ;;  %v11429_v51 = vld [vmem:[%s12357_s23 + $0xc04] sm:$0xf]  ;;  %v8997_v54 = vld [vmem:[%s12357_s23 + $0xc10] sm:$0xf0]  ;;  %v6050_v55 = vadd.f32 %v13128_v44, %v6037_v40  ;;  %v9400_v0 = vor.u32 %v11529_v41, %v9397_v48  ;;  %v6103_v12 = vpop.f32.mrf.mxu2 }
 0x19a   : > { %v11461_v4 = vld [vmem:[%s12357_s23 + $0xd04] sm:$0xf]  ;;  %v9125_v58 = vld [vmem:[%s12357_s23 + $0xd10] sm:$0xf0]  ;;  %v9000_v23 = vor.u32 %v11429_v51, %v8997_v54 }
 0x19b   : > { %6369 = vmatpush.bf16.msra.mxu3 %v9432_v60  ;;  %6331 = vmatpush.bf16.msra.mxu0 %v9032_v53  ;;  %v11493_v60 = vld [vmem:[%s12357_s23 + $0xe04] sm:$0xf]  ;;  %v9253_v1 = vld [vmem:[%s12357_s23 + $0xe10] sm:$0xf0]  ;;  %v6116_v53 = vpop.f32.mrf.mxu3  ;;  %v6063_v63 = vadd.f32 %v13133_v52, %v6050_v55  ;;  %v9128_v27 = vor.u32 %v11461_v4, %v9125_v58 }
 0x19c   : > { %6344 = vmatpush.bf16.msra.mxu1 %v9160_v20  ;;  %v11525_v2 = vld [vmem:[%s12357_s23 + $0xf04] sm:$0xf]  ;;  %v9381_v6 = vld [vmem:[%s12357_s23 + $0xf10] sm:$0xf0] }
 0x19d   : > { %6357 = vmatpush.bf16.msra.mxu2 %v9288_v25  ;;  %v11585_v44 = vld [vmem:[%s12357_s23 + $0x10e4] sm:$0xf]  ;;  %v9621_v15 = vld [vmem:[%s12357_s23 + $0x10f0] sm:$0xf0]  ;;  %v9384_v37 = vor.u32 %v11525_v2, %v9381_v6  ;;  %v6076_v41 = vadd.f32 %v13187_v18, %v6063_v63 }
 0x19e   : > { %v11617_v19 = vld [vmem:[%s12357_s23 + $0x11e4] sm:$0xf]  ;;  %v9749_v20 = vld [vmem:[%s12357_s23 + $0x11f0] sm:$0xf0]  ;;  %v9624_v40 = vor.u32 %v11585_v44, %v9621_v15 }
 0x19f   : > { %6370 = vmatpush.bf16.msra.mxu3 %v9416_v28  ;;  %6332 = vmatpush.bf16.msra.mxu0 %v9016_v49  ;;  %v11649_v25 = vld [vmem:[%s12357_s23 + $0x12e4] sm:$0xf]  ;;  %v9877_v61 = vld [vmem:[%s12357_s23 + $0x12f0] sm:$0xf0]  ;;  %v9256_v28 = vor.u32 %v11493_v60, %v9253_v1  ;;  %v9752_v48 = vor.u32 %v11617_v19, %v9749_v20 }
 0x1a0   : > { %6345 = vmatpush.bf16.msra.mxu1 %v9144_v56  ;;  %v11681_v33 = vld [vmem:[%s12357_s23 + $0x13e4] sm:$0xf]  ;;  %v10005_v35 = vld [vmem:[%s12357_s23 + $0x13f0] sm:$0xf0]  ;;  %v9880_v49 = vor.u32 %v11649_v25, %v9877_v61 }
 0x1a1   : > { %6358 = vmatpush.bf16.msra.mxu2 %v9272_v57  ;;  %v11581_v51 = vld [vmem:[%s12357_s23 + $0x10c4] sm:$0xf]  ;;  %v9605_v52 = vld [vmem:[%s12357_s23 + $0x10d0] sm:$0xf0]  ;;  %v10008_v55 = vor.u32 %v11681_v33, %v10005_v35 }
 0x1a2   : > { %v11613_v54 = vld [vmem:[%s12357_s23 + $0x11c4] sm:$0xf]  ;;  %v9733_v56 = vld [vmem:[%s12357_s23 + $0x11d0] sm:$0xf0]  ;;  %v9608_v18 = vor.u32 %v11581_v51, %v9605_v52 }
 0x1a3   : > { %6371 = vmatpush.bf16.msra.mxu3 %v9400_v0  ;;  %6333 = vmatpush.bf16.msra.mxu0 %v9000_v23  ;;  %v11645_v57 = vld [vmem:[%s12357_s23 + $0x12c4] sm:$0xf]  ;;  %v9861_v4 = vld [vmem:[%s12357_s23 + $0x12d0] sm:$0xf0]  ;;  %v6089_v0 = vadd.f32 %v13191_v59, %v6076_v41  ;;  %v9736_v1 = vor.u32 %v11613_v54, %v9733_v56 }
 0x1a4   : > { %6346 = vmatpush.bf16.msra.mxu1 %v9128_v27  ;;  %v11677_v58 = vld [vmem:[%s12357_s23 + $0x13c4] sm:$0xf]  ;;  %v9989_v60 = vld [vmem:[%s12357_s23 + $0x13d0] sm:$0xf0]  ;;  %v9864_v2 = vor.u32 %v11645_v57, %v9861_v4 }
 0x1a5   : > { %6359 = vmatpush.bf16.msra.mxu2 %v9256_v28  ;;  %v11577_v6 = vld [vmem:[%s12357_s23 + $0x10a4] sm:$0xf]  ;;  %v9589_v12 = vld [vmem:[%s12357_s23 + $0x10b0] sm:$0xf0]  ;;  %v9992_v15 = vor.u32 %v11677_v58, %v9989_v60  ;;  %v6102_v59 = vadd.f32 %v13204_v62, %v6089_v0 }
 0x1a6   : > { %v11609_v44 = vld [vmem:[%s12357_s23 + $0x11a4] sm:$0xf]  ;;  %6334 = vmatmul.bf16.vlgmr.msra.gmra.mxu0 %v12699_v24  ;;  %v9717_v19 = vld [vmem:[%s12357_s23 + $0x11b0] sm:$0xf0]  ;;  %v9592_v61 = vor.u32 %v11577_v6, %v9589_v12 }
 0x1a7   : > { %6372 = vmatpush.bf16.msra.mxu3 %v9384_v37  ;;  %6378 = vmatpush.bf16.msrb.mxu0 %v9624_v40  ;;  %v11641_v53 = vld [vmem:[%s12357_s23 + $0x12a4] sm:$0xf]  ;;  %v9845_v23 = vld [vmem:[%s12357_s23 + $0x12b0] sm:$0xf0]  ;;  %v9720_v63 = vor.u32 %v11609_v44, %v9717_v19 }
 0x1a8   : > { %6391 = vmatpush.bf16.msrb.mxu1 %v9752_v48  ;;  %6360 = vmatmul.bf16.vlgmr.msra.gmra.mxu2 %v12704_v29  ;;  %v11673_v20 = vld [vmem:[%s12357_s23 + $0x13a4] sm:$0xf]  ;;  %v9973_v25 = vld [vmem:[%s12357_s23 + $0x13b0] sm:$0xf0]  ;;  %v9848_v27 = vor.u32 %v11641_v53, %v9845_v23  ;;  %v6115_v48 = vadd.f32 %v13211_v8, %v6102_v59 }
 0x1a9   : > { %6404 = vmatpush.bf16.msrb.mxu2 %v9880_v49  ;;  %6347 = vmatmul.bf16.vlgmr.msra.gmra.mxu1 %v12706_v32  ;;  %v11573_v62 = vld [vmem:[%s12357_s23 + $0x1084] sm:$0xf]  ;;  %v9573_v28 = vld [vmem:[%s12357_s23 + $0x1090] sm:$0xf0]  ;;  %v9976_v35 = vor.u32 %v11673_v20, %v9973_v25  ;;  %v6127_v49 = vpop.f32.mrf.mxu0 }
 0x1aa   : > { %6373 = vmatmul.bf16.vlgmr.msra.gmra.mxu3 %v12710_v36  ;;  %v11605_v33 = vld [vmem:[%s12357_s23 + $0x1184] sm:$0xf]  ;;  %v9701_v37 = vld [vmem:[%s12357_s23 + $0x1190] sm:$0xf0]  ;;  %v9576_v54 = vor.u32 %v11573_v62, %v9573_v28  ;;  %v6128_v56 = vadd.f32 %v6127_v49, %v6115_v48 }
 0x1ab   : > { %6417 = vmatpush.bf16.msrb.mxu3 %v10008_v55  ;;  %6379 = vmatpush.bf16.msrb.mxu0 %v9608_v18  ;;  %v11637_v40 = vld [vmem:[%s12357_s23 + $0x1284] sm:$0xf]  ;;  %v9829_v41 = vld [vmem:[%s12357_s23 + $0x1290] sm:$0xf0]  ;;  %v6140_v55 = vpop.f32.mrf.mxu1  ;;  %v9704_v57 = vor.u32 %v11605_v33, %v9701_v37 }
 0x1ac   : > { %6392 = vmatpush.bf16.msrb.mxu1 %v9736_v1  ;;  %v11669_v51 = vld [vmem:[%s12357_s23 + $0x1384] sm:$0xf]  ;;  %v9957_v52 = vld [vmem:[%s12357_s23 + $0x1390] sm:$0xf0]  ;;  %v9832_v4 = vor.u32 %v11637_v40, %v9829_v41 }
 0x1ad   : > { %6405 = vmatpush.bf16.msrb.mxu2 %v9864_v2  ;;  %v11569_v58 = vld [vmem:[%s12357_s23 + $0x1064] sm:$0xf]  ;;  %v9557_v60 = vld [vmem:[%s12357_s23 + $0x1070] sm:$0xf0]  ;;  %v9960_v18 = vor.u32 %v11669_v51, %v9957_v52 }
 0x1ae   : > { %v11601_v8 = vld [vmem:[%s12357_s23 + $0x1164] sm:$0xf]  ;;  %v9685_v0 = vld [vmem:[%s12357_s23 + $0x1170] sm:$0xf0]  ;;  %v9560_v44 = vor.u32 %v11569_v58, %v9557_v60 }
 0x1af   : > { %6418 = vmatpush.bf16.msrb.mxu3 %v9992_v15  ;;  %6380 = vmatpush.bf16.msrb.mxu0 %v9592_v61  ;;  %v11633_v1 = vld [vmem:[%s12357_s23 + $0x1264] sm:$0xf]  ;;  %v9813_v2 = vld [vmem:[%s12357_s23 + $0x1270] sm:$0xf0]  ;;  %v6141_v15 = vadd.f32 %v6140_v55, %v6128_v56  ;;  %v9688_v19 = vor.u32 %v11601_v8, %v9685_v0  ;;  %v6153_v61 = vpop.f32.mrf.mxu2 }
 0x1b0   : > { %6393 = vmatpush.bf16.msrb.mxu1 %v9720_v63  ;;  %v11665_v6 = vld [vmem:[%s12357_s23 + $0x1364] sm:$0xf]  ;;  %v9941_v12 = vld [vmem:[%s12357_s23 + $0x1370] sm:$0xf0]  ;;  %v9816_v53 = vor.u32 %v11633_v1, %v9813_v2  ;;  %v13304_v1 = vld [vmem:[%s12376_s26 + $0x18] sm:$0xff] }
 0x1b1   : > { %6406 = vmatpush.bf16.msrb.mxu2 %v9848_v27  ;;  %v11565_v23 = vld [vmem:[%s12357_s23 + $0x1044] sm:$0xf]  ;;  %v9541_v59 = vld [vmem:[%s12357_s23 + $0x1050] sm:$0xf0]  ;;  %v9944_v25 = vor.u32 %v11665_v6, %v9941_v12  ;;  %v6154_v28 = vadd.f32 %v6153_v61, %v6141_v15  ;;  %v6129_v41 = vpop.f32.mrf.mxu0 }
 0x1b2   : > { %v11597_v20 = vld [vmem:[%s12357_s23 + $0x1144] sm:$0xf]  ;;  %v9669_v63 = vld [vmem:[%s12357_s23 + $0x1150] sm:$0xf0]  ;;  %v9544_v48 = vor.u32 %v11565_v23, %v9541_v59 }
 0x1b3   : > { %6419 = vmatpush.bf16.msrb.mxu3 %v9976_v35  ;;  %6381 = vmatpush.bf16.msrb.mxu0 %v9576_v54  ;;  %v11629_v27 = vld [vmem:[%s12357_s23 + $0x1244] sm:$0xf]  ;;  %v9797_v62 = vld [vmem:[%s12357_s23 + $0x1250] sm:$0xf0]  ;;  %v6166_v35 = vpop.f32.mrf.mxu3  ;;  %v6142_v54 = vpop.f32.mrf.mxu1  ;;  %v9672_v56 = vor.u32 %v11597_v20, %v9669_v63 }
 0x1b4   : > { %6394 = vmatpush.bf16.msrb.mxu1 %v9704_v57  ;;  %v314_v33 = vld [vmem:[%s12376_s26] sm:$0xff]  ;;  %v9925_v40 = vld [vmem:[%s12357_s23 + $0x1350] sm:$0xf0]  ;;  %v6167_v55 = vadd.f32 %v6166_v35, %v6154_v28  ;;  %v9800_v57 = vor.u32 %v11629_v27, %v9797_v62 }
 0x1b5   : > { %6407 = vmatpush.bf16.msrb.mxu2 %v9832_v4  ;;  %v11661_v37 = vld [vmem:[%s12357_s23 + $0x1344] sm:$0xf]  ;;  %v9525_v51 = vld [vmem:[%s12357_s23 + $0x1030] sm:$0xf0] }
 0x1b6   : > { %v11561_v49 = vld [vmem:[%s12357_s23 + $0x1024] sm:$0xf]  ;;  %v9653_v4 = vld [vmem:[%s12357_s23 + $0x1130] sm:$0xf0]  ;;  %v9928_v8 = vor.u32 %v11661_v37, %v9925_v40  ;;  %v7262_v2 = vadd.f32 %v6167_v55, %v314_v33 }
 0x1b7   : > { %6420 = vmatpush.bf16.msrb.mxu3 %v9960_v18  ;;  %6382 = vmatpush.bf16.msrb.mxu0 %v9560_v44  ;;  %v11593_v52 = vld [vmem:[%s12357_s23 + $0x1124] sm:$0xf]  ;;  %v9781_v60 = vld [vmem:[%s12357_s23 + $0x1230] sm:$0xf0]  ;;  %v13298_v18 = vld [vmem:[%s12376_s26 + $0x8] sm:$0xff]  ;;  %v9528_v44 = vor.u32 %v11561_v49, %v9525_v51  ;;  %v6155_v28 = vpop.f32.mrf.mxu2 }
 0x1b8   : > { %6395 = vmatpush.bf16.msrb.mxu1 %v9688_v19  ;;  %v11625_v58 = vld [vmem:[%s12357_s23 + $0x1224] sm:$0xf]  ;;  %v13301_v0 = vld [vmem:[%s12376_s26 + $0x10] sm:$0xff]  ;;  %7266 = vst [vmem:[%s12376_s26] sm:$0xff] %v7262_v2 }
 0x1b9   : > { %6408 = vmatpush.bf16.msrb.mxu2 %v9816_v53  ;;  %v11657_v6 = vld [vmem:[%s12357_s23 + $0x1324] sm:$0xf]  ;;  %v9909_v12 = vld [vmem:[%s12357_s23 + $0x1330] sm:$0xf0]  ;;  %v9656_v53 = vor.u32 %v11593_v52, %v9653_v4  ;;  %v9784_v23 = vor.u32 %v11625_v58, %v9781_v60 }
 0x1ba   : > { %v11557_v15 = vld [vmem:[%s12357_s23 + $0x1004] sm:$0xf]  ;;  %v9509_v19 = vld [vmem:[%s12357_s23 + $0x1010] sm:$0xf0]  ;;  %v9912_v61 = vor.u32 %v11657_v6, %v9909_v12 }
 0x1bb   : > { %6421 = vmatpush.bf16.msrb.mxu3 %v9944_v25  ;;  %6383 = vmatpush.bf16.msrb.mxu0 %v9544_v48  ;;  %v11589_v59 = vld [vmem:[%s12357_s23 + $0x1104] sm:$0xf]  ;;  %v9637_v20 = vld [vmem:[%s12357_s23 + $0x1110] sm:$0xf0]  ;;  %v6168_v40 = vpop.f32.mrf.mxu3  ;;  %v9512_v41 = vor.u32 %v11557_v15, %v9509_v19 }
 0x1bc   : > { %6396 = vmatpush.bf16.msrb.mxu1 %v9672_v56  ;;  %v11621_v25 = vld [vmem:[%s12357_s23 + $0x1204] sm:$0xf]  ;;  %v9765_v63 = vld [vmem:[%s12357_s23 + $0x1210] sm:$0xf0]  ;;  %v9640_v52 = vor.u32 %v11589_v59, %v9637_v20 }
 0x1bd   : > { %6409 = vmatpush.bf16.msrb.mxu2 %v9800_v57  ;;  %v11653_v27 = vld [vmem:[%s12357_s23 + $0x1304] sm:$0xf]  ;;  %v9893_v62 = vld [vmem:[%s12357_s23 + $0x1310] sm:$0xf0]  ;;  %v9768_v54 = vor.u32 %v11621_v25, %v9765_v63 }
 0x1be   : > { %v11713_v33 = vld [vmem:[%s12357_s23 + $0x14e4] sm:$0xf]  ;;  %v10133_v35 = vld [vmem:[%s12357_s23 + $0x14f0] sm:$0xf0]  ;;  %v9896_v57 = vor.u32 %v11653_v27, %v9893_v62 }
 0x1bf   : > { %6422 = vmatpush.bf16.msrb.mxu3 %v9928_v8  ;;  %v11745_v37 = vld [vmem:[%s12357_s23 + $0x15e4] sm:$0xf]  ;;  %6384 = vmatpush.bf16.msrb.mxu0 %v9528_v44  ;;  %v10261_v48 = vld [vmem:[%s12357_s23 + $0x15f0] sm:$0xf0]  ;;  %v10136_v4 = vor.u32 %v11713_v33, %v10133_v35 }
 0x1c0   : > { %v11777_v49 = vld [vmem:[%s12357_s23 + $0x16e4] sm:$0xf]  ;;  %v10389_v51 = vld [vmem:[%s12357_s23 + $0x16f0] sm:$0xf0]  ;;  %6397 = vmatpush.bf16.msrb.mxu1 %v9656_v53  ;;  %v10264_v58 = vor.u32 %v11745_v37, %v10261_v48 }
 0x1c1   : > { %6410 = vmatpush.bf16.msrb.mxu2 %v9784_v23  ;;  %v11809_v55 = vld [vmem:[%s12357_s23 + $0x17e4] sm:$0xf]  ;;  %v10517_v56 = vld [vmem:[%s12357_s23 + $0x17f0] sm:$0xf0]  ;;  %v10392_v60 = vor.u32 %v11777_v49, %v10389_v51 }
 0x1c2   : > { %v11709_v8 = vld [vmem:[%s12357_s23 + $0x14c4] sm:$0xf]  ;;  %v10117_v2 = vld [vmem:[%s12357_s23 + $0x14d0] sm:$0xf0]  ;;  %v10520_v12 = vor.u32 %v11809_v55, %v10517_v56 }
 0x1c3   : > { %6423 = vmatpush.bf16.msrb.mxu3 %v9912_v61  ;;  %v11741_v6 = vld [vmem:[%s12357_s23 + $0x15c4] sm:$0xf]  ;;  %6385 = vmatpush.bf16.msrb.mxu0 %v9512_v41  ;;  %v10245_v44 = vld [vmem:[%s12357_s23 + $0x15d0] sm:$0xf0]  ;;  %v10120_v59 = vor.u32 %v11709_v8, %v10117_v2  ;;  %v6179_v2 = vpop.f32.mrf.mxu0 }
 0x1c4   : > { %v11773_v15 = vld [vmem:[%s12357_s23 + $0x16c4] sm:$0xf]  ;;  %v10373_v19 = vld [vmem:[%s12357_s23 + $0x16d0] sm:$0xf0]  ;;  %6398 = vmatpush.bf16.msrb.mxu1 %v9640_v52  ;;  %v10248_v20 = vor.u32 %v11741_v6, %v10245_v44 }
 0x1c5   : > { %6411 = vmatpush.bf16.msrb.mxu2 %v9768_v54  ;;  %v11805_v53 = vld [vmem:[%s12357_s23 + $0x17c4] sm:$0xf]  ;;  %v10501_v23 = vld [vmem:[%s12357_s23 + $0x17d0] sm:$0xf0]  ;;  %v10376_v25 = vor.u32 %v11773_v15, %v10373_v19 }
 0x1c6   : > { %v11705_v61 = vld [vmem:[%s12357_s23 + $0x14a4] sm:$0xf]  ;;  %v10101_v63 = vld [vmem:[%s12357_s23 + $0x14b0] sm:$0xf0]  ;;  %6386 = vmatmul.bf16.vlgmr.msrb.gmra.mxu0 %v12777_v38  ;;  %v10504_v62 = vor.u32 %v11805_v53, %v10501_v23  ;;  %v6192_v53 = vpop.f32.mrf.mxu1 }
 0x1c7   : > { %6424 = vmatpush.bf16.msrb.mxu3 %v9896_v57  ;;  %6430 = vmatpush.bf16.msra.mxu0 %v10136_v4  ;;  %v11737_v27 = vld [vmem:[%s12357_s23 + $0x15a4] sm:$0xf]  ;;  %v10229_v28 = vld [vmem:[%s12357_s23 + $0x15b0] sm:$0xf0]  ;;  %v10104_v41 = vor.u32 %v11705_v61, %v10101_v63  ;;  %v6193_v61 = vadd.f32 %v6192_v53, %v6179_v2 }
 0x1c8   : > { %6443 = vmatpush.bf16.msra.mxu1 %v10264_v58  ;;  %v11769_v33 = vld [vmem:[%s12357_s23 + $0x16a4] sm:$0xf]  ;;  %v10357_v35 = vld [vmem:[%s12357_s23 + $0x16b0] sm:$0xf0]  ;;  %6412 = vmatmul.bf16.vlgmr.msrb.gmra.mxu2 %v12782_v46  ;;  %v10232_v48 = vor.u32 %v11737_v27, %v10229_v28 }
 0x1c9   : > { %6456 = vmatpush.bf16.msra.mxu2 %v10392_v60  ;;  %6399 = vmatmul.bf16.vlgmr.msrb.gmra.mxu1 %v12784_v47  ;;  %v11801_v37 = vld [vmem:[%s12357_s23 + $0x17a4] sm:$0xf]  ;;  %v10485_v40 = vld [vmem:[%s12357_s23 + $0x17b0] sm:$0xf0]  ;;  %v10360_v49 = vor.u32 %v11769_v33, %v10357_v35 }
 0x1ca   : > { %6425 = vmatmul.bf16.vlgmr.msrb.gmra.mxu3 %v12788_v50  ;;  %v11701_v51 = vld [vmem:[%s12357_s23 + $0x1484] sm:$0xf]  ;;  %v10085_v52 = vld [vmem:[%s12357_s23 + $0x1490] sm:$0xf0]  ;;  %v10488_v55 = vor.u32 %v11801_v37, %v10485_v40 }
 0x1cb   : > { %6469 = vmatpush.bf16.msra.mxu3 %v10520_v12  ;;  %6431 = vmatpush.bf16.msra.mxu0 %v10120_v59  ;;  %v11733_v54 = vld [vmem:[%s12357_s23 + $0x1584] sm:$0xf]  ;;  %v10213_v56 = vld [vmem:[%s12357_s23 + $0x1590] sm:$0xf0]  ;;  %v10088_v8 = vor.u32 %v11701_v51, %v10085_v52 }
 0x1cc   : > { %6444 = vmatpush.bf16.msra.mxu1 %v10248_v20  ;;  %v11765_v57 = vld [vmem:[%s12357_s23 + $0x1684] sm:$0xf]  ;;  %v10341_v4 = vld [vmem:[%s12357_s23 + $0x1690] sm:$0xf0]  ;;  %v10216_v6 = vor.u32 %v11733_v54, %v10213_v56 }
 0x1cd   : > { %6457 = vmatpush.bf16.msra.mxu2 %v10376_v25  ;;  %v11797_v58 = vld [vmem:[%s12357_s23 + $0x1784] sm:$0xf]  ;;  %v10469_v60 = vld [vmem:[%s12357_s23 + $0x1790] sm:$0xf0]  ;;  %v10344_v12 = vor.u32 %v11765_v57, %v10341_v4 }
 0x1ce   : > { %v11697_v44 = vld [vmem:[%s12357_s23 + $0x1464] sm:$0xf]  ;;  %v10069_v15 = vld [vmem:[%s12357_s23 + $0x1470] sm:$0xf0]  ;;  %v10472_v23 = vor.u32 %v11797_v58, %v10469_v60  ;;  %v6181_v60 = vpop.f32.mrf.mxu0 }
 0x1cf   : > { %6470 = vmatpush.bf16.msra.mxu3 %v10504_v62  ;;  %6432 = vmatpush.bf16.msra.mxu0 %v10104_v41  ;;  %v11729_v19 = vld [vmem:[%s12357_s23 + $0x1564] sm:$0xf]  ;;  %v10197_v59 = vld [vmem:[%s12357_s23 + $0x1570] sm:$0xf0]  ;;  %v10072_v62 = vor.u32 %v11697_v44, %v10069_v15  ;;  %v6205_v41 = vpop.f32.mrf.mxu2  ;;  %v6194_v15 = vpop.f32.mrf.mxu1 }
 0x1d0   : > { %6445 = vmatpush.bf16.msra.mxu1 %v10232_v48  ;;  %v11761_v20 = vld [vmem:[%s12357_s23 + $0x1664] sm:$0xf]  ;;  %v10325_v25 = vld [vmem:[%s12357_s23 + $0x1670] sm:$0xf0]  ;;  %v10200_v28 = vor.u32 %v11729_v19, %v10197_v59  ;;  %v6206_v54 = vadd.f32 %v6205_v41, %v6193_v61 }
 0x1d1   : > { %6458 = vmatpush.bf16.msra.mxu2 %v10360_v49  ;;  %v11793_v63 = vld [vmem:[%s12357_s23 + $0x1764] sm:$0xf]  ;;  %v10453_v27 = vld [vmem:[%s12357_s23 + $0x1770] sm:$0xf0]  ;;  %v10328_v33 = vor.u32 %v11761_v20, %v10325_v25 }
 0x1d2   : > { %v11693_v35 = vld [vmem:[%s12357_s23 + $0x1444] sm:$0xf]  ;;  %v10053_v37 = vld [vmem:[%s12357_s23 + $0x1450] sm:$0xf0]  ;;  %v10456_v48 = vor.u32 %v11793_v63, %v10453_v27 }
 0x1d3   : > { %6471 = vmatpush.bf16.msra.mxu3 %v10488_v55  ;;  %6433 = vmatpush.bf16.msra.mxu0 %v10088_v8  ;;  %v11725_v40 = vld [vmem:[%s12357_s23 + $0x1544] sm:$0xf]  ;;  %v10181_v49 = vld [vmem:[%s12357_s23 + $0x1550] sm:$0xf0]  ;;  %v6218_v55 = vpop.f32.mrf.mxu3  ;;  %v10056_v4 = vor.u32 %v11693_v35, %v10053_v37 }
 0x1d4   : > { %6446 = vmatpush.bf16.msra.mxu1 %v10216_v6  ;;  %v11757_v51 = vld [vmem:[%s12357_s23 + $0x1644] sm:$0xf]  ;;  %v10309_v52 = vld [vmem:[%s12357_s23 + $0x1650] sm:$0xf0]  ;;  %v13369_v58 = vadd.f32 %v6218_v55, %v6206_v54  ;;  %v10184_v8 = vor.u32 %v11725_v40, %v10181_v49 }
 0x1d5   : > { %6459 = vmatpush.bf16.msra.mxu2 %v10344_v12  ;;  %v11789_v56 = vld [vmem:[%s12357_s23 + $0x1744] sm:$0xf]  ;;  %v10437_v57 = vld [vmem:[%s12357_s23 + $0x1750] sm:$0xf0]  ;;  %v10312_v2 = vor.u32 %v11757_v51, %v10309_v52 }
 0x1d6   : > { %v11689_v6 = vld [vmem:[%s12357_s23 + $0x1424] sm:$0xf]  ;;  %v10037_v12 = vld [vmem:[%s12357_s23 + $0x1430] sm:$0xf0]  ;;  %v10440_v19 = vor.u32 %v11789_v56, %v10437_v57 }
 0x1d7   : > { %6472 = vmatpush.bf16.msra.mxu3 %v10472_v23  ;;  %6434 = vmatpush.bf16.msra.mxu0 %v10072_v62  ;;  %v11721_v44 = vld [vmem:[%s12357_s23 + $0x1524] sm:$0xf]  ;;  %v10165_v53 = vld [vmem:[%s12357_s23 + $0x1530] sm:$0xf0]  ;;  %v10040_v61 = vor.u32 %v11689_v6, %v10037_v12  ;;  %v6207_v40 = vpop.f32.mrf.mxu2 }
 0x1d8   : > { %6447 = vmatpush.bf16.msra.mxu1 %v10200_v28  ;;  %v11753_v23 = vld [vmem:[%s12357_s23 + $0x1624] sm:$0xf]  ;;  %v10293_v59 = vld [vmem:[%s12357_s23 + $0x1630] sm:$0xf0]  ;;  %v10168_v62 = vor.u32 %v11721_v44, %v10165_v53 }
 0x1d9   : > { %6460 = vmatpush.bf16.msra.mxu2 %v10328_v33  ;;  %v11785_v20 = vld [vmem:[%s12357_s23 + $0x1724] sm:$0xf]  ;;  %v10421_v25 = vld [vmem:[%s12357_s23 + $0x1730] sm:$0xf0]  ;;  %v10296_v28 = vor.u32 %v11753_v23, %v10293_v59 }
 0x1da   : > { %v11685_v63 = vld [vmem:[%s12357_s23 + $0x1404] sm:$0xf]  ;;  %v10021_v27 = vld [vmem:[%s12357_s23 + $0x1410] sm:$0xf0]  ;;  %v10424_v41 = vor.u32 %v11785_v20, %v10421_v25 }
 0x1db   : > { %6473 = vmatpush.bf16.msra.mxu3 %v10456_v48  ;;  %6435 = vmatpush.bf16.msra.mxu0 %v10056_v4  ;;  %v11717_v33 = vld [vmem:[%s12357_s23 + $0x1504] sm:$0xf]  ;;  %v10149_v35 = vld [vmem:[%s12357_s23 + $0x1510] sm:$0xf0]  ;;  %v6220_v52 = vpop.f32.mrf.mxu3  ;;  %v10024_v57 = vor.u32 %v11685_v63, %v10021_v27 }
 0x1dc   : > { %6448 = vmatpush.bf16.msra.mxu1 %v10184_v8  ;;  %v11749_v37 = vld [vmem:[%s12357_s23 + $0x1604] sm:$0xf]  ;;  %v10277_v48 = vld [vmem:[%s12357_s23 + $0x1610] sm:$0xf0] }
 0x1dd   : > { %6461 = vmatpush.bf16.msra.mxu2 %v10312_v2  ;;  %v11781_v49 = vld [vmem:[%s12357_s23 + $0x1704] sm:$0xf]  ;;  %v10405_v51 = vld [vmem:[%s12357_s23 + $0x1710] sm:$0xf0]  ;;  %v10152_v2 = vor.u32 %v11717_v33, %v10149_v35  ;;  %v10280_v6 = vor.u32 %v11749_v37, %v10277_v48 }
 0x1de   : > { %v11841_v54 = vld [vmem:[%s12357_s23 + $0x18e4] sm:$0xf]  ;;  %v10645_v55 = vld [vmem:[%s12357_s23 + $0x18f0] sm:$0xf0]  ;;  %v10408_v15 = vor.u32 %v11781_v49, %v10405_v51 }
 0x1df   : > { %6474 = vmatpush.bf16.msra.mxu3 %v10440_v19  ;;  %v11873_v56 = vld [vmem:[%s12357_s23 + $0x19e4] sm:$0xf]  ;;  %6436 = vmatpush.bf16.msra.mxu0 %v10040_v61  ;;  %v10773_v4 = vld [vmem:[%s12357_s23 + $0x19f0] sm:$0xf0]  ;;  %v10648_v19 = vor.u32 %v11841_v54, %v10645_v55 }
 0x1e0   : > { %v11905_v60 = vld [vmem:[%s12357_s23 + $0x1ae4] sm:$0xf]  ;;  %v10901_v8 = vld [vmem:[%s12357_s23 + $0x1af0] sm:$0xf0]  ;;  %6449 = vmatpush.bf16.msra.mxu1 %v10168_v62  ;;  %v10776_v53 = vor.u32 %v11873_v56, %v10773_v4 }
 0x1e1   : > { %6462 = vmatpush.bf16.msra.mxu2 %v10296_v28  ;;  %v11937_v12 = vld [vmem:[%s12357_s23 + $0x1be4] sm:$0xf]  ;;  %v11029_v44 = vld [vmem:[%s12357_s23 + $0x1bf0] sm:$0xf0]  ;;  %v10904_v23 = vor.u32 %v11905_v60, %v10901_v8 }
 0x1e2   : > { %v11837_v59 = vld [vmem:[%s12357_s23 + $0x18c4] sm:$0xf]  ;;  %v10629_v20 = vld [vmem:[%s12357_s23 + $0x18d0] sm:$0xf0]  ;;  %v11032_v61 = vor.u32 %v11937_v12, %v11029_v44 }
 0x1e3   : > { %6475 = vmatpush.bf16.msra.mxu3 %v10424_v41  ;;  %v11869_v25 = vld [vmem:[%s12357_s23 + $0x19c4] sm:$0xf]  ;;  %6437 = vmatpush.bf16.msra.mxu0 %v10024_v57  ;;  %v10757_v63 = vld [vmem:[%s12357_s23 + $0x19d0] sm:$0xf0]  ;;  %v10632_v35 = vor.u32 %v11837_v59, %v10629_v20 }
 0x1e4   : > { %v11901_v27 = vld [vmem:[%s12357_s23 + $0x1ac4] sm:$0xf]  ;;  %v10885_v62 = vld [vmem:[%s12357_s23 + $0x1ad0] sm:$0xf0]  ;;  %6450 = vmatpush.bf16.msra.mxu1 %v10152_v2  ;;  %v10760_v37 = vor.u32 %v11869_v25, %v10757_v63  ;;  %v6231_v25 = vpop.f32.mrf.mxu0 }
 0x1e5   : > { %6463 = vmatpush.bf16.msra.mxu2 %v10280_v6  ;;  %v11933_v28 = vld [vmem:[%s12357_s23 + $0x1bc4] sm:$0xf]  ;;  %v11013_v33 = vld [vmem:[%s12357_s23 + $0x1bd0] sm:$0xf0]  ;;  %v10888_v40 = vor.u32 %v11901_v27, %v10885_v62 }
 0x1e6   : > { %v11833_v41 = vld [vmem:[%s12357_s23 + $0x18a4] sm:$0xf]  ;;  %v10613_v48 = vld [vmem:[%s12357_s23 + $0x18b0] sm:$0xf0]  ;;  %6438 = vmatmul.bf16.vlgmr.msra.gmra.mxu0 %v12857_v9  ;;  %v11016_v51 = vor.u32 %v11933_v28, %v11013_v33  ;;  %v6232_v33 = vadd.f32 %v6231_v25, %v13369_v58 }
 0x1e7   : > { %6476 = vmatpush.bf16.msra.mxu3 %v10408_v15  ;;  %6482 = vmatpush.bf16.msrb.mxu0 %v10648_v19  ;;  %v11865_v49 = vld [vmem:[%s12357_s23 + $0x19a4] sm:$0xf]  ;;  %v10741_v52 = vld [vmem:[%s12357_s23 + $0x19b0] sm:$0xf0]  ;;  %v10616_v4 = vor.u32 %v11833_v41, %v10613_v48 }
 0x1e8   : > { %6495 = vmatpush.bf16.msrb.mxu1 %v10776_v53  ;;  %v11897_v54 = vld [vmem:[%s12357_s23 + $0x1aa4] sm:$0xf]  ;;  %v10869_v55 = vld [vmem:[%s12357_s23 + $0x1ab0] sm:$0xf0]  ;;  %6464 = vmatmul.bf16.vlgmr.msra.gmra.mxu2 %v12862_v13  ;;  %v10744_v60 = vor.u32 %v11865_v49, %v10741_v52 }
 0x1e9   : > { %6508 = vmatpush.bf16.msrb.mxu2 %v10904_v23  ;;  %6451 = vmatmul.bf16.vlgmr.msra.gmra.mxu1 %v12864_v14  ;;  %v11929_v56 = vld [vmem:[%s12357_s23 + $0x1ba4] sm:$0xf]  ;;  %v10997_v57 = vld [vmem:[%s12357_s23 + $0x1bb0] sm:$0xf0]  ;;  %v10872_v8 = vor.u32 %v11897_v54, %v10869_v55 }
 0x1ea   : > { %6477 = vmatmul.bf16.vlgmr.msra.gmra.mxu3 %v12868_v17  ;;  %v11829_v2 = vld [vmem:[%s12357_s23 + $0x1884] sm:$0xf]  ;;  %v10597_v6 = vld [vmem:[%s12357_s23 + $0x1890] sm:$0xf0]  ;;  %v11000_v44 = vor.u32 %v11929_v56, %v10997_v57 }
 0x1eb   : > { %6521 = vmatpush.bf16.msrb.mxu3 %v11032_v61  ;;  %6483 = vmatpush.bf16.msrb.mxu0 %v10632_v35  ;;  %v11861_v12 = vld [vmem:[%s12357_s23 + $0x1984] sm:$0xf]  ;;  %v10725_v15 = vld [vmem:[%s12357_s23 + $0x1990] sm:$0xf0]  ;;  %v10600_v20 = vor.u32 %v11829_v2, %v10597_v6  ;;  %v6244_v35 = vpop.f32.mrf.mxu1 }
 0x1ec   : > { %6496 = vmatpush.bf16.msrb.mxu1 %v10760_v37  ;;  %v11893_v19 = vld [vmem:[%s12357_s23 + $0x1a84] sm:$0xf]  ;;  %v10853_v53 = vld [vmem:[%s12357_s23 + $0x1a90] sm:$0xf0]  ;;  %v10728_v61 = vor.u32 %v11861_v12, %v10725_v15  ;;  %v6245_v52 = vadd.f32 %v6244_v35, %v6232_v33 }
 0x1ed   : > { %6509 = vmatpush.bf16.msrb.mxu2 %v10888_v40  ;;  %v11925_v23 = vld [vmem:[%s12357_s23 + $0x1b84] sm:$0xf]  ;;  %v10981_v59 = vld [vmem:[%s12357_s23 + $0x1b90] sm:$0xf0]  ;;  %v10856_v63 = vor.u32 %v11893_v19, %v10853_v53  ;;  %v6270_v15 = vpop.f32.mrf.mxu3 }
 0x1ee   : > { %v11825_v27 = vld [vmem:[%s12357_s23 + $0x1864] sm:$0xf]  ;;  %v10581_v62 = vld [vmem:[%s12357_s23 + $0x1870] sm:$0xf0]  ;;  %v10984_v37 = vor.u32 %v11925_v23, %v10981_v59 }
 0x1ef   : > { %6522 = vmatpush.bf16.msrb.mxu3 %v11016_v51  ;;  %6484 = vmatpush.bf16.msrb.mxu0 %v10616_v4  ;;  %v11857_v28 = vld [vmem:[%s12357_s23 + $0x1964] sm:$0xf]  ;;  %v10709_v40 = vld [vmem:[%s12357_s23 + $0x1970] sm:$0xf0]  ;;  %v10584_v54 = vor.u32 %v11825_v27, %v10581_v62 }
 0x1f0   : > { %6497 = vmatpush.bf16.msrb.mxu1 %v10744_v60  ;;  %v11889_v41 = vld [vmem:[%s12357_s23 + $0x1a64] sm:$0xf]  ;;  %v10837_v48 = vld [vmem:[%s12357_s23 + $0x1a70] sm:$0xf0]  ;;  %v10712_v58 = vor.u32 %v11857_v28, %v10709_v40  ;;  %v6257_v60 = vpop.f32.mrf.mxu2 }
 0x1f1   : > { %6510 = vmatpush.bf16.msrb.mxu2 %v10872_v8  ;;  %v11921_v49 = vld [vmem:[%s12357_s23 + $0x1b64] sm:$0xf]  ;;  %v10965_v51 = vld [vmem:[%s12357_s23 + $0x1b70] sm:$0xf0]  ;;  %v10840_v55 = vor.u32 %v11889_v41, %v10837_v48 }
 0x1f2   : > { %v11821_v56 = vld [vmem:[%s12357_s23 + $0x1844] sm:$0xf]  ;;  %v10565_v57 = vld [vmem:[%s12357_s23 + $0x1850] sm:$0xf0]  ;;  %v10968_v8 = vor.u32 %v11921_v49, %v10965_v51 }
 0x1f3   : > { %6523 = vmatpush.bf16.msrb.mxu3 %v11000_v44  ;;  %6485 = vmatpush.bf16.msrb.mxu0 %v10600_v20  ;;  %v11853_v4 = vld [vmem:[%s12357_s23 + $0x1944] sm:$0xf]  ;;  %v10693_v2 = vld [vmem:[%s12357_s23 + $0x1950] sm:$0xf0]  ;;  %v6258_v44 = vadd.f32 %v6257_v60, %v6245_v52  ;;  %v10568_v23 = vor.u32 %v11821_v56, %v10565_v57  ;;  %v6233_v20 = vpop.f32.mrf.mxu0  ;;  %v6246_v28 = vpop.f32.mrf.mxu1 }
 0x1f4   : > { %6498 = vmatpush.bf16.msrb.mxu1 %v10728_v61  ;;  %v11885_v6 = vld [vmem:[%s12357_s23 + $0x1a44] sm:$0xf]  ;;  %v10821_v12 = vld [vmem:[%s12357_s23 + $0x1a50] sm:$0xf0]  ;;  %v10696_v25 = vor.u32 %v11853_v4, %v10693_v2  ;;  %v7835_v20 = vld [vmem:[%s12357_s23 + $0x2e8] sm:$0xf] }
 0x1f5   : > { %6511 = vmatpush.bf16.msrb.mxu2 %v10856_v63  ;;  %v11917_v19 = vld [vmem:[%s12357_s23 + $0x1b44] sm:$0xf]  ;;  %v10949_v53 = vld [vmem:[%s12357_s23 + $0x1b50] sm:$0xf0]  ;;  %v13440_v59 = vadd.f32 %v6270_v15, %v6258_v44  ;;  %v10824_v61 = vor.u32 %v11885_v6, %v10821_v12  ;;  %v6272_v12 = vpop.f32.mrf.mxu3  ;;  %v7579_v44 = vld [vmem:[%s12357_s23 + $0xe8] sm:$0xf] }
 0x1f6   : > { %v11817_v63 = vld [vmem:[%s12357_s23 + $0x1824] sm:$0xf]  ;;  %v10549_v27 = vld [vmem:[%s12357_s23 + $0x1830] sm:$0xf0]  ;;  %v10952_v33 = vor.u32 %v11917_v19, %v10949_v53  ;;  %v11076_v15 = vld [vmem:[%s12357_s23 + $0xf4] sm:$0xf0] }
 0x1f7   : > { %6524 = vmatpush.bf16.msrb.mxu3 %v10984_v37  ;;  %6486 = vmatpush.bf16.msrb.mxu0 %v10584_v54  ;;  %v11849_v62 = vld [vmem:[%s12357_s23 + $0x1924] sm:$0xf]  ;;  %v10677_v35 = vld [vmem:[%s12357_s23 + $0x1930] sm:$0xf0]  ;;  %v10552_v49 = vor.u32 %v11817_v63, %v10549_v27  ;;  %v7707_v19 = vld [vmem:[%s12357_s23 + $0x1e8] sm:$0xf] }
 0x1f8   : > { %6499 = vmatpush.bf16.msrb.mxu1 %v10712_v58  ;;  %v11881_v37 = vld [vmem:[%s12357_s23 + $0x1a24] sm:$0xf]  ;;  %v10805_v40 = vld [vmem:[%s12357_s23 + $0x1a30] sm:$0xf0]  ;;  %v10680_v54 = vor.u32 %v11849_v62, %v10677_v35  ;;  %v6259_v4 = vpop.f32.mrf.mxu2  ;;  %v7963_v27 = vld [vmem:[%s12357_s23 + $0x3e8] sm:$0xf] }
 0x1f9   : > { %6512 = vmatpush.bf16.msrb.mxu2 %v10840_v55  ;;  %v11913_v41 = vld [vmem:[%s12357_s23 + $0x1b24] sm:$0xf]  ;;  %v10933_v48 = vld [vmem:[%s12357_s23 + $0x1b30] sm:$0xf0]  ;;  %v10808_v58 = vor.u32 %v11881_v37, %v10805_v40  ;;  %v11172_v62 = vld [vmem:[%s12357_s23 + $0x3f4] sm:$0xf0] }
 0x1fa   : > { %v11813_v51 = vld [vmem:[%s12357_s23 + $0x1804] sm:$0xf]  ;;  %v10533_v52 = vld [vmem:[%s12357_s23 + $0x1810] sm:$0xf0]  ;;  %v10936_v60 = vor.u32 %v11913_v41, %v10933_v48  ;;  %v7563_v40 = vld [vmem:[%s12357_s23 + $0xc8] sm:$0xf] }
 0x1fb   : > { %6525 = vmatpush.bf16.msrb.mxu3 %v10968_v8  ;;  %6487 = vmatpush.bf16.msrb.mxu0 %v10568_v23  ;;  %v11845_v55 = vld [vmem:[%s12357_s23 + $0x1904] sm:$0xf]  ;;  %v10661_v56 = vld [vmem:[%s12357_s23 + $0x1910] sm:$0xf0]  ;;  %v10536_v53 = vor.u32 %v11813_v51, %v10533_v52  ;;  %v11108_v23 = vld [vmem:[%s12357_s23 + $0x1f4] sm:$0xf0] }
 0x1fc   : > { %6500 = vmatpush.bf16.msrb.mxu1 %v10696_v25  ;;  %v11877_v57 = vld [vmem:[%s12357_s23 + $0x1a04] sm:$0xf]  ;;  %v10789_v8 = vld [vmem:[%s12357_s23 + $0x1a10] sm:$0xf0]  ;;  %v11140_v25 = vld [vmem:[%s12357_s23 + $0x2f4] sm:$0xf0]  ;;  %v7708_v35 = vor.u32 %v11108_v23, %v7707_v19 }
 0x1fd   : > { %6513 = vmatpush.bf16.msrb.mxu2 %v10824_v61  ;;  %v11909_v2 = vld [vmem:[%s12357_s23 + $0x1b04] sm:$0xf]  ;;  %v10917_v6 = vld [vmem:[%s12357_s23 + $0x1b10] sm:$0xf0]  ;;  %v10664_v61 = vor.u32 %v11845_v55, %v10661_v56  ;;  %v10792_v63 = vor.u32 %v11877_v57, %v10789_v8  ;;  %v7836_v37 = vor.u32 %v11140_v25, %v7835_v20  ;;  %v11072_v41 = vld [vmem:[%s12357_s23 + $0xd4] sm:$0xf0] }
 0x1fe   : > { %v10920_v28 = vor.u32 %v11909_v2, %v10917_v6  ;;  %v7691_v48 = vld [vmem:[%s12357_s23 + $0x1c8] sm:$0xf]  ;;  %v11104_v51 = vld [vmem:[%s12357_s23 + $0x1d4] sm:$0xf0]  ;;  %v7564_v56 = vor.u32 %v11072_v41, %v7563_v40 }
 0x1ff   : > { %6526 = vmatpush.bf16.msrb.mxu3 %v10952_v33  ;;  %6488 = vmatpush.bf16.msrb.mxu0 %v10552_v49  ;;  %v7580_v33 = vor.u32 %v11076_v15, %v7579_v44  ;;  %v7964_v49 = vor.u32 %v11172_v62, %v7963_v27  ;;  %v7819_v52 = vld [vmem:[%s12357_s23 + $0x2c8] sm:$0xf]  ;;  %v11168_v55 = vld [vmem:[%s12357_s23 + $0x3d4] sm:$0xf0]  ;;  %v7692_v57 = vor.u32 %v11104_v51, %v7691_v48 }
 0x200   : > { %6501 = vmatpush.bf16.msrb.mxu1 %v10680_v54  ;;  %v11136_v54 = vld [vmem:[%s12357_s23 + $0x2d4] sm:$0xf0]  ;;  %v7675_v2 = vld [vmem:[%s12357_s23 + $0x1a8] sm:$0xf] }
 0x201   : > { %6514 = vmatpush.bf16.msrb.mxu2 %v10808_v58  ;;  %v7947_v58 = vld [vmem:[%s12357_s23 + $0x3c8] sm:$0xf]  ;;  %v7820_v4 = vor.u32 %v11136_v54, %v7819_v52  ;;  %v11068_v8 = vld [vmem:[%s12357_s23 + $0xb4] sm:$0xf0] }
 0x202   : > { %v7948_v6 = vor.u32 %v11168_v55, %v7947_v58  ;;  %v11100_v12 = vld [vmem:[%s12357_s23 + $0x1b4] sm:$0xf0]  ;;  %v7803_v44 = vld [vmem:[%s12357_s23 + $0x2a8] sm:$0xf] }
 0x203   : > { %6527 = vmatpush.bf16.msrb.mxu3 %v10936_v60  ;;  %6489 = vmatpush.bf16.msrb.mxu0 %v10536_v53  ;;  %v7547_v60 = vld [vmem:[%s12357_s23 + $0xa8] sm:$0xf]  ;;  %v11132_v15 = vld [vmem:[%s12357_s23 + $0x2b4] sm:$0xf0]  ;;  %v7676_v20 = vor.u32 %v11100_v12, %v7675_v2 }
 0x204   : > { %6502 = vmatpush.bf16.msrb.mxu1 %v10664_v61  ;;  %v7931_v19 = vld [vmem:[%s12357_s23 + $0x3a8] sm:$0xf]  ;;  %v11164_v53 = vld [vmem:[%s12357_s23 + $0x3b4] sm:$0xf0]  ;;  %v7548_v23 = vor.u32 %v11068_v8, %v7547_v60  ;;  %v7804_v25 = vor.u32 %v11132_v15, %v7803_v44 }
 0x205   : > { %6515 = vmatpush.bf16.msrb.mxu2 %v10792_v63  ;;  %v7531_v61 = vld [vmem:[%s12357_s23 + $0x88] sm:$0xf]  ;;  %v11064_v63 = vld [vmem:[%s12357_s23 + $0x94] sm:$0xf0]  ;;  %v7932_v62 = vor.u32 %v11164_v53, %v7931_v19 }
 0x206   : > { %6490 = vmatmul.bf16.vlgmr.msrb.gmra.mxu0 %v12938_v3  ;;  %v7659_v27 = vld [vmem:[%s12357_s23 + $0x188] sm:$0xf]  ;;  %v11160_v41 = vld [vmem:[%s12357_s23 + $0x394] sm:$0xf0]  ;;  %v6296_v51 = vpop.f32.mrf.mxu1 }
 0x207   : > { %6528 = vmatpush.bf16.msrb.mxu3 %v10920_v28  ;;  %6534 = vmatpush.bf16.msra.mxu0 %v7580_v33  ;;  %v11096_v28 = vld [vmem:[%s12357_s23 + $0x194] sm:$0xf0]  ;;  %v7787_v33 = vld [vmem:[%s12357_s23 + $0x288] sm:$0xf] }
 0x208   : > { %6547 = vmatpush.bf16.msra.mxu1 %v7708_v35  ;;  %6516 = vmatmul.bf16.vlgmr.msrb.gmra.mxu2 %v12943_v10  ;;  %v11128_v35 = vld [vmem:[%s12357_s23 + $0x294] sm:$0xf0]  ;;  %v7915_v40 = vld [vmem:[%s12357_s23 + $0x388] sm:$0xf]  ;;  %v7660_v52 = vor.u32 %v11096_v28, %v7659_v27 }
 0x209   : > { %6560 = vmatpush.bf16.msra.mxu2 %v7836_v37  ;;  %6503 = vmatmul.bf16.vlgmr.msrb.gmra.mxu1 %v12945_v11  ;;  %v6283_v37 = vpop.f32.mrf.mxu0  ;;  %v7788_v54 = vor.u32 %v11128_v35, %v7787_v33  ;;  %v7515_v58 = vld [vmem:[%s12357_s23 + $0x68] sm:$0xf]  ;;  %v11060_v55 = vld [vmem:[%s12357_s23 + $0x74] sm:$0xf0] }
 0x20a   : > { %6529 = vmatmul.bf16.vlgmr.msrb.gmra.mxu3 %v12949_v16  ;;  %v6284_v48 = vadd.f32 %v6283_v37, %v13440_v59  ;;  %v11092_v60 = vld [vmem:[%s12357_s23 + $0x174] sm:$0xf0]  ;;  %v7771_v8 = vld [vmem:[%s12357_s23 + $0x268] sm:$0xf]  ;;  %v7516_v12 = vor.u32 %v11060_v55, %v7515_v58 }
 0x20b   : > { %6573 = vmatpush.bf16.msra.mxu3 %v7964_v49  ;;  %6535 = vmatpush.bf16.msra.mxu0 %v7564_v56  ;;  %v7532_v49 = vor.u32 %v11064_v63, %v7531_v61  ;;  %v7643_v56 = vld [vmem:[%s12357_s23 + $0x168] sm:$0xf]  ;;  %v11124_v59 = vld [vmem:[%s12357_s23 + $0x274] sm:$0xf0] }
 0x20c   : > { %6548 = vmatpush.bf16.msra.mxu1 %v7692_v57  ;;  %v7916_v57 = vor.u32 %v11160_v41, %v7915_v40  ;;  %v7899_v2 = vld [vmem:[%s12357_s23 + $0x368] sm:$0xf]  ;;  %v7644_v44 = vor.u32 %v11092_v60, %v7643_v56  ;;  %v7772_v15 = vor.u32 %v11124_v59, %v7771_v8  ;;  %v11056_v53 = vld [vmem:[%s12357_s23 + $0x54] sm:$0xf0] }
 0x20d   : > { %6561 = vmatpush.bf16.msra.mxu2 %v7820_v4  ;;  %v6297_v4 = vadd.f32 %v6296_v51, %v6284_v48  ;;  %v7499_v19 = vld [vmem:[%s12357_s23 + $0x48] sm:$0xf]  ;;  %v11088_v61 = vld [vmem:[%s12357_s23 + $0x154] sm:$0xf0]  ;;  %v6322_v28 = vpop.f32.mrf.mxu3 }
 0x20e   : > { %v7755_v63 = vld [vmem:[%s12357_s23 + $0x248] sm:$0xf]  ;;  %v11120_v27 = vld [vmem:[%s12357_s23 + $0x254] sm:$0xf0]  ;;  %v7500_v40 = vor.u32 %v11056_v53, %v7499_v19  ;;  %v6298_v41 = vpop.f32.mrf.mxu1 }
 0x20f   : > { %6574 = vmatpush.bf16.msra.mxu3 %v7948_v6  ;;  %6536 = vmatpush.bf16.msra.mxu0 %v7548_v23  ;;  %v11156_v6 = vld [vmem:[%s12357_s23 + $0x374] sm:$0xf0]  ;;  %v7627_v23 = vld [vmem:[%s12357_s23 + $0x148] sm:$0xf]  ;;  %v7756_v51 = vor.u32 %v11120_v27, %v7755_v63 }
 0x210   : > { %6549 = vmatpush.bf16.msra.mxu1 %v7676_v20  ;;  %v7900_v20 = vor.u32 %v11156_v6, %v7899_v2  ;;  %v7883_v33 = vld [vmem:[%s12357_s23 + $0x348] sm:$0xf]  ;;  %v11152_v35 = vld [vmem:[%s12357_s23 + $0x354] sm:$0xf0] }
 0x211   : > { %6562 = vmatpush.bf16.msra.mxu2 %v7804_v25  ;;  %v6309_v25 = vpop.f32.mrf.mxu2  ;;  %v6285_v37 = vpop.f32.mrf.mxu0  ;;  %v7611_v58 = vld [vmem:[%s12357_s23 + $0x128] sm:$0xf]  ;;  %v7884_v55 = vor.u32 %v11152_v35, %v7883_v33  ;;  %v11084_v56 = vld [vmem:[%s12357_s23 + $0x134] sm:$0xf0] }
 0x212   : > { %v7867_v60 = vld [vmem:[%s12357_s23 + $0x328] sm:$0xf]  ;;  %v11148_v8 = vld [vmem:[%s12357_s23 + $0x334] sm:$0xf0] }
 0x213   : > { %6575 = vmatpush.bf16.msra.mxu3 %v7932_v62  ;;  %6537 = vmatpush.bf16.msra.mxu0 %v7532_v49  ;;  %v6310_v62 = vadd.f32 %v6309_v25, %v6297_v4  ;;  %v7628_v49 = vor.u32 %v11088_v61, %v7627_v23  ;;  %v11116_v4 = vld [vmem:[%s12357_s23 + $0x234] sm:$0xf0]  ;;  %v7467_v2 = vld [vmem:[%s12357_s23 + $0x8] sm:$0xf]  ;;  %v7868_v23 = vor.u32 %v11148_v8, %v7867_v60 }
 0x214   : > { %6550 = vmatpush.bf16.msra.mxu1 %v7660_v52  ;;  %v7483_v52 = vld [vmem:[%s12357_s23 + $0x28] sm:$0xf]  ;;  %v11048_v6 = vld [vmem:[%s12357_s23 + $0x14] sm:$0xf0] }
 0x215   : > { %6563 = vmatpush.bf16.msra.mxu2 %v7788_v54  ;;  %v13511_v48 = vadd.f32 %v6322_v28, %v6310_v62  ;;  %v11052_v54 = vld [vmem:[%s12357_s23 + $0x34] sm:$0xf0]  ;;  %v7723_v53 = vld [vmem:[%s12357_s23 + $0x208] sm:$0xf]  ;;  %v6324_v33 = vpop.f32.mrf.mxu3  ;;  %v7468_v35 = vor.u32 %v11048_v6, %v7467_v2 }
 0x216   : > { %v7484_v59 = vor.u32 %v11052_v54, %v7483_v52  ;;  %v11080_v19 = vld [vmem:[%s12357_s23 + $0x114] sm:$0xf0]  ;;  %v7851_v25 = vld [vmem:[%s12357_s23 + $0x308] sm:$0xf] }
 0x217   : > { %6576 = vmatpush.bf16.msra.mxu3 %v7916_v57  ;;  %6538 = vmatpush.bf16.msra.mxu0 %v7516_v12  ;;  %v7739_v57 = vld [vmem:[%s12357_s23 + $0x228] sm:$0xf]  ;;  %v7612_v12 = vor.u32 %v11084_v56, %v7611_v58  ;;  %v11144_v61 = vld [vmem:[%s12357_s23 + $0x314] sm:$0xf0] }
 0x218   : > { %6551 = vmatpush.bf16.msra.mxu1 %v7644_v44  ;;  %v7740_v44 = vor.u32 %v11116_v4, %v7739_v57  ;;  %v8091_v27 = vld [vmem:[%s12357_s23 + $0x4e8] sm:$0xf]  ;;  %v11204_v62 = vld [vmem:[%s12357_s23 + $0x4f4] sm:$0xf0]  ;;  %v7852_v58 = vor.u32 %v11144_v61, %v7851_v25 }
 0x219   : > { %6564 = vmatpush.bf16.msra.mxu2 %v7772_v15  ;;  %v7595_v15 = vld [vmem:[%s12357_s23 + $0x108] sm:$0xf]  ;;  %v6311_v63 = vpop.f32.mrf.mxu2  ;;  %v11236_v37 = vld [vmem:[%s12357_s23 + $0x5f4] sm:$0xf0] }
 0x21a   : > { %v8219_v28 = vld [vmem:[%s12357_s23 + $0x5e8] sm:$0xf]  ;;  %v11268_v41 = vld [vmem:[%s12357_s23 + $0x6f4] sm:$0xf0] }
 0x21b   : > { %6577 = vmatpush.bf16.msra.mxu3 %v7900_v20  ;;  %6539 = vmatpush.bf16.msra.mxu0 %v7500_v40  ;;  %v11112_v20 = vld [vmem:[%s12357_s23 + $0x214] sm:$0xf0]  ;;  %v8347_v40 = vld [vmem:[%s12357_s23 + $0x6e8] sm:$0xf]  ;;  %v8220_v56 = vor.u32 %v11236_v37, %v8219_v28 }
 0x21c   : > { %6552 = vmatpush.bf16.msra.mxu1 %v7628_v49  ;;  %v7596_v49 = vor.u32 %v11080_v19, %v7595_v15  ;;  %v8475_v52 = vld [vmem:[%s12357_s23 + $0x7e8] sm:$0xf]  ;;  %v11300_v54 = vld [vmem:[%s12357_s23 + $0x7f4] sm:$0xf0]  ;;  %v8348_v57 = vor.u32 %v11268_v41, %v8347_v40 }
 0x21d   : > { %6565 = vmatpush.bf16.msra.mxu2 %v7756_v51  ;;  %v7724_v51 = vor.u32 %v11112_v20, %v7723_v53  ;;  %v8075_v4 = vld [vmem:[%s12357_s23 + $0x4c8] sm:$0xf]  ;;  %v11200_v60 = vld [vmem:[%s12357_s23 + $0x4d4] sm:$0xf0] }
 0x21e   : > { %v8203_v8 = vld [vmem:[%s12357_s23 + $0x5c8] sm:$0xf]  ;;  %v11232_v2 = vld [vmem:[%s12357_s23 + $0x5d4] sm:$0xf0]  ;;  %v8076_v19 = vor.u32 %v11200_v60, %v8075_v4 }
 0x21f   : > { %6578 = vmatpush.bf16.msra.mxu3 %v7884_v55  ;;  %6540 = vmatpush.bf16.msra.mxu0 %v7484_v59  ;;  %v8092_v55 = vor.u32 %v11204_v62, %v8091_v27  ;;  %v8476_v59 = vor.u32 %v11300_v54, %v8475_v52  ;;  %v8331_v6 = vld [vmem:[%s12357_s23 + $0x6c8] sm:$0xf]  ;;  %v11296_v15 = vld [vmem:[%s12357_s23 + $0x7d4] sm:$0xf0]  ;;  %v8204_v53 = vor.u32 %v11232_v2, %v8203_v8 }
 0x220   : > { %6553 = vmatpush.bf16.msra.mxu1 %v7612_v12  ;;  %v11264_v12 = vld [vmem:[%s12357_s23 + $0x6d4] sm:$0xf0]  ;;  %v8059_v20 = vld [vmem:[%s12357_s23 + $0x4a8] sm:$0xf] }
 0x221   : > { %6566 = vmatpush.bf16.msra.mxu2 %v7740_v44  ;;  %v8459_v44 = vld [vmem:[%s12357_s23 + $0x7c8] sm:$0xf]  ;;  %v11196_v25 = vld [vmem:[%s12357_s23 + $0x4b4] sm:$0xf0] }
 0x222   : > { %v8187_v61 = vld [vmem:[%s12357_s23 + $0x5a8] sm:$0xf]  ;;  %v8460_v63 = vor.u32 %v11296_v15, %v8459_v44  ;;  %v11228_v27 = vld [vmem:[%s12357_s23 + $0x5b4] sm:$0xf0]  ;;  %v8060_v37 = vor.u32 %v11196_v25, %v8059_v20 }
 0x223   : > { %6579 = vmatpush.bf16.msra.mxu3 %v7868_v23  ;;  %6541 = vmatpush.bf16.msra.mxu0 %v7468_v35  ;;  %v8332_v23 = vor.u32 %v11264_v12, %v8331_v6  ;;  %v8315_v62 = vld [vmem:[%s12357_s23 + $0x6a8] sm:$0xf]  ;;  %v11260_v28 = vld [vmem:[%s12357_s23 + $0x6b4] sm:$0xf0]  ;;  %v8188_v40 = vor.u32 %v11228_v27, %v8187_v61 }
 0x224   : > { %6554 = vmatpush.bf16.msra.mxu1 %v7596_v49  ;;  %v8443_v33 = vld [vmem:[%s12357_s23 + $0x7a8] sm:$0xf]  ;;  %v11292_v35 = vld [vmem:[%s12357_s23 + $0x7b4] sm:$0xf0]  ;;  %v8316_v41 = vor.u32 %v11260_v28, %v8315_v62 }
 0x225   : > { %6567 = vmatpush.bf16.msra.mxu2 %v7724_v51  ;;  %v8043_v49 = vld [vmem:[%s12357_s23 + $0x488] sm:$0xf]  ;;  %v11192_v51 = vld [vmem:[%s12357_s23 + $0x494] sm:$0xf0]  ;;  %v8444_v54 = vor.u32 %v11292_v35, %v8443_v33 }
 0x226   : > { %6542 = vmatmul.bf16.vlgmr.msra.gmra.mxu0 %v12491_v21  ;;  %v8171_v52 = vld [vmem:[%s12357_s23 + $0x588] sm:$0xf]  ;;  %v11288_v60 = vld [vmem:[%s12357_s23 + $0x794] sm:$0xf0]  ;;  %v6348_v2 = vpop.f32.mrf.mxu1 }
 0x227   : > { %6580 = vmatpush.bf16.msra.mxu3 %v7852_v58  ;;  %6586 = vmatpush.bf16.msrb.mxu0 %v8092_v55  ;;  %v11224_v58 = vld [vmem:[%s12357_s23 + $0x594] sm:$0xf0]  ;;  %v8299_v55 = vld [vmem:[%s12357_s23 + $0x688] sm:$0xf] }
 0x228   : > { %6599 = vmatpush.bf16.msrb.mxu1 %v8220_v56  ;;  %6568 = vmatmul.bf16.vlgmr.msra.gmra.mxu2 %v12477_v5  ;;  %v11256_v56 = vld [vmem:[%s12357_s23 + $0x694] sm:$0xf0]  ;;  %v8427_v4 = vld [vmem:[%s12357_s23 + $0x788] sm:$0xf]  ;;  %v8172_v6 = vor.u32 %v11224_v58, %v8171_v52 }
 0x229   : > { %6612 = vmatpush.bf16.msrb.mxu2 %v8348_v57  ;;  %6555 = vmatmul.bf16.vlgmr.msra.gmra.mxu1 %v12494_v22  ;;  %v6335_v57 = vpop.f32.mrf.mxu0  ;;  %v8300_v12 = vor.u32 %v11256_v56, %v8299_v55  ;;  %v8027_v44 = vld [vmem:[%s12357_s23 + $0x468] sm:$0xf]  ;;  %v11188_v15 = vld [vmem:[%s12357_s23 + $0x474] sm:$0xf0] }
 0x22a   : > { %6581 = vmatmul.bf16.vlgmr.msra.gmra.mxu3 %v12480_v7  ;;  %v6336_v8 = vadd.f32 %v6335_v57, %v13511_v48  ;;  %v11220_v20 = vld [vmem:[%s12357_s23 + $0x574] sm:$0xf0]  ;;  %v8283_v25 = vld [vmem:[%s12357_s23 + $0x668] sm:$0xf]  ;;  %v8028_v27 = vor.u32 %v11188_v15, %v8027_v44 }
 0x22b   : > { %6625 = vmatpush.bf16.msrb.mxu3 %v8476_v59  ;;  %6587 = vmatpush.bf16.msrb.mxu0 %v8076_v19  ;;  %v8044_v59 = vor.u32 %v11192_v51, %v8043_v49  ;;  %v8155_v19 = vld [vmem:[%s12357_s23 + $0x568] sm:$0xf]  ;;  %v11252_v48 = vld [vmem:[%s12357_s23 + $0x674] sm:$0xf0] }
 0x22c   : > { %6600 = vmatpush.bf16.msrb.mxu1 %v8204_v53  ;;  %v8428_v53 = vor.u32 %v11288_v60, %v8427_v4  ;;  %v8411_v61 = vld [vmem:[%s12357_s23 + $0x768] sm:$0xf]  ;;  %v8156_v62 = vor.u32 %v11220_v20, %v8155_v19  ;;  %v8284_v28 = vor.u32 %v11252_v48, %v8283_v25  ;;  %v11184_v35 = vld [vmem:[%s12357_s23 + $0x454] sm:$0xf0] }
 0x22d   : > { %6613 = vmatpush.bf16.msrb.mxu2 %v8332_v23  ;;  %v6349_v23 = vadd.f32 %v6348_v2, %v6336_v8  ;;  %v8011_v33 = vld [vmem:[%s12357_s23 + $0x448] sm:$0xf]  ;;  %v11216_v49 = vld [vmem:[%s12357_s23 + $0x554] sm:$0xf0]  ;;  %v6374_v58 = vpop.f32.mrf.mxu3 }
 0x22e   : > { %v8267_v51 = vld [vmem:[%s12357_s23 + $0x648] sm:$0xf]  ;;  %v11248_v52 = vld [vmem:[%s12357_s23 + $0x654] sm:$0xf0]  ;;  %v8012_v4 = vor.u32 %v11184_v35, %v8011_v33  ;;  %v6350_v60 = vpop.f32.mrf.mxu1 }
 0x22f   : > { %6626 = vmatpush.bf16.msrb.mxu3 %v8460_v63  ;;  %6588 = vmatpush.bf16.msrb.mxu0 %v8060_v37  ;;  %v11284_v63 = vld [vmem:[%s12357_s23 + $0x774] sm:$0xf0]  ;;  %v8139_v37 = vld [vmem:[%s12357_s23 + $0x548] sm:$0xf]  ;;  %v8268_v2 = vor.u32 %v11248_v52, %v8267_v51 }
 0x230   : > { %6601 = vmatpush.bf16.msrb.mxu1 %v8188_v40  ;;  %v8412_v40 = vor.u32 %v11284_v63, %v8411_v61  ;;  %v8395_v55 = vld [vmem:[%s12357_s23 + $0x748] sm:$0xf]  ;;  %v11280_v56 = vld [vmem:[%s12357_s23 + $0x754] sm:$0xf0] }
 0x231   : > { %6614 = vmatpush.bf16.msrb.mxu2 %v8316_v41  ;;  %v6361_v41 = vpop.f32.mrf.mxu2  ;;  %v6337_v57 = vpop.f32.mrf.mxu0  ;;  %v8123_v44 = vld [vmem:[%s12357_s23 + $0x528] sm:$0xf]  ;;  %v8396_v15 = vor.u32 %v11280_v56, %v8395_v55  ;;  %v11212_v19 = vld [vmem:[%s12357_s23 + $0x534] sm:$0xf0] }
 0x232   : > { %v8379_v20 = vld [vmem:[%s12357_s23 + $0x728] sm:$0xf]  ;;  %v11276_v25 = vld [vmem:[%s12357_s23 + $0x734] sm:$0xf0] }
 0x233   : > { %6627 = vmatpush.bf16.msrb.mxu3 %v8444_v54  ;;  %6589 = vmatpush.bf16.msrb.mxu0 %v8044_v59  ;;  %v6362_v54 = vadd.f32 %v6361_v41, %v6349_v23  ;;  %v8140_v59 = vor.u32 %v11216_v49, %v8139_v37  ;;  %v11244_v23 = vld [vmem:[%s12357_s23 + $0x634] sm:$0xf0]  ;;  %v7979_v61 = vld [vmem:[%s12357_s23 + $0x408] sm:$0xf]  ;;  %v8380_v37 = vor.u32 %v11276_v25, %v8379_v20 }
 0x234   : > { %6602 = vmatpush.bf16.msrb.mxu1 %v8172_v6  ;;  %v7995_v6 = vld [vmem:[%s12357_s23 + $0x428] sm:$0xf]  ;;  %v11176_v63 = vld [vmem:[%s12357_s23 + $0x414] sm:$0xf0] }
 0x235   : > { %6615 = vmatpush.bf16.msrb.mxu2 %v8300_v12  ;;  %v13582_v8 = vadd.f32 %v6374_v58, %v6362_v54  ;;  %v11180_v12 = vld [vmem:[%s12357_s23 + $0x434] sm:$0xf0]  ;;  %v8235_v35 = vld [vmem:[%s12357_s23 + $0x608] sm:$0xf]  ;;  %v6376_v55 = vpop.f32.mrf.mxu3  ;;  %v7980_v56 = vor.u32 %v11176_v63, %v7979_v61 }
 0x236   : > { %v7996_v48 = vor.u32 %v11180_v12, %v7995_v6  ;;  %v11208_v33 = vld [vmem:[%s12357_s23 + $0x514] sm:$0xf0]  ;;  %v8363_v41 = vld [vmem:[%s12357_s23 + $0x708] sm:$0xf] }
 0x237   : > { %6628 = vmatpush.bf16.msrb.mxu3 %v8428_v53  ;;  %6590 = vmatpush.bf16.msrb.mxu0 %v8028_v27  ;;  %v8251_v53 = vld [vmem:[%s12357_s23 + $0x628] sm:$0xf]  ;;  %v8124_v27 = vor.u32 %v11212_v19, %v8123_v44  ;;  %v11272_v49 = vld [vmem:[%s12357_s23 + $0x714] sm:$0xf0] }
 0x238   : > { %6603 = vmatpush.bf16.msrb.mxu1 %v8156_v62  ;;  %v8252_v62 = vor.u32 %v11244_v23, %v8251_v53  ;;  %v8603_v52 = vld [vmem:[%s12357_s23 + $0x8e8] sm:$0xf]  ;;  %v11332_v54 = vld [vmem:[%s12357_s23 + $0x8f4] sm:$0xf0]  ;;  %v8364_v44 = vor.u32 %v11272_v49, %v8363_v41 }
 0x239   : > { %6616 = vmatpush.bf16.msrb.mxu2 %v8284_v28  ;;  %v8107_v28 = vld [vmem:[%s12357_s23 + $0x508] sm:$0xf]  ;;  %v6363_v51 = vpop.f32.mrf.mxu2  ;;  %v11364_v57 = vld [vmem:[%s12357_s23 + $0x9f4] sm:$0xf0] }
 0x23a   : > { %v8731_v58 = vld [vmem:[%s12357_s23 + $0x9e8] sm:$0xf]  ;;  %v11396_v60 = vld [vmem:[%s12357_s23 + $0xaf4] sm:$0xf0] }
 0x23b   : > { %6629 = vmatpush.bf16.msrb.mxu3 %v8412_v40  ;;  %6591 = vmatpush.bf16.msrb.mxu0 %v8012_v4  ;;  %v11240_v40 = vld [vmem:[%s12357_s23 + $0x614] sm:$0xf0]  ;;  %v8859_v4 = vld [vmem:[%s12357_s23 + $0xae8] sm:$0xf]  ;;  %v8732_v19 = vor.u32 %v11364_v57, %v8731_v58 }
 0x23c   : > { %6604 = vmatpush.bf16.msrb.mxu1 %v8140_v59  ;;  %v8108_v59 = vor.u32 %v11208_v33, %v8107_v28  ;;  %v8987_v6 = vld [vmem:[%s12357_s23 + $0xbe8] sm:$0xf]  ;;  %v11428_v12 = vld [vmem:[%s12357_s23 + $0xbf4] sm:$0xf0]  ;;  %v8860_v53 = vor.u32 %v11396_v60, %v8859_v4 }
 0x23d   : > { %6617 = vmatpush.bf16.msrb.mxu2 %v8268_v2  ;;  %v8236_v2 = vor.u32 %v11240_v40, %v8235_v35  ;;  %v8587_v23 = vld [vmem:[%s12357_s23 + $0x8c8] sm:$0xf]  ;;  %v11328_v20 = vld [vmem:[%s12357_s23 + $0x8d4] sm:$0xf0] }
 0x23e   : > { %v8715_v25 = vld [vmem:[%s12357_s23 + $0x9c8] sm:$0xf]  ;;  %v11360_v61 = vld [vmem:[%s12357_s23 + $0x9d4] sm:$0xf0]  ;;  %v8588_v33 = vor.u32 %v11328_v20, %v8587_v23 }
 0x23f   : > { %6630 = vmatpush.bf16.msrb.mxu3 %v8396_v15  ;;  %6592 = vmatpush.bf16.msrb.mxu0 %v7996_v48  ;;  %v8604_v15 = vor.u32 %v11332_v54, %v8603_v52  ;;  %v8988_v48 = vor.u32 %v11428_v12, %v8987_v6  ;;  %v8843_v63 = vld [vmem:[%s12357_s23 + $0xac8] sm:$0xf]  ;;  %v11424_v28 = vld [vmem:[%s12357_s23 + $0xbd4] sm:$0xf0]  ;;  %v8716_v35 = vor.u32 %v11360_v61, %v8715_v25 }
 0x240   : > { %6605 = vmatpush.bf16.msrb.mxu1 %v8124_v27  ;;  %v11392_v27 = vld [vmem:[%s12357_s23 + $0xad4] sm:$0xf0]  ;;  %v8571_v40 = vld [vmem:[%s12357_s23 + $0x8a8] sm:$0xf] }
 0x241   : > { %6618 = vmatpush.bf16.msrb.mxu2 %v8252_v62  ;;  %v8971_v62 = vld [vmem:[%s12357_s23 + $0xbc8] sm:$0xf]  ;;  %v11324_v41 = vld [vmem:[%s12357_s23 + $0x8b4] sm:$0xf0] }
 0x242   : > { %v8699_v49 = vld [vmem:[%s12357_s23 + $0x9a8] sm:$0xf]  ;;  %v8972_v51 = vor.u32 %v11424_v28, %v8971_v62  ;;  %v11356_v52 = vld [vmem:[%s12357_s23 + $0x9b4] sm:$0xf0]  ;;  %v8572_v57 = vor.u32 %v11324_v41, %v8571_v40 }
 0x243   : > { %6631 = vmatpush.bf16.msrb.mxu3 %v8380_v37  ;;  %6593 = vmatpush.bf16.msrb.mxu0 %v7980_v56  ;;  %v8844_v37 = vor.u32 %v11392_v27, %v8843_v63  ;;  %v8827_v54 = vld [vmem:[%s12357_s23 + $0xaa8] sm:$0xf]  ;;  %v11388_v58 = vld [vmem:[%s12357_s23 + $0xab4] sm:$0xf0]  ;;  %v8700_v4 = vor.u32 %v11356_v52, %v8699_v49 }
 0x244   : > { %6606 = vmatpush.bf16.msrb.mxu1 %v8108_v59  ;;  %v8955_v55 = vld [vmem:[%s12357_s23 + $0xba8] sm:$0xf]  ;;  %v11420_v56 = vld [vmem:[%s12357_s23 + $0xbb4] sm:$0xf0]  ;;  %v8828_v60 = vor.u32 %v11388_v58, %v8827_v54 }
 0x245   : > { %6619 = vmatpush.bf16.msrb.mxu2 %v8236_v2  ;;  %v8555_v59 = vld [vmem:[%s12357_s23 + $0x888] sm:$0xf]  ;;  %v11320_v2 = vld [vmem:[%s12357_s23 + $0x894] sm:$0xf0]  ;;  %v8956_v12 = vor.u32 %v11420_v56, %v8955_v55 }
 0x246   : > { %6594 = vmatmul.bf16.vlgmr.msrb.gmra.mxu0 %v12550_v42  ;;  %v8683_v6 = vld [vmem:[%s12357_s23 + $0x988] sm:$0xf]  ;;  %v11416_v20 = vld [vmem:[%s12357_s23 + $0xb94] sm:$0xf0]  ;;  %v8556_v25 = vor.u32 %v11320_v2, %v8555_v59 }
 0x247   : > { %6632 = vmatpush.bf16.msrb.mxu3 %v8364_v44  ;;  %6638 = vmatpush.bf16.msra.mxu0 %v8604_v15  ;;  %v11352_v44 = vld [vmem:[%s12357_s23 + $0x994] sm:$0xf0]  ;;  %v8811_v15 = vld [vmem:[%s12357_s23 + $0xa88] sm:$0xf] }
 0x248   : > { %6651 = vmatpush.bf16.msra.mxu1 %v8732_v19  ;;  %6620 = vmatmul.bf16.vlgmr.msrb.gmra.mxu2 %v12546_v39  ;;  %v11384_v19 = vld [vmem:[%s12357_s23 + $0xa94] sm:$0xf0]  ;;  %v8939_v23 = vld [vmem:[%s12357_s23 + $0xb88] sm:$0xf]  ;;  %v8684_v61 = vor.u32 %v11352_v44, %v8683_v6 }
 0x249   : > { %6664 = vmatpush.bf16.msra.mxu2 %v8860_v53  ;;  %6607 = vmatmul.bf16.vlgmr.msrb.gmra.mxu1 %v12554_v45  ;;  %v13634_v53 = vpop.f32.mrf.mxu0  ;;  %v8812_v63 = vor.u32 %v11384_v19, %v8811_v15  ;;  %v8539_v27 = vld [vmem:[%s12357_s23 + $0x868] sm:$0xf]  ;;  %v11316_v62 = vld [vmem:[%s12357_s23 + $0x874] sm:$0xf0] }
 0x24a   : > { %6633 = vmatmul.bf16.vlgmr.msrb.gmra.mxu3 %v12552_v43  ;;  %v8667_v28 = vld [vmem:[%s12357_s23 + $0x968] sm:$0xf]  ;;  %v11380_v40 = vld [vmem:[%s12357_s23 + $0xa74] sm:$0xf0] }
 0x24b   : > { %6677 = vmatpush.bf16.msra.mxu3 %v8988_v48  ;;  %6639 = vmatpush.bf16.msra.mxu0 %v8588_v33  ;;  %v13638_v48 = vpop.f32.mrf.mxu1  ;;  %v8940_v33 = vor.u32 %v11416_v20, %v8939_v23  ;;  %v8923_v41 = vld [vmem:[%s12357_s23 + $0xb68] sm:$0xf]  ;;  %v11412_v49 = vld [vmem:[%s12357_s23 + $0xb74] sm:$0xf0] }
 0x24c   : > { %6652 = vmatpush.bf16.msra.mxu1 %v8716_v35  ;;  %v11348_v35 = vld [vmem:[%s12357_s23 + $0x974] sm:$0xf0]  ;;  %v8523_v58 = vld [vmem:[%s12357_s23 + $0x848] sm:$0xf] }
 0x24d   : > { %6665 = vmatpush.bf16.msra.mxu2 %v8844_v37  ;;  %v8795_v37 = vld [vmem:[%s12357_s23 + $0xa68] sm:$0xf]  ;;  %v8668_v52 = vor.u32 %v11348_v35, %v8667_v28  ;;  %v11312_v55 = vld [vmem:[%s12357_s23 + $0x854] sm:$0xf0]  ;;  %v13656_v6 = vpop.f32.mrf.mxu3 }
 0x24e   : > { %v8796_v54 = vor.u32 %v11380_v40, %v8795_v37  ;;  %v8651_v56 = vld [vmem:[%s12357_s23 + $0x948] sm:$0xf]  ;;  %v11376_v2 = vld [vmem:[%s12357_s23 + $0xa54] sm:$0xf0]  ;;  %v8524_v19 = vor.u32 %v11312_v55, %v8523_v58 }
 0x24f   : > { %6678 = vmatpush.bf16.msra.mxu3 %v8972_v51  ;;  %6640 = vmatpush.bf16.msra.mxu0 %v8572_v57  ;;  %v8540_v51 = vor.u32 %v11316_v62, %v8539_v27  ;;  %v8924_v57 = vor.u32 %v11412_v49, %v8923_v41  ;;  %v8779_v59 = vld [vmem:[%s12357_s23 + $0xa48] sm:$0xf]  ;;  %v11408_v44 = vld [vmem:[%s12357_s23 + $0xb54] sm:$0xf0] }
 0x250   : > { %6653 = vmatpush.bf16.msra.mxu1 %v8700_v4  ;;  %v13651_v4 = vpop.f32.mrf.mxu2  ;;  %v8635_v27 = vld [vmem:[%s12357_s23 + $0x928] sm:$0xf]  ;;  %v11340_v28 = vld [vmem:[%s12357_s23 + $0x934] sm:$0xf0] }
 0x251   : > { %6666 = vmatpush.bf16.msra.mxu2 %v8828_v60  ;;  %v11344_v60 = vld [vmem:[%s12357_s23 + $0x954] sm:$0xf0]  ;;  %v6389_v15 = vpop.f32.mrf.mxu0  ;;  %v8891_v37 = vld [vmem:[%s12357_s23 + $0xb28] sm:$0xf] }
 0x252   : > { %v8652_v20 = vor.u32 %v11344_v60, %v8651_v56  ;;  %v11372_v35 = vld [vmem:[%s12357_s23 + $0xa34] sm:$0xf0]  ;;  %v8491_v49 = vld [vmem:[%s12357_s23 + $0x808] sm:$0xf] }
 0x253   : > { %6679 = vmatpush.bf16.msra.mxu3 %v8956_v12  ;;  %6641 = vmatpush.bf16.msra.mxu0 %v8556_v25  ;;  %v8907_v12 = vld [vmem:[%s12357_s23 + $0xb48] sm:$0xf]  ;;  %v6402_v23 = vpop.f32.mrf.mxu1  ;;  %v8780_v25 = vor.u32 %v11376_v2, %v8779_v59  ;;  %v11404_v40 = vld [vmem:[%s12357_s23 + $0xb34] sm:$0xf0] }
 0x254   : > { %6654 = vmatpush.bf16.msra.mxu1 %v8684_v61  ;;  %v8507_v61 = vld [vmem:[%s12357_s23 + $0x828] sm:$0xf]  ;;  %v8908_v62 = vor.u32 %v11408_v44, %v8907_v12  ;;  %v11336_v55 = vld [vmem:[%s12357_s23 + $0x914] sm:$0xf0] }
 0x255   : > { %6667 = vmatpush.bf16.msra.mxu2 %v8812_v63  ;;  %v11308_v63 = vld [vmem:[%s12357_s23 + $0x834] sm:$0xf0]  ;;  %v8619_v58 = vld [vmem:[%s12357_s23 + $0x908] sm:$0xf]  ;;  %v6428_v23 = vpop.f32.mrf.mxu3 }
 0x256   : > { %v8508_v41 = vor.u32 %v11308_v63, %v8507_v61  ;;  %v8747_v56 = vld [vmem:[%s12357_s23 + $0xa08] sm:$0xf]  ;;  %v11368_v60 = vld [vmem:[%s12357_s23 + $0xa14] sm:$0xf0] }
 0x257   : > { %6680 = vmatpush.bf16.msra.mxu3 %v8940_v33  ;;  %6642 = vmatpush.bf16.msra.mxu0 %v8540_v51  ;;  %v8763_v33 = vld [vmem:[%s12357_s23 + $0xa28] sm:$0xf]  ;;  %v11304_v51 = vld [vmem:[%s12357_s23 + $0x814] sm:$0xf0] }
 0x258   : > { %6655 = vmatpush.bf16.msra.mxu1 %v8668_v52  ;;  %v8636_v52 = vor.u32 %v11340_v28, %v8635_v27  ;;  %v8875_v59 = vld [vmem:[%s12357_s23 + $0xb08] sm:$0xf]  ;;  %v11400_v2 = vld [vmem:[%s12357_s23 + $0xb14] sm:$0xf0]  ;;  %v6415_v12 = vpop.f32.mrf.mxu2  ;;  %v8620_v27 = vor.u32 %v11336_v55, %v8619_v58 }
 0x259   : > { %6668 = vmatpush.bf16.msra.mxu2 %v8796_v54  ;;  %v8764_v54 = vor.u32 %v11372_v35, %v8763_v33  ;;  %v9115_v44 = vld [vmem:[%s12357_s23 + $0xce8] sm:$0xf]  ;;  %v11460_v15 = vld [vmem:[%s12357_s23 + $0xcf4] sm:$0xf0]  ;;  %v8876_v35 = vor.u32 %v11400_v2, %v8875_v59 }
 0x25a   : > { %v9371_v61 = vld [vmem:[%s12357_s23 + $0xee8] sm:$0xf]  ;;  %v11524_v63 = vld [vmem:[%s12357_s23 + $0xef4] sm:$0xf0] }
 0x25b   : > { %6681 = vmatpush.bf16.msra.mxu3 %v8924_v57  ;;  %6643 = vmatpush.bf16.msra.mxu0 %v8524_v19  ;;  %v8892_v57 = vor.u32 %v11404_v40, %v8891_v37  ;;  %v9243_v19 = vld [vmem:[%s12357_s23 + $0xde8] sm:$0xf]  ;;  %v11556_v33 = vld [vmem:[%s12357_s23 + $0xff4] sm:$0xf0]  ;;  %v9116_v37 = vor.u32 %v11460_v15, %v9115_v44 }
 0x25c   : > { %6656 = vmatpush.bf16.msra.mxu1 %v8652_v20  ;;  %v8492_v20 = vor.u32 %v11304_v51, %v8491_v49  ;;  %v9499_v28 = vld [vmem:[%s12357_s23 + $0xfe8] sm:$0xf]  ;;  %v11456_v51 = vld [vmem:[%s12357_s23 + $0xcd4] sm:$0xf0] }
 0x25d   : > { %6669 = vmatpush.bf16.msra.mxu2 %v8780_v25  ;;  %v11492_v25 = vld [vmem:[%s12357_s23 + $0xdf4] sm:$0xf0]  ;;  %v9099_v49 = vld [vmem:[%s12357_s23 + $0xcc8] sm:$0xf] }
 0x25e   : > { %v9244_v40 = vor.u32 %v11492_v25, %v9243_v19  ;;  %v9227_v12 = vld [vmem:[%s12357_s23 + $0xdc8] sm:$0xf]  ;;  %v11520_v55 = vld [vmem:[%s12357_s23 + $0xed4] sm:$0xf0] }
 0x25f   : > { %6682 = vmatpush.bf16.msra.mxu3 %v8908_v62  ;;  %6644 = vmatpush.bf16.msra.mxu0 %v8508_v41  ;;  %v8748_v62 = vor.u32 %v11368_v60, %v8747_v56  ;;  %v9372_v41 = vor.u32 %v11524_v63, %v9371_v61  ;;  %v9355_v58 = vld [vmem:[%s12357_s23 + $0xec8] sm:$0xf]  ;;  %v9100_v60 = vor.u32 %v11456_v51, %v9099_v49  ;;  %v11452_v15 = vld [vmem:[%s12357_s23 + $0xcb4] sm:$0xf0] }
 0x260   : > { %6657 = vmatpush.bf16.msra.mxu1 %v8636_v52  ;;  %v9500_v52 = vor.u32 %v11556_v33, %v9499_v28  ;;  %v9483_v56 = vld [vmem:[%s12357_s23 + $0xfc8] sm:$0xf]  ;;  %v9356_v2 = vor.u32 %v11520_v55, %v9355_v58  ;;  %v11516_v61 = vld [vmem:[%s12357_s23 + $0xeb4] sm:$0xf0] }
 0x261   : > { %6670 = vmatpush.bf16.msra.mxu2 %v8764_v54  ;;  %v11488_v54 = vld [vmem:[%s12357_s23 + $0xdd4] sm:$0xf0]  ;;  %v9083_v44 = vld [vmem:[%s12357_s23 + $0xca8] sm:$0xf] }
 0x262   : > { %v9228_v59 = vor.u32 %v11488_v54, %v9227_v12  ;;  %v9211_v19 = vld [vmem:[%s12357_s23 + $0xda8] sm:$0xf]  ;;  %v11480_v49 = vld [vmem:[%s12357_s23 + $0xd94] sm:$0xf0] }
 0x263   : > { %6683 = vmatpush.bf16.msra.mxu3 %v8892_v57  ;;  %6645 = vmatpush.bf16.msra.mxu0 %v8492_v20  ;;  %v11552_v57 = vld [vmem:[%s12357_s23 + $0xfd4] sm:$0xf0]  ;;  %v9339_v25 = vld [vmem:[%s12357_s23 + $0xea8] sm:$0xf] }
 0x264   : > { %6658 = vmatpush.bf16.msra.mxu1 %v8620_v27  ;;  %v9484_v23 = vor.u32 %v11552_v57, %v9483_v56  ;;  %v11484_v20 = vld [vmem:[%s12357_s23 + $0xdb4] sm:$0xf0]  ;;  %v9467_v63 = vld [vmem:[%s12357_s23 + $0xfa8] sm:$0xf]  ;;  %v9340_v33 = vor.u32 %v11516_v61, %v9339_v25 }
 0x265   : > { %6671 = vmatpush.bf16.msra.mxu2 %v8748_v62  ;;  %v11548_v27 = vld [vmem:[%s12357_s23 + $0xfb4] sm:$0xf0]  ;;  %v9084_v62 = vor.u32 %v11452_v15, %v9083_v44  ;;  %v9212_v28 = vor.u32 %v11484_v20, %v9211_v19  ;;  %v9323_v51 = vld [vmem:[%s12357_s23 + $0xe88] sm:$0xf] }
 0x266   : > { %6646 = vmatmul.bf16.vlgmr.msra.gmra.mxu0 %v12621_v26  ;;  %v11512_v12 = vld [vmem:[%s12357_s23 + $0xe94] sm:$0xf0]  ;;  %v9451_v54 = vld [vmem:[%s12357_s23 + $0xf88] sm:$0xf]  ;;  %v13714_v56 = vpop.f32.mrf.mxu1 }
 0x267   : > { %6684 = vmatpush.bf16.msra.mxu3 %v8876_v35  ;;  %6690 = vmatpush.bf16.msrb.mxu0 %v9116_v37  ;;  %v9067_v35 = vld [vmem:[%s12357_s23 + $0xc88] sm:$0xf]  ;;  %v11448_v37 = vld [vmem:[%s12357_s23 + $0xc94] sm:$0xf0] }
 0x268   : > { %6703 = vmatpush.bf16.msrb.mxu1 %v9244_v40  ;;  %6672 = vmatmul.bf16.vlgmr.msra.gmra.mxu2 %v12626_v30  ;;  %v9195_v40 = vld [vmem:[%s12357_s23 + $0xd88] sm:$0xf]  ;;  %v11544_v58 = vld [vmem:[%s12357_s23 + $0xf94] sm:$0xf0]  ;;  %v9068_v55 = vor.u32 %v11448_v37, %v9067_v35 }
 0x269   : > { %6716 = vmatpush.bf16.msrb.mxu2 %v9372_v41  ;;  %6659 = vmatmul.bf16.vlgmr.msra.gmra.mxu1 %v12628_v31  ;;  %v9468_v41 = vor.u32 %v11548_v27, %v9467_v63  ;;  %v9196_v57 = vor.u32 %v11480_v49, %v9195_v40  ;;  %v9179_v44 = vld [vmem:[%s12357_s23 + $0xd68] sm:$0xf]  ;;  %v9452_v15 = vor.u32 %v11544_v58, %v9451_v54  ;;  %v11476_v19 = vld [vmem:[%s12357_s23 + $0xd74] sm:$0xf0] }
 0x26a   : > { %6685 = vmatmul.bf16.vlgmr.msra.gmra.mxu3 %v12632_v34  ;;  %v11508_v20 = vld [vmem:[%s12357_s23 + $0xe74] sm:$0xf0]  ;;  %v9435_v25 = vld [vmem:[%s12357_s23 + $0xf68] sm:$0xf]  ;;  %v9180_v27 = vor.u32 %v11476_v19, %v9179_v44 }
 0x26b   : > { %6729 = vmatpush.bf16.msrb.mxu3 %v9500_v52  ;;  %6691 = vmatpush.bf16.msrb.mxu0 %v9100_v60  ;;  %v13710_v52 = vpop.f32.mrf.mxu0  ;;  %v9324_v60 = vor.u32 %v11512_v12, %v9323_v51  ;;  %v11540_v61 = vld [vmem:[%s12357_s23 + $0xf74] sm:$0xf0]  ;;  %v9163_v35 = vld [vmem:[%s12357_s23 + $0xd48] sm:$0xf]  ;;  %v13727_v40 = vpop.f32.mrf.mxu2  ;;  %v6388_v12 = vadd.f32 %v13634_v53, %v13582_v8 }
 0x26c   : > { %6704 = vmatpush.bf16.msrb.mxu1 %v9228_v59  ;;  %v9051_v59 = vld [vmem:[%s12357_s23 + $0xc68] sm:$0xf]  ;;  %v9436_v37 = vor.u32 %v11540_v61, %v9435_v25  ;;  %v11504_v51 = vld [vmem:[%s12357_s23 + $0xe54] sm:$0xf0] }
 0x26d   : > { %6717 = vmatpush.bf16.msrb.mxu2 %v9356_v2  ;;  %v11444_v2 = vld [vmem:[%s12357_s23 + $0xc74] sm:$0xf0]  ;;  %v9291_v49 = vld [vmem:[%s12357_s23 + $0xe48] sm:$0xf]  ;;  %v13734_v54 = vpop.f32.mrf.mxu3  ;;  %v6401_v61 = vadd.f32 %v13638_v48, %v6388_v12 }
 0x26e   : > { %v9052_v63 = vor.u32 %v11444_v2, %v9051_v59  ;;  %v9419_v58 = vld [vmem:[%s12357_s23 + $0xf48] sm:$0xf]  ;;  %v6454_v59 = vpop.f32.mrf.mxu1  ;;  %v9292_v44 = vor.u32 %v11504_v51, %v9291_v49  ;;  %v11436_v53 = vld [vmem:[%s12357_s23 + $0xc34] sm:$0xf0] }
 0x26f   : > { %6730 = vmatpush.bf16.msrb.mxu3 %v9484_v23  ;;  %6692 = vmatpush.bf16.msrb.mxu0 %v9084_v62  ;;  %v9307_v23 = vld [vmem:[%s12357_s23 + $0xe68] sm:$0xf]  ;;  %v11500_v25 = vld [vmem:[%s12357_s23 + $0xe34] sm:$0xf0] }
 0x270   : > { %6705 = vmatpush.bf16.msrb.mxu1 %v9212_v28  ;;  %v9308_v62 = vor.u32 %v11508_v20, %v9307_v23  ;;  %v9035_v28 = vld [vmem:[%s12357_s23 + $0xc48] sm:$0xf]  ;;  %v11468_v23 = vld [vmem:[%s12357_s23 + $0xd34] sm:$0xf0] }
 0x271   : > { %6718 = vmatpush.bf16.msrb.mxu2 %v9340_v33  ;;  %v11440_v33 = vld [vmem:[%s12357_s23 + $0xc54] sm:$0xf0]  ;;  %v9019_v8 = vld [vmem:[%s12357_s23 + $0xc28] sm:$0xf] }
 0x272   : > { %v9275_v20 = vld [vmem:[%s12357_s23 + $0xe28] sm:$0xf]  ;;  %v11464_v49 = vld [vmem:[%s12357_s23 + $0xd14] sm:$0xf0] }
 0x273   : > { %6731 = vmatpush.bf16.msrb.mxu3 %v9468_v41  ;;  %6693 = vmatpush.bf16.msrb.mxu0 %v9068_v55  ;;  %v11472_v41 = vld [vmem:[%s12357_s23 + $0xd54] sm:$0xf0]  ;;  %v9131_v48 = vld [vmem:[%s12357_s23 + $0xd08] sm:$0xf] }
 0x274   : > { %6706 = vmatpush.bf16.msrb.mxu1 %v9196_v57  ;;  %v11536_v55 = vld [vmem:[%s12357_s23 + $0xf54] sm:$0xf0]  ;;  %v6441_v57 = vpop.f32.mrf.mxu0  ;;  %v9164_v2 = vor.u32 %v11472_v41, %v9163_v35  ;;  %v6414_v35 = vadd.f32 %v13651_v4, %v6401_v61  ;;  %v9276_v41 = vor.u32 %v11500_v25, %v9275_v20  ;;  %v9259_v51 = vld [vmem:[%s12357_s23 + $0xe08] sm:$0xf]  ;;  %v9132_v20 = vor.u32 %v11464_v49, %v9131_v48 }
 0x275   : > { %6719 = vmatpush.bf16.msrb.mxu2 %v9324_v60  ;;  %v9036_v60 = vor.u32 %v11440_v33, %v9035_v28  ;;  %v9420_v19 = vor.u32 %v11536_v55, %v9419_v58  ;;  %v9003_v28 = vld [vmem:[%s12357_s23 + $0xc08] sm:$0xf]  ;;  %v11432_v33 = vld [vmem:[%s12357_s23 + $0xc14] sm:$0xf0] }
 0x276   : > { %v11496_v58 = vld [vmem:[%s12357_s23 + $0xe14] sm:$0xf0]  ;;  %v9387_v55 = vld [vmem:[%s12357_s23 + $0xf08] sm:$0xf] }
 0x277   : > { %6732 = vmatpush.bf16.msrb.mxu3 %v9452_v15  ;;  %6694 = vmatpush.bf16.msrb.mxu0 %v9052_v63  ;;  %v9147_v15 = vld [vmem:[%s12357_s23 + $0xd28] sm:$0xf]  ;;  %v11528_v57 = vld [vmem:[%s12357_s23 + $0xf14] sm:$0xf0]  ;;  %v9260_v25 = vor.u32 %v11496_v58, %v9259_v51 }
 0x278   : > { %6707 = vmatpush.bf16.msrb.mxu1 %v9180_v27  ;;  %v9403_v63 = vld [vmem:[%s12357_s23 + $0xf28] sm:$0xf]  ;;  %v11532_v27 = vld [vmem:[%s12357_s23 + $0xf34] sm:$0xf0] }
 0x279   : > { %6720 = vmatpush.bf16.msrb.mxu2 %v9308_v62  ;;  %v9020_v62 = vor.u32 %v11436_v53, %v9019_v8  ;;  %v9404_v12 = vor.u32 %v11532_v27, %v9403_v63  ;;  %v9627_v4 = vld [vmem:[%s12357_s23 + $0x10e8] sm:$0xf]  ;;  %v11588_v59 = vld [vmem:[%s12357_s23 + $0x10f4] sm:$0xf0]  ;;  %v9004_v8 = vor.u32 %v11432_v33, %v9003_v28  ;;  %v9388_v27 = vor.u32 %v11528_v57, %v9387_v55 }
 0x27a   : > { %v11620_v53 = vld [vmem:[%s12357_s23 + $0x11f4] sm:$0xf0]  ;;  %v10011_v61 = vld [vmem:[%s12357_s23 + $0x13e8] sm:$0xf] }
 0x27b   : > { %6733 = vmatpush.bf16.msrb.mxu3 %v9436_v37  ;;  %6695 = vmatpush.bf16.msrb.mxu0 %v9036_v60  ;;  %v9148_v37 = vor.u32 %v11468_v23, %v9147_v15  ;;  %v6467_v60 = vpop.f32.mrf.mxu2  ;;  %v9883_v15 = vld [vmem:[%s12357_s23 + $0x12e8] sm:$0xf]  ;;  %v11652_v23 = vld [vmem:[%s12357_s23 + $0x12f4] sm:$0xf0] }
 0x27c   : > { %6708 = vmatpush.bf16.msrb.mxu1 %v9164_v2  ;;  %v9755_v2 = vld [vmem:[%s12357_s23 + $0x11e8] sm:$0xf]  ;;  %v11684_v63 = vld [vmem:[%s12357_s23 + $0x13f4] sm:$0xf0]  ;;  %v9884_v60 = vor.u32 %v11652_v23, %v9883_v15 }
 0x27d   : > { %6721 = vmatpush.bf16.msrb.mxu2 %v9292_v44  ;;  %v6480_v44 = vpop.f32.mrf.mxu3  ;;  %v9756_v33 = vor.u32 %v11620_v53, %v9755_v2  ;;  %v9867_v48 = vld [vmem:[%s12357_s23 + $0x12c8] sm:$0xf]  ;;  %v11648_v49 = vld [vmem:[%s12357_s23 + $0x12d4] sm:$0xf0] }
 0x27e   : > { %v9611_v44 = vld [vmem:[%s12357_s23 + $0x10c8] sm:$0xf]  ;;  %v9868_v57 = vor.u32 %v11648_v49, %v9867_v48  ;;  %v11612_v53 = vld [vmem:[%s12357_s23 + $0x11b4] sm:$0xf0] }
 0x27f   : > { %6734 = vmatpush.bf16.msrb.mxu3 %v9420_v19  ;;  %6696 = vmatpush.bf16.msrb.mxu0 %v9020_v62  ;;  %v6427_v19 = vadd.f32 %v13656_v6, %v6414_v35  ;;  %v9628_v62 = vor.u32 %v11588_v59, %v9627_v4  ;;  %v11584_v6 = vld [vmem:[%s12357_s23 + $0x10d4] sm:$0xf0]  ;;  %v9739_v35 = vld [vmem:[%s12357_s23 + $0x11c8] sm:$0xf] }
 0x280   : > { %6709 = vmatpush.bf16.msrb.mxu1 %v9148_v37  ;;  %v10012_v37 = vor.u32 %v11684_v63, %v10011_v61  ;;  %v9995_v51 = vld [vmem:[%s12357_s23 + $0x13c8] sm:$0xf]  ;;  %v11580_v59 = vld [vmem:[%s12357_s23 + $0x10b4] sm:$0xf0] }
 0x281   : > { %6722 = vmatpush.bf16.msrb.mxu2 %v9276_v41  ;;  %v6440_v28 = vadd.f32 %v13710_v52, %v6427_v19  ;;  %v11616_v41 = vld [vmem:[%s12357_s23 + $0x11d4] sm:$0xf0]  ;;  %v9612_v52 = vor.u32 %v11584_v6, %v9611_v44  ;;  %v9595_v4 = vld [vmem:[%s12357_s23 + $0x10a8] sm:$0xf] }
 0x282   : > { %v9740_v55 = vor.u32 %v11616_v41, %v9739_v35  ;;  %v9723_v2 = vld [vmem:[%s12357_s23 + $0x11a8] sm:$0xf]  ;;  %v11644_v23 = vld [vmem:[%s12357_s23 + $0x12b4] sm:$0xf0] }
 0x283   : > { %6735 = vmatpush.bf16.msrb.mxu3 %v9404_v12  ;;  %6697 = vmatpush.bf16.msrb.mxu0 %v9004_v8  ;;  %v11680_v12 = vld [vmem:[%s12357_s23 + $0x13d4] sm:$0xf0]  ;;  %v6453_v58 = vadd.f32 %v13714_v56, %v6440_v28  ;;  %v9851_v15 = vld [vmem:[%s12357_s23 + $0x12a8] sm:$0xf]  ;;  %v9724_v61 = vor.u32 %v11612_v53, %v9723_v2  ;;  %v6491_v35 = vpop.f32.mrf.mxu0 }
 0x284   : > { %6710 = vmatpush.bf16.msrb.mxu1 %v9132_v20  ;;  %v9996_v8 = vor.u32 %v11680_v12, %v9995_v51  ;;  %v9979_v19 = vld [vmem:[%s12357_s23 + $0x13a8] sm:$0xf]  ;;  %v11676_v20 = vld [vmem:[%s12357_s23 + $0x13b4] sm:$0xf0]  ;;  %v9852_v63 = vor.u32 %v11644_v23, %v9851_v15 }
 0x285   : > { %6723 = vmatpush.bf16.msrb.mxu2 %v9260_v25  ;;  %v6466_v56 = vadd.f32 %v13727_v40, %v6453_v58  ;;  %v9596_v25 = vor.u32 %v11580_v59, %v9595_v4  ;;  %v9579_v40 = vld [vmem:[%s12357_s23 + $0x1088] sm:$0xf]  ;;  %v9980_v28 = vor.u32 %v11676_v20, %v9979_v19  ;;  %v11640_v44 = vld [vmem:[%s12357_s23 + $0x1294] sm:$0xf0] }
 0x286   : > { %6698 = vmatmul.bf16.vlgmr.msrb.gmra.mxu0 %v12699_v24  ;;  %v11672_v41 = vld [vmem:[%s12357_s23 + $0x1394] sm:$0xf0]  ;;  %v6504_v49 = vpop.f32.mrf.mxu1  ;;  %v9563_v58 = vld [vmem:[%s12357_s23 + $0x1068] sm:$0xf] }
 0x287   : > { %6736 = vmatpush.bf16.msrb.mxu3 %v9388_v27  ;;  %6742 = vmatpush.bf16.msra.mxu0 %v9628_v62  ;;  %v11576_v27 = vld [vmem:[%s12357_s23 + $0x1094] sm:$0xf0]  ;;  %v9707_v62 = vld [vmem:[%s12357_s23 + $0x1188] sm:$0xf]  ;;  %v6479_v6 = vadd.f32 %v13734_v54, %v6466_v56 }
 0x288   : > { %6755 = vmatpush.bf16.msra.mxu1 %v9756_v33  ;;  %6724 = vmatmul.bf16.vlgmr.msrb.gmra.mxu2 %v12704_v29  ;;  %v11608_v33 = vld [vmem:[%s12357_s23 + $0x1194] sm:$0xf0]  ;;  %v9580_v48 = vor.u32 %v11576_v27, %v9579_v40  ;;  %v9691_v54 = vld [vmem:[%s12357_s23 + $0x1168] sm:$0xf] }
 0x289   : > { %6768 = vmatpush.bf16.msra.mxu2 %v9884_v60  ;;  %6711 = vmatmul.bf16.vlgmr.msrb.gmra.mxu1 %v12706_v32  ;;  %v9835_v60 = vld [vmem:[%s12357_s23 + $0x1288] sm:$0xf]  ;;  %v6492_v51 = vadd.f32 %v6491_v35, %v6479_v6  ;;  %v9708_v12 = vor.u32 %v11608_v33, %v9707_v62  ;;  %v11604_v4 = vld [vmem:[%s12357_s23 + $0x1174] sm:$0xf0] }
 0x28a   : > { %6737 = vmatmul.bf16.vlgmr.msrb.gmra.mxu3 %v12710_v36  ;;  %v9819_v59 = vld [vmem:[%s12357_s23 + $0x1268] sm:$0xf]  ;;  %v11636_v2 = vld [vmem:[%s12357_s23 + $0x1274] sm:$0xf0]  ;;  %v9692_v56 = vor.u32 %v11604_v4, %v9691_v54 }
 0x28b   : > { %6781 = vmatpush.bf16.msra.mxu3 %v10012_v37  ;;  %6743 = vmatpush.bf16.msra.mxu0 %v9612_v52  ;;  %v9963_v37 = vld [vmem:[%s12357_s23 + $0x1388] sm:$0xf]  ;;  %v9836_v52 = vor.u32 %v11640_v44, %v9835_v60  ;;  %v11668_v53 = vld [vmem:[%s12357_s23 + $0x1374] sm:$0xf0]  ;;  %v6505_v23 = vadd.f32 %v6504_v49, %v6492_v51  ;;  %v9820_v19 = vor.u32 %v11636_v2, %v9819_v59  ;;  %v6517_v40 = vpop.f32.mrf.mxu2  ;;  %v6493_v35 = vpop.f32.mrf.mxu0 }
 0x28c   : > { %6756 = vmatpush.bf16.msra.mxu1 %v9740_v55  ;;  %v11572_v55 = vld [vmem:[%s12357_s23 + $0x1074] sm:$0xf0]  ;;  %v9547_v20 = vld [vmem:[%s12357_s23 + $0x1048] sm:$0xf] }
 0x28d   : > { %6769 = vmatpush.bf16.msra.mxu2 %v9868_v57  ;;  %v9964_v57 = vor.u32 %v11672_v41, %v9963_v37  ;;  %v9564_v15 = vor.u32 %v11572_v55, %v9563_v58  ;;  %v11600_v27 = vld [vmem:[%s12357_s23 + $0x1154] sm:$0xf0]  ;;  %v9803_v62 = vld [vmem:[%s12357_s23 + $0x1248] sm:$0xf]  ;;  %v6518_v33 = vadd.f32 %v6517_v40, %v6505_v23  ;;  %v6530_v60 = vpop.f32.mrf.mxu3 }
 0x28e   : > { %v9931_v44 = vld [vmem:[%s12357_s23 + $0x1348] sm:$0xf]  ;;  %v11664_v6 = vld [vmem:[%s12357_s23 + $0x1354] sm:$0xf0]  ;;  %v6506_v41 = vpop.f32.mrf.mxu1 }
 0x28f   : > { %6782 = vmatpush.bf16.msra.mxu3 %v9996_v8  ;;  %6744 = vmatpush.bf16.msra.mxu0 %v9596_v25  ;;  %v9947_v8 = vld [vmem:[%s12357_s23 + $0x1368] sm:$0xf]  ;;  %v11568_v25 = vld [vmem:[%s12357_s23 + $0x1054] sm:$0xf0]  ;;  %v9932_v55 = vor.u32 %v11664_v6, %v9931_v44 }
 0x290   : > { %6757 = vmatpush.bf16.msra.mxu1 %v9724_v61  ;;  %v9675_v61 = vld [vmem:[%s12357_s23 + $0x1148] sm:$0xf]  ;;  %v9548_v37 = vor.u32 %v11568_v25, %v9547_v20  ;;  %v11596_v54 = vld [vmem:[%s12357_s23 + $0x1134] sm:$0xf0] }
 0x291   : > { %6770 = vmatpush.bf16.msra.mxu2 %v9852_v63  ;;  %v9948_v63 = vor.u32 %v11668_v53, %v9947_v8  ;;  %v9676_v49 = vor.u32 %v11600_v27, %v9675_v61  ;;  %v9659_v58 = vld [vmem:[%s12357_s23 + $0x1128] sm:$0xf]  ;;  %v11628_v4 = vld [vmem:[%s12357_s23 + $0x1234] sm:$0xf0] }
 0x292   : > { %v9915_v2 = vld [vmem:[%s12357_s23 + $0x1328] sm:$0xf]  ;;  %v11660_v8 = vld [vmem:[%s12357_s23 + $0x1334] sm:$0xf0] }
 0x293   : > { %6783 = vmatpush.bf16.msra.mxu3 %v9980_v28  ;;  %6745 = vmatpush.bf16.msra.mxu0 %v9580_v48  ;;  %v11632_v28 = vld [vmem:[%s12357_s23 + $0x1254] sm:$0xf0]  ;;  %v6531_v48 = vadd.f32 %v6530_v60, %v6518_v33  ;;  %v9899_v40 = vld [vmem:[%s12357_s23 + $0x1308] sm:$0xf] }
 0x294   : > { %6758 = vmatpush.bf16.msra.mxu1 %v9708_v12  ;;  %v9804_v51 = vor.u32 %v11632_v28, %v9803_v62  ;;  %v9531_v12 = vld [vmem:[%s12357_s23 + $0x1028] sm:$0xf]  ;;  %v11560_v23 = vld [vmem:[%s12357_s23 + $0x1014] sm:$0xf0]  ;;  %v6519_v28 = vpop.f32.mrf.mxu2 }
 0x295   : > { %6771 = vmatpush.bf16.msra.mxu2 %v9836_v52  ;;  %v11564_v52 = vld [vmem:[%s12357_s23 + $0x1034] sm:$0xf0]  ;;  %v7263_v59 = vadd.f32 %v6531_v48, %v13298_v18  ;;  %v9771_v18 = vld [vmem:[%s12357_s23 + $0x1208] sm:$0xf]  ;;  %v6532_v44 = vpop.f32.mrf.mxu3 }
 0x296   : > { %v9532_v53 = vor.u32 %v11564_v52, %v9531_v12  ;;  %v11592_v25 = vld [vmem:[%s12357_s23 + $0x1114] sm:$0xf0]  ;;  %v10139_v62 = vld [vmem:[%s12357_s23 + $0x14e8] sm:$0xf] }
 0x297   : > { %6784 = vmatpush.bf16.msra.mxu3 %v9964_v57  ;;  %6746 = vmatpush.bf16.msra.mxu0 %v9564_v15  ;;  %v9787_v57 = vld [vmem:[%s12357_s23 + $0x1228] sm:$0xf]  ;;  %v11624_v61 = vld [vmem:[%s12357_s23 + $0x1214] sm:$0xf0]  ;;  %7267 = vst [vmem:[%s12376_s26 + $0x8] sm:$0xff] %v7263_v59 }
 0x298   : > { %6759 = vmatpush.bf16.msra.mxu1 %v9692_v56  ;;  %v9515_v15 = vld [vmem:[%s12357_s23 + $0x1008] sm:$0xf]  ;;  %v9788_v20 = vor.u32 %v11628_v4, %v9787_v57  ;;  %v11656_v27 = vld [vmem:[%s12357_s23 + $0x1314] sm:$0xf0] }
 0x299   : > { %6772 = vmatpush.bf16.msra.mxu2 %v9820_v19  ;;  %v9643_v56 = vld [vmem:[%s12357_s23 + $0x1108] sm:$0xf]  ;;  %v9660_v19 = vor.u32 %v11596_v54, %v9659_v58  ;;  %v11716_v33 = vld [vmem:[%s12357_s23 + $0x14f4] sm:$0xf0]  ;;  %v9516_v6 = vor.u32 %v11560_v23, %v9515_v15  ;;  %v9900_v52 = vor.u32 %v11656_v27, %v9899_v40 }
 0x29a   : > { %v10267_v60 = vld [vmem:[%s12357_s23 + $0x15e8] sm:$0xf]  ;;  %v11748_v35 = vld [vmem:[%s12357_s23 + $0x15f4] sm:$0xf0]  ;;  %v9644_v48 = vor.u32 %v11592_v25, %v9643_v56  ;;  %v10140_v58 = vor.u32 %v11716_v33, %v10139_v62 }
 0x29b   : > { %6785 = vmatpush.bf16.msra.mxu3 %v9948_v63  ;;  %6747 = vmatpush.bf16.msra.mxu0 %v9548_v37  ;;  %v9916_v63 = vor.u32 %v11660_v8, %v9915_v2  ;;  %v10395_v37 = vld [vmem:[%s12357_s23 + $0x16e8] sm:$0xf]  ;;  %v11780_v41 = vld [vmem:[%s12357_s23 + $0x16f4] sm:$0xf0] }
 0x29c   : > { %6760 = vmatpush.bf16.msra.mxu1 %v9676_v49  ;;  %v9772_v49 = vor.u32 %v11624_v61, %v9771_v18  ;;  %v11812_v12 = vld [vmem:[%s12357_s23 + $0x17f4] sm:$0xf0]  ;;  %v10396_v54 = vor.u32 %v11780_v41, %v10395_v37  ;;  %v10123_v57 = vld [vmem:[%s12357_s23 + $0x14c8] sm:$0xf] }
 0x29d   : > { %6773 = vmatpush.bf16.msra.mxu2 %v9804_v51  ;;  %v10523_v51 = vld [vmem:[%s12357_s23 + $0x17e8] sm:$0xf]  ;;  %v11712_v4 = vld [vmem:[%s12357_s23 + $0x14d4] sm:$0xf0] }
 0x29e   : > { %v10251_v59 = vld [vmem:[%s12357_s23 + $0x15c8] sm:$0xf]  ;;  %v10524_v2 = vor.u32 %v11812_v12, %v10523_v51  ;;  %v11744_v8 = vld [vmem:[%s12357_s23 + $0x15d4] sm:$0xf0] }
 0x29f   : > { %6786 = vmatpush.bf16.msra.mxu3 %v9932_v55  ;;  %6748 = vmatpush.bf16.msra.mxu0 %v9532_v53  ;;  %v10268_v55 = vor.u32 %v11748_v35, %v10267_v60  ;;  %v10379_v53 = vld [vmem:[%s12357_s23 + $0x16c8] sm:$0xf]  ;;  %v11776_v15 = vld [vmem:[%s12357_s23 + $0x16d4] sm:$0xf0] }
 0x2a0   : > { %6761 = vmatpush.bf16.msra.mxu1 %v9660_v19  ;;  %v10507_v23 = vld [vmem:[%s12357_s23 + $0x17c8] sm:$0xf]  ;;  %v11808_v56 = vld [vmem:[%s12357_s23 + $0x17d4] sm:$0xf0]  ;;  %v10124_v19 = vor.u32 %v11712_v4, %v10123_v57  ;;  %v10380_v25 = vor.u32 %v11776_v15, %v10379_v53 }
 0x2a1   : > { %6774 = vmatpush.bf16.msra.mxu2 %v9788_v20  ;;  %v10252_v20 = vor.u32 %v11744_v8, %v10251_v59  ;;  %v10107_v18 = vld [vmem:[%s12357_s23 + $0x14a8] sm:$0xf]  ;;  %v11708_v61 = vld [vmem:[%s12357_s23 + $0x14b4] sm:$0xf0]  ;;  %v10508_v40 = vor.u32 %v11808_v56, %v10507_v23 }
 0x2a2   : > { %v11740_v27 = vld [vmem:[%s12357_s23 + $0x15b4] sm:$0xf0]  ;;  %v10363_v62 = vld [vmem:[%s12357_s23 + $0x16a8] sm:$0xf]  ;;  %v10108_v44 = vor.u32 %v11708_v61, %v10107_v18 }
 0x2a3   : > { %6787 = vmatpush.bf16.msra.mxu3 %v9916_v63  ;;  %6749 = vmatpush.bf16.msra.mxu0 %v9516_v6  ;;  %v10235_v63 = vld [vmem:[%s12357_s23 + $0x15a8] sm:$0xf]  ;;  %v11772_v28 = vld [vmem:[%s12357_s23 + $0x16b4] sm:$0xf0]  ;;  %v6543_v57 = vpop.f32.mrf.mxu0 }
 0x2a4   : > { %6762 = vmatpush.bf16.msra.mxu1 %v9644_v48  ;;  %v10491_v33 = vld [vmem:[%s12357_s23 + $0x17a8] sm:$0xf]  ;;  %v11804_v60 = vld [vmem:[%s12357_s23 + $0x17b4] sm:$0xf0]  ;;  %v10236_v6 = vor.u32 %v11740_v27, %v10235_v63  ;;  %v10364_v35 = vor.u32 %v11772_v28, %v10363_v62 }
 0x2a5   : > { %6775 = vmatpush.bf16.msra.mxu2 %v9772_v49  ;;  %v10091_v37 = vld [vmem:[%s12357_s23 + $0x1488] sm:$0xf]  ;;  %v11704_v41 = vld [vmem:[%s12357_s23 + $0x1494] sm:$0xf0]  ;;  %v10492_v49 = vor.u32 %v11804_v60, %v10491_v33 }
 0x2a6   : > { %6750 = vmatmul.bf16.vlgmr.msra.gmra.mxu0 %v12777_v38  ;;  %v10219_v48 = vld [vmem:[%s12357_s23 + $0x1588] sm:$0xf]  ;;  %v11736_v51 = vld [vmem:[%s12357_s23 + $0x1594] sm:$0xf0]  ;;  %v6556_v15 = vpop.f32.mrf.mxu1 }
 0x2a7   : > { %6788 = vmatpush.bf16.msra.mxu3 %v9900_v52  ;;  %6794 = vmatpush.bf16.msrb.mxu0 %v10140_v58  ;;  %v10347_v12 = vld [vmem:[%s12357_s23 + $0x1688] sm:$0xf]  ;;  %v11768_v52 = vld [vmem:[%s12357_s23 + $0x1694] sm:$0xf0]  ;;  %v10220_v4 = vor.u32 %v11736_v51, %v10219_v48 }
 0x2a8   : > { %6807 = vmatpush.bf16.msrb.mxu1 %v10268_v55  ;;  %6776 = vmatmul.bf16.vlgmr.msra.gmra.mxu2 %v12782_v46  ;;  %v10475_v58 = vld [vmem:[%s12357_s23 + $0x1788] sm:$0xf]  ;;  %v11800_v55 = vld [vmem:[%s12357_s23 + $0x1794] sm:$0xf0]  ;;  %v10348_v59 = vor.u32 %v11768_v52, %v10347_v12 }
 0x2a9   : > { %6820 = vmatpush.bf16.msrb.mxu2 %v10396_v54  ;;  %6763 = vmatmul.bf16.vlgmr.msra.gmra.mxu1 %v12784_v47  ;;  %v10092_v54 = vor.u32 %v11704_v41, %v10091_v37  ;;  %v11700_v8 = vld [vmem:[%s12357_s23 + $0x1474] sm:$0xf0]  ;;  %v10203_v53 = vld [vmem:[%s12357_s23 + $0x1568] sm:$0xf]  ;;  %v10476_v23 = vor.u32 %v11800_v55, %v10475_v58 }
 0x2aa   : > { %6789 = vmatmul.bf16.vlgmr.msra.gmra.mxu3 %v12788_v50  ;;  %v11732_v56 = vld [vmem:[%s12357_s23 + $0x1574] sm:$0xf0]  ;;  %v10459_v18 = vld [vmem:[%s12357_s23 + $0x1768] sm:$0xf] }
 0x2ab   : > { %6833 = vmatpush.bf16.msrb.mxu3 %v10524_v2  ;;  %6795 = vmatpush.bf16.msrb.mxu0 %v10124_v19  ;;  %v10075_v2 = vld [vmem:[%s12357_s23 + $0x1468] sm:$0xf]  ;;  %v11796_v61 = vld [vmem:[%s12357_s23 + $0x1774] sm:$0xf0]  ;;  %v6569_v60 = vpop.f32.mrf.mxu2  ;;  %v6545_v58 = vpop.f32.mrf.mxu0 }
 0x2ac   : > { %6808 = vmatpush.bf16.msrb.mxu1 %v10252_v20  ;;  %v10331_v19 = vld [vmem:[%s12357_s23 + $0x1668] sm:$0xf]  ;;  %v11764_v20 = vld [vmem:[%s12357_s23 + $0x1674] sm:$0xf0]  ;;  %v10076_v63 = vor.u32 %v11700_v8, %v10075_v2 }
 0x2ad   : > { %6821 = vmatpush.bf16.msrb.mxu2 %v10380_v25  ;;  %v6557_v25 = vadd.f32 %v6556_v15, %v6543_v57  ;;  %v10332_v27 = vor.u32 %v11764_v20, %v10331_v19  ;;  %v10059_v62 = vld [vmem:[%s12357_s23 + $0x1448] sm:$0xf]  ;;  %v11696_v28 = vld [vmem:[%s12357_s23 + $0x1454] sm:$0xf0]  ;;  %v6582_v48 = vpop.f32.mrf.mxu3 }
 0x2ae   : > { %v10187_v33 = vld [vmem:[%s12357_s23 + $0x1548] sm:$0xf]  ;;  %v11760_v37 = vld [vmem:[%s12357_s23 + $0x1654] sm:$0xf0]  ;;  %v10060_v12 = vor.u32 %v11696_v28, %v10059_v62  ;;  %v6558_v2 = vpop.f32.mrf.mxu1 }
 0x2af   : > { %6834 = vmatpush.bf16.msrb.mxu3 %v10508_v40  ;;  %6796 = vmatpush.bf16.msrb.mxu0 %v10108_v44  ;;  %v10204_v40 = vor.u32 %v11732_v56, %v10203_v53  ;;  %v10460_v44 = vor.u32 %v11796_v61, %v10459_v18  ;;  %v6570_v41 = vadd.f32 %v6569_v60, %v6557_v25  ;;  %v11792_v51 = vld [vmem:[%s12357_s23 + $0x1754] sm:$0xf0]  ;;  %v10043_v57 = vld [vmem:[%s12357_s23 + $0x1428] sm:$0xf] }
 0x2b0   : > { %6809 = vmatpush.bf16.msrb.mxu1 %v10236_v6  ;;  %v11728_v6 = vld [vmem:[%s12357_s23 + $0x1554] sm:$0xf0]  ;;  %v10299_v15 = vld [vmem:[%s12357_s23 + $0x1628] sm:$0xf] }
 0x2b1   : > { %6822 = vmatpush.bf16.msrb.mxu2 %v10364_v35  ;;  %v10315_v35 = vld [vmem:[%s12357_s23 + $0x1648] sm:$0xf]  ;;  %v13883_v52 = vadd.f32 %v6582_v48, %v6570_v41  ;;  %v10188_v55 = vor.u32 %v11728_v6, %v10187_v33  ;;  %v11724_v53 = vld [vmem:[%s12357_s23 + $0x1534] sm:$0xf0] }
 0x2b2   : > { %v10427_v56 = vld [vmem:[%s12357_s23 + $0x1728] sm:$0xf]  ;;  %v11788_v19 = vld [vmem:[%s12357_s23 + $0x1734] sm:$0xf0] }
 0x2b3   : > { %6835 = vmatpush.bf16.msrb.mxu3 %v10492_v49  ;;  %6797 = vmatpush.bf16.msrb.mxu0 %v10092_v54  ;;  %v10443_v49 = vld [vmem:[%s12357_s23 + $0x1748] sm:$0xf]  ;;  %v10316_v54 = vor.u32 %v11760_v37, %v10315_v35  ;;  %v11688_v18 = vld [vmem:[%s12357_s23 + $0x1414] sm:$0xf0]  ;;  %v6571_v28 = vpop.f32.mrf.mxu2  ;;  %v10428_v33 = vor.u32 %v11788_v19, %v10427_v56 }
 0x2b4   : > { %6810 = vmatpush.bf16.msrb.mxu1 %v10220_v4  ;;  %v11692_v4 = vld [vmem:[%s12357_s23 + $0x1434] sm:$0xf0]  ;;  %v10444_v8 = vor.u32 %v11792_v51, %v10443_v49  ;;  %v10027_v25 = vld [vmem:[%s12357_s23 + $0x1408] sm:$0xf] }
 0x2b5   : > { %6823 = vmatpush.bf16.msrb.mxu2 %v10348_v59  ;;  %v10171_v59 = vld [vmem:[%s12357_s23 + $0x1528] sm:$0xf]  ;;  %v10044_v20 = vor.u32 %v11692_v4, %v10043_v57  ;;  %v11752_v60 = vld [vmem:[%s12357_s23 + $0x1614] sm:$0xf0]  ;;  %v6584_v35 = vpop.f32.mrf.mxu3  ;;  %v10028_v49 = vor.u32 %v11688_v18, %v10027_v25 }
 0x2b6   : > { %v10172_v61 = vor.u32 %v11724_v53, %v10171_v59  ;;  %v10283_v62 = vld [vmem:[%s12357_s23 + $0x1608] sm:$0xf]  ;;  %v11784_v6 = vld [vmem:[%s12357_s23 + $0x1714] sm:$0xf0] }
 0x2b7   : > { %6836 = vmatpush.bf16.msrb.mxu3 %v10476_v23  ;;  %6798 = vmatpush.bf16.msrb.mxu0 %v10076_v63  ;;  %v11756_v23 = vld [vmem:[%s12357_s23 + $0x1634] sm:$0xf0]  ;;  %v10651_v37 = vld [vmem:[%s12357_s23 + $0x18e8] sm:$0xf] }
 0x2b8   : > { %6811 = vmatpush.bf16.msrb.mxu1 %v10204_v40  ;;  %v10300_v63 = vor.u32 %v11756_v23, %v10299_v15  ;;  %v10155_v40 = vld [vmem:[%s12357_s23 + $0x1508] sm:$0xf]  ;;  %v11844_v41 = vld [vmem:[%s12357_s23 + $0x18f4] sm:$0xf0] }
 0x2b9   : > { %6824 = vmatpush.bf16.msrb.mxu2 %v10332_v27  ;;  %v11720_v27 = vld [vmem:[%s12357_s23 + $0x1514] sm:$0xf0]  ;;  %v10779_v48 = vld [vmem:[%s12357_s23 + $0x19e8] sm:$0xf]  ;;  %v10652_v2 = vor.u32 %v11844_v41, %v10651_v37 }
 0x2ba   : > { %v11876_v51 = vld [vmem:[%s12357_s23 + $0x19f4] sm:$0xf0]  ;;  %v11035_v57 = vld [vmem:[%s12357_s23 + $0x1be8] sm:$0xf] }
 0x2bb   : > { %6837 = vmatpush.bf16.msrb.mxu3 %v10460_v44  ;;  %6799 = vmatpush.bf16.msrb.mxu0 %v10060_v12  ;;  %v10411_v44 = vld [vmem:[%s12357_s23 + $0x1708] sm:$0xf]  ;;  %v11908_v58 = vld [vmem:[%s12357_s23 + $0x1af4] sm:$0xf0] }
 0x2bc   : > { %6812 = vmatpush.bf16.msrb.mxu1 %v10188_v55  ;;  %v10907_v12 = vld [vmem:[%s12357_s23 + $0x1ae8] sm:$0xf]  ;;  %v10156_v55 = vor.u32 %v11720_v27, %v10155_v40  ;;  %v11940_v4 = vld [vmem:[%s12357_s23 + $0x1bf4] sm:$0xf0]  ;;  %v10412_v59 = vor.u32 %v11784_v6, %v10411_v44 }
 0x2bd   : > { %6825 = vmatpush.bf16.msrb.mxu2 %v10316_v54  ;;  %v10284_v54 = vor.u32 %v11752_v60, %v10283_v62  ;;  %v10908_v53 = vor.u32 %v11908_v58, %v10907_v12  ;;  %v10635_v15 = vld [vmem:[%s12357_s23 + $0x18c8] sm:$0xf]  ;;  %v11840_v23 = vld [vmem:[%s12357_s23 + $0x18d4] sm:$0xf0]  ;;  %v11036_v19 = vor.u32 %v11940_v4, %v11035_v57 }
 0x2be   : > { %v10763_v56 = vld [vmem:[%s12357_s23 + $0x19c8] sm:$0xf]  ;;  %v11904_v18 = vld [vmem:[%s12357_s23 + $0x1ad4] sm:$0xf0]  ;;  %v10636_v40 = vor.u32 %v11840_v23, %v10635_v15 }
 0x2bf   : > { %6838 = vmatpush.bf16.msrb.mxu3 %v10444_v8  ;;  %6800 = vmatpush.bf16.msrb.mxu0 %v10044_v20  ;;  %v10780_v8 = vor.u32 %v11876_v51, %v10779_v48  ;;  %v11872_v20 = vld [vmem:[%s12357_s23 + $0x19d4] sm:$0xf0]  ;;  %v10891_v25 = vld [vmem:[%s12357_s23 + $0x1ac8] sm:$0xf] }
 0x2c0   : > { %6813 = vmatpush.bf16.msrb.mxu1 %v10172_v61  ;;  %v11019_v61 = vld [vmem:[%s12357_s23 + $0x1bc8] sm:$0xf]  ;;  %v10764_v27 = vor.u32 %v11872_v20, %v10763_v56  ;;  %v10892_v62 = vor.u32 %v11904_v18, %v10891_v25  ;;  %v11868_v6 = vld [vmem:[%s12357_s23 + $0x19b4] sm:$0xf0] }
 0x2c1   : > { %6826 = vmatpush.bf16.msrb.mxu2 %v10300_v63  ;;  %v11936_v63 = vld [vmem:[%s12357_s23 + $0x1bd4] sm:$0xf0]  ;;  %v10619_v28 = vld [vmem:[%s12357_s23 + $0x18a8] sm:$0xf] }
 0x2c2   : > { %v10747_v60 = vld [vmem:[%s12357_s23 + $0x19a8] sm:$0xf]  ;;  %v11020_v44 = vor.u32 %v11936_v63, %v11019_v61  ;;  %v11900_v37 = vld [vmem:[%s12357_s23 + $0x1ab4] sm:$0xf0] }
 0x2c3   : > { %6839 = vmatpush.bf16.msrb.mxu3 %v10428_v33  ;;  %6801 = vmatpush.bf16.msrb.mxu0 %v10028_v49  ;;  %v11836_v33 = vld [vmem:[%s12357_s23 + $0x18b4] sm:$0xf0]  ;;  %v10875_v35 = vld [vmem:[%s12357_s23 + $0x1aa8] sm:$0xf]  ;;  %v10748_v51 = vor.u32 %v11868_v6, %v10747_v60  ;;  %v6595_v23 = vpop.f32.mrf.mxu0 }
 0x2c4   : > { %6814 = vmatpush.bf16.msrb.mxu1 %v10156_v55  ;;  %v11003_v41 = vld [vmem:[%s12357_s23 + $0x1ba8] sm:$0xf]  ;;  %v11932_v48 = vld [vmem:[%s12357_s23 + $0x1bb4] sm:$0xf0]  ;;  %v10620_v49 = vor.u32 %v11836_v33, %v10619_v28  ;;  %v10876_v12 = vor.u32 %v11900_v37, %v10875_v35  ;;  %v6596_v61 = vadd.f32 %v6595_v23, %v13883_v52 }
 0x2c5   : > { %6827 = vmatpush.bf16.msrb.mxu2 %v10284_v54  ;;  %v10603_v58 = vld [vmem:[%s12357_s23 + $0x1888] sm:$0xf]  ;;  %v11832_v55 = vld [vmem:[%s12357_s23 + $0x1894] sm:$0xf0]  ;;  %v11004_v57 = vor.u32 %v11932_v48, %v11003_v41 }
 0x2c6   : > { %6802 = vmatmul.bf16.vlgmr.msrb.gmra.mxu0 %v12857_v9  ;;  %v10731_v54 = vld [vmem:[%s12357_s23 + $0x1988] sm:$0xf]  ;;  %v11864_v4 = vld [vmem:[%s12357_s23 + $0x1994] sm:$0xf0]  ;;  %v10604_v15 = vor.u32 %v11832_v55, %v10603_v58  ;;  %v6608_v63 = vpop.f32.mrf.mxu1 }
 0x2c7   : > { %6840 = vmatpush.bf16.msrb.mxu3 %v10412_v59  ;;  %6846 = vmatpush.bf16.msra.mxu0 %v10652_v2  ;;  %v10859_v59 = vld [vmem:[%s12357_s23 + $0x1a88] sm:$0xf]  ;;  %v11896_v2 = vld [vmem:[%s12357_s23 + $0x1a94] sm:$0xf0]  ;;  %v10732_v56 = vor.u32 %v11864_v4, %v10731_v54 }
 0x2c8   : > { %6859 = vmatpush.bf16.msra.mxu1 %v10780_v8  ;;  %6828 = vmatmul.bf16.vlgmr.msrb.gmra.mxu2 %v12862_v13  ;;  %v10987_v8 = vld [vmem:[%s12357_s23 + $0x1b88] sm:$0xf]  ;;  %v11828_v25 = vld [vmem:[%s12357_s23 + $0x1874] sm:$0xf0] }
 0x2c9   : > { %6872 = vmatpush.bf16.msra.mxu2 %v10908_v53  ;;  %6815 = vmatmul.bf16.vlgmr.msrb.gmra.mxu1 %v12864_v14  ;;  %v11928_v53 = vld [vmem:[%s12357_s23 + $0x1b94] sm:$0xf0]  ;;  %v10587_v20 = vld [vmem:[%s12357_s23 + $0x1868] sm:$0xf] }
 0x2ca   : > { %6841 = vmatmul.bf16.vlgmr.msrb.gmra.mxu3 %v12868_v17  ;;  %v10715_v18 = vld [vmem:[%s12357_s23 + $0x1968] sm:$0xf]  ;;  %v11892_v28 = vld [vmem:[%s12357_s23 + $0x1a74] sm:$0xf0]  ;;  %v10588_v6 = vor.u32 %v11828_v25, %v10587_v20 }
 0x2cb   : > { %6885 = vmatpush.bf16.msra.mxu3 %v11036_v19  ;;  %6847 = vmatpush.bf16.msra.mxu0 %v10636_v40  ;;  %v10860_v19 = vor.u32 %v11896_v2, %v10859_v59  ;;  %v10988_v40 = vor.u32 %v11928_v53, %v10987_v8  ;;  %v10971_v33 = vld [vmem:[%s12357_s23 + $0x1b68] sm:$0xf]  ;;  %v11924_v60 = vld [vmem:[%s12357_s23 + $0x1b74] sm:$0xf0]  ;;  %v6597_v53 = vpop.f32.mrf.mxu0 }
 0x2cc   : > { %6860 = vmatpush.bf16.msra.mxu1 %v10764_v27  ;;  %v11860_v27 = vld [vmem:[%s12357_s23 + $0x1974] sm:$0xf0]  ;;  %v10571_v37 = vld [vmem:[%s12357_s23 + $0x1848] sm:$0xf]  ;;  %v7837_v53 = vld [vmem:[%s12357_s23 + $0x2f8] sm:$0xf0] }
 0x2cd   : > { %6873 = vmatpush.bf16.msra.mxu2 %v10892_v62  ;;  %v10843_v62 = vld [vmem:[%s12357_s23 + $0x1a68] sm:$0xf]  ;;  %v10716_v52 = vor.u32 %v11860_v27, %v10715_v18  ;;  %v11824_v41 = vld [vmem:[%s12357_s23 + $0x1854] sm:$0xf0] }
 0x2ce   : > { %v10844_v35 = vor.u32 %v11892_v28, %v10843_v62  ;;  %v10699_v48 = vld [vmem:[%s12357_s23 + $0x1948] sm:$0xf]  ;;  %v11888_v55 = vld [vmem:[%s12357_s23 + $0x1a54] sm:$0xf0]  ;;  %v10572_v2 = vor.u32 %v11824_v41, %v10571_v37  ;;  %v6610_v25 = vpop.f32.mrf.mxu1 }
 0x2cf   : > { %6886 = vmatpush.bf16.msra.mxu3 %v11020_v44  ;;  %6848 = vmatpush.bf16.msra.mxu0 %v10620_v49  ;;  %v6609_v44 = vadd.f32 %v6608_v63, %v6596_v61  ;;  %v6621_v49 = vpop.f32.mrf.mxu2  ;;  %v10827_v58 = vld [vmem:[%s12357_s23 + $0x1a48] sm:$0xf]  ;;  %v11920_v59 = vld [vmem:[%s12357_s23 + $0x1b54] sm:$0xf0] }
 0x2d0   : > { %6861 = vmatpush.bf16.msra.mxu1 %v10748_v51  ;;  %v10972_v51 = vor.u32 %v11924_v60, %v10971_v33  ;;  %v10955_v4 = vld [vmem:[%s12357_s23 + $0x1b48] sm:$0xf]  ;;  %v10828_v23 = vor.u32 %v11888_v55, %v10827_v58  ;;  %v11852_v61 = vld [vmem:[%s12357_s23 + $0x1934] sm:$0xf0]  ;;  %v11074_v55 = vld [vmem:[%s12357_s23 + $0xec] sm:$0xf] }
 0x2d1   : > { %6874 = vmatpush.bf16.msra.mxu2 %v10876_v12  ;;  %v11856_v12 = vld [vmem:[%s12357_s23 + $0x1954] sm:$0xf0]  ;;  %v6622_v54 = vadd.f32 %v6621_v49, %v6609_v44  ;;  %v10683_v20 = vld [vmem:[%s12357_s23 + $0x1928] sm:$0xf]  ;;  %v10956_v18 = vor.u32 %v11920_v59, %v10955_v4  ;;  %v7709_v59 = vld [vmem:[%s12357_s23 + $0x1f8] sm:$0xf0] }
 0x2d2   : > { %v10811_v63 = vld [vmem:[%s12357_s23 + $0x1a28] sm:$0xf]  ;;  %v11916_v62 = vld [vmem:[%s12357_s23 + $0x1b34] sm:$0xf0]  ;;  %v10684_v44 = vor.u32 %v11852_v61, %v10683_v20 }
 0x2d3   : > { %6887 = vmatpush.bf16.msra.mxu3 %v11004_v57  ;;  %6849 = vmatpush.bf16.msra.mxu0 %v10604_v15  ;;  %v6634_v57 = vpop.f32.mrf.mxu3  ;;  %v10700_v15 = vor.u32 %v11856_v12, %v10699_v48  ;;  %v10939_v27 = vld [vmem:[%s12357_s23 + $0x1b28] sm:$0xf]  ;;  %v11816_v60 = vld [vmem:[%s12357_s23 + $0x1814] sm:$0xf0] }
 0x2d4   : > { %6862 = vmatpush.bf16.msra.mxu1 %v10732_v56  ;;  %v13954_v8 = vadd.f32 %v6634_v57, %v6622_v54  ;;  %v10555_v56 = vld [vmem:[%s12357_s23 + $0x1828] sm:$0xf]  ;;  %v10940_v48 = vor.u32 %v11916_v62, %v10939_v27  ;;  %v11880_v49 = vld [vmem:[%s12357_s23 + $0x1a14] sm:$0xf0]  ;;  %v7581_v54 = vld [vmem:[%s12357_s23 + $0xf8] sm:$0xf0] }
 0x2d5   : > { %6875 = vmatpush.bf16.msra.mxu2 %v10860_v19  ;;  %v11820_v19 = vld [vmem:[%s12357_s23 + $0x1834] sm:$0xf0]  ;;  %v10539_v33 = vld [vmem:[%s12357_s23 + $0x1808] sm:$0xf]  ;;  %v11106_v57 = vld [vmem:[%s12357_s23 + $0x1ec] sm:$0xf]  ;;  %v7584_v25 = vor.u32 %v11074_v55, %v7581_v54 }
 0x2d6   : > { %v10556_v28 = vor.u32 %v11820_v19, %v10555_v56  ;;  %v10795_v37 = vld [vmem:[%s12357_s23 + $0x1a08] sm:$0xf]  ;;  %v11912_v12 = vld [vmem:[%s12357_s23 + $0x1b14] sm:$0xf0]  ;;  %v10540_v4 = vor.u32 %v11816_v60, %v10539_v33  ;;  %v11170_v56 = vld [vmem:[%s12357_s23 + $0x3ec] sm:$0xf] }
 0x2d7   : > { %6888 = vmatpush.bf16.msra.mxu3 %v10988_v40  ;;  %6850 = vmatpush.bf16.msra.mxu0 %v10588_v6  ;;  %v11884_v40 = vld [vmem:[%s12357_s23 + $0x1a34] sm:$0xf0]  ;;  %v6623_v41 = vpop.f32.mrf.mxu2  ;;  %v7965_v19 = vld [vmem:[%s12357_s23 + $0x3f8] sm:$0xf0]  ;;  %v11102_v27 = vld [vmem:[%s12357_s23 + $0x1cc] sm:$0xf] }
 0x2d8   : > { %6863 = vmatpush.bf16.msra.mxu1 %v10716_v52  ;;  %v10812_v6 = vor.u32 %v11884_v40, %v10811_v63  ;;  %v10667_v52 = vld [vmem:[%s12357_s23 + $0x1908] sm:$0xf]  ;;  %v11070_v63 = vld [vmem:[%s12357_s23 + $0xcc] sm:$0xf]  ;;  %v7565_v40 = vld [vmem:[%s12357_s23 + $0xd8] sm:$0xf0]  ;;  %v7968_v62 = vor.u32 %v11170_v56, %v7965_v19 }
 0x2d9   : > { %6876 = vmatpush.bf16.msra.mxu2 %v10844_v35  ;;  %v11848_v35 = vld [vmem:[%s12357_s23 + $0x1914] sm:$0xf0]  ;;  %v11134_v33 = vld [vmem:[%s12357_s23 + $0x2cc] sm:$0xf]  ;;  %v7821_v60 = vld [vmem:[%s12357_s23 + $0x2d8] sm:$0xf0] }
 0x2da   : > { %v11066_v41 = vld [vmem:[%s12357_s23 + $0xac] sm:$0xf]  ;;  %v7805_v55 = vld [vmem:[%s12357_s23 + $0x2b8] sm:$0xf0] }
 0x2db   : > { %6889 = vmatpush.bf16.msra.mxu3 %v10972_v51  ;;  %6851 = vmatpush.bf16.msra.mxu0 %v10572_v2  ;;  %v10923_v51 = vld [vmem:[%s12357_s23 + $0x1b08] sm:$0xf]  ;;  %v6636_v58 = vpop.f32.mrf.mxu3  ;;  %v11138_v2 = vld [vmem:[%s12357_s23 + $0x2ec] sm:$0xf]  ;;  %v7661_v19 = vld [vmem:[%s12357_s23 + $0x198] sm:$0xf0] }
 0x2dc   : > { %6864 = vmatpush.bf16.msra.mxu1 %v10700_v15  ;;  %v10668_v15 = vor.u32 %v11848_v35, %v10667_v52  ;;  %v10924_v20 = vor.u32 %v11912_v12, %v10923_v51  ;;  %v7840_v61 = vor.u32 %v11138_v2, %v7837_v53  ;;  %v7568_v52 = vor.u32 %v11070_v63, %v7565_v40  ;;  %v7677_v12 = vld [vmem:[%s12357_s23 + $0x1b8] sm:$0xf0]  ;;  %v11130_v58 = vld [vmem:[%s12357_s23 + $0x2ac] sm:$0xf] }
 0x2dd   : > { %6877 = vmatpush.bf16.msra.mxu2 %v10828_v23  ;;  %v10796_v23 = vor.u32 %v11880_v49, %v10795_v37  ;;  %v7824_v37 = vor.u32 %v11134_v33, %v7821_v60  ;;  %v11098_v49 = vld [vmem:[%s12357_s23 + $0x1ac] sm:$0xf]  ;;  %v7808_v2 = vor.u32 %v11130_v58, %v7805_v55  ;;  %v7917_v63 = vld [vmem:[%s12357_s23 + $0x398] sm:$0xf0] }
 0x2de   : > { %v11162_v54 = vld [vmem:[%s12357_s23 + $0x3ac] sm:$0xf] }
 0x2df   : > { %6890 = vmatpush.bf16.msra.mxu3 %v10956_v18  ;;  %6852 = vmatpush.bf16.msra.mxu0 %v10556_v28  ;;  %v7712_v18 = vor.u32 %v11106_v57, %v7709_v59  ;;  %v7693_v28 = vld [vmem:[%s12357_s23 + $0x1d8] sm:$0xf0]  ;;  %v7680_v59 = vor.u32 %v11098_v49, %v7677_v12  ;;  %v11062_v53 = vld [vmem:[%s12357_s23 + $0x8c] sm:$0xf] }
 0x2e0   : > { %6865 = vmatpush.bf16.msra.mxu1 %v10684_v44  ;;  %v11166_v44 = vld [vmem:[%s12357_s23 + $0x3cc] sm:$0xf]  ;;  %v7696_v35 = vor.u32 %v11102_v27, %v7693_v28  ;;  %v7933_v57 = vld [vmem:[%s12357_s23 + $0x3b8] sm:$0xf0] }
 0x2e1   : > { %6878 = vmatpush.bf16.msra.mxu2 %v10812_v6  ;;  %v7949_v6 = vld [vmem:[%s12357_s23 + $0x3d8] sm:$0xf0]  ;;  %v7936_v56 = vor.u32 %v11162_v54, %v7933_v57  ;;  %v11058_v60 = vld [vmem:[%s12357_s23 + $0x6c] sm:$0xf] }
 0x2e2   : > { %v7952_v51 = vor.u32 %v11166_v44, %v7949_v6  ;;  %v7517_v44 = vld [vmem:[%s12357_s23 + $0x78] sm:$0xf0]  ;;  %v11090_v6 = vld [vmem:[%s12357_s23 + $0x16c] sm:$0xf] }
 0x2e3   : > { %6891 = vmatpush.bf16.msra.mxu3 %v10940_v48  ;;  %6853 = vmatpush.bf16.msra.mxu0 %v10540_v4  ;;  %v7549_v48 = vld [vmem:[%s12357_s23 + $0xb8] sm:$0xf0]  ;;  %v11054_v55 = vld [vmem:[%s12357_s23 + $0x4c] sm:$0xf] }
 0x2e4   : > { %6866 = vmatpush.bf16.msra.mxu1 %v10668_v15  ;;  %v7552_v4 = vor.u32 %v11066_v41, %v7549_v48  ;;  %v7533_v15 = vld [vmem:[%s12357_s23 + $0x98] sm:$0xf0]  ;;  %v11122_v41 = vld [vmem:[%s12357_s23 + $0x26c] sm:$0xf] }
 0x2e5   : > { %6879 = vmatpush.bf16.msra.mxu2 %v10796_v23  ;;  %v11094_v23 = vld [vmem:[%s12357_s23 + $0x18c] sm:$0xf]  ;;  %v7536_v27 = vor.u32 %v11062_v53, %v7533_v15  ;;  %v7901_v49 = vld [vmem:[%s12357_s23 + $0x378] sm:$0xf0] }
 0x2e6   : > { %6854 = vmatmul.bf16.vlgmr.msra.gmra.mxu0 %v12938_v3  ;;  %v7664_v28 = vor.u32 %v11094_v23, %v7661_v19  ;;  %v11154_v48 = vld [vmem:[%s12357_s23 + $0x36c] sm:$0xf]  ;;  %v7501_v54 = vld [vmem:[%s12357_s23 + $0x58] sm:$0xf0] }
 0x2e7   : > { %6892 = vmatpush.bf16.msra.mxu3 %v10924_v20  ;;  %6898 = vmatpush.bf16.msrb.mxu0 %v7584_v25  ;;  %v11126_v20 = vld [vmem:[%s12357_s23 + $0x28c] sm:$0xf]  ;;  %v7789_v25 = vld [vmem:[%s12357_s23 + $0x298] sm:$0xf0] }
 0x2e8   : > { %6911 = vmatpush.bf16.msrb.mxu1 %v7712_v18  ;;  %6880 = vmatmul.bf16.vlgmr.msra.gmra.mxu2 %v12943_v10  ;;  %v6647_v18 = vpop.f32.mrf.mxu0  ;;  %v7792_v33 = vor.u32 %v11126_v20, %v7789_v25  ;;  %v11086_v57 = vld [vmem:[%s12357_s23 + $0x14c] sm:$0xf]  ;;  %v7757_v15 = vld [vmem:[%s12357_s23 + $0x258] sm:$0xf0] }
 0x2e9   : > { %6924 = vmatpush.bf16.msrb.mxu2 %v7840_v61  ;;  %6867 = vmatmul.bf16.vlgmr.msra.gmra.mxu1 %v12945_v11  ;;  %v11158_v61 = vld [vmem:[%s12357_s23 + $0x38c] sm:$0xf]  ;;  %v6648_v40 = vadd.f32 %v6647_v18, %v13954_v8  ;;  %v7773_v8 = vld [vmem:[%s12357_s23 + $0x278] sm:$0xf0]  ;;  %v7504_v18 = vor.u32 %v11054_v55, %v7501_v54 }
 0x2ea   : > { %6893 = vmatmul.bf16.vlgmr.msra.gmra.mxu3 %v12949_v16  ;;  %v7776_v58 = vor.u32 %v11122_v41, %v7773_v8  ;;  %v11118_v53 = vld [vmem:[%s12357_s23 + $0x24c] sm:$0xf]  ;;  %v7885_v20 = vld [vmem:[%s12357_s23 + $0x358] sm:$0xf0] }
 0x2eb   : > { %6937 = vmatpush.bf16.msrb.mxu3 %v7968_v62  ;;  %6899 = vmatpush.bf16.msrb.mxu0 %v7568_v52  ;;  %v6660_v62 = vpop.f32.mrf.mxu1  ;;  %v7920_v52 = vor.u32 %v11158_v61, %v7917_v63  ;;  %v11150_v19 = vld [vmem:[%s12357_s23 + $0x34c] sm:$0xf] }
 0x2ec   : > { %6912 = vmatpush.bf16.msrb.mxu1 %v7696_v35  ;;  %v6661_v35 = vadd.f32 %v6660_v62, %v6648_v40  ;;  %v11050_v62 = vld [vmem:[%s12357_s23 + $0x2c] sm:$0xf] }
 0x2ed   : > { %6925 = vmatpush.bf16.msrb.mxu2 %v7824_v37  ;;  %v7645_v37 = vld [vmem:[%s12357_s23 + $0x178] sm:$0xf0]  ;;  %v11046_v8 = vld [vmem:[%s12357_s23 + $0xc] sm:$0xf] }
 0x2ee   : > { %v7648_v12 = vor.u32 %v11090_v6, %v7645_v37  ;;  %v11114_v6 = vld [vmem:[%s12357_s23 + $0x22c] sm:$0xf]  ;;  %v7869_v37 = vld [vmem:[%s12357_s23 + $0x338] sm:$0xf0] }
 0x2ef   : > { %6938 = vmatpush.bf16.msrb.mxu3 %v7952_v51  ;;  %6900 = vmatpush.bf16.msrb.mxu0 %v7552_v4  ;;  %v7520_v51 = vor.u32 %v11058_v60, %v7517_v44  ;;  %v7904_v4 = vor.u32 %v11154_v48, %v7901_v49  ;;  %v7888_v60 = vor.u32 %v11150_v19, %v7885_v20  ;;  %v7613_v44 = vld [vmem:[%s12357_s23 + $0x138] sm:$0xf0]  ;;  %v11110_v55 = vld [vmem:[%s12357_s23 + $0x20c] sm:$0xf] }
 0x2f0   : > { %6913 = vmatpush.bf16.msrb.mxu1 %v7680_v59  ;;  %v6673_v59 = vpop.f32.mrf.mxu2  ;;  %v6649_v25 = vpop.f32.mrf.mxu0  ;;  %v7469_v48 = vld [vmem:[%s12357_s23 + $0x18] sm:$0xf0] }
 0x2f1   : > { %6926 = vmatpush.bf16.msrb.mxu2 %v7808_v2  ;;  %v7629_v2 = vld [vmem:[%s12357_s23 + $0x158] sm:$0xf0]  ;;  %v6674_v23 = vadd.f32 %v6673_v59, %v6661_v35  ;;  %v11146_v35 = vld [vmem:[%s12357_s23 + $0x32c] sm:$0xf]  ;;  %v7472_v19 = vor.u32 %v11046_v8, %v7469_v48 }
 0x2f2   : > { %v7632_v40 = vor.u32 %v11086_v57, %v7629_v2  ;;  %v7872_v54 = vor.u32 %v11146_v35, %v7869_v37  ;;  %v7725_v57 = vld [vmem:[%s12357_s23 + $0x218] sm:$0xf0]  ;;  %v11266_v25 = vld [vmem:[%s12357_s23 + $0x6ec] sm:$0xf] }
 0x2f3   : > { %6939 = vmatpush.bf16.msrb.mxu3 %v7936_v56  ;;  %6901 = vmatpush.bf16.msrb.mxu0 %v7536_v27  ;;  %v6686_v56 = vpop.f32.mrf.mxu3  ;;  %v6662_v61 = vpop.f32.mrf.mxu1  ;;  %v7760_v27 = vor.u32 %v11118_v53, %v7757_v15  ;;  %v7853_v59 = vld [vmem:[%s12357_s23 + $0x318] sm:$0xf0]  ;;  %v11202_v53 = vld [vmem:[%s12357_s23 + $0x4ec] sm:$0xf] }
 0x2f4   : > { %6914 = vmatpush.bf16.msrb.mxu1 %v7664_v28  ;;  %v14025_v63 = vadd.f32 %v6686_v56, %v6674_v23  ;;  %v7485_v28 = vld [vmem:[%s12357_s23 + $0x38] sm:$0xf0]  ;;  %v11234_v23 = vld [vmem:[%s12357_s23 + $0x5ec] sm:$0xf] }
 0x2f5   : > { %6927 = vmatpush.bf16.msrb.mxu2 %v7792_v33  ;;  %v11082_v33 = vld [vmem:[%s12357_s23 + $0x12c] sm:$0xf]  ;;  %v7488_v41 = vor.u32 %v11050_v62, %v7485_v28  ;;  %v8093_v15 = vld [vmem:[%s12357_s23 + $0x4f8] sm:$0xf0] }
 0x2f6   : > { %v7616_v49 = vor.u32 %v11082_v33, %v7613_v44  ;;  %v8221_v20 = vld [vmem:[%s12357_s23 + $0x5f8] sm:$0xf0]  ;;  %v8096_v33 = vor.u32 %v11202_v53, %v8093_v15  ;;  %v11230_v35 = vld [vmem:[%s12357_s23 + $0x5cc] sm:$0xf] }
 0x2f7   : > { %6940 = vmatpush.bf16.msrb.mxu3 %v7920_v52  ;;  %6902 = vmatpush.bf16.msrb.mxu0 %v7520_v51  ;;  %v7741_v52 = vld [vmem:[%s12357_s23 + $0x238] sm:$0xf0]  ;;  %v11262_v8 = vld [vmem:[%s12357_s23 + $0x6cc] sm:$0xf] }
 0x2f8   : > { %6915 = vmatpush.bf16.msrb.mxu1 %v7648_v12  ;;  %v7744_v51 = vor.u32 %v11114_v6, %v7741_v52  ;;  %v11078_v12 = vld [vmem:[%s12357_s23 + $0x10c] sm:$0xf]  ;;  %v6675_v2 = vpop.f32.mrf.mxu2  ;;  %v8477_v62 = vld [vmem:[%s12357_s23 + $0x7f8] sm:$0xf0] }
 0x2f9   : > { %6928 = vmatpush.bf16.msrb.mxu2 %v7776_v58  ;;  %v7597_v58 = vld [vmem:[%s12357_s23 + $0x118] sm:$0xf0]  ;;  %v11198_v6 = vld [vmem:[%s12357_s23 + $0x4cc] sm:$0xf] }
 0x2fa   : > { %v7600_v61 = vor.u32 %v11078_v12, %v7597_v58  ;;  %v8077_v52 = vld [vmem:[%s12357_s23 + $0x4d8] sm:$0xf0]  ;;  %v11258_v53 = vld [vmem:[%s12357_s23 + $0x6ac] sm:$0xf] }
 0x2fb   : > { %6941 = vmatpush.bf16.msrb.mxu3 %v7904_v4  ;;  %6903 = vmatpush.bf16.msrb.mxu0 %v7504_v18  ;;  %v11142_v4 = vld [vmem:[%s12357_s23 + $0x30c] sm:$0xf]  ;;  %v6688_v56 = vpop.f32.mrf.mxu3  ;;  %v8349_v18 = vld [vmem:[%s12357_s23 + $0x6f8] sm:$0xf0]  ;;  %v8080_v12 = vor.u32 %v11198_v6, %v8077_v52 }
 0x2fc   : > { %6916 = vmatpush.bf16.msrb.mxu1 %v7632_v40  ;;  %v7728_v40 = vor.u32 %v11110_v55, %v7725_v57  ;;  %v7856_v28 = vor.u32 %v11142_v4, %v7853_v59  ;;  %v8352_v44 = vor.u32 %v11266_v25, %v8349_v18  ;;  %v8333_v48 = vld [vmem:[%s12357_s23 + $0x6d8] sm:$0xf0]  ;;  %v11226_v4 = vld [vmem:[%s12357_s23 + $0x5ac] sm:$0xf] }
 0x2fd   : > { %6929 = vmatpush.bf16.msrb.mxu2 %v7760_v27  ;;  %v11298_v27 = vld [vmem:[%s12357_s23 + $0x7ec] sm:$0xf]  ;;  %v8336_v55 = vor.u32 %v11262_v8, %v8333_v48  ;;  %v8061_v57 = vld [vmem:[%s12357_s23 + $0x4b8] sm:$0xf0] }
 0x2fe   : > { %v8480_v37 = vor.u32 %v11298_v27, %v8477_v62  ;;  %v8189_v2 = vld [vmem:[%s12357_s23 + $0x5b8] sm:$0xf0] }
 0x2ff   : > { %6942 = vmatpush.bf16.msrb.mxu3 %v7888_v60  ;;  %6904 = vmatpush.bf16.msrb.mxu0 %v7488_v41  ;;  %v8224_v60 = vor.u32 %v11234_v23, %v8221_v20  ;;  %v8205_v41 = vld [vmem:[%s12357_s23 + $0x5d8] sm:$0xf0]  ;;  %v11290_v23 = vld [vmem:[%s12357_s23 + $0x7ac] sm:$0xf]  ;;  %v8192_v20 = vor.u32 %v11226_v4, %v8189_v2 }
 0x300   : > { %6917 = vmatpush.bf16.msrb.mxu1 %v7616_v49  ;;  %v11294_v49 = vld [vmem:[%s12357_s23 + $0x7cc] sm:$0xf]  ;;  %v8208_v58 = vor.u32 %v11230_v35, %v8205_v41  ;;  %v8317_v15 = vld [vmem:[%s12357_s23 + $0x6b8] sm:$0xf0] }
 0x301   : > { %6930 = vmatpush.bf16.msrb.mxu2 %v7744_v51  ;;  %v8461_v51 = vld [vmem:[%s12357_s23 + $0x7d8] sm:$0xf0]  ;;  %v8320_v25 = vor.u32 %v11258_v53, %v8317_v15  ;;  %v11186_v35 = vld [vmem:[%s12357_s23 + $0x46c] sm:$0xf] }
 0x302   : > { %v8464_v59 = vor.u32 %v11294_v49, %v8461_v51  ;;  %v8445_v56 = vld [vmem:[%s12357_s23 + $0x7b8] sm:$0xf0]  ;;  %v11218_v41 = vld [vmem:[%s12357_s23 + $0x56c] sm:$0xf] }
 0x303   : > { %6943 = vmatpush.bf16.msrb.mxu3 %v7872_v54  ;;  %6905 = vmatpush.bf16.msrb.mxu0 %v7472_v19  ;;  %v11194_v54 = vld [vmem:[%s12357_s23 + $0x4ac] sm:$0xf]  ;;  %v8045_v18 = vld [vmem:[%s12357_s23 + $0x498] sm:$0xf0]  ;;  %v6699_v62 = vpop.f32.mrf.mxu0 }
 0x304   : > { %6918 = vmatpush.bf16.msrb.mxu1 %v7600_v61  ;;  %v8064_v19 = vor.u32 %v11194_v54, %v8061_v57  ;;  %v11222_v61 = vld [vmem:[%s12357_s23 + $0x58c] sm:$0xf]  ;;  %v8301_v27 = vld [vmem:[%s12357_s23 + $0x698] sm:$0xf0] }
 0x305   : > { %6931 = vmatpush.bf16.msrb.mxu2 %v7728_v40  ;;  %v8448_v40 = vor.u32 %v11290_v23, %v8445_v56  ;;  %v8157_v49 = vld [vmem:[%s12357_s23 + $0x578] sm:$0xf0]  ;;  %v11250_v51 = vld [vmem:[%s12357_s23 + $0x66c] sm:$0xf] }
 0x306   : > { %6906 = vmatmul.bf16.vlgmr.msrb.gmra.mxu0 %v12491_v21  ;;  %v8173_v21 = vld [vmem:[%s12357_s23 + $0x598] sm:$0xf0]  ;;  %v8160_v54 = vor.u32 %v11218_v41, %v8157_v49  ;;  %v11182_v4 = vld [vmem:[%s12357_s23 + $0x44c] sm:$0xf] }
 0x307   : > { %6944 = vmatpush.bf16.msrb.mxu3 %v7856_v28  ;;  %6950 = vmatpush.bf16.msra.mxu0 %v8096_v33  ;;  %v11286_v28 = vld [vmem:[%s12357_s23 + $0x78c] sm:$0xf]  ;;  %v8429_v33 = vld [vmem:[%s12357_s23 + $0x798] sm:$0xf0]  ;;  %v8176_v6 = vor.u32 %v11222_v61, %v8173_v21 }
 0x308   : > { %6963 = vmatpush.bf16.msra.mxu1 %v8224_v60  ;;  %6932 = vmatmul.bf16.vlgmr.msrb.gmra.mxu2 %v12477_v5  ;;  %v11190_v5 = vld [vmem:[%s12357_s23 + $0x48c] sm:$0xf]  ;;  %v8432_v8 = vor.u32 %v11286_v28, %v8429_v33  ;;  %v8141_v23 = vld [vmem:[%s12357_s23 + $0x558] sm:$0xf0] }
 0x309   : > { %6976 = vmatpush.bf16.msra.mxu2 %v8352_v44  ;;  %6919 = vmatmul.bf16.vlgmr.msrb.gmra.mxu1 %v12494_v22  ;;  %v6700_v22 = vadd.f32 %v6699_v62, %v14025_v63  ;;  %v8048_v60 = vor.u32 %v11190_v5, %v8045_v18  ;;  %v6712_v44 = vpop.f32.mrf.mxu1  ;;  %v8285_v63 = vld [vmem:[%s12357_s23 + $0x678] sm:$0xf0]  ;;  %v11214_v2 = vld [vmem:[%s12357_s23 + $0x54c] sm:$0xf] }
 0x30a   : > { %6945 = vmatmul.bf16.vlgmr.msrb.gmra.mxu3 %v12480_v7  ;;  %v11254_v7 = vld [vmem:[%s12357_s23 + $0x68c] sm:$0xf]  ;;  %v8288_v57 = vor.u32 %v11250_v51, %v8285_v63  ;;  %v8397_v18 = vld [vmem:[%s12357_s23 + $0x758] sm:$0xf0] }
 0x30b   : > { %6989 = vmatpush.bf16.msra.mxu3 %v8480_v37  ;;  %6951 = vmatpush.bf16.msra.mxu0 %v8080_v12  ;;  %v8304_v52 = vor.u32 %v11254_v7, %v8301_v27  ;;  %v8029_v37 = vld [vmem:[%s12357_s23 + $0x478] sm:$0xf0]  ;;  %v6713_v48 = vadd.f32 %v6712_v44, %v6700_v22  ;;  %v11282_v12 = vld [vmem:[%s12357_s23 + $0x76c] sm:$0xf]  ;;  %v6725_v15 = vpop.f32.mrf.mxu2  ;;  %v6701_v61 = vpop.f32.mrf.mxu0  ;;  %v8144_v27 = vor.u32 %v11214_v2, %v8141_v23 }
 0x30c   : > { %6964 = vmatpush.bf16.msra.mxu1 %v8208_v58  ;;  %v8413_v58 = vld [vmem:[%s12357_s23 + $0x778] sm:$0xf0]  ;;  %v11246_v56 = vld [vmem:[%s12357_s23 + $0x64c] sm:$0xf] }
 0x30d   : > { %6977 = vmatpush.bf16.msra.mxu2 %v8336_v55  ;;  %v8032_v55 = vor.u32 %v11186_v35, %v8029_v37  ;;  %v8416_v53 = vor.u32 %v11282_v12, %v8413_v58  ;;  %v11278_v5 = vld [vmem:[%s12357_s23 + $0x74c] sm:$0xf]  ;;  %v7997_v33 = vld [vmem:[%s12357_s23 + $0x438] sm:$0xf0] }
 0x30e   : > { %v11178_v28 = vld [vmem:[%s12357_s23 + $0x42c] sm:$0xf]  ;;  %v8125_v44 = vld [vmem:[%s12357_s23 + $0x538] sm:$0xf0] }
 0x30f   : > { %6990 = vmatpush.bf16.msra.mxu3 %v8464_v59  ;;  %6952 = vmatpush.bf16.msra.mxu0 %v8064_v19  ;;  %v8013_v59 = vld [vmem:[%s12357_s23 + $0x458] sm:$0xf0]  ;;  %v11210_v22 = vld [vmem:[%s12357_s23 + $0x52c] sm:$0xf]  ;;  %v8000_v41 = vor.u32 %v11178_v28, %v7997_v33 }
 0x310   : > { %6965 = vmatpush.bf16.msra.mxu1 %v8192_v20  ;;  %v8269_v19 = vld [vmem:[%s12357_s23 + $0x658] sm:$0xf0]  ;;  %v6726_v20 = vadd.f32 %v6725_v15, %v6713_v48  ;;  %v11274_v35 = vld [vmem:[%s12357_s23 + $0x72c] sm:$0xf]  ;;  %v8128_v49 = vor.u32 %v11210_v22, %v8125_v44 }
 0x311   : > { %6978 = vmatpush.bf16.msra.mxu2 %v8320_v25  ;;  %v6738_v25 = vpop.f32.mrf.mxu3  ;;  %v6714_v21 = vpop.f32.mrf.mxu1  ;;  %v8272_v62 = vor.u32 %v11246_v56, %v8269_v19  ;;  %v8381_v37 = vld [vmem:[%s12357_s23 + $0x738] sm:$0xf0]  ;;  %v11206_v63 = vld [vmem:[%s12357_s23 + $0x50c] sm:$0xf] }
 0x312   : > { %v14096_v7 = vadd.f32 %v6738_v25, %v6726_v20  ;;  %v7981_v48 = vld [vmem:[%s12357_s23 + $0x418] sm:$0xf0]  ;;  %v11238_v58 = vld [vmem:[%s12357_s23 + $0x60c] sm:$0xf] }
 0x313   : > { %6991 = vmatpush.bf16.msra.mxu3 %v8448_v40  ;;  %6953 = vmatpush.bf16.msra.mxu0 %v8048_v60  ;;  %v8016_v40 = vor.u32 %v11182_v4, %v8013_v59  ;;  %v8400_v60 = vor.u32 %v11278_v5, %v8397_v18  ;;  %v8109_v12 = vld [vmem:[%s12357_s23 + $0x518] sm:$0xf0]  ;;  %v6727_v59 = vpop.f32.mrf.mxu2  ;;  %v11330_v2 = vld [vmem:[%s12357_s23 + $0x8ec] sm:$0xf] }
 0x314   : > { %6966 = vmatpush.bf16.msra.mxu1 %v8176_v6  ;;  %v11242_v6 = vld [vmem:[%s12357_s23 + $0x62c] sm:$0xf]  ;;  %v8365_v4 = vld [vmem:[%s12357_s23 + $0x718] sm:$0xf0]  ;;  %v8112_v5 = vor.u32 %v11206_v63, %v8109_v12 }
 0x315   : > { %6979 = vmatpush.bf16.msra.mxu2 %v8304_v52  ;;  %v8253_v52 = vld [vmem:[%s12357_s23 + $0x638] sm:$0xf0]  ;;  %v11362_v15 = vld [vmem:[%s12357_s23 + $0x9ec] sm:$0xf] }
 0x316   : > { %v8256_v51 = vor.u32 %v11242_v6, %v8253_v52  ;;  %v8733_v19 = vld [vmem:[%s12357_s23 + $0x9f8] sm:$0xf0]  ;;  %v11394_v20 = vld [vmem:[%s12357_s23 + $0xaec] sm:$0xf] }
 0x317   : > { %6992 = vmatpush.bf16.msra.mxu3 %v8432_v8  ;;  %6954 = vmatpush.bf16.msra.mxu0 %v8032_v55  ;;  %v11174_v8 = vld [vmem:[%s12357_s23 + $0x40c] sm:$0xf]  ;;  %v8384_v55 = vor.u32 %v11274_v35, %v8381_v37  ;;  %v8861_v25 = vld [vmem:[%s12357_s23 + $0xaf8] sm:$0xf0] }
 0x318   : > { %6967 = vmatpush.bf16.msra.mxu1 %v8160_v54  ;;  %v8237_v54 = vld [vmem:[%s12357_s23 + $0x618] sm:$0xf0]  ;;  %v7984_v56 = vor.u32 %v11174_v8, %v7981_v48  ;;  %v11426_v61 = vld [vmem:[%s12357_s23 + $0xbec] sm:$0xf]  ;;  %v8864_v28 = vor.u32 %v11394_v20, %v8861_v25 }
 0x319   : > { %6980 = vmatpush.bf16.msra.mxu2 %v8288_v57  ;;  %v11270_v57 = vld [vmem:[%s12357_s23 + $0x70c] sm:$0xf]  ;;  %v6740_v23 = vpop.f32.mrf.mxu3  ;;  %v8240_v18 = vor.u32 %v11238_v58, %v8237_v54  ;;  %v8589_v22 = vld [vmem:[%s12357_s23 + $0x8d8] sm:$0xf0] }
 0x31a   : > { %v8368_v21 = vor.u32 %v11270_v57, %v8365_v4  ;;  %v11326_v33 = vld [vmem:[%s12357_s23 + $0x8cc] sm:$0xf]  ;;  %v8717_v6 = vld [vmem:[%s12357_s23 + $0x9d8] sm:$0xf0] }
 0x31b   : > { %6993 = vmatpush.bf16.msra.mxu3 %v8416_v53  ;;  %6955 = vmatpush.bf16.msra.mxu0 %v8016_v40  ;;  %v8605_v53 = vld [vmem:[%s12357_s23 + $0x8f8] sm:$0xf0]  ;;  %v11390_v52 = vld [vmem:[%s12357_s23 + $0xacc] sm:$0xf]  ;;  %v8592_v8 = vor.u32 %v11326_v33, %v8589_v22 }
 0x31c   : > { %6968 = vmatpush.bf16.msra.mxu1 %v8144_v27  ;;  %v8989_v40 = vld [vmem:[%s12357_s23 + $0xbf8] sm:$0xf0]  ;;  %v8608_v27 = vor.u32 %v11330_v2, %v8605_v53  ;;  %v11422_v37 = vld [vmem:[%s12357_s23 + $0xbcc] sm:$0xf] }
 0x31d   : > { %6981 = vmatpush.bf16.msra.mxu2 %v8272_v62  ;;  %v8736_v62 = vor.u32 %v11362_v15, %v8733_v19  ;;  %v8992_v44 = vor.u32 %v11426_v61, %v8989_v40  ;;  %v8845_v35 = vld [vmem:[%s12357_s23 + $0xad8] sm:$0xf0]  ;;  %v11354_v12 = vld [vmem:[%s12357_s23 + $0x9ac] sm:$0xf] }
 0x31e   : > { %v8573_v63 = vld [vmem:[%s12357_s23 + $0x8b8] sm:$0xf0]  ;;  %v11386_v54 = vld [vmem:[%s12357_s23 + $0xaac] sm:$0xf] }
 0x31f   : > { %6994 = vmatpush.bf16.msra.mxu3 %v8400_v60  ;;  %6956 = vmatpush.bf16.msra.mxu0 %v8000_v41  ;;  %v11358_v60 = vld [vmem:[%s12357_s23 + $0x9cc] sm:$0xf]  ;;  %v8973_v41 = vld [vmem:[%s12357_s23 + $0xbd8] sm:$0xf0] }
 0x320   : > { %6969 = vmatpush.bf16.msra.mxu1 %v8128_v49  ;;  %v8720_v48 = vor.u32 %v11358_v60, %v8717_v6  ;;  %v8848_v49 = vor.u32 %v11390_v52, %v8845_v35  ;;  %v8976_v58 = vor.u32 %v11422_v37, %v8973_v41  ;;  %v8829_v57 = vld [vmem:[%s12357_s23 + $0xab8] sm:$0xf0]  ;;  %v11418_v4 = vld [vmem:[%s12357_s23 + $0xbac] sm:$0xf] }
 0x321   : > { %6982 = vmatpush.bf16.msra.mxu2 %v8256_v51  ;;  %v11322_v51 = vld [vmem:[%s12357_s23 + $0x8ac] sm:$0xf]  ;;  %v8957_v59 = vld [vmem:[%s12357_s23 + $0xbb8] sm:$0xf0]  ;;  %v8832_v53 = vor.u32 %v11386_v54, %v8829_v57 }
 0x322   : > { %v8576_v2 = vor.u32 %v11322_v51, %v8573_v63  ;;  %v11318_v15 = vld [vmem:[%s12357_s23 + $0x88c] sm:$0xf]  ;;  %v8557_v23 = vld [vmem:[%s12357_s23 + $0x898] sm:$0xf0] }
 0x323   : > { %6995 = vmatpush.bf16.msra.mxu3 %v8384_v55  ;;  %6957 = vmatpush.bf16.msra.mxu0 %v7984_v56  ;;  %v8701_v55 = vld [vmem:[%s12357_s23 + $0x9b8] sm:$0xf0]  ;;  %v11382_v19 = vld [vmem:[%s12357_s23 + $0xa8c] sm:$0xf]  ;;  %v14148_v25 = vpop.f32.mrf.mxu0 }
 0x324   : > { %6970 = vmatpush.bf16.msra.mxu1 %v8112_v5  ;;  %v8685_v56 = vld [vmem:[%s12357_s23 + $0x998] sm:$0xf0]  ;;  %v11378_v60 = vld [vmem:[%s12357_s23 + $0xa6c] sm:$0xf] }
 0x325   : > { %6983 = vmatpush.bf16.msra.mxu2 %v8240_v18  ;;  %v8813_v20 = vld [vmem:[%s12357_s23 + $0xa98] sm:$0xf0]  ;;  %v8560_v18 = vor.u32 %v11318_v15, %v8557_v23  ;;  %v11410_v6 = vld [vmem:[%s12357_s23 + $0xb6c] sm:$0xf] }
 0x326   : > { %6958 = vmatmul.bf16.vlgmr.msra.gmra.mxu0 %v12550_v42  ;;  %v11350_v42 = vld [vmem:[%s12357_s23 + $0x98c] sm:$0xf]  ;;  %v8941_v5 = vld [vmem:[%s12357_s23 + $0xb98] sm:$0xf0]  ;;  %v14152_v61 = vpop.f32.mrf.mxu1 }
 0x327   : > { %6996 = vmatpush.bf16.msra.mxu3 %v8368_v21  ;;  %7002 = vmatpush.bf16.msrb.mxu0 %v8608_v27  ;;  %v8688_v40 = vor.u32 %v11350_v42, %v8685_v56  ;;  %v8816_v21 = vor.u32 %v11382_v19, %v8813_v20  ;;  %v11314_v27 = vld [vmem:[%s12357_s23 + $0x86c] sm:$0xf]  ;;  %v8669_v22 = vld [vmem:[%s12357_s23 + $0x978] sm:$0xf0] }
 0x328   : > { %7015 = vmatpush.bf16.msrb.mxu1 %v8736_v62  ;;  %6984 = vmatmul.bf16.vlgmr.msra.gmra.mxu2 %v12546_v39  ;;  %v8704_v39 = vor.u32 %v11354_v12, %v8701_v55  ;;  %v8541_v62 = vld [vmem:[%s12357_s23 + $0x878] sm:$0xf0]  ;;  %v11406_v57 = vld [vmem:[%s12357_s23 + $0xb4c] sm:$0xf] }
 0x329   : > { %7028 = vmatpush.bf16.msrb.mxu2 %v8864_v28  ;;  %6971 = vmatmul.bf16.vlgmr.msra.gmra.mxu1 %v12554_v45  ;;  %v11414_v45 = vld [vmem:[%s12357_s23 + $0xb8c] sm:$0xf]  ;;  %v8925_v52 = vld [vmem:[%s12357_s23 + $0xb78] sm:$0xf0]  ;;  %v8544_v35 = vor.u32 %v11314_v27, %v8541_v62 }
 0x32a   : > { %6997 = vmatmul.bf16.vlgmr.msra.gmra.mxu3 %v12552_v43  ;;  %v8960_v43 = vor.u32 %v11418_v4, %v8957_v59  ;;  %v11346_v28 = vld [vmem:[%s12357_s23 + $0x96c] sm:$0xf]  ;;  %v8944_v33 = vor.u32 %v11414_v45, %v8941_v5  ;;  %v8928_v51 = vor.u32 %v11410_v6, %v8925_v52  ;;  %v8653_v12 = vld [vmem:[%s12357_s23 + $0x958] sm:$0xf0] }
 0x32b   : > { %7041 = vmatpush.bf16.msrb.mxu3 %v8992_v44  ;;  %7003 = vmatpush.bf16.msrb.mxu0 %v8592_v8  ;;  %v8797_v44 = vld [vmem:[%s12357_s23 + $0xa78] sm:$0xf0]  ;;  %v8672_v37 = vor.u32 %v11346_v28, %v8669_v22  ;;  %v11310_v8 = vld [vmem:[%s12357_s23 + $0x84c] sm:$0xf]  ;;  %v14165_v63 = vpop.f32.mrf.mxu2  ;;  %v6753_v59 = vpop.f32.mrf.mxu0 }
 0x32c   : > { %7016 = vmatpush.bf16.msrb.mxu1 %v8720_v48  ;;  %v8800_v41 = vor.u32 %v11378_v60, %v8797_v44  ;;  %v8525_v48 = vld [vmem:[%s12357_s23 + $0x858] sm:$0xf0]  ;;  %v11306_v23 = vld [vmem:[%s12357_s23 + $0x82c] sm:$0xf] }
 0x32d   : > { %7029 = vmatpush.bf16.msrb.mxu2 %v8848_v49  ;;  %v11342_v49 = vld [vmem:[%s12357_s23 + $0x94c] sm:$0xf]  ;;  %v8781_v55 = vld [vmem:[%s12357_s23 + $0xa58] sm:$0xf0]  ;;  %v14170_v54 = vpop.f32.mrf.mxu3 }
 0x32e   : > { %v8909_v4 = vld [vmem:[%s12357_s23 + $0xb58] sm:$0xf0]  ;;  %v11370_v20 = vld [vmem:[%s12357_s23 + $0xa2c] sm:$0xf] }
 0x32f   : > { %7042 = vmatpush.bf16.msrb.mxu3 %v8976_v58  ;;  %7004 = vmatpush.bf16.msrb.mxu0 %v8576_v2  ;;  %v11374_v58 = vld [vmem:[%s12357_s23 + $0xa4c] sm:$0xf]  ;;  %v8528_v2 = vor.u32 %v11310_v8, %v8525_v48  ;;  %v8509_v42 = vld [vmem:[%s12357_s23 + $0x838] sm:$0xf0]  ;;  %v8912_v56 = vor.u32 %v11406_v57, %v8909_v4 }
 0x330   : > { %7017 = vmatpush.bf16.msrb.mxu1 %v8704_v39  ;;  %v6766_v39 = vpop.f32.mrf.mxu1  ;;  %v8784_v15 = vor.u32 %v11374_v58, %v8781_v55  ;;  %v8637_v19 = vld [vmem:[%s12357_s23 + $0x938] sm:$0xf0]  ;;  %v11402_v5 = vld [vmem:[%s12357_s23 + $0xb2c] sm:$0xf] }
 0x331   : > { %7030 = vmatpush.bf16.msrb.mxu2 %v8832_v53  ;;  %v8656_v53 = vor.u32 %v11342_v49, %v8653_v12  ;;  %v8765_v45 = vld [vmem:[%s12357_s23 + $0xa38] sm:$0xf0]  ;;  %v11366_v60 = vld [vmem:[%s12357_s23 + $0xa0c] sm:$0xf] }
 0x332   : > { %v8493_v27 = vld [vmem:[%s12357_s23 + $0x818] sm:$0xf0]  ;;  %v8768_v28 = vor.u32 %v11370_v20, %v8765_v45  ;;  %v11398_v52 = vld [vmem:[%s12357_s23 + $0xb0c] sm:$0xf] }
 0x333   : > { %7043 = vmatpush.bf16.msrb.mxu3 %v8960_v43  ;;  %7005 = vmatpush.bf16.msrb.mxu0 %v8560_v18  ;;  %v11338_v43 = vld [vmem:[%s12357_s23 + $0x92c] sm:$0xf]  ;;  %v8893_v18 = vld [vmem:[%s12357_s23 + $0xb38] sm:$0xf0] }
 0x334   : > { %7018 = vmatpush.bf16.msrb.mxu1 %v8688_v40  ;;  %v8512_v40 = vor.u32 %v11306_v23, %v8509_v42  ;;  %v8640_v62 = vor.u32 %v11338_v43, %v8637_v19  ;;  %v8621_v22 = vld [vmem:[%s12357_s23 + $0x918] sm:$0xf0]  ;;  %v8896_v44 = vor.u32 %v11402_v5, %v8893_v18  ;;  %v11490_v48 = vld [vmem:[%s12357_s23 + $0xdec] sm:$0xf] }
 0x335   : > { %7031 = vmatpush.bf16.msrb.mxu2 %v8816_v21  ;;  %v11302_v21 = vld [vmem:[%s12357_s23 + $0x80c] sm:$0xf]  ;;  %v8749_v6 = vld [vmem:[%s12357_s23 + $0xa18] sm:$0xf0]  ;;  %v6792_v49 = vpop.f32.mrf.mxu3 }
 0x336   : > { %v9117_v8 = vld [vmem:[%s12357_s23 + $0xcf8] sm:$0xf0]  ;;  %v11522_v58 = vld [vmem:[%s12357_s23 + $0xeec] sm:$0xf]  ;;  %v8752_v4 = vor.u32 %v11366_v60, %v8749_v6 }
 0x337   : > { %7044 = vmatpush.bf16.msrb.mxu3 %v8944_v33  ;;  %7006 = vmatpush.bf16.msrb.mxu0 %v8544_v35  ;;  %v11334_v33 = vld [vmem:[%s12357_s23 + $0x90c] sm:$0xf]  ;;  %v8877_v35 = vld [vmem:[%s12357_s23 + $0xb18] sm:$0xf0] }
 0x338   : > { %7019 = vmatpush.bf16.msrb.mxu1 %v8672_v37  ;;  %v6779_v37 = vpop.f32.mrf.mxu2  ;;  %v9245_v12 = vld [vmem:[%s12357_s23 + $0xdf8] sm:$0xf0]  ;;  %v8624_v57 = vor.u32 %v11334_v33, %v8621_v22  ;;  %v11554_v59 = vld [vmem:[%s12357_s23 + $0xfec] sm:$0xf]  ;;  %v8880_v39 = vor.u32 %v11398_v52, %v8877_v35 }
 0x339   : > { %7032 = vmatpush.bf16.msrb.mxu2 %v8800_v41  ;;  %v11458_v41 = vld [vmem:[%s12357_s23 + $0xcec] sm:$0xf]  ;;  %v9373_v55 = vld [vmem:[%s12357_s23 + $0xef8] sm:$0xf0] }
 0x33a   : > { %v9376_v23 = vor.u32 %v11522_v58, %v9373_v55  ;;  %v11454_v42 = vld [vmem:[%s12357_s23 + $0xccc] sm:$0xf]  ;;  %v9101_v43 = vld [vmem:[%s12357_s23 + $0xcd8] sm:$0xf0] }
 0x33b   : > { %7045 = vmatpush.bf16.msrb.mxu3 %v8928_v51  ;;  %7007 = vmatpush.bf16.msrb.mxu0 %v8528_v2  ;;  %v8496_v51 = vor.u32 %v11302_v21, %v8493_v27  ;;  %v9501_v2 = vld [vmem:[%s12357_s23 + $0xff8] sm:$0xf0]  ;;  %v11518_v45 = vld [vmem:[%s12357_s23 + $0xecc] sm:$0xf]  ;;  %v9104_v21 = vor.u32 %v11454_v42, %v9101_v43 }
 0x33c   : > { %7020 = vmatpush.bf16.msrb.mxu1 %v8656_v53  ;;  %v9120_v53 = vor.u32 %v11458_v41, %v9117_v8  ;;  %v9504_v19 = vor.u32 %v11554_v59, %v9501_v2  ;;  %v9229_v20 = vld [vmem:[%s12357_s23 + $0xdd8] sm:$0xf0]  ;;  %v11550_v18 = vld [vmem:[%s12357_s23 + $0xfcc] sm:$0xf] }
 0x33d   : > { %7033 = vmatpush.bf16.msrb.mxu2 %v8784_v15  ;;  %v9248_v15 = vor.u32 %v11490_v48, %v9245_v12  ;;  %v9357_v5 = vld [vmem:[%s12357_s23 + $0xed8] sm:$0xf0]  ;;  %v11482_v22 = vld [vmem:[%s12357_s23 + $0xdac] sm:$0xf] }
 0x33e   : > { %v9085_v33 = vld [vmem:[%s12357_s23 + $0xcb8] sm:$0xf0]  ;;  %v11514_v6 = vld [vmem:[%s12357_s23 + $0xeac] sm:$0xf] }
 0x33f   : > { %7046 = vmatpush.bf16.msrb.mxu3 %v8912_v56  ;;  %7008 = vmatpush.bf16.msrb.mxu0 %v8512_v40  ;;  %v11486_v56 = vld [vmem:[%s12357_s23 + $0xdcc] sm:$0xf]  ;;  %v9485_v40 = vld [vmem:[%s12357_s23 + $0xfd8] sm:$0xf0] }
 0x340   : > { %7021 = vmatpush.bf16.msrb.mxu1 %v8640_v62  ;;  %v9232_v27 = vor.u32 %v11486_v56, %v9229_v20  ;;  %v9360_v62 = vor.u32 %v11518_v45, %v9357_v5  ;;  %v9488_v60 = vor.u32 %v11550_v18, %v9485_v40  ;;  %v9341_v52 = vld [vmem:[%s12357_s23 + $0xeb8] sm:$0xf0]  ;;  %v11546_v35 = vld [vmem:[%s12357_s23 + $0xfac] sm:$0xf] }
 0x341   : > { %7034 = vmatpush.bf16.msrb.mxu2 %v8768_v28  ;;  %v11450_v28 = vld [vmem:[%s12357_s23 + $0xcac] sm:$0xf]  ;;  %v9469_v37 = vld [vmem:[%s12357_s23 + $0xfb8] sm:$0xf0]  ;;  %v9344_v8 = vor.u32 %v11514_v6, %v9341_v52  ;;  %v6752_v6 = vadd.f32 %v14148_v25, %v14096_v7 }
 0x342   : > { %v11446_v48 = vld [vmem:[%s12357_s23 + $0xc8c] sm:$0xf]  ;;  %v9069_v49 = vld [vmem:[%s12357_s23 + $0xc98] sm:$0xf0] }
 0x343   : > { %7047 = vmatpush.bf16.msrb.mxu3 %v8896_v44  ;;  %7009 = vmatpush.bf16.msrb.mxu0 %v8496_v51  ;;  %v9213_v44 = vld [vmem:[%s12357_s23 + $0xdb8] sm:$0xf0]  ;;  %v11510_v12 = vld [vmem:[%s12357_s23 + $0xe8c] sm:$0xf] }
 0x344   : > { %7022 = vmatpush.bf16.msrb.mxu1 %v8624_v57  ;;  %v9216_v41 = vor.u32 %v11482_v22, %v9213_v44  ;;  %v9197_v51 = vld [vmem:[%s12357_s23 + $0xd98] sm:$0xf0]  ;;  %v11542_v55 = vld [vmem:[%s12357_s23 + $0xf8c] sm:$0xf] }
 0x345   : > { %7035 = vmatpush.bf16.msrb.mxu2 %v8752_v4  ;;  %v9325_v58 = vld [vmem:[%s12357_s23 + $0xe98] sm:$0xf0]  ;;  %v9072_v4 = vor.u32 %v11446_v48, %v9069_v49  ;;  %v11506_v56 = vld [vmem:[%s12357_s23 + $0xe6c] sm:$0xf] }
 0x346   : > { %7010 = vmatmul.bf16.vlgmr.msrb.gmra.mxu0 %v12621_v26  ;;  %v9088_v26 = vor.u32 %v11450_v28, %v9085_v33  ;;  %v9453_v57 = vld [vmem:[%s12357_s23 + $0xf98] sm:$0xf0]  ;;  %v14228_v59 = vpop.f32.mrf.mxu1  ;;  %v11538_v20 = vld [vmem:[%s12357_s23 + $0xf6c] sm:$0xf] }
 0x347   : > { %7048 = vmatpush.bf16.msrb.mxu3 %v8880_v39  ;;  %7054 = vmatpush.bf16.msra.mxu0 %v9120_v53  ;;  %v9328_v39 = vor.u32 %v11510_v12, %v9325_v58  ;;  %v11442_v53 = vld [vmem:[%s12357_s23 + $0xc6c] sm:$0xf]  ;;  %v9456_v42 = vor.u32 %v11542_v55, %v9453_v57  ;;  %v9181_v43 = vld [vmem:[%s12357_s23 + $0xd78] sm:$0xf0]  ;;  %v6765_v55 = vadd.f32 %v14152_v61, %v6752_v6 }
 0x348   : > { %7067 = vmatpush.bf16.msra.mxu1 %v9248_v15  ;;  %7036 = vmatmul.bf16.vlgmr.msrb.gmra.mxu2 %v12626_v30  ;;  %v11478_v30 = vld [vmem:[%s12357_s23 + $0xd8c] sm:$0xf]  ;;  %v9053_v15 = vld [vmem:[%s12357_s23 + $0xc78] sm:$0xf0] }
 0x349   : > { %7080 = vmatpush.bf16.msra.mxu2 %v9376_v23  ;;  %7023 = vmatmul.bf16.vlgmr.msrb.gmra.mxu1 %v12628_v31  ;;  %v9472_v31 = vor.u32 %v11546_v35, %v9469_v37  ;;  %v9200_v2 = vor.u32 %v11478_v30, %v9197_v51  ;;  %v11474_v23 = vld [vmem:[%s12357_s23 + $0xd6c] sm:$0xf]  ;;  %v9437_v45 = vld [vmem:[%s12357_s23 + $0xf78] sm:$0xf0]  ;;  %v9056_v5 = vor.u32 %v11442_v53, %v9053_v15 }
 0x34a   : > { %7049 = vmatmul.bf16.vlgmr.msrb.gmra.mxu3 %v12632_v34  ;;  %v14224_v34 = vpop.f32.mrf.mxu0  ;;  %v9184_v18 = vor.u32 %v11474_v23, %v9181_v43  ;;  %v9440_v28 = vor.u32 %v11538_v20, %v9437_v45  ;;  %v9165_v22 = vld [vmem:[%s12357_s23 + $0xd58] sm:$0xf0]  ;;  %v11534_v35 = vld [vmem:[%s12357_s23 + $0xf4c] sm:$0xf]  ;;  %v6778_v15 = vadd.f32 %v14165_v63, %v6765_v55 }
 0x34b   : > { %7093 = vmatpush.bf16.msra.mxu3 %v9504_v19  ;;  %7055 = vmatpush.bf16.msra.mxu0 %v9104_v21  ;;  %v9309_v19 = vld [vmem:[%s12357_s23 + $0xe78] sm:$0xf0]  ;;  %v11438_v21 = vld [vmem:[%s12357_s23 + $0xc4c] sm:$0xf]  ;;  %v14241_v33 = vpop.f32.mrf.mxu2 }
 0x34c   : > { %7068 = vmatpush.bf16.msra.mxu1 %v9232_v27  ;;  %v9312_v40 = vor.u32 %v11506_v56, %v9309_v19  ;;  %v9037_v27 = vld [vmem:[%s12357_s23 + $0xc58] sm:$0xf0]  ;;  %v11434_v7 = vld [vmem:[%s12357_s23 + $0xc2c] sm:$0xf] }
 0x34d   : > { %7081 = vmatpush.bf16.msra.mxu2 %v9360_v62  ;;  %v11470_v62 = vld [vmem:[%s12357_s23 + $0xd4c] sm:$0xf]  ;;  %v9293_v44 = vld [vmem:[%s12357_s23 + $0xe58] sm:$0xf0]  ;;  %v14248_v52 = vpop.f32.mrf.mxu3 }
 0x34e   : > { %v9421_v37 = vld [vmem:[%s12357_s23 + $0xf58] sm:$0xf0]  ;;  %v9168_v48 = vor.u32 %v11470_v62, %v9165_v22  ;;  %v11466_v30 = vld [vmem:[%s12357_s23 + $0xd2c] sm:$0xf] }
 0x34f   : > { %7094 = vmatpush.bf16.msra.mxu3 %v9488_v60  ;;  %7056 = vmatpush.bf16.msra.mxu0 %v9088_v26  ;;  %v11502_v60 = vld [vmem:[%s12357_s23 + $0xe4c] sm:$0xf]  ;;  %v9021_v25 = vld [vmem:[%s12357_s23 + $0xc38] sm:$0xf0] }
 0x350   : > { %7069 = vmatpush.bf16.msra.mxu1 %v9216_v41  ;;  %v9040_v41 = vor.u32 %v11438_v21, %v9037_v27  ;;  %v9296_v49 = vor.u32 %v11502_v60, %v9293_v44  ;;  %v9149_v51 = vld [vmem:[%s12357_s23 + $0xd38] sm:$0xf0]  ;;  %v11498_v12 = vld [vmem:[%s12357_s23 + $0xe2c] sm:$0xf]  ;;  %v6791_v44 = vadd.f32 %v14170_v54, %v6778_v15 }
 0x351   : > { %7082 = vmatpush.bf16.msra.mxu2 %v9344_v8  ;;  %v6818_v8 = vpop.f32.mrf.mxu1  ;;  %v9277_v58 = vld [vmem:[%s12357_s23 + $0xe38] sm:$0xf0]  ;;  %v11530_v57 = vld [vmem:[%s12357_s23 + $0xf2c] sm:$0xf]  ;;  %v9152_v23 = vor.u32 %v11466_v30, %v9149_v51 }
 0x352   : > { %v6805_v26 = vpop.f32.mrf.mxu0  ;;  %v9005_v53 = vld [vmem:[%s12357_s23 + $0xc18] sm:$0xf0]  ;;  %v11462_v61 = vld [vmem:[%s12357_s23 + $0xd0c] sm:$0xf] }
 0x353   : > { %7095 = vmatpush.bf16.msra.mxu3 %v9472_v31  ;;  %7057 = vmatpush.bf16.msra.mxu0 %v9072_v4  ;;  %v9424_v31 = vor.u32 %v11534_v35, %v9421_v37  ;;  %v9405_v4 = vld [vmem:[%s12357_s23 + $0xf38] sm:$0xf0]  ;;  %v11494_v56 = vld [vmem:[%s12357_s23 + $0xe0c] sm:$0xf] }
 0x354   : > { %7070 = vmatpush.bf16.msra.mxu1 %v9200_v2  ;;  %v9024_v2 = vor.u32 %v11434_v7, %v9021_v25  ;;  %v9133_v43 = vld [vmem:[%s12357_s23 + $0xd18] sm:$0xf0]  ;;  %v9408_v19 = vor.u32 %v11530_v57, %v9405_v4  ;;  %v11526_v45 = vld [vmem:[%s12357_s23 + $0xf0c] sm:$0xf] }
 0x355   : > { %7083 = vmatpush.bf16.msra.mxu2 %v9328_v39  ;;  %v11430_v39 = vld [vmem:[%s12357_s23 + $0xc0c] sm:$0xf]  ;;  %v9261_v20 = vld [vmem:[%s12357_s23 + $0xe18] sm:$0xf0]  ;;  %v6844_v27 = vpop.f32.mrf.mxu3  ;;  %v9136_v6 = vor.u32 %v11462_v61, %v9133_v43 }
 0x356   : > { %v11586_v63 = vld [vmem:[%s12357_s23 + $0x10ec] sm:$0xf]  ;;  %v9008_v62 = vor.u32 %v11430_v39, %v9005_v53  ;;  %v9885_v60 = vld [vmem:[%s12357_s23 + $0x12f8] sm:$0xf0]  ;;  %v9264_v35 = vor.u32 %v11494_v56, %v9261_v20 }
 0x357   : > { %7096 = vmatpush.bf16.msra.mxu3 %v9456_v42  ;;  %7058 = vmatpush.bf16.msra.mxu0 %v9056_v5  ;;  %v9280_v42 = vor.u32 %v11498_v12, %v9277_v58  ;;  %v9389_v5 = vld [vmem:[%s12357_s23 + $0xf18] sm:$0xf0]  ;;  %v11618_v21 = vld [vmem:[%s12357_s23 + $0x11ec] sm:$0xf] }
 0x358   : > { %7071 = vmatpush.bf16.msra.mxu1 %v9184_v18  ;;  %v6831_v18 = vpop.f32.mrf.mxu2  ;;  %v11650_v22 = vld [vmem:[%s12357_s23 + $0x12ec] sm:$0xf]  ;;  %v10013_v26 = vld [vmem:[%s12357_s23 + $0x13f8] sm:$0xf0] }
 0x359   : > { %7084 = vmatpush.bf16.msra.mxu2 %v9312_v40  ;;  %v9629_v40 = vld [vmem:[%s12357_s23 + $0x10f8] sm:$0xf0]  ;;  %v11682_v37 = vld [vmem:[%s12357_s23 + $0x13ec] sm:$0xf]  ;;  %v9888_v7 = vor.u32 %v11650_v22, %v9885_v60 }
 0x35a   : > { %v9632_v8 = vor.u32 %v11586_v63, %v9629_v40  ;;  %v11582_v25 = vld [vmem:[%s12357_s23 + $0x10cc] sm:$0xf]  ;;  %v9613_v54 = vld [vmem:[%s12357_s23 + $0x10d8] sm:$0xf0] }
 0x35b   : > { %7097 = vmatpush.bf16.msra.mxu3 %v9440_v28  ;;  %7059 = vmatpush.bf16.msra.mxu0 %v9040_v41  ;;  %v9757_v28 = vld [vmem:[%s12357_s23 + $0x11f8] sm:$0xf0]  ;;  %v9392_v41 = vor.u32 %v11526_v45, %v9389_v5  ;;  %v11614_v30 = vld [vmem:[%s12357_s23 + $0x11cc] sm:$0xf] }
 0x35c   : > { %7072 = vmatpush.bf16.msra.mxu1 %v9168_v48  ;;  %v6804_v48 = vadd.f32 %v14224_v34, %v6791_v44  ;;  %v9741_v51 = vld [vmem:[%s12357_s23 + $0x11d8] sm:$0xf0]  ;;  %v11646_v12 = vld [vmem:[%s12357_s23 + $0x12cc] sm:$0xf]  ;;  %v9616_v34 = vor.u32 %v11582_v25, %v9613_v54 }
 0x35d   : > { %7085 = vmatpush.bf16.msra.mxu2 %v9296_v49  ;;  %v9760_v49 = vor.u32 %v11618_v21, %v9757_v28  ;;  %v9869_v58 = vld [vmem:[%s12357_s23 + $0x12d8] sm:$0xf0]  ;;  %v11678_v55 = vld [vmem:[%s12357_s23 + $0x13cc] sm:$0xf] }
 0x35e   : > { %v9997_v57 = vld [vmem:[%s12357_s23 + $0x13d8] sm:$0xf0]  ;;  %v6817_v4 = vadd.f32 %v14228_v59, %v6804_v48  ;;  %v9872_v39 = vor.u32 %v11646_v12, %v9869_v58  ;;  %v11578_v53 = vld [vmem:[%s12357_s23 + $0x10ac] sm:$0xf] }
 0x35f   : > { %7098 = vmatpush.bf16.msra.mxu3 %v9424_v31  ;;  %7060 = vmatpush.bf16.msra.mxu0 %v9024_v2  ;;  %v10016_v31 = vor.u32 %v11682_v37, %v10013_v26  ;;  %v9744_v2 = vor.u32 %v11614_v30, %v9741_v51  ;;  %v9597_v15 = vld [vmem:[%s12357_s23 + $0x10b8] sm:$0xf0]  ;;  %v11642_v43 = vld [vmem:[%s12357_s23 + $0x12ac] sm:$0xf] }
 0x360   : > { %7073 = vmatpush.bf16.msra.mxu1 %v9152_v23  ;;  %v11610_v23 = vld [vmem:[%s12357_s23 + $0x11ac] sm:$0xf]  ;;  %v9725_v61 = vld [vmem:[%s12357_s23 + $0x11b8] sm:$0xf0]  ;;  %v6830_v59 = vadd.f32 %v14241_v33, %v6817_v4 }
 0x361   : > { %7086 = vmatpush.bf16.msra.mxu2 %v9280_v42  ;;  %v10000_v42 = vor.u32 %v11678_v55, %v9997_v57  ;;  %v9853_v56 = vld [vmem:[%s12357_s23 + $0x12b8] sm:$0xf0]  ;;  %v9728_v45 = vor.u32 %v11610_v23, %v9725_v61  ;;  %v11574_v33 = vld [vmem:[%s12357_s23 + $0x108c] sm:$0xf] }
 0x362   : > { %v9981_v20 = vld [vmem:[%s12357_s23 + $0x13b8] sm:$0xf0]  ;;  %v9856_v5 = vor.u32 %v11642_v43, %v9853_v56  ;;  %v11638_v40 = vld [vmem:[%s12357_s23 + $0x128c] sm:$0xf] }
 0x363   : > { %7099 = vmatpush.bf16.msra.mxu3 %v9408_v19  ;;  %7061 = vmatpush.bf16.msra.mxu0 %v9008_v62  ;;  %v11674_v19 = vld [vmem:[%s12357_s23 + $0x13ac] sm:$0xf]  ;;  %v9581_v18 = vld [vmem:[%s12357_s23 + $0x1098] sm:$0xf0]  ;;  %v6855_v27 = vpop.f32.mrf.mxu0 }
 0x364   : > { %7074 = vmatpush.bf16.msra.mxu1 %v9136_v6  ;;  %v9984_v63 = vor.u32 %v11674_v19, %v9981_v20  ;;  %v9837_v21 = vld [vmem:[%s12357_s23 + $0x1298] sm:$0xf0]  ;;  %v11670_v62 = vld [vmem:[%s12357_s23 + $0x138c] sm:$0xf]  ;;  %v9584_v22 = vor.u32 %v11574_v33, %v9581_v18 }
 0x365   : > { %7087 = vmatpush.bf16.msra.mxu2 %v9264_v35  ;;  %v9965_v28 = vld [vmem:[%s12357_s23 + $0x1398] sm:$0xf0]  ;;  %v9840_v35 = vor.u32 %v11638_v40, %v9837_v21  ;;  %v11570_v37 = vld [vmem:[%s12357_s23 + $0x106c] sm:$0xf] }
 0x366   : > { %7062 = vmatmul.bf16.vlgmr.msra.gmra.mxu0 %v12699_v24  ;;  %v9600_v24 = vor.u32 %v11578_v53, %v9597_v15  ;;  %v6868_v60 = vpop.f32.mrf.mxu1  ;;  %v9565_v26 = vld [vmem:[%s12357_s23 + $0x1078] sm:$0xf0]  ;;  %v11634_v48 = vld [vmem:[%s12357_s23 + $0x126c] sm:$0xf] }
 0x367   : > { %7100 = vmatpush.bf16.msra.mxu3 %v9392_v41  ;;  %7106 = vmatpush.bf16.msrb.mxu0 %v9632_v8  ;;  %v9968_v41 = vor.u32 %v11670_v62, %v9965_v28  ;;  %v9693_v8 = vld [vmem:[%s12357_s23 + $0x1178] sm:$0xf0]  ;;  %v9568_v54 = vor.u32 %v11570_v37, %v9565_v26  ;;  %v11566_v12 = vld [vmem:[%s12357_s23 + $0x104c] sm:$0xf] }
 0x368   : > { %7119 = vmatpush.bf16.msrb.mxu1 %v9760_v49  ;;  %7088 = vmatmul.bf16.vlgmr.msra.gmra.mxu2 %v12704_v29  ;;  %v11606_v29 = vld [vmem:[%s12357_s23 + $0x118c] sm:$0xf]  ;;  %v9821_v49 = vld [vmem:[%s12357_s23 + $0x1278] sm:$0xf0] }
 0x369   : > { %7132 = vmatpush.bf16.msrb.mxu2 %v9888_v7  ;;  %7075 = vmatmul.bf16.vlgmr.msra.gmra.mxu1 %v12706_v32  ;;  %v9709_v32 = vld [vmem:[%s12357_s23 + $0x1198] sm:$0xf0]  ;;  %v11666_v7 = vld [vmem:[%s12357_s23 + $0x136c] sm:$0xf]  ;;  %v9824_v51 = vor.u32 %v11634_v48, %v9821_v49 }
 0x36a   : > { %7101 = vmatmul.bf16.vlgmr.msra.gmra.mxu3 %v12710_v36  ;;  %v6843_v36 = vadd.f32 %v14248_v52, %v6830_v59  ;;  %v9712_v6 = vor.u32 %v11606_v29, %v9709_v32  ;;  %v11602_v52 = vld [vmem:[%s12357_s23 + $0x116c] sm:$0xf]  ;;  %v9949_v25 = vld [vmem:[%s12357_s23 + $0x1378] sm:$0xf0] }
 0x36b   : > { %7145 = vmatpush.bf16.msrb.mxu3 %v10016_v31  ;;  %7107 = vmatpush.bf16.msrb.mxu0 %v9616_v34  ;;  %v9696_v31 = vor.u32 %v11602_v52, %v9693_v8  ;;  %v9549_v58 = vld [vmem:[%s12357_s23 + $0x1058] sm:$0xf0]  ;;  %v11598_v55 = vld [vmem:[%s12357_s23 + $0x114c] sm:$0xf]  ;;  %v9952_v57 = vor.u32 %v11666_v7, %v9949_v25  ;;  %v6881_v34 = vpop.f32.mrf.mxu2  ;;  %v6857_v61 = vpop.f32.mrf.mxu0 }
 0x36c   : > { %7120 = vmatpush.bf16.msrb.mxu1 %v9744_v2  ;;  %v6856_v44 = vadd.f32 %v6855_v27, %v6843_v36  ;;  %v9677_v4 = vld [vmem:[%s12357_s23 + $0x1158] sm:$0xf0]  ;;  %v11630_v2 = vld [vmem:[%s12357_s23 + $0x124c] sm:$0xf]  ;;  %v9552_v43 = vor.u32 %v11566_v12, %v9549_v58 }
 0x36d   : > { %7133 = vmatpush.bf16.msrb.mxu2 %v9872_v39  ;;  %v9805_v39 = vld [vmem:[%s12357_s23 + $0x1258] sm:$0xf0]  ;;  %v6894_v15 = vpop.f32.mrf.mxu3  ;;  %v11662_v23 = vld [vmem:[%s12357_s23 + $0x134c] sm:$0xf]  ;;  %v9680_v19 = vor.u32 %v11598_v55, %v9677_v4 }
 0x36e   : > { %v6869_v30 = vadd.f32 %v6868_v60, %v6856_v44  ;;  %v6870_v56 = vpop.f32.mrf.mxu1  ;;  %v9808_v20 = vor.u32 %v11630_v2, %v9805_v39  ;;  %v9661_v18 = vld [vmem:[%s12357_s23 + $0x1138] sm:$0xf0]  ;;  %v11626_v29 = vld [vmem:[%s12357_s23 + $0x122c] sm:$0xf] }
 0x36f   : > { %7146 = vmatpush.bf16.msrb.mxu3 %v10000_v42  ;;  %7108 = vmatpush.bf16.msrb.mxu0 %v9600_v24  ;;  %v9933_v42 = vld [vmem:[%s12357_s23 + $0x1358] sm:$0xf0]  ;;  %v11562_v24 = vld [vmem:[%s12357_s23 + $0x102c] sm:$0xf] }
 0x370   : > { %7121 = vmatpush.bf16.msrb.mxu1 %v9728_v45  ;;  %v6882_v53 = vadd.f32 %v6881_v34, %v6869_v30  ;;  %v9533_v45 = vld [vmem:[%s12357_s23 + $0x1038] sm:$0xf0]  ;;  %v9936_v33 = vor.u32 %v11662_v23, %v9933_v42  ;;  %v11658_v40 = vld [vmem:[%s12357_s23 + $0x132c] sm:$0xf] }
 0x371   : > { %7134 = vmatpush.bf16.msrb.mxu2 %v9856_v5  ;;  %v11594_v5 = vld [vmem:[%s12357_s23 + $0x112c] sm:$0xf]  ;;  %v9917_v21 = vld [vmem:[%s12357_s23 + $0x1338] sm:$0xf0]  ;;  %v9536_v36 = vor.u32 %v11562_v24, %v9533_v45 }
 0x372   : > { %v6895_v59 = vadd.f32 %v6894_v15, %v6882_v53  ;;  %v11558_v27 = vld [vmem:[%s12357_s23 + $0x100c] sm:$0xf]  ;;  %v9517_v62 = vld [vmem:[%s12357_s23 + $0x1018] sm:$0xf0] }
 0x373   : > { %7147 = vmatpush.bf16.msrb.mxu3 %v9984_v63  ;;  %7109 = vmatpush.bf16.msrb.mxu0 %v9584_v22  ;;  %v9789_v63 = vld [vmem:[%s12357_s23 + $0x1238] sm:$0xf0]  ;;  %v11590_v28 = vld [vmem:[%s12357_s23 + $0x110c] sm:$0xf]  ;;  %v9664_v22 = vor.u32 %v11594_v5, %v9661_v18  ;;  %v9520_v7 = vor.u32 %v11558_v27, %v9517_v62 }
 0x374   : > { %7122 = vmatpush.bf16.msrb.mxu1 %v9712_v6  ;;  %v7264_v32 = vadd.f32 %v6895_v59, %v13301_v0  ;;  %v9792_v60 = vor.u32 %v11626_v29, %v9789_v63  ;;  %v9645_v44 = vld [vmem:[%s12357_s23 + $0x1118] sm:$0xf0]  ;;  %v11622_v0 = vld [vmem:[%s12357_s23 + $0x120c] sm:$0xf] }
 0x375   : > { %7135 = vmatpush.bf16.msrb.mxu2 %v9840_v35  ;;  %v9773_v6 = vld [vmem:[%s12357_s23 + $0x1218] sm:$0xf0]  ;;  %v9920_v35 = vor.u32 %v11658_v40, %v9917_v21  ;;  %v11654_v37 = vld [vmem:[%s12357_s23 + $0x130c] sm:$0xf]  ;;  %v6896_v49 = vpop.f32.mrf.mxu3 }
 0x376   : > { %v9901_v26 = vld [vmem:[%s12357_s23 + $0x1318] sm:$0xf0]  ;;  %v11714_v52 = vld [vmem:[%s12357_s23 + $0x14ec] sm:$0xf]  ;;  %7268 = vst [vmem:[%s12376_s26 + $0x10] sm:$0xff] %v7264_v32 }
 0x377   : > { %7148 = vmatpush.bf16.msrb.mxu3 %v9968_v41  ;;  %7110 = vmatpush.bf16.msrb.mxu0 %v9568_v54  ;;  %v6883_v41 = vpop.f32.mrf.mxu2  ;;  %v10141_v8 = vld [vmem:[%s12357_s23 + $0x14f8] sm:$0xf0]  ;;  %v11746_v48 = vld [vmem:[%s12357_s23 + $0x15ec] sm:$0xf]  ;;  %v9904_v55 = vor.u32 %v11654_v37, %v9901_v26 }
 0x378   : > { %7123 = vmatpush.bf16.msrb.mxu1 %v9696_v31  ;;  %v10269_v25 = vld [vmem:[%s12357_s23 + $0x15f8] sm:$0xf0]  ;;  %v11778_v54 = vld [vmem:[%s12357_s23 + $0x16ec] sm:$0xf]  ;;  %v9648_v31 = vor.u32 %v11590_v28, %v9645_v44 }
 0x379   : > { %7136 = vmatpush.bf16.msrb.mxu2 %v9824_v51  ;;  %v10397_v30 = vld [vmem:[%s12357_s23 + $0x16f8] sm:$0xf0]  ;;  %v9776_v51 = vor.u32 %v11622_v0, %v9773_v6  ;;  %v11810_v12 = vld [vmem:[%s12357_s23 + $0x17ec] sm:$0xf]  ;;  %v10272_v34 = vor.u32 %v11746_v48, %v10269_v25 }
 0x37a   : > { %v10525_v58 = vld [vmem:[%s12357_s23 + $0x17f8] sm:$0xf0]  ;;  %v10400_v4 = vor.u32 %v11778_v54, %v10397_v30  ;;  %v11710_v2 = vld [vmem:[%s12357_s23 + $0x14cc] sm:$0xf] }
 0x37b   : > { %7149 = vmatpush.bf16.msrb.mxu3 %v9952_v57  ;;  %7111 = vmatpush.bf16.msrb.mxu0 %v9552_v43  ;;  %v10144_v57 = vor.u32 %v11714_v52, %v10141_v8  ;;  %v10125_v39 = vld [vmem:[%s12357_s23 + $0x14d8] sm:$0xf0]  ;;  %v11742_v53 = vld [vmem:[%s12357_s23 + $0x15cc] sm:$0xf]  ;;  %v10528_v15 = vor.u32 %v11810_v12, %v10525_v58 }
 0x37c   : > { %7124 = vmatpush.bf16.msrb.mxu1 %v9680_v19  ;;  %v10253_v23 = vld [vmem:[%s12357_s23 + $0x15d8] sm:$0xf0]  ;;  %v11774_v42 = vld [vmem:[%s12357_s23 + $0x16cc] sm:$0xf]  ;;  %v10128_v59 = vor.u32 %v11710_v2, %v10125_v39 }
 0x37d   : > { %7137 = vmatpush.bf16.msrb.mxu2 %v9808_v20  ;;  %v10381_v61 = vld [vmem:[%s12357_s23 + $0x16d8] sm:$0xf0]  ;;  %v11806_v43 = vld [vmem:[%s12357_s23 + $0x17cc] sm:$0xf]  ;;  %v10256_v19 = vor.u32 %v11742_v53, %v10253_v23 }
 0x37e   : > { %v10509_v56 = vld [vmem:[%s12357_s23 + $0x17d8] sm:$0xf0]  ;;  %v10384_v20 = vor.u32 %v11774_v42, %v10381_v61  ;;  %v11706_v24 = vld [vmem:[%s12357_s23 + $0x14ac] sm:$0xf] }
 0x37f   : > { %7150 = vmatpush.bf16.msrb.mxu3 %v9936_v33  ;;  %7112 = vmatpush.bf16.msrb.mxu0 %v9536_v36  ;;  %v10109_v45 = vld [vmem:[%s12357_s23 + $0x14b8] sm:$0xf0]  ;;  %v11738_v5 = vld [vmem:[%s12357_s23 + $0x15ac] sm:$0xf]  ;;  %v10512_v33 = vor.u32 %v11806_v43, %v10509_v56 }
 0x380   : > { %7125 = vmatpush.bf16.msrb.mxu1 %v9664_v22  ;;  %v10237_v18 = vld [vmem:[%s12357_s23 + $0x15b8] sm:$0xf0]  ;;  %v11770_v29 = vld [vmem:[%s12357_s23 + $0x16ac] sm:$0xf] }
 0x381   : > { %7138 = vmatpush.bf16.msrb.mxu2 %v9792_v60  ;;  %v10365_v63 = vld [vmem:[%s12357_s23 + $0x16b8] sm:$0xf0]  ;;  %v11802_v32 = vld [vmem:[%s12357_s23 + $0x17ac] sm:$0xf]  ;;  %v10240_v21 = vor.u32 %v11738_v5, %v10237_v18 }
 0x382   : > { %v10493_v40 = vld [vmem:[%s12357_s23 + $0x17b8] sm:$0xf0]  ;;  %v10368_v36 = vor.u32 %v11770_v29, %v10365_v63  ;;  %v11702_v27 = vld [vmem:[%s12357_s23 + $0x148c] sm:$0xf] }
 0x383   : > { %7151 = vmatpush.bf16.msrb.mxu3 %v9920_v35  ;;  %7113 = vmatpush.bf16.msrb.mxu0 %v9520_v7  ;;  %v10093_v62 = vld [vmem:[%s12357_s23 + $0x1498] sm:$0xf0]  ;;  %v11766_v22 = vld [vmem:[%s12357_s23 + $0x168c] sm:$0xf]  ;;  %v6907_v6 = vpop.f32.mrf.mxu0 }
 0x384   : > { %7126 = vmatpush.bf16.msrb.mxu1 %v9648_v31  ;;  %v10221_v28 = vld [vmem:[%s12357_s23 + $0x1598] sm:$0xf0]  ;;  %v10096_v0 = vor.u32 %v11702_v27, %v10093_v62  ;;  %v11698_v26 = vld [vmem:[%s12357_s23 + $0x146c] sm:$0xf] }
 0x385   : > { %7139 = vmatpush.bf16.msrb.mxu2 %v9776_v51  ;;  %v10349_v60 = vld [vmem:[%s12357_s23 + $0x1698] sm:$0xf0]  ;;  %v11730_v41 = vld [vmem:[%s12357_s23 + $0x156c] sm:$0xf] }
 0x386   : > { %7114 = vmatmul.bf16.vlgmr.msrb.gmra.mxu0 %v12777_v38  ;;  %v10112_v38 = vor.u32 %v11706_v24, %v10109_v45  ;;  %v10477_v44 = vld [vmem:[%s12357_s23 + $0x1798] sm:$0xf0]  ;;  %v10352_v37 = vor.u32 %v11766_v22, %v10349_v60  ;;  %v6920_v8 = vpop.f32.mrf.mxu1  ;;  %v11762_v7 = vld [vmem:[%s12357_s23 + $0x166c] sm:$0xf] }
 0x387   : > { %7152 = vmatpush.bf16.msrb.mxu3 %v9904_v55  ;;  %7158 = vmatpush.bf16.msra.mxu0 %v10144_v57  ;;  %v10077_v52 = vld [vmem:[%s12357_s23 + $0x1478] sm:$0xf0]  ;;  %v6921_v54 = vadd.f32 %v6920_v8, %v6907_v6  ;;  %v11794_v30 = vld [vmem:[%s12357_s23 + $0x176c] sm:$0xf] }
 0x388   : > { %7171 = vmatpush.bf16.msra.mxu1 %v10272_v34  ;;  %7140 = vmatmul.bf16.vlgmr.msrb.gmra.mxu2 %v12782_v46  ;;  %v11734_v46 = vld [vmem:[%s12357_s23 + $0x158c] sm:$0xf]  ;;  %v10205_v49 = vld [vmem:[%s12357_s23 + $0x1578] sm:$0xf0]  ;;  %v10080_v51 = vor.u32 %v11698_v26, %v10077_v52 }
 0x389   : > { %7184 = vmatpush.bf16.msra.mxu2 %v10400_v4  ;;  %7127 = vmatmul.bf16.vlgmr.msrb.gmra.mxu1 %v12784_v47  ;;  %v10496_v47 = vor.u32 %v11802_v32, %v10493_v40  ;;  %v10224_v35 = vor.u32 %v11734_v46, %v10221_v28  ;;  %v10333_v25 = vld [vmem:[%s12357_s23 + $0x1678] sm:$0xf0]  ;;  %v10208_v12 = vor.u32 %v11730_v41, %v10205_v49  ;;  %v11694_v55 = vld [vmem:[%s12357_s23 + $0x144c] sm:$0xf] }
 0x38a   : > { %7153 = vmatmul.bf16.vlgmr.msrb.gmra.mxu3 %v12788_v50  ;;  %v11798_v50 = vld [vmem:[%s12357_s23 + $0x178c] sm:$0xf]  ;;  %v10461_v31 = vld [vmem:[%s12357_s23 + $0x1778] sm:$0xf0]  ;;  %v10336_v58 = vor.u32 %v11762_v7, %v10333_v25 }
 0x38b   : > { %7197 = vmatpush.bf16.msra.mxu3 %v10528_v15  ;;  %7159 = vmatpush.bf16.msra.mxu0 %v10128_v59  ;;  %v10480_v48 = vor.u32 %v11798_v50, %v10477_v44  ;;  %v10061_v57 = vld [vmem:[%s12357_s23 + $0x1458] sm:$0xf0]  ;;  %v11726_v34 = vld [vmem:[%s12357_s23 + $0x154c] sm:$0xf]  ;;  %v6933_v4 = vpop.f32.mrf.mxu2  ;;  %v10464_v2 = vor.u32 %v11794_v30, %v10461_v31 }
 0x38c   : > { %7172 = vmatpush.bf16.msra.mxu1 %v10256_v19  ;;  %v10189_v39 = vld [vmem:[%s12357_s23 + $0x1558] sm:$0xf0]  ;;  %v11758_v53 = vld [vmem:[%s12357_s23 + $0x164c] sm:$0xf]  ;;  %v6934_v23 = vadd.f32 %v6933_v4, %v6921_v54  ;;  %v10064_v56 = vor.u32 %v11694_v55, %v10061_v57  ;;  %v6909_v19 = vpop.f32.mrf.mxu0 }
 0x38d   : > { %7185 = vmatpush.bf16.msra.mxu2 %v10384_v20  ;;  %v10317_v15 = vld [vmem:[%s12357_s23 + $0x1658] sm:$0xf0]  ;;  %v6946_v42 = vpop.f32.mrf.mxu3  ;;  %v11790_v61 = vld [vmem:[%s12357_s23 + $0x174c] sm:$0xf]  ;;  %v10192_v20 = vor.u32 %v11726_v34, %v10189_v39 }
 0x38e   : > { %v10445_v43 = vld [vmem:[%s12357_s23 + $0x1758] sm:$0xf0]  ;;  %v14397_v59 = vadd.f32 %v6946_v42, %v6934_v23  ;;  %v10320_v24 = vor.u32 %v11758_v53, %v10317_v15  ;;  %v11690_v45 = vld [vmem:[%s12357_s23 + $0x142c] sm:$0xf]  ;;  %v6922_v18 = vpop.f32.mrf.mxu1 }
 0x38f   : > { %7198 = vmatpush.bf16.msra.mxu3 %v10512_v33  ;;  %7160 = vmatpush.bf16.msra.mxu0 %v10112_v38  ;;  %v10045_v5 = vld [vmem:[%s12357_s23 + $0x1438] sm:$0xf0]  ;;  %v11722_v33 = vld [vmem:[%s12357_s23 + $0x152c] sm:$0xf]  ;;  %v10448_v29 = vor.u32 %v11790_v61, %v10445_v43 }
 0x390   : > { %7173 = vmatpush.bf16.msra.mxu1 %v10240_v21  ;;  %v10173_v63 = vld [vmem:[%s12357_s23 + $0x1538] sm:$0xf0]  ;;  %v11754_v32 = vld [vmem:[%s12357_s23 + $0x162c] sm:$0xf] }
 0x391   : > { %7186 = vmatpush.bf16.msra.mxu2 %v10368_v36  ;;  %v10301_v40 = vld [vmem:[%s12357_s23 + $0x1638] sm:$0xf0]  ;;  %v11786_v38 = vld [vmem:[%s12357_s23 + $0x172c] sm:$0xf]  ;;  %v10048_v36 = vor.u32 %v11690_v45, %v10045_v5  ;;  %v10176_v46 = vor.u32 %v11722_v33, %v10173_v63 }
 0x392   : > { %v10429_v21 = vld [vmem:[%s12357_s23 + $0x1738] sm:$0xf0]  ;;  %v11686_v27 = vld [vmem:[%s12357_s23 + $0x140c] sm:$0xf] }
 0x393   : > { %7199 = vmatpush.bf16.msra.mxu3 %v10496_v47  ;;  %7161 = vmatpush.bf16.msra.mxu0 %v10096_v0  ;;  %v10029_v62 = vld [vmem:[%s12357_s23 + $0x1418] sm:$0xf0]  ;;  %v10304_v47 = vor.u32 %v11754_v32, %v10301_v40  ;;  %v11718_v28 = vld [vmem:[%s12357_s23 + $0x150c] sm:$0xf]  ;;  %v6935_v50 = vpop.f32.mrf.mxu2  ;;  %v10432_v44 = vor.u32 %v11786_v38, %v10429_v21 }
 0x394   : > { %7174 = vmatpush.bf16.msra.mxu1 %v10224_v35  ;;  %v10157_v22 = vld [vmem:[%s12357_s23 + $0x1518] sm:$0xf0]  ;;  %v11750_v60 = vld [vmem:[%s12357_s23 + $0x160c] sm:$0xf]  ;;  %v10032_v8 = vor.u32 %v11686_v27, %v10029_v62 }
 0x395   : > { %7187 = vmatpush.bf16.msra.mxu2 %v10352_v37  ;;  %v10285_v0 = vld [vmem:[%s12357_s23 + $0x1618] sm:$0xf0]  ;;  %v11782_v6 = vld [vmem:[%s12357_s23 + $0x170c] sm:$0xf]  ;;  %v6948_v37 = vpop.f32.mrf.mxu3  ;;  %v10160_v25 = vor.u32 %v11718_v28, %v10157_v22 }
 0x396   : > { %v10413_v35 = vld [vmem:[%s12357_s23 + $0x1718] sm:$0xf0]  ;;  %v11842_v26 = vld [vmem:[%s12357_s23 + $0x18ec] sm:$0xf]  ;;  %v10288_v54 = vor.u32 %v11750_v60, %v10285_v0 }
 0x397   : > { %7200 = vmatpush.bf16.msra.mxu3 %v10480_v48  ;;  %7162 = vmatpush.bf16.msra.mxu0 %v10080_v51  ;;  %v10653_v52 = vld [vmem:[%s12357_s23 + $0x18f8] sm:$0xf0]  ;;  %v11874_v41 = vld [vmem:[%s12357_s23 + $0x19ec] sm:$0xf]  ;;  %v10416_v51 = vor.u32 %v11782_v6, %v10413_v35 }
 0x398   : > { %7175 = vmatpush.bf16.msra.mxu1 %v10208_v12  ;;  %v10781_v48 = vld [vmem:[%s12357_s23 + $0x19f8] sm:$0xf0]  ;;  %v11906_v49 = vld [vmem:[%s12357_s23 + $0x1aec] sm:$0xf]  ;;  %v10656_v12 = vor.u32 %v11842_v26, %v10653_v52 }
 0x399   : > { %7188 = vmatpush.bf16.msra.mxu2 %v10336_v58  ;;  %v10909_v7 = vld [vmem:[%s12357_s23 + $0x1af8] sm:$0xf0]  ;;  %v11938_v30 = vld [vmem:[%s12357_s23 + $0x1bec] sm:$0xf]  ;;  %v10784_v58 = vor.u32 %v11874_v41, %v10781_v48 }
 0x39a   : > { %v11037_v31 = vld [vmem:[%s12357_s23 + $0x1bf8] sm:$0xf0]  ;;  %v10912_v55 = vor.u32 %v11906_v49, %v10909_v7  ;;  %v11838_v57 = vld [vmem:[%s12357_s23 + $0x18cc] sm:$0xf] }
 0x39b   : > { %7201 = vmatpush.bf16.msra.mxu3 %v10464_v2  ;;  %7163 = vmatpush.bf16.msra.mxu0 %v10064_v56  ;;  %v10637_v34 = vld [vmem:[%s12357_s23 + $0x18d8] sm:$0xf0]  ;;  %v11870_v4 = vld [vmem:[%s12357_s23 + $0x19cc] sm:$0xf]  ;;  %v11040_v2 = vor.u32 %v11938_v30, %v11037_v31 }
 0x39c   : > { %7176 = vmatpush.bf16.msra.mxu1 %v10192_v20  ;;  %v10765_v39 = vld [vmem:[%s12357_s23 + $0x19d8] sm:$0xf0]  ;;  %v11902_v53 = vld [vmem:[%s12357_s23 + $0x1acc] sm:$0xf]  ;;  %v10640_v61 = vor.u32 %v11838_v57, %v10637_v34 }
 0x39d   : > { %7189 = vmatpush.bf16.msra.mxu2 %v10320_v24  ;;  %v10893_v15 = vld [vmem:[%s12357_s23 + $0x1ad8] sm:$0xf0]  ;;  %v11934_v23 = vld [vmem:[%s12357_s23 + $0x1bcc] sm:$0xf]  ;;  %v10768_v43 = vor.u32 %v11870_v4, %v10765_v39 }
 0x39e   : > { %v11021_v42 = vld [vmem:[%s12357_s23 + $0x1bd8] sm:$0xf0]  ;;  %v10896_v56 = vor.u32 %v11902_v53, %v10893_v15  ;;  %v11834_v19 = vld [vmem:[%s12357_s23 + $0x18ac] sm:$0xf] }
 0x39f   : > { %7202 = vmatpush.bf16.msra.mxu3 %v10448_v29  ;;  %7164 = vmatpush.bf16.msra.mxu0 %v10048_v36  ;;  %v10621_v20 = vld [vmem:[%s12357_s23 + $0x18b8] sm:$0xf0]  ;;  %v11866_v24 = vld [vmem:[%s12357_s23 + $0x19ac] sm:$0xf]  ;;  %v11024_v45 = vor.u32 %v11934_v23, %v11021_v42 }
 0x3a0   : > { %7177 = vmatpush.bf16.msra.mxu1 %v10176_v46  ;;  %v10749_v5 = vld [vmem:[%s12357_s23 + $0x19b8] sm:$0xf0]  ;;  %v11898_v33 = vld [vmem:[%s12357_s23 + $0x1aac] sm:$0xf] }
 0x3a1   : > { %7190 = vmatpush.bf16.msra.mxu2 %v10304_v47  ;;  %v10877_v18 = vld [vmem:[%s12357_s23 + $0x1ab8] sm:$0xf0]  ;;  %v11930_v29 = vld [vmem:[%s12357_s23 + $0x1bac] sm:$0xf]  ;;  %v10752_v32 = vor.u32 %v11866_v24, %v10749_v5 }
 0x3a2   : > { %v11005_v63 = vld [vmem:[%s12357_s23 + $0x1bb8] sm:$0xf0]  ;;  %v10880_v40 = vor.u32 %v11898_v33, %v10877_v18  ;;  %v11830_v38 = vld [vmem:[%s12357_s23 + $0x188c] sm:$0xf] }
 0x3a3   : > { %7203 = vmatpush.bf16.msra.mxu3 %v10432_v44  ;;  %7165 = vmatpush.bf16.msra.mxu0 %v10032_v8  ;;  %v10605_v21 = vld [vmem:[%s12357_s23 + $0x1898] sm:$0xf0]  ;;  %v11894_v27 = vld [vmem:[%s12357_s23 + $0x1a8c] sm:$0xf]  ;;  %v6959_v28 = vpop.f32.mrf.mxu0 }
 0x3a4   : > { %7178 = vmatpush.bf16.msra.mxu1 %v10160_v25  ;;  %v10733_v36 = vld [vmem:[%s12357_s23 + $0x1998] sm:$0xf0]  ;;  %v11926_v46 = vld [vmem:[%s12357_s23 + $0x1b8c] sm:$0xf]  ;;  %v10608_v47 = vor.u32 %v11830_v38, %v10605_v21  ;;  %v6960_v6 = vadd.f32 %v6959_v28, %v14397_v59 }
 0x3a5   : > { %7191 = vmatpush.bf16.msra.mxu2 %v10288_v54  ;;  %v10861_v62 = vld [vmem:[%s12357_s23 + $0x1a98] sm:$0xf0]  ;;  %v11826_v50 = vld [vmem:[%s12357_s23 + $0x186c] sm:$0xf] }
 0x3a6   : > { %7166 = vmatmul.bf16.vlgmr.msra.gmra.mxu0 %v12857_v9  ;;  %v10624_v9 = vor.u32 %v11834_v19, %v10621_v20  ;;  %v10864_v60 = vor.u32 %v11894_v27, %v10861_v62  ;;  %v10589_v44 = vld [vmem:[%s12357_s23 + $0x1878] sm:$0xf0]  ;;  %v11858_v0 = vld [vmem:[%s12357_s23 + $0x196c] sm:$0xf]  ;;  %v6972_v35 = vpop.f32.mrf.mxu1 }
 0x3a7   : > { %7204 = vmatpush.bf16.msra.mxu3 %v10416_v51  ;;  %7210 = vmatpush.bf16.msrb.mxu0 %v10656_v12  ;;  %v10717_v26 = vld [vmem:[%s12357_s23 + $0x1978] sm:$0xf0]  ;;  %v11890_v52 = vld [vmem:[%s12357_s23 + $0x1a6c] sm:$0xf]  ;;  %v6973_v49 = vadd.f32 %v6972_v35, %v6960_v6  ;;  %v10592_v7 = vor.u32 %v11826_v50, %v10589_v44 }
 0x3a8   : > { %7223 = vmatpush.bf16.msrb.mxu1 %v10784_v58  ;;  %7192 = vmatmul.bf16.vlgmr.msra.gmra.mxu2 %v12862_v13  ;;  %v11862_v13 = vld [vmem:[%s12357_s23 + $0x198c] sm:$0xf]  ;;  %v10845_v41 = vld [vmem:[%s12357_s23 + $0x1a78] sm:$0xf0]  ;;  %v10720_v59 = vor.u32 %v11858_v0, %v10717_v26 }
 0x3a9   : > { %7236 = vmatpush.bf16.msrb.mxu2 %v10912_v55  ;;  %7179 = vmatmul.bf16.vlgmr.msra.gmra.mxu1 %v12864_v14  ;;  %v11008_v14 = vor.u32 %v11930_v29, %v11005_v63  ;;  %v10736_v22 = vor.u32 %v11862_v13, %v10733_v36  ;;  %v11922_v8 = vld [vmem:[%s12357_s23 + $0x1b6c] sm:$0xf]  ;;  %v10973_v48 = vld [vmem:[%s12357_s23 + $0x1b78] sm:$0xf0]  ;;  %v10848_v25 = vor.u32 %v11890_v52, %v10845_v41 }
 0x3aa   : > { %7205 = vmatmul.bf16.vlgmr.msra.gmra.mxu3 %v12868_v17  ;;  %v10989_v17 = vld [vmem:[%s12357_s23 + $0x1b98] sm:$0xf0]  ;;  %v11822_v54 = vld [vmem:[%s12357_s23 + $0x184c] sm:$0xf]  ;;  %v10976_v12 = vor.u32 %v11922_v8, %v10973_v48 }
 0x3ab   : > { %7249 = vmatpush.bf16.msrb.mxu3 %v11040_v2  ;;  %7211 = vmatpush.bf16.msrb.mxu0 %v10640_v61  ;;  %v10992_v37 = vor.u32 %v11926_v46, %v10989_v17  ;;  %v10573_v30 = vld [vmem:[%s12357_s23 + $0x1858] sm:$0xf0]  ;;  %v11854_v31 = vld [vmem:[%s12357_s23 + $0x194c] sm:$0xf]  ;;  %v6985_v51 = vpop.f32.mrf.mxu2  ;;  %v6961_v23 = vpop.f32.mrf.mxu0 }
 0x3ac   : > { %7224 = vmatpush.bf16.msrb.mxu1 %v10768_v43  ;;  %v10701_v58 = vld [vmem:[%s12357_s23 + $0x1958] sm:$0xf0]  ;;  %v11886_v55 = vld [vmem:[%s12357_s23 + $0x1a4c] sm:$0xf]  ;;  %v6986_v34 = vadd.f32 %v6985_v51, %v6973_v49  ;;  %v10576_v53 = vor.u32 %v11822_v54, %v10573_v30 }
 0x3ad   : > { %7237 = vmatpush.bf16.msrb.mxu2 %v10896_v56  ;;  %v10829_v57 = vld [vmem:[%s12357_s23 + $0x1a58] sm:$0xf0]  ;;  %v6998_v4 = vpop.f32.mrf.mxu3  ;;  %v11918_v2 = vld [vmem:[%s12357_s23 + $0x1b4c] sm:$0xf]  ;;  %v10704_v42 = vor.u32 %v11854_v31, %v10701_v58 }
 0x3ae   : > { %v10957_v39 = vld [vmem:[%s12357_s23 + $0x1b58] sm:$0xf0]  ;;  %v6999_v15 = vadd.f32 %v6998_v4, %v6986_v34  ;;  %v10832_v61 = vor.u32 %v11886_v55, %v10829_v57  ;;  %v11818_v43 = vld [vmem:[%s12357_s23 + $0x182c] sm:$0xf]  ;;  %v6974_v20 = vpop.f32.mrf.mxu1 }
 0x3af   : > { %7250 = vmatpush.bf16.msrb.mxu3 %v11024_v45  ;;  %7212 = vmatpush.bf16.msrb.mxu0 %v10624_v9  ;;  %v10557_v56 = vld [vmem:[%s12357_s23 + $0x1838] sm:$0xf0]  ;;  %v11850_v19 = vld [vmem:[%s12357_s23 + $0x192c] sm:$0xf]  ;;  %v10960_v24 = vor.u32 %v11918_v2, %v10957_v39 }
 0x3b0   : > { %7225 = vmatpush.bf16.msrb.mxu1 %v10752_v32  ;;  %v10685_v45 = vld [vmem:[%s12357_s23 + $0x1938] sm:$0xf0]  ;;  %v11882_v5 = vld [vmem:[%s12357_s23 + $0x1a2c] sm:$0xf]  ;;  %v10560_v63 = vor.u32 %v11818_v43, %v10557_v56 }
 0x3b1   : > { %7238 = vmatpush.bf16.msrb.mxu2 %v10880_v40  ;;  %v10813_v33 = vld [vmem:[%s12357_s23 + $0x1a38] sm:$0xf0]  ;;  %v11914_v18 = vld [vmem:[%s12357_s23 + $0x1b2c] sm:$0xf]  ;;  %v10688_v9 = vor.u32 %v11850_v19, %v10685_v45 }
 0x3b2   : > { %v10941_v29 = vld [vmem:[%s12357_s23 + $0x1b38] sm:$0xf0]  ;;  %v10816_v32 = vor.u32 %v11882_v5, %v10813_v33  ;;  %v11814_v40 = vld [vmem:[%s12357_s23 + $0x180c] sm:$0xf] }
 0x3b3   : > { %7251 = vmatpush.bf16.msrb.mxu3 %v11008_v14  ;;  %7213 = vmatpush.bf16.msrb.mxu0 %v10608_v47  ;;  %v10541_v38 = vld [vmem:[%s12357_s23 + $0x1818] sm:$0xf0]  ;;  %v11846_v21 = vld [vmem:[%s12357_s23 + $0x190c] sm:$0xf]  ;;  %v6987_v13 = vpop.f32.mrf.mxu2  ;;  %v10944_v14 = vor.u32 %v11914_v18, %v10941_v29 }
 0x3b4   : > { %7226 = vmatpush.bf16.msrb.mxu1 %v10736_v22  ;;  %v10669_v36 = vld [vmem:[%s12357_s23 + $0x1918] sm:$0xf0]  ;;  %v11878_v27 = vld [vmem:[%s12357_s23 + $0x1a0c] sm:$0xf]  ;;  %v10544_v28 = vor.u32 %v11814_v40, %v10541_v38 }
 0x3b5   : > { %7239 = vmatpush.bf16.msrb.mxu2 %v10864_v60  ;;  %v10797_v62 = vld [vmem:[%s12357_s23 + $0x1a18] sm:$0xf0]  ;;  %v7000_v46 = vpop.f32.mrf.mxu3  ;;  %v11910_v17 = vld [vmem:[%s12357_s23 + $0x1b0c] sm:$0xf]  ;;  %v10672_v22 = vor.u32 %v11846_v21, %v10669_v36 }
 0x3b6   : > { %v10925_v47 = vld [vmem:[%s12357_s23 + $0x1b18] sm:$0xf0]  ;;  %v10800_v60 = vor.u32 %v11878_v27, %v10797_v62 }
 0x3b7   : > { %7252 = vmatpush.bf16.msrb.mxu3 %v10992_v37  ;;  %7214 = vmatpush.bf16.msrb.mxu0 %v10592_v7  ;;  %v10928_v50 = vor.u32 %v11910_v17, %v10925_v47 }
 0x3b8   : > { %7227 = vmatpush.bf16.msrb.mxu1 %v10720_v59 }
 0x3b9   : > { %7240 = vmatpush.bf16.msrb.mxu2 %v10848_v25 }
 0x3bb   : > { %7253 = vmatpush.bf16.msrb.mxu3 %v10976_v12  ;;  %7215 = vmatpush.bf16.msrb.mxu0 %v10576_v53 }
 0x3bc   : > { %7228 = vmatpush.bf16.msrb.mxu1 %v10704_v42 }
 0x3bd   : > { %7241 = vmatpush.bf16.msrb.mxu2 %v10832_v61 }
 0x3bf   : > { %7254 = vmatpush.bf16.msrb.mxu3 %v10960_v24  ;;  %7216 = vmatpush.bf16.msrb.mxu0 %v10560_v63 }
 0x3c0   : > { %7229 = vmatpush.bf16.msrb.mxu1 %v10688_v9 }
 0x3c1   : > { %7242 = vmatpush.bf16.msrb.mxu2 %v10816_v32 }
 0x3c3   : > { %7255 = vmatpush.bf16.msrb.mxu3 %v10944_v14  ;;  %7217 = vmatpush.bf16.msrb.mxu0 %v10544_v28  ;;  %v7011_v44 = vpop.f32.mrf.mxu0 }
 0x3c4   : > { %7230 = vmatpush.bf16.msrb.mxu1 %v10672_v22  ;;  %v7012_v0 = vadd.f32 %v7011_v44, %v6999_v15 }
 0x3c5   : > { %7243 = vmatpush.bf16.msrb.mxu2 %v10800_v60 }
 0x3c6   : > { %7218 = vmatmul.bf16.vlgmr.msrb.gmra.mxu0 %v12938_v3  ;;  %v7024_v6 = vpop.f32.mrf.mxu1 }
 0x3c7   : > { %7256 = vmatpush.bf16.msrb.mxu3 %v10928_v50  ;;  %7231 = vmatmul.bf16.vlgmr.msrb.gmra.mxu1 %v12945_v11  ;;  %v7025_v35 = vadd.f32 %v7024_v6, %v7012_v0 }
 0x3c8   : > { %7244 = vmatmul.bf16.vlgmr.msrb.gmra.mxu2 %v12943_v10 }
 0x3ca   : > { %7257 = vmatmul.bf16.vlgmr.msrb.gmra.mxu3 %v12949_v16 }
 0x3cb   : > { %v7037_v37 = vpop.f32.mrf.mxu2  ;;  %v7013_v41 = vpop.f32.mrf.mxu0 }
 0x3cc   : > { %v7038_v26 = vadd.f32 %v7037_v37, %v7025_v35 }
 0x3cd   : > { %v7050_v52 = vpop.f32.mrf.mxu3 }
 0x3ce   : > { %v7026_v8 = vpop.f32.mrf.mxu1  ;;  %v7051_v48 = vadd.f32 %v7050_v52, %v7038_v26 }
 0x3d3   : > { %v7039_v49 = vpop.f32.mrf.mxu2 }
 0x3d5   : > { %v7052_v7 = vpop.f32.mrf.mxu3 }
 0x3e3   : > { %v7063_v59 = vpop.f32.mrf.mxu0 }
 0x3e4   : > { %v7064_v3 = vadd.f32 %v7063_v59, %v7051_v48 }
 0x3e6   : > { %v7076_v25 = vpop.f32.mrf.mxu1 }
 0x3e7   : > { %v7077_v11 = vadd.f32 %v7076_v25, %v7064_v3 }
 0x3eb   : > { %v7089_v54 = vpop.f32.mrf.mxu2  ;;  %v7065_v16 = vpop.f32.mrf.mxu0 }
 0x3ec   : > { %v7090_v10 = vadd.f32 %v7089_v54, %v7077_v11 }
 0x3ed   : > { %v7102_v30 = vpop.f32.mrf.mxu3 }
 0x3ee   : > { %v7078_v31 = vpop.f32.mrf.mxu1  ;;  %v7103_v51 = vadd.f32 %v7102_v30, %v7090_v10 }
 0x3f3   : > { %v7091_v12 = vpop.f32.mrf.mxu2 }
 0x3f5   : > { %v7104_v58 = vpop.f32.mrf.mxu3 }
 0x403   : > { %v7115_v55 = vpop.f32.mrf.mxu0 }
 0x404   : > { %v7116_v61 = vadd.f32 %v7115_v55, %v7103_v51 }
 0x406   : > { %v7128_v57 = vpop.f32.mrf.mxu1 }
 0x407   : > { %v7129_v24 = vadd.f32 %v7128_v57, %v7116_v61 }
 0x40b   : > { %v7141_v34 = vpop.f32.mrf.mxu2  ;;  %v7117_v2 = vpop.f32.mrf.mxu0 }
 0x40c   : > { %v7142_v45 = vadd.f32 %v7141_v34, %v7129_v24 }
 0x40d   : > { %v7154_v4 = vpop.f32.mrf.mxu3 }
 0x40e   : > { %v7130_v39 = vpop.f32.mrf.mxu1  ;;  %v7155_v18 = vadd.f32 %v7154_v4, %v7142_v45 }
 0x413   : > { %v7143_v53 = vpop.f32.mrf.mxu2 }
 0x415   : > { %v7156_v15 = vpop.f32.mrf.mxu3 }
 0x423   : > { %v7167_v23 = vpop.f32.mrf.mxu0 }
 0x424   : > { %v7168_v29 = vadd.f32 %v7167_v23, %v7155_v18 }
 0x426   : > { %v7180_v42 = vpop.f32.mrf.mxu1 }
 0x427   : > { %v7181_v63 = vadd.f32 %v7180_v42, %v7168_v29 }
 0x42b   : > { %v7193_v43 = vpop.f32.mrf.mxu2  ;;  %v7169_v19 = vpop.f32.mrf.mxu0 }
 0x42c   : > { %v7194_v9 = vadd.f32 %v7193_v43, %v7181_v63 }
 0x42d   : > { %v7206_v56 = vpop.f32.mrf.mxu3 }
 0x42e   : > { %v7182_v20 = vpop.f32.mrf.mxu1  ;;  %v7207_v32 = vadd.f32 %v7206_v56, %v7194_v9 }
 0x433   : > { %v7195_v5 = vpop.f32.mrf.mxu2 }
 0x435   : > { %v7208_v33 = vpop.f32.mrf.mxu3 }
 0x443   : > { %v7219_v40 = vpop.f32.mrf.mxu0 }
 0x444   : > { %v7232_v38 = vpop.f32.mrf.mxu1  ;;  %v7220_v21 = vadd.f32 %v7219_v40, %v7207_v32 }
 0x446   : > { %v7233_v13 = vadd.f32 %v7232_v38, %v7220_v21 }
 0x44b   : > { %v7245_v14 = vpop.f32.mrf.mxu2  ;;  %v7221_v62 = vpop.f32.mrf.mxu0 }
 0x44c   : > { %v7246_v36 = vadd.f32 %v7245_v14, %v7233_v13  ;;  %v7234_v46 = vpop.f32.mrf.mxu1 }
 0x44d   : > { %v7258_v27 = vpop.f32.mrf.mxu3 }
 0x44e   : > { %v7259_v17 = vadd.f32 %v7258_v27, %v7246_v36 }
 0x450   : > { %v7265_v47 = vadd.f32 %v7259_v17, %v13304_v1 }
 0x451   : > { %7273 = sbr.rel (%p11041_p9) target bundleno = 1122 (0x462), region = 48 }
 0x452   : > { %7269 = vst [vmem:[%s12376_s26 + $0x18] sm:$0xff] %v7265_v47 }
 0x453   : > { %v7247_v28 = vpop.f32.mrf.mxu2 }
 0x455   : > { %v7260_v22 = vpop.f32.mrf.mxu3 }
 0x456   : > { %v7274_v60 = vld [vmem:[%s12376_s26] sm:$0xff]  ;;  %v7275_v50 = vld [vmem:[%s12376_s26 + $0x8] sm:$0xff]  ;;  %v7276_v44 = vld [vmem:[%s12376_s26 + $0x10] sm:$0xff] }
 0x457   : > { %v7278_v1 = vld [vmem:[%s241_s28] sm:$0xf] }
 0x458   : > { %v7280_v6 = vperm.slane %v7278_v1, 0  ;;  %v7281_v35 = vperm.slane %v7278_v1, 1  ;;  %v7282_v37 = vperm.slane %v7278_v1, 2  ;;  %v7283_v26 = vperm.slane %v7278_v1, 3 }
 0x459   : > { %v7277_v0 = vld [vmem:[%s12376_s26 + $0x18] sm:$0xff] }
 0x45a   : > { %v7288_v52 = vadd.f32 %v7280_v6, %v7274_v60  ;;  %v7289_v41 = vadd.f32 %v7281_v35, %v7275_v50  ;;  %v7290_v8 = vadd.f32 %v7282_v37, %v7276_v44  ;;  %v7291_v48 = vadd.f32 %v7283_v26, %v7277_v0 }
 0x45c   : > { %v7292_v49 = vmax.f32 %v7288_v52, 0.0  ;;  %v7293_v7 = vmax.f32 %v7289_v41, 0.0  ;;  %v7294_v59 = vmax.f32 %v7290_v8, 0.0  ;;  %v7295_v3 = vmax.f32 %v7291_v48, 0.0 }
 0x45e   : > { %7296 = vst [vmem:[%s12376_s26] sm:$0xff] %v7292_v49 }
 0x45f   : > { %7297 = vst [vmem:[%s12376_s26 + $0x8] sm:$0xff] %v7293_v7 }
 0x460   : > { %7298 = vst [vmem:[%s12376_s26 + $0x10] sm:$0xff] %v7294_v59 }
 0x461   : > { %7299 = vst [vmem:[%s12376_s26 + $0x18] sm:$0xff] %v7295_v3 }
 0x462 PF: > { %s19_s22 = sadd.s32 1, %s12201_s22   ;;  %s14548_s23 = sld [smem:[#allocation8_spill]] }
 0x463   : > { %p16_p10 = scmp.ge.s32.totalorder %s19_s22, 16   ;;  %s14549_s7 = sld [smem:[#allocation9_spill]] }
 0x464   : > { %s14550_s12 = smov %s12165_s13  ;;  %s14551_s13 = smov %s12169_s14 }
 0x465   : > { %s14552_s14 = smov %s12333_s8  ;;  %s14553_s15 = smov %s12177_s16 }
 0x466   : > { %s14554_s16 = smov %s12181_s17  ;;  %s14555_s17 = smov %s12338_s9 }
 0x467   : > { %s14556_s18 = smov %s12193_s20  ;;  %s14557_s19 = smov %s12197_s21 }
 0x468   : > { %s14558_s20 = smov %s14548_s23  ;;  %18 = sbr.rel (!%p16_p10) target bundleno = 11 (0xb), region = 96 }
 0x469   : > { %s14559_s21 = smov %s14549_s7 }
 0x46d   :  { %7330 = vsyncpa [#allocation3], 1 }
 0x46e   :  { %7332 = vsyncpa [#allocation3 + $0x1], 1 }
 0x46f   :  { %7333 = vsyncpa [#allocation5], 1 }
 0x470   :  { %7335 = vsyncpa [#allocation5 + $0x1], 1 }

</bundles_post_ra>
